<compile_context>
chip_gen: v7x
topology: tpu7x:2x2x1
jax: 0.10.0
libtpu: 0.0.40
codegen_flags: <defaults>
</compile_context>

<pallas_src>
import functools

import numpy as np
import jax
import jax.numpy as jnp
from jax.experimental import pallas as pl
from jax.experimental.pallas import tpu as pltpu

EXPANSION = 2                    # Block.expansion in the PyTorch module
BN_EPS = 1e-5
COMPUTE_DTYPE = jnp.bfloat16     # MXU-native dtype on v5e / v6e / v7x
LANE_TILE = 128                  # vreg / MXU lane width -> conv2 channel-slab target


# ----------------------------------------------------------------------------
# Pallas kernel: one batch element per grid step, whole block fused.
# ----------------------------------------------------------------------------
def _block_kernel(*refs, H, W, stride, has_proj, has_xsc):
    it = iter(refs)
    x_ref = next(it)                           # (1, H*W, Cin)
    xsc_ref = next(it) if has_xsc else None    # (1, Hout*Wout, Cin), stride>1 proj only
    w1_ref = next(it); b1_ref = next(it)
    w2_ref = next(it); b2_ref = next(it)       # w2: (3, 3, n_slabs, cs, cs)
    w3_ref = next(it); b3_ref = next(it)
    if has_proj:
        wsc_ref = next(it); bsc_ref = next(it)
    out_ref = next(it)                         # (1, Hout*Wout, cout)
    pad_ref = next(it)                         # (H+2, W+2, GW) bf16 scratch

    GW = w1_ref.shape[1]
    n_slabs, cs = w2_ref.shape[2], w2_ref.shape[3]
    Hout = (H - 1) // stride + 1
    Wout = (W - 1) // stride + 1
    cdt = pad_ref.dtype                        # bf16 compute dtype

    x_flat = x_ref[0]                          # (H*W, Cin); f32 for identity path
    x_mm = x_flat.astype(cdt)

    # --- conv1 (1x1, BN1 scale pre-folded into w1) + bias + relu --------------
    o1 = jnp.dot(x_mm, w1_ref[...], preferred_element_type=jnp.float32)
    o1 = jnp.maximum(o1 + b1_ref[...], 0.0).astype(cdt)        # (H*W, GW) bf16, one cast

    # --- conv2 (3x3, grouped, stride, pad=1) -----------------------------------
    # Zero only the 1-px border of the padded scratch each step; the interior is
    # fully overwritten below, so this stays correct even when the batch axis is
    # sharded across TensorCores.
    pad_ref[pl.ds(0, 1), :, :] = jnp.zeros((1, W + 2, GW), cdt)
    pad_ref[pl.ds(H + 1, 1), :, :] = jnp.zeros((1, W + 2, GW), cdt)
    # TODO(synk): v5e micro-opt -- fold the two masked column stores below into the
    #             interior write to free the single vst slot.
    pad_ref[:, pl.ds(0, 1), :] = jnp.zeros((H + 2, 1, GW), cdt)
    pad_ref[:, pl.ds(W + 1, 1), :] = jnp.zeros((H + 2, 1, GW), cdt)
    pad_ref[pl.ds(1, H), pl.ds(1, W), :] = o1.reshape(H, W, GW)

    # 9 shifted windows; groups densified only within each <=128-lane channel slab,
    # so the MXU never multiplies zero blocks across slabs. Accumulators start from
    # the first tap (no zeros + add).
    accs = [None] * n_slabs
    for kh in range(3):
        for kw in range(3):
            if stride == 1:
                patch = pad_ref[pl.ds(kh, Hout), pl.ds(kw, Wout), :]
            else:
                patch = pad_ref[pl.ds(kh, Hout, stride), pl.ds(kw, Wout, stride), :]
            p2 = patch.reshape(Hout * Wout, GW)          # bf16, no per-tap cast
            for s in range(n_slabs):
                d = jnp.dot(p2[:, s * cs:(s + 1) * cs], w2_ref[kh, kw, s],
                            preferred_element_type=jnp.float32)
                accs[s] = d if accs[s] is None else accs[s] + d

    # --- conv3 (1x1, BN3 pre-folded): per-slab partial matmuls (no concat) -----
    o3 = None
    for s in range(n_slabs):
        o2_s = jnp.maximum(accs[s] + b2_ref[:, s * cs:(s + 1) * cs], 0.0).astype(cdt)
        part = jnp.dot(o2_s, w3_ref[s * cs:(s + 1) * cs, :],
                       preferred_element_type=jnp.float32)
        o3 = part if o3 is None else o3 + part
    o3 = o3 + b3_ref[...]

    # --- shortcut ---------------------------------------------------------------
    if has_proj:
        src = xsc_ref[0] if has_xsc else x_mm            # (Hout*Wout, Cin) bf16
        sc = jnp.dot(src, wsc_ref[...], preferred_element_type=jnp.float32)
        sc = sc + bsc_ref[...]
    else:
        sc = x_flat.astype(jnp.float32)                  # identity residual stays f32

    out_ref[0] = jnp.maximum(o3 + sc, 0.0).astype(out_ref.dtype)


# ----------------------------------------------------------------------------
# Glue: BN folding, grouped->per-slab-dense weight prep, pallas_call
# ----------------------------------------------------------------------------
def _fold_bn(gamma, beta, mean, var, eps=BN_EPS):
    scale = gamma / jnp.sqrt(var + eps)
    return scale, beta - mean * scale


def _pick_groups_per_slab(cardinality, bottleneck_width, lane_target=LANE_TILE):
    """Largest divisor of `cardinality` whose slab width fits in one lane tile."""
    best = 1
    for g in range(1, cardinality + 1):
        if cardinality % g == 0 and g * bottleneck_width <= lane_target:
            best = g
    return best


def _grouped_conv2_slab_dense(w, cardinality, groups_per_slab):
    """PyTorch grouped OIHW (GW, BW, 3, 3) -> (3, 3, n_slabs, cs, cs).

    Each slab covers `groups_per_slab` consecutive groups densified block-diagonally
    (cs = groups_per_slab * BW <= 128 lanes), so one (M, cs) @ (cs, cs) MXU matmul per
    tap per slab reproduces the grouped convolution exactly without cross-slab zeros.
    """
    gw, bw, kh, kw = w.shape
    n_slabs = cardinality // groups_per_slab
    cs = groups_per_slab * bw
    wg = w.reshape(n_slabs, groups_per_slab, bw, bw, kh, kw)      # (s, g, o, i, kh, kw)
    wg = jnp.transpose(wg, (0, 4, 5, 1, 3, 2))                    # (s, kh, kw, g, i, o)
    eye = jnp.eye(groups_per_slab, dtype=w.dtype)                 # (g_in, g_out)
    dense = wg[:, :, :, :, :, None, :] * eye[None, None, None, :, None, :, None]
    dense = dense.reshape(n_slabs, kh, kw, cs, cs)                # (s, kh, kw, in, out)
    return jnp.transpose(dense, (1, 2, 0, 3, 4))                  # (kh, kw, s, in, out)


def _vmem_capacity_bytes():
    try:
        info = pltpu.get_tpu_info()
        for name in ("vmem_capacity_bytes", "vmem_bytes", "vmem_size_bytes"):
            v = getattr(info, name, None)
            if v:
                return int(v)
    except Exception:
        pass
    return 128 * 2**20   # conservative v5e/v6e default


def _nbytes(shape, dtype):
    return int(np.prod(shape)) * jnp.dtype(dtype).itemsize


def block_forward_nhwc(x_nhwc, p, stride=1, out_dtype=jnp.float32):
    """Fused Block forward on NHWC activations (preferred: no layout transposes)."""
    N, H, W, Cin = x_nhwc.shape
    GW = p["conv1_w"].shape[0]
    BW = p["conv2_w"].shape[1]
    cardinality = GW // BW
    cout = EXPANSION * GW
    has_proj = (stride != 1) or (Cin != cout)
    has_xsc = has_proj and stride != 1
    Hout = (H - 1) // stride + 1
    Wout = (W - 1) // stride + 1

    s1, b1 = _fold_bn(p["bn1_g"], p["bn1_b"], p["bn1_m"], p["bn1_v"])
    s2, b2 = _fold_bn(p["bn2_g"], p["bn2_b"], p["bn2_m"], p["bn2_v"])
    s3, b3 = _fold_bn(p["bn3_g"], p["bn3_b"], p["bn3_m"], p["bn3_v"])

    gps = _pick_groups_per_slab(cardinality, BW)
    n_slabs = cardinality // gps
    cs = gps * BW

    # Fold BN scales into conv weights (per output channel), cast to bf16.
    w1 = (jnp.transpose(p["conv1_w"][:, :, 0, 0], (1, 0)) * s1[None, :]).astype(COMPUTE_DTYPE)
    w2 = (_grouped_conv2_slab_dense(p["conv2_w"], cardinality, gps)
          * s2.reshape(1, 1, n_slabs, 1, cs)).astype(COMPUTE_DTYPE)
    w3 = (jnp.transpose(p["conv3_w"][:, :, 0, 0], (1, 0)) * s3[None, :]).astype(COMPUTE_DTYPE)

    # Identity-shortcut path keeps x in f32 so the residual add stays full precision;
    # projection path only feeds matmuls, so bf16 is enough and halves input DMA.
    x_dtype = COMPUTE_DTYPE if has_proj else jnp.float32
    x_flat = x_nhwc.reshape(N, H * W, Cin).astype(x_dtype)
    row = lambda v: v.reshape(1, -1).astype(jnp.float32)

    args = [x_flat]
    dyn_specs = [pl.BlockSpec((1, H * W, Cin), lambda n: (n, 0, 0))]
    if has_xsc:
        # Strided shortcut subsampling done in the wrapper (layout plumbing, not compute).
        xsc = x_nhwc[:, ::stride, ::stride, :].reshape(N, Hout * Wout, Cin).astype(COMPUTE_DTYPE)
        args.append(xsc)
        dyn_specs.append(pl.BlockSpec((1, Hout * Wout, Cin), lambda n: (n, 0, 0)))

    const_args = [w1, row(b1), w2, row(b2), w3, row(b3)]
    if has_proj:
        ssc, bsc = _fold_bn(p["sc_g"], p["sc_b"], p["sc_m"], p["sc_v"])
        wsc = (jnp.transpose(p["sc_w"][:, :, 0, 0], (1, 0)) * ssc[None, :]).astype(COMPUTE_DTYPE)
        const_args += [wsc, row(bsc)]
    args += const_args

    # VMEM budget: double-buffered activations/output, (single- or double-buffered)
    # weights, bf16 pad scratch, plus generous slack for live intermediates.
    act_bytes = 2 * _nbytes((1, H * W, Cin), x_dtype)
    if has_xsc:
        act_bytes += 2 * _nbytes((1, Hout * Wout, Cin), COMPUTE_DTYPE)
    out_bytes = 2 * _nbytes((1, Hout * Wout, cout), out_dtype)
    w_bytes = sum(_nbytes(a.shape, a.dtype) for a in const_args)
    pad_bytes = _nbytes((H + 2, W + 2, GW), COMPUTE_DTYPE)
    live_bytes = 10 * _nbytes((H * W, max(GW, cout, Cin)), jnp.float32)
    vmem_cap = _vmem_capacity_bytes()

    kernel = functools.partial(_block_kernel, H=H, W=W, stride=stride,
                               has_proj=has_proj, has_xsc=has_xsc)

    def _run(single_buffer_weights):
        def const_spec(shape):
            zeros = (0,) * len(shape)
            idx = lambda n, _z=zeros: _z
            if single_buffer_weights:
                # Constant index_map -> one resident copy is enough.
                return pl.BlockSpec(shape, idx, pipeline_mode=pl.Buffered(1))
            return pl.BlockSpec(shape, idx)

        in_specs = list(dyn_specs) + [const_spec(a.shape) for a in const_args]
        est = (act_bytes + out_bytes + pad_bytes + live_bytes
               + (1 if single_buffer_weights else 2) * w_bytes)
        vmem_limit = int(min(int(0.75 * vmem_cap), max(32 * 2**20, 2 * est)))

        return pl.pallas_call(
            kernel,
            out_shape=jax.ShapeDtypeStruct((N, Hout * Wout, cout), out_dtype),
            grid=(N,),
            in_specs=in_specs,
            out_specs=pl.BlockSpec((1, Hout * Wout, cout), lambda n: (n, 0, 0)),
            scratch_shapes=[pltpu.VMEM((H + 2, W + 2, GW), COMPUTE_DTYPE)],
            compiler_params=pltpu.CompilerParams(
                dimension_semantics=("parallel",),   # batch elems independent
                vmem_limit_bytes=vmem_limit),
        )(*args)

    try:
        out_flat = jax.block_until_ready(_run(True))
    except Exception:
        # Fall back to default double-buffered weight specs if Buffered(1) is rejected.
        out_flat = _run(False)
    return out_flat.reshape(N, Hout, Wout, cout)


def block_forward(x_nchw, p, stride=1, out_dtype=jnp.float32):
    """NCHW wrapper matching the PyTorch interface (transposes only for the test)."""
    x = jnp.transpose(x_nchw, (0, 2, 3, 1))
    out = block_forward_nhwc(x, p, stride=stride, out_dtype=out_dtype)
    return jnp.transpose(out, (0, 3, 1, 2))


# ----------------------------------------------------------------------------
# Deterministic parameter init + pure-JAX reference for verification
# ----------------------------------------------------------------------------
def init_params(key, in_planes, cardinality, bottleneck_width, stride):
    gw = cardinality * bottleneck_width
    cout = EXPANSION * gw
    has_proj = (stride != 1) or (in_planes != cout)
    keys = iter(jax.random.split(key, 40))

    def bn_set(c):
        return {
            "g": 1.0 + 0.1 * jax.random.normal(next(keys), (c,), jnp.float32),
            "b": 0.1 * jax.random.normal(next(keys), (c,), jnp.float32),
            "m": 0.05 * jax.random.normal(next(keys), (c,), jnp.float32),
            "v": 1.0 + 0.5 * jax.random.uniform(next(keys), (c,), jnp.float32),
        }

    # Fan-in-scaled weights keep activation magnitudes O(1) at every width so the
    # bf16/f32 comparison tolerances are width-independent.
    p = {
        "conv1_w": jax.random.normal(next(keys), (gw, in_planes, 1, 1), jnp.float32)
                   / np.sqrt(in_planes),
        "conv2_w": jax.random.normal(next(keys), (gw, bottleneck_width, 3, 3), jnp.float32)
                   / np.sqrt(bottleneck_width * 9),
        "conv3_w": jax.random.normal(next(keys), (cout, gw, 1, 1), jnp.float32)
                   / np.sqrt(gw),
    }
    for name, c in (("bn1", gw), ("bn2", gw), ("bn3", cout)):
        s = bn_set(c)
        p.update({f"{name}_g": s["g"], f"{name}_b": s["b"],
                  f"{name}_m": s["m"], f"{name}_v": s["v"]})
    if has_proj:
        p["sc_w"] = jax.random.normal(next(keys), (cout, in_planes, 1, 1), jnp.float32) \
                    / np.sqrt(in_planes)
        s = bn_set(cout)
        p.update({"sc_g": s["g"], "sc_b": s["b"], "sc_m": s["m"], "sc_v": s["v"]})
    return p


def _conv_nchw(x, w, stride=1, padding=0, groups=1):
    return jax.lax.conv_general_dilated(
        x, w, window_strides=(stride, stride),
        padding=[(padding, padding), (padding, padding)],
        dimension_numbers=("NCHW", "OIHW", "NCHW"),
        feature_group_count=groups)


def _bn_nchw(x, g, b, m, v, eps=BN_EPS):
    inv = (g / jnp.sqrt(v + eps))[None, :, None, None]
    return (x - m[None, :, None, None]) * inv + b[None, :, None, None]


def reference_forward(x, p, stride, cardinality):
    cout = EXPANSION * p["conv1_w"].shape[0]
    has_proj = (stride != 1) or (x.shape[1] != cout)
    out = jax.nn.relu(_bn_nchw(_conv_nchw(x, p["conv1_w"]),
                               p["bn1_g"], p["bn1_b"], p["bn1_m"], p["bn1_v"]))
    out = jax.nn.relu(_bn_nchw(
        _conv_nchw(out, p["conv2_w"], stride=stride, padding=1, groups=cardinality),
        p["bn2_g"], p["bn2_b"], p["bn2_m"], p["bn2_v"]))
    out = _bn_nchw(_conv_nchw(out, p["conv3_w"]),
                   p["bn3_g"], p["bn3_b"], p["bn3_m"], p["bn3_v"])
    if has_proj:
        sc = _bn_nchw(_conv_nchw(x, p["sc_w"], stride=stride),
                      p["sc_g"], p["sc_b"], p["sc_m"], p["sc_v"])
    else:
        sc = x
    return jax.nn.relu(out + sc)


if __name__ == "__main__":
    key = jax.random.PRNGKey(0)
    N, H, W = 2, 16, 16
    # (in_planes, cardinality, bottleneck_width, stride)
    configs = [
        (32, 4, 4, 1),     # identity shortcut, tiny channels
        (16, 4, 4, 1),     # projection shortcut (1x1 conv + BN)
        (512, 32, 8, 1),   # identity shortcut, GW=256 -> two 128-channel conv2 slabs
        (128, 32, 4, 1),   # projection shortcut, GW=128 (lane-dense, one slab)
    ]
    for idx, (in_planes, card, bw, stride) in enumerate(configs):
        k_x, k_p = jax.random.split(jax.random.fold_in(key, idx))
        x = jax.random.normal(k_x, (N, in_planes, H, W), jnp.float32)   # NCHW, like PyTorch
        params = init_params(k_p, in_planes, card, bw, stride)

        out = jax.block_until_ready(block_forward(x, params, stride=stride))
        ref = jax.block_until_ready(reference_forward(x, params, stride, card))

        out_np, ref_np = np.asarray(out), np.asarray(ref)
        # bf16 matmuls with f32 accumulation -> ~1e-2 relative error expected.
        np.testing.assert_allclose(out_np, ref_np, rtol=5e-2, atol=5e-2)
        assert float(np.mean(np.abs(out_np - ref_np))) < 2e-2

    print("KERNEL_OK")
</pallas_src>

<mosaic_0001>
module attributes {stable_mosaic.version = 11 : i64} {
  func.func @_block_kernel(%arg0: i32, %arg1: memref<1x256x32xf32, #tpu.memory_space<vmem>>, %arg2: memref<32x16xbf16, #tpu.memory_space<vmem>>, %arg3: memref<1x16xf32, #tpu.memory_space<vmem>>, %arg4: memref<3x3x1x16x16xbf16, #tpu.memory_space<vmem>>, %arg5: memref<1x16xf32, #tpu.memory_space<vmem>>, %arg6: memref<16x32xbf16, #tpu.memory_space<vmem>>, %arg7: memref<1x32xf32, #tpu.memory_space<vmem>>, %arg8: memref<1x256x32xf32, #tpu.memory_space<vmem>>, %arg9: memref<18x18x16xbf16, #tpu.memory_space<vmem>>) attributes {dimension_semantics = [#tpu.dimension_semantics<parallel>], iteration_bounds = array<i64: 2>, scalar_prefetch = 0 : i64, scratch_operands = 1 : i64, tpu.core_type = #tpu.core_type<tc>, window_params = [{transform_indices = @transform_0, window_bounds = array<i64: 1, 256, 32>}, {pipeline_mode = #tpu.pipeline_mode<synchronous>, transform_indices = @transform_1, window_bounds = array<i64: 32, 16>}, {pipeline_mode = #tpu.pipeline_mode<synchronous>, transform_indices = @transform_2, window_bounds = array<i64: 1, 16>}, {pipeline_mode = #tpu.pipeline_mode<synchronous>, transform_indices = @transform_3, window_bounds = array<i64: 3, 3, 1, 16, 16>}, {pipeline_mode = #tpu.pipeline_mode<synchronous>, transform_indices = @transform_4, window_bounds = array<i64: 1, 16>}, {pipeline_mode = #tpu.pipeline_mode<synchronous>, transform_indices = @transform_5, window_bounds = array<i64: 16, 32>}, {pipeline_mode = #tpu.pipeline_mode<synchronous>, transform_indices = @transform_6, window_bounds = array<i64: 1, 32>}, {transform_indices = @transform_7, window_bounds = array<i64: 1, 256, 32>}]} {
    %c0 = arith.constant 0 : index
    %c0_0 = arith.constant 0 : index
    %c0_1 = arith.constant 0 : index
    %0 = vector.load %arg1[%c0, %c0_0, %c0_1] : memref<1x256x32xf32, #tpu.memory_space<vmem>>, vector<1x256x32xf32>
    %1 = vector.shape_cast %0 : vector<1x256x32xf32> to vector<256x32xf32>
    %2 = arith.truncf %1 : vector<256x32xf32> to vector<256x32xbf16>
    %c0_2 = arith.constant 0 : index
    %c0_3 = arith.constant 0 : index
    %3 = vector.load %arg2[%c0_2, %c0_3] : memref<32x16xbf16, #tpu.memory_space<vmem>>, vector<32x16xbf16>
    %cst = arith.constant dense<0.000000e+00> : vector<256x16xf32>
    %4 = tpu.matmul %2, %3, %cst {dimension_numbers = #tpu.dot_dimension_numbers<[1], [0], [0], [1], [0, 0, 1, 1], [], []>} : vector<256x32xbf16>, vector<32x16xbf16>, vector<256x16xf32> -> vector<256x16xf32>
    %c0_4 = arith.constant 0 : index
    %c0_5 = arith.constant 0 : index
    %5 = vector.load %arg3[%c0_4, %c0_5] : memref<1x16xf32, #tpu.memory_space<vmem>>, vector<1x16xf32>
    %6 = vector.broadcast %5 : vector<1x16xf32> to vector<256x16xf32>
    %7 = arith.addf %4, %6 : vector<256x16xf32>
    %cst_6 = arith.constant 0.000000e+00 : f32
    %8 = vector.broadcast %cst_6 : f32 to vector<256x16xf32>
    %9 = arith.maximumf %7, %8 : vector<256x16xf32>
    %10 = arith.truncf %9 : vector<256x16xf32> to vector<256x16xbf16>
    %cst_7 = arith.constant 0.000000e+00 : bf16
    %11 = vector.broadcast %cst_7 : bf16 to vector<1x18x16xbf16>
    %c0_8 = arith.constant 0 : index
    %c0_9 = arith.constant 0 : index
    %c0_10 = arith.constant 0 : index
    %12 = vector.load %arg9[%c0_8, %c0_9, %c0_10] : memref<18x18x16xbf16, #tpu.memory_space<vmem>>, vector<1x18x16xbf16>
    tpu.vector_store %arg9[%c0_8, %c0_9, %c0_10], %11 {strides = array<i32>} : memref<18x18x16xbf16, #tpu.memory_space<vmem>>, vector<1x18x16xbf16>,
    %cst_11 = arith.constant 0.000000e+00 : bf16
    %13 = vector.broadcast %cst_11 : bf16 to vector<1x18x16xbf16>
    %c17 = arith.constant 17 : index
    %c0_12 = arith.constant 0 : index
    %c0_13 = arith.constant 0 : index
    %14 = vector.load %arg9[%c17, %c0_12, %c0_13] : memref<18x18x16xbf16, #tpu.memory_space<vmem>>, vector<1x18x16xbf16>
    tpu.vector_store %arg9[%c17, %c0_12, %c0_13], %13 {strides = array<i32>} : memref<18x18x16xbf16, #tpu.memory_space<vmem>>, vector<1x18x16xbf16>,
    %cst_14 = arith.constant 0.000000e+00 : bf16
    %15 = vector.broadcast %cst_14 : bf16 to vector<18x1x16xbf16>
    %c0_15 = arith.constant 0 : index
    %c0_16 = arith.constant 0 : index
    %c0_17 = arith.constant 0 : index
    %16 = vector.load %arg9[%c0_15, %c0_16, %c0_17] : memref<18x18x16xbf16, #tpu.memory_space<vmem>>, vector<18x1x16xbf16>
    tpu.vector_store %arg9[%c0_15, %c0_16, %c0_17], %15 {strides = array<i32>} : memref<18x18x16xbf16, #tpu.memory_space<vmem>>, vector<18x1x16xbf16>,
    %cst_18 = arith.constant 0.000000e+00 : bf16
    %17 = vector.broadcast %cst_18 : bf16 to vector<18x1x16xbf16>
    %c0_19 = arith.constant 0 : index
    %c17_20 = arith.constant 17 : index
    %c0_21 = arith.constant 0 : index
    %18 = vector.load %arg9[%c0_19, %c17_20, %c0_21] : memref<18x18x16xbf16, #tpu.memory_space<vmem>>, vector<18x1x16xbf16>
    tpu.vector_store %arg9[%c0_19, %c17_20, %c0_21], %17 {strides = array<i32>} : memref<18x18x16xbf16, #tpu.memory_space<vmem>>, vector<18x1x16xbf16>,
    %19 = vector.shape_cast %10 : vector<256x16xbf16> to vector<16x16x16xbf16>
    %c1 = arith.constant 1 : index
    %c1_22 = arith.constant 1 : index
    %c0_23 = arith.constant 0 : index
    %20 = vector.load %arg9[%c1, %c1_22, %c0_23] : memref<18x18x16xbf16, #tpu.memory_space<vmem>>, vector<16x16x16xbf16>
    tpu.vector_store %arg9[%c1, %c1_22, %c0_23], %19 {strides = array<i32>} : memref<18x18x16xbf16, #tpu.memory_space<vmem>>, vector<16x16x16xbf16>,
    %c0_24 = arith.constant 0 : index
    %c0_25 = arith.constant 0 : index
    %c0_26 = arith.constant 0 : index
    %21 = vector.load %arg9[%c0_24, %c0_25, %c0_26] : memref<18x18x16xbf16, #tpu.memory_space<vmem>>, vector<16x16x16xbf16>
    %22 = vector.shape_cast %21 : vector<16x16x16xbf16> to vector<256x16xbf16>
    %c0_27 = arith.constant 0 : index
    %c0_28 = arith.constant 0 : index
    %c0_29 = arith.constant 0 : index
    %c0_30 = arith.constant 0 : index
    %c0_31 = arith.constant 0 : index
    %23 = vector.load %arg4[%c0_27, %c0_28, %c0_29, %c0_30, %c0_31] : memref<3x3x1x16x16xbf16, #tpu.memory_space<vmem>>, vector<1x1x1x16x16xbf16>
    %24 = vector.shape_cast %23 : vector<1x1x1x16x16xbf16> to vector<16x16xbf16>
    %cst_32 = arith.constant dense<0.000000e+00> : vector<256x16xf32>
    %25 = tpu.matmul %22, %24, %cst_32 {dimension_numbers = #tpu.dot_dimension_numbers<[1], [0], [0], [1], [0, 0, 1, 1], [], []>} : vector<256x16xbf16>, vector<16x16xbf16>, vector<256x16xf32> -> vector<256x16xf32>
    %c0_33 = arith.constant 0 : index
    %c1_34 = arith.constant 1 : index
    %c0_35 = arith.constant 0 : index
    %26 = vector.load %arg9[%c0_33, %c1_34, %c0_35] : memref<18x18x16xbf16, #tpu.memory_space<vmem>>, vector<16x16x16xbf16>
    %27 = vector.shape_cast %26 : vector<16x16x16xbf16> to vector<256x16xbf16>
    %c0_36 = arith.constant 0 : index
    %c1_37 = arith.constant 1 : index
    %c0_38 = arith.constant 0 : index
    %c0_39 = arith.constant 0 : index
    %c0_40 = arith.constant 0 : index
    %28 = vector.load %arg4[%c0_36, %c1_37, %c0_38, %c0_39, %c0_40] : memref<3x3x1x16x16xbf16, #tpu.memory_space<vmem>>, vector<1x1x1x16x16xbf16>
    %29 = vector.shape_cast %28 : vector<1x1x1x16x16xbf16> to vector<16x16xbf16>
    %cst_41 = arith.constant dense<0.000000e+00> : vector<256x16xf32>
    %30 = tpu.matmul %27, %29, %cst_41 {dimension_numbers = #tpu.dot_dimension_numbers<[1], [0], [0], [1], [0, 0, 1, 1], [], []>} : vector<256x16xbf16>, vector<16x16xbf16>, vector<256x16xf32> -> vector<256x16xf32>
    %31 = arith.addf %25, %30 : vector<256x16xf32>
    %c0_42 = arith.constant 0 : index
    %c2 = arith.constant 2 : index
    %c0_43 = arith.constant 0 : index
    %32 = vector.load %arg9[%c0_42, %c2, %c0_43] : memref<18x18x16xbf16, #tpu.memory_space<vmem>>, vector<16x16x16xbf16>
    %33 = vector.shape_cast %32 : vector<16x16x16xbf16> to vector<256x16xbf16>
    %c0_44 = arith.constant 0 : index
    %c2_45 = arith.constant 2 : index
    %c0_46 = arith.constant 0 : index
    %c0_47 = arith.constant 0 : index
    %c0_48 = arith.constant 0 : index
    %34 = vector.load %arg4[%c0_44, %c2_45, %c0_46, %c0_47, %c0_48] : memref<3x3x1x16x16xbf16, #tpu.memory_space<vmem>>, vector<1x1x1x16x16xbf16>
    %35 = vector.shape_cast %34 : vector<1x1x1x16x16xbf16> to vector<16x16xbf16>
    %cst_49 = arith.constant dense<0.000000e+00> : vector<256x16xf32>
    %36 = tpu.matmul %33, %35, %cst_49 {dimension_numbers = #tpu.dot_dimension_numbers<[1], [0], [0], [1], [0, 0, 1, 1], [], []>} : vector<256x16xbf16>, vector<16x16xbf16>, vector<256x16xf32> -> vector<256x16xf32>
    %37 = arith.addf %31, %36 : vector<256x16xf32>
    %c1_50 = arith.constant 1 : index
    %c0_51 = arith.constant 0 : index
    %c0_52 = arith.constant 0 : index
    %38 = vector.load %arg9[%c1_50, %c0_51, %c0_52] : memref<18x18x16xbf16, #tpu.memory_space<vmem>>, vector<16x16x16xbf16>
    %39 = vector.shape_cast %38 : vector<16x16x16xbf16> to vector<256x16xbf16>
    %c1_53 = arith.constant 1 : index
    %c0_54 = arith.constant 0 : index
    %c0_55 = arith.constant 0 : index
    %c0_56 = arith.constant 0 : index
    %c0_57 = arith.constant 0 : index
    %40 = vector.load %arg4[%c1_53, %c0_54, %c0_55, %c0_56, %c0_57] : memref<3x3x1x16x16xbf16, #tpu.memory_space<vmem>>, vector<1x1x1x16x16xbf16>
    %41 = vector.shape_cast %40 : vector<1x1x1x16x16xbf16> to vector<16x16xbf16>
    %cst_58 = arith.constant dense<0.000000e+00> : vector<256x16xf32>
    %42 = tpu.matmul %39, %41, %cst_58 {dimension_numbers = #tpu.dot_dimension_numbers<[1], [0], [0], [1], [0, 0, 1, 1], [], []>} : vector<256x16xbf16>, vector<16x16xbf16>, vector<256x16xf32> -> vector<256x16xf32>
    %43 = arith.addf %37, %42 : vector<256x16xf32>
    %c1_59 = arith.constant 1 : index
    %c1_60 = arith.constant 1 : index
    %c0_61 = arith.constant 0 : index
    %44 = vector.load %arg9[%c1_59, %c1_60, %c0_61] : memref<18x18x16xbf16, #tpu.memory_space<vmem>>, vector<16x16x16xbf16>
    %45 = vector.shape_cast %44 : vector<16x16x16xbf16> to vector<256x16xbf16>
    %c1_62 = arith.constant 1 : index
    %c1_63 = arith.constant 1 : index
    %c0_64 = arith.constant 0 : index
    %c0_65 = arith.constant 0 : index
    %c0_66 = arith.constant 0 : index
    %46 = vector.load %arg4[%c1_62, %c1_63, %c0_64, %c0_65, %c0_66] : memref<3x3x1x16x16xbf16, #tpu.memory_space<vmem>>, vector<1x1x1x16x16xbf16>
    %47 = vector.shape_cast %46 : vector<1x1x1x16x16xbf16> to vector<16x16xbf16>
    %cst_67 = arith.constant dense<0.000000e+00> : vector<256x16xf32>
    %48 = tpu.matmul %45, %47, %cst_67 {dimension_numbers = #tpu.dot_dimension_numbers<[1], [0], [0], [1], [0, 0, 1, 1], [], []>} : vector<256x16xbf16>, vector<16x16xbf16>, vector<256x16xf32> -> vector<256x16xf32>
    %49 = arith.addf %43, %48 : vector<256x16xf32>
    %c1_68 = arith.constant 1 : index
    %c2_69 = arith.constant 2 : index
    %c0_70 = arith.constant 0 : index
    %50 = vector.load %arg9[%c1_68, %c2_69, %c0_70] : memref<18x18x16xbf16, #tpu.memory_space<vmem>>, vector<16x16x16xbf16>
    %51 = vector.shape_cast %50 : vector<16x16x16xbf16> to vector<256x16xbf16>
    %c1_71 = arith.constant 1 : index
    %c2_72 = arith.constant 2 : index
    %c0_73 = arith.constant 0 : index
    %c0_74 = arith.constant 0 : index
    %c0_75 = arith.constant 0 : index
    %52 = vector.load %arg4[%c1_71, %c2_72, %c0_73, %c0_74, %c0_75] : memref<3x3x1x16x16xbf16, #tpu.memory_space<vmem>>, vector<1x1x1x16x16xbf16>
    %53 = vector.shape_cast %52 : vector<1x1x1x16x16xbf16> to vector<16x16xbf16>
    %cst_76 = arith.constant dense<0.000000e+00> : vector<256x16xf32>
    %54 = tpu.matmul %51, %53, %cst_76 {dimension_numbers = #tpu.dot_dimension_numbers<[1], [0], [0], [1], [0, 0, 1, 1], [], []>} : vector<256x16xbf16>, vector<16x16xbf16>, vector<256x16xf32> -> vector<256x16xf32>
    %55 = arith.addf %49, %54 : vector<256x16xf32>
    %c2_77 = arith.constant 2 : index
    %c0_78 = arith.constant 0 : index
    %c0_79 = arith.constant 0 : index
    %56 = vector.load %arg9[%c2_77, %c0_78, %c0_79] : memref<18x18x16xbf16, #tpu.memory_space<vmem>>, vector<16x16x16xbf16>
    %57 = vector.shape_cast %56 : vector<16x16x16xbf16> to vector<256x16xbf16>
    %c2_80 = arith.constant 2 : index
    %c0_81 = arith.constant 0 : index
    %c0_82 = arith.constant 0 : index
    %c0_83 = arith.constant 0 : index
    %c0_84 = arith.constant 0 : index
    %58 = vector.load %arg4[%c2_80, %c0_81, %c0_82, %c0_83, %c0_84] : memref<3x3x1x16x16xbf16, #tpu.memory_space<vmem>>, vector<1x1x1x16x16xbf16>
    %59 = vector.shape_cast %58 : vector<1x1x1x16x16xbf16> to vector<16x16xbf16>
    %cst_85 = arith.constant dense<0.000000e+00> : vector<256x16xf32>
    %60 = tpu.matmul %57, %59, %cst_85 {dimension_numbers = #tpu.dot_dimension_numbers<[1], [0], [0], [1], [0, 0, 1, 1], [], []>} : vector<256x16xbf16>, vector<16x16xbf16>, vector<256x16xf32> -> vector<256x16xf32>
    %61 = arith.addf %55, %60 : vector<256x16xf32>
    %c2_86 = arith.constant 2 : index
    %c1_87 = arith.constant 1 : index
    %c0_88 = arith.constant 0 : index
    %62 = vector.load %arg9[%c2_86, %c1_87, %c0_88] : memref<18x18x16xbf16, #tpu.memory_space<vmem>>, vector<16x16x16xbf16>
    %63 = vector.shape_cast %62 : vector<16x16x16xbf16> to vector<256x16xbf16>
    %c2_89 = arith.constant 2 : index
    %c1_90 = arith.constant 1 : index
    %c0_91 = arith.constant 0 : index
    %c0_92 = arith.constant 0 : index
    %c0_93 = arith.constant 0 : index
    %64 = vector.load %arg4[%c2_89, %c1_90, %c0_91, %c0_92, %c0_93] : memref<3x3x1x16x16xbf16, #tpu.memory_space<vmem>>, vector<1x1x1x16x16xbf16>
    %65 = vector.shape_cast %64 : vector<1x1x1x16x16xbf16> to vector<16x16xbf16>
    %cst_94 = arith.constant dense<0.000000e+00> : vector<256x16xf32>
    %66 = tpu.matmul %63, %65, %cst_94 {dimension_numbers = #tpu.dot_dimension_numbers<[1], [0], [0], [1], [0, 0, 1, 1], [], []>} : vector<256x16xbf16>, vector<16x16xbf16>, vector<256x16xf32> -> vector<256x16xf32>
    %67 = arith.addf %61, %66 : vector<256x16xf32>
    %c2_95 = arith.constant 2 : index
    %c2_96 = arith.constant 2 : index
    %c0_97 = arith.constant 0 : index
    %68 = vector.load %arg9[%c2_95, %c2_96, %c0_97] : memref<18x18x16xbf16, #tpu.memory_space<vmem>>, vector<16x16x16xbf16>
    %69 = vector.shape_cast %68 : vector<16x16x16xbf16> to vector<256x16xbf16>
    %c2_98 = arith.constant 2 : index
    %c2_99 = arith.constant 2 : index
    %c0_100 = arith.constant 0 : index
    %c0_101 = arith.constant 0 : index
    %c0_102 = arith.constant 0 : index
    %70 = vector.load %arg4[%c2_98, %c2_99, %c0_100, %c0_101, %c0_102] : memref<3x3x1x16x16xbf16, #tpu.memory_space<vmem>>, vector<1x1x1x16x16xbf16>
    %71 = vector.shape_cast %70 : vector<1x1x1x16x16xbf16> to vector<16x16xbf16>
    %cst_103 = arith.constant dense<0.000000e+00> : vector<256x16xf32>
    %72 = tpu.matmul %69, %71, %cst_103 {dimension_numbers = #tpu.dot_dimension_numbers<[1], [0], [0], [1], [0, 0, 1, 1], [], []>} : vector<256x16xbf16>, vector<16x16xbf16>, vector<256x16xf32> -> vector<256x16xf32>
    %73 = arith.addf %67, %72 : vector<256x16xf32>
    %c0_104 = arith.constant 0 : index
    %c0_105 = arith.constant 0 : index
    %74 = vector.load %arg5[%c0_104, %c0_105] : memref<1x16xf32, #tpu.memory_space<vmem>>, vector<1x16xf32>
    %75 = vector.broadcast %74 : vector<1x16xf32> to vector<256x16xf32>
    %76 = arith.addf %73, %75 : vector<256x16xf32>
    %cst_106 = arith.constant 0.000000e+00 : f32
    %77 = vector.broadcast %cst_106 : f32 to vector<256x16xf32>
    %78 = arith.maximumf %76, %77 : vector<256x16xf32>
    %79 = arith.truncf %78 : vector<256x16xf32> to vector<256x16xbf16>
    %c0_107 = arith.constant 0 : index
    %c0_108 = arith.constant 0 : index
    %80 = vector.load %arg6[%c0_107, %c0_108] : memref<16x32xbf16, #tpu.memory_space<vmem>>, vector<16x32xbf16>
    %cst_109 = arith.constant dense<0.000000e+00> : vector<256x32xf32>
    %81 = tpu.matmul %79, %80, %cst_109 {dimension_numbers = #tpu.dot_dimension_numbers<[1], [0], [0], [1], [0, 0, 1, 1], [], []>} : vector<256x16xbf16>, vector<16x32xbf16>, vector<256x32xf32> -> vector<256x32xf32>
    %c0_110 = arith.constant 0 : index
    %c0_111 = arith.constant 0 : index
    %82 = vector.load %arg7[%c0_110, %c0_111] : memref<1x32xf32, #tpu.memory_space<vmem>>, vector<1x32xf32>
    %83 = vector.broadcast %82 : vector<1x32xf32> to vector<256x32xf32>
    %84 = arith.addf %81, %83 : vector<256x32xf32>
    %85 = arith.addf %84, %1 : vector<256x32xf32>
    %cst_112 = arith.constant 0.000000e+00 : f32
    %86 = vector.broadcast %cst_112 : f32 to vector<256x32xf32>
    %87 = arith.maximumf %85, %86 : vector<256x32xf32>
    %c0_113 = arith.constant 0 : index
    %c0_114 = arith.constant 0 : index
    %c0_115 = arith.constant 0 : index
    %88 = vector.load %arg8[%c0_113, %c0_114, %c0_115] : memref<1x256x32xf32, #tpu.memory_space<vmem>>, vector<1x256x32xf32>
    %89 = vector.shape_cast %88 : vector<1x256x32xf32> to vector<256x32xf32>
    %90 = vector.shape_cast %87 : vector<256x32xf32> to vector<1x256x32xf32>
    tpu.vector_store %arg8[%c0_113, %c0_114, %c0_115], %90 {strides = array<i32>} : memref<1x256x32xf32, #tpu.memory_space<vmem>>, vector<1x256x32xf32>,
    return
  }
  func.func @transform_0(%arg0: i32) -> (i32, i32, i32) {
    %c0_i32 = arith.constant 0 : i32
    %c0_i32_0 = arith.constant 0 : i32
    %c0_i32_1 = arith.constant 0 : i32
    return %arg0, %c0_i32, %c0_i32_0 : i32, i32, i32
  }
  func.func @transform_1(%arg0: i32) -> (i32, i32) {
    %c0_i32 = arith.constant 0 : i32
    %c0_i32_0 = arith.constant 0 : i32
    %c0_i32_1 = arith.constant 0 : i32
    return %c0_i32, %c0_i32_0 : i32, i32
  }
  func.func @transform_2(%arg0: i32) -> (i32, i32) {
    %c0_i32 = arith.constant 0 : i32
    %c0_i32_0 = arith.constant 0 : i32
    %c0_i32_1 = arith.constant 0 : i32
    return %c0_i32, %c0_i32_0 : i32, i32
  }
  func.func @transform_3(%arg0: i32) -> (i32, i32, i32, i32, i32) {
    %c0_i32 = arith.constant 0 : i32
    %c0_i32_0 = arith.constant 0 : i32
    %c0_i32_1 = arith.constant 0 : i32
    %c0_i32_2 = arith.constant 0 : i32
    %c0_i32_3 = arith.constant 0 : i32
    %c0_i32_4 = arith.constant 0 : i32
    return %c0_i32, %c0_i32_0, %c0_i32_1, %c0_i32_2, %c0_i32_3 : i32, i32, i32, i32, i32
  }
  func.func @transform_4(%arg0: i32) -> (i32, i32) {
    %c0_i32 = arith.constant 0 : i32
    %c0_i32_0 = arith.constant 0 : i32
    %c0_i32_1 = arith.constant 0 : i32
    return %c0_i32, %c0_i32_0 : i32, i32
  }
  func.func @transform_5(%arg0: i32) -> (i32, i32) {
    %c0_i32 = arith.constant 0 : i32
    %c0_i32_0 = arith.constant 0 : i32
    %c0_i32_1 = arith.constant 0 : i32
    return %c0_i32, %c0_i32_0 : i32, i32
  }
  func.func @transform_6(%arg0: i32) -> (i32, i32) {
    %c0_i32 = arith.constant 0 : i32
    %c0_i32_0 = arith.constant 0 : i32
    %c0_i32_1 = arith.constant 0 : i32
    return %c0_i32, %c0_i32_0 : i32, i32
  }
  func.func @transform_7(%arg0: i32) -> (i32, i32, i32) {
    %c0_i32 = arith.constant 0 : i32
    %c0_i32_0 = arith.constant 0 : i32
    %c0_i32_1 = arith.constant 0 : i32
    return %arg0, %c0_i32, %c0_i32_0 : i32, i32, i32
  }
}

module attributes {stable_mosaic.version = 11 : i64} {
  func.func @_block_kernel(%arg0: i32, %arg1: memref<1x256x32xf32, #tpu.memory_space<vmem>>, %arg2: memref<32x16xbf16, #tpu.memory_space<vmem>>, %arg3: memref<1x16xf32, #tpu.memory_space<vmem>>, %arg4: memref<3x3x1x16x16xbf16, #tpu.memory_space<vmem>>, %arg5: memref<1x16xf32, #tpu.memory_space<vmem>>, %arg6: memref<16x32xbf16, #tpu.memory_space<vmem>>, %arg7: memref<1x32xf32, #tpu.memory_space<vmem>>, %arg8: memref<1x256x32xf32, #tpu.memory_space<vmem>>, %arg9: memref<18x18x16xbf16, #tpu.memory_space<vmem>>) attributes {dimension_semantics = [#tpu.dimension_semantics<parallel>], iteration_bounds = array<i64: 2>, scalar_prefetch = 0 : i64, scratch_operands = 1 : i64, tpu.core_type = #tpu.core_type<tc>, window_params = [{transform_indices = @transform_0, window_bounds = array<i64: 1, 256, 32>}, {pipeline_mode = #tpu.pipeline_mode<synchronous>, transform_indices = @transform_1, window_bounds = array<i64: 32, 16>}, {pipeline_mode = #tpu.pipeline_mode<synchronous>, transform_indices = @transform_2, window_bounds = array<i64: 1, 16>}, {pipeline_mode = #tpu.pipeline_mode<synchronous>, transform_indices = @transform_3, window_bounds = array<i64: 3, 3, 1, 16, 16>}, {pipeline_mode = #tpu.pipeline_mode<synchronous>, transform_indices = @transform_4, window_bounds = array<i64: 1, 16>}, {pipeline_mode = #tpu.pipeline_mode<synchronous>, transform_indices = @transform_5, window_bounds = array<i64: 16, 32>}, {pipeline_mode = #tpu.pipeline_mode<synchronous>, transform_indices = @transform_6, window_bounds = array<i64: 1, 32>}, {transform_indices = @transform_7, window_bounds = array<i64: 1, 256, 32>}]} {
    %c0 = arith.constant 0 : index
    %c0_0 = arith.constant 0 : index
    %c0_1 = arith.constant 0 : index
    %0 = vector.load %arg1[%c0, %c0_0, %c0_1] : memref<1x256x32xf32, #tpu.memory_space<vmem>>, vector<1x256x32xf32>
    %1 = vector.shape_cast %0 : vector<1x256x32xf32> to vector<256x32xf32>
    %2 = arith.truncf %1 : vector<256x32xf32> to vector<256x32xbf16>
    %c0_2 = arith.constant 0 : index
    %c0_3 = arith.constant 0 : index
    %3 = vector.load %arg2[%c0_2, %c0_3] : memref<32x16xbf16, #tpu.memory_space<vmem>>, vector<32x16xbf16>
    %cst = arith.constant dense<0.000000e+00> : vector<256x16xf32>
    %4 = tpu.matmul %2, %3, %cst {dimension_numbers = #tpu.dot_dimension_numbers<[1], [0], [0], [1], [0, 0, 1, 1], [], []>} : vector<256x32xbf16>, vector<32x16xbf16>, vector<256x16xf32> -> vector<256x16xf32>
    %c0_4 = arith.constant 0 : index
    %c0_5 = arith.constant 0 : index
    %5 = vector.load %arg3[%c0_4, %c0_5] : memref<1x16xf32, #tpu.memory_space<vmem>>, vector<1x16xf32>
    %6 = vector.broadcast %5 : vector<1x16xf32> to vector<256x16xf32>
    %7 = arith.addf %4, %6 : vector<256x16xf32>
    %cst_6 = arith.constant 0.000000e+00 : f32
    %8 = vector.broadcast %cst_6 : f32 to vector<256x16xf32>
    %9 = arith.maximumf %7, %8 : vector<256x16xf32>
    %10 = arith.truncf %9 : vector<256x16xf32> to vector<256x16xbf16>
    %cst_7 = arith.constant 0.000000e+00 : bf16
    %11 = vector.broadcast %cst_7 : bf16 to vector<1x18x16xbf16>
    %c0_8 = arith.constant 0 : index
    %c0_9 = arith.constant 0 : index
    %c0_10 = arith.constant 0 : index
    %12 = vector.load %arg9[%c0_8, %c0_9, %c0_10] : memref<18x18x16xbf16, #tpu.memory_space<vmem>>, vector<1x18x16xbf16>
    tpu.vector_store %arg9[%c0_8, %c0_9, %c0_10], %11 {strides = array<i32>} : memref<18x18x16xbf16, #tpu.memory_space<vmem>>, vector<1x18x16xbf16>,
    %cst_11 = arith.constant 0.000000e+00 : bf16
    %13 = vector.broadcast %cst_11 : bf16 to vector<1x18x16xbf16>
    %c17 = arith.constant 17 : index
    %c0_12 = arith.constant 0 : index
    %c0_13 = arith.constant 0 : index
    %14 = vector.load %arg9[%c17, %c0_12, %c0_13] : memref<18x18x16xbf16, #tpu.memory_space<vmem>>, vector<1x18x16xbf16>
    tpu.vector_store %arg9[%c17, %c0_12, %c0_13], %13 {strides = array<i32>} : memref<18x18x16xbf16, #tpu.memory_space<vmem>>, vector<1x18x16xbf16>,
    %cst_14 = arith.constant 0.000000e+00 : bf16
    %15 = vector.broadcast %cst_14 : bf16 to vector<18x1x16xbf16>
    %c0_15 = arith.constant 0 : index
    %c0_16 = arith.constant 0 : index
    %c0_17 = arith.constant 0 : index
    %16 = vector.load %arg9[%c0_15, %c0_16, %c0_17] : memref<18x18x16xbf16, #tpu.memory_space<vmem>>, vector<18x1x16xbf16>
    tpu.vector_store %arg9[%c0_15, %c0_16, %c0_17], %15 {strides = array<i32>} : memref<18x18x16xbf16, #tpu.memory_space<vmem>>, vector<18x1x16xbf16>,
    %cst_18 = arith.constant 0.000000e+00 : bf16
    %17 = vector.broadcast %cst_18 : bf16 to vector<18x1x16xbf16>
    %c0_19 = arith.constant 0 : index
    %c17_20 = arith.constant 17 : index
    %c0_21 = arith.constant 0 : index
    %18 = vector.load %arg9[%c0_19, %c17_20, %c0_21] : memref<18x18x16xbf16, #tpu.memory_space<vmem>>, vector<18x1x16xbf16>
    tpu.vector_store %arg9[%c0_19, %c17_20, %c0_21], %17 {strides = array<i32>} : memref<18x18x16xbf16, #tpu.memory_space<vmem>>, vector<18x1x16xbf16>,
    %19 = vector.shape_cast %10 : vector<256x16xbf16> to vector<16x16x16xbf16>
    %c1 = arith.constant 1 : index
    %c1_22 = arith.constant 1 : index
    %c0_23 = arith.constant 0 : index
    %20 = vector.load %arg9[%c1, %c1_22, %c0_23] : memref<18x18x16xbf16, #tpu.memory_space<vmem>>, vector<16x16x16xbf16>
    tpu.vector_store %arg9[%c1, %c1_22, %c0_23], %19 {strides = array<i32>} : memref<18x18x16xbf16, #tpu.memory_space<vmem>>, vector<16x16x16xbf16>,
    %c0_24 = arith.constant 0 : index
    %c0_25 = arith.constant 0 : index
    %c0_26 = arith.constant 0 : index
    %21 = vector.load %arg9[%c0_24, %c0_25, %c0_26] : memref<18x18x16xbf16, #tpu.memory_space<vmem>>, vector<16x16x16xbf16>
    %22 = vector.shape_cast %21 : vector<16x16x16xbf16> to vector<256x16xbf16>
    %c0_27 = arith.constant 0 : index
    %c0_28 = arith.constant 0 : index
    %c0_29 = arith.constant 0 : index
    %c0_30 = arith.constant 0 : index
    %c0_31 = arith.constant 0 : index
    %23 = vector.load %arg4[%c0_27, %c0_28, %c0_29, %c0_30, %c0_31] : memref<3x3x1x16x16xbf16, #tpu.memory_space<vmem>>, vector<1x1x1x16x16xbf16>
    %24 = vector.shape_cast %23 : vector<1x1x1x16x16xbf16> to vector<16x16xbf16>
    %cst_32 = arith.constant dense<0.000000e+00> : vector<256x16xf32>
    %25 = tpu.matmul %22, %24, %cst_32 {dimension_numbers = #tpu.dot_dimension_numbers<[1], [0], [0], [1], [0, 0, 1, 1], [], []>} : vector<256x16xbf16>, vector<16x16xbf16>, vector<256x16xf32> -> vector<256x16xf32>
    %c0_33 = arith.constant 0 : index
    %c1_34 = arith.constant 1 : index
    %c0_35 = arith.constant 0 : index
    %26 = vector.load %arg9[%c0_33, %c1_34, %c0_35] : memref<18x18x16xbf16, #tpu.memory_space<vmem>>, vector<16x16x16xbf16>
    %27 = vector.shape_cast %26 : vector<16x16x16xbf16> to vector<256x16xbf16>
    %c0_36 = arith.constant 0 : index
    %c1_37 = arith.constant 1 : index
    %c0_38 = arith.constant 0 : index
    %c0_39 = arith.constant 0 : index
    %c0_40 = arith.constant 0 : index
    %28 = vector.load %arg4[%c0_36, %c1_37, %c0_38, %c0_39, %c0_40] : memref<3x3x1x16x16xbf16, #tpu.memory_space<vmem>>, vector<1x1x1x16x16xbf16>
    %29 = vector.shape_cast %28 : vector<1x1x1x16x16xbf16> to vector<16x16xbf16>
    %cst_41 = arith.constant dense<0.000000e+00> : vector<256x16xf32>
    %30 = tpu.matmul %27, %29, %cst_41 {dimension_numbers = #tpu.dot_dimension_numbers<[1], [0], [0], [1], [0, 0, 1, 1], [], []>} : vector<256x16xbf16>, vector<16x16xbf16>, vector<256x16xf32> -> vector<256x16xf32>
    %31 = arith.addf %25, %30 : vector<256x16xf32>
    %c0_42 = arith.constant 0 : index
    %c2 = arith.constant 2 : index
    %c0_43 = arith.constant 0 : index
    %32 = vector.load %arg9[%c0_42, %c2, %c0_43] : memref<18x18x16xbf16, #tpu.memory_space<vmem>>, vector<16x16x16xbf16>
    %33 = vector.shape_cast %32 : vector<16x16x16xbf16> to vector<256x16xbf16>
    %c0_44 = arith.constant 0 : index
    %c2_45 = arith.constant 2 : index
    %c0_46 = arith.constant 0 : index
    %c0_47 = arith.constant 0 : index
    %c0_48 = arith.constant 0 : index
    %34 = vector.load %arg4[%c0_44, %c2_45, %c0_46, %c0_47, %c0_48] : memref<3x3x1x16x16xbf16, #tpu.memory_space<vmem>>, vector<1x1x1x16x16xbf16>
    %35 = vector.shape_cast %34 : vector<1x1x1x16x16xbf16> to vector<16x16xbf16>
    %cst_49 = arith.constant dense<0.000000e+00> : vector<256x16xf32>
    %36 = tpu.matmul %33, %35, %cst_49 {dimension_numbers = #tpu.dot_dimension_numbers<[1], [0], [0], [1], [0, 0, 1, 1], [], []>} : vector<256x16xbf16>, vector<16x16xbf16>, vector<256x16xf32> -> vector<256x16xf32>
    %37 = arith.addf %31, %36 : vector<256x16xf32>
    %c1_50 = arith.constant 1 : index
    %c0_51 = arith.constant 0 : index
    %c0_52 = arith.constant 0 : index
    %38 = vector.load %arg9[%c1_50, %c0_51, %c0_52] : memref<18x18x16xbf16, #tpu.memory_space<vmem>>, vector<16x16x16xbf16>
    %39 = vector.shape_cast %38 : vector<16x16x16xbf16> to vector<256x16xbf16>
    %c1_53 = arith.constant 1 : index
    %c0_54 = arith.constant 0 : index
    %c0_55 = arith.constant 0 : index
    %c0_56 = arith.constant 0 : index
    %c0_57 = arith.constant 0 : index
    %40 = vector.load %arg4[%c1_53, %c0_54, %c0_55, %c0_56, %c0_57] : memref<3x3x1x16x16xbf16, #tpu.memory_space<vmem>>, vector<1x1x1x16x16xbf16>
    %41 = vector.shape_cast %40 : vector<1x1x1x16x16xbf16> to vector<16x16xbf16>
    %cst_58 = arith.constant dense<0.000000e+00> : vector<256x16xf32>
    %42 = tpu.matmul %39, %41, %cst_58 {dimension_numbers = #tpu.dot_dimension_numbers<[1], [0], [0], [1], [0, 0, 1, 1], [], []>} : vector<256x16xbf16>, vector<16x16xbf16>, vector<256x16xf32> -> vector<256x16xf32>
    %43 = arith.addf %37, %42 : vector<256x16xf32>
    %c1_59 = arith.constant 1 : index
    %c1_60 = arith.constant 1 : index
    %c0_61 = arith.constant 0 : index
    %44 = vector.load %arg9[%c1_59, %c1_60, %c0_61] : memref<18x18x16xbf16, #tpu.memory_space<vmem>>, vector<16x16x16xbf16>
    %45 = vector.shape_cast %44 : vector<16x16x16xbf16> to vector<256x16xbf16>
    %c1_62 = arith.constant 1 : index
    %c1_63 = arith.constant 1 : index
    %c0_64 = arith.constant 0 : index
    %c0_65 = arith.constant 0 : index
    %c0_66 = arith.constant 0 : index
    %46 = vector.load %arg4[%c1_62, %c1_63, %c0_64, %c0_65, %c0_66] : memref<3x3x1x16x16xbf16, #tpu.memory_space<vmem>>, vector<1x1x1x16x16xbf16>
    %47 = vector.shape_cast %46 : vector<1x1x1x16x16xbf16> to vector<16x16xbf16>
    %cst_67 = arith.constant dense<0.000000e+00> : vector<256x16xf32>
    %48 = tpu.matmul %45, %47, %cst_67 {dimension_numbers = #tpu.dot_dimension_numbers<[1], [0], [0], [1], [0, 0, 1, 1], [], []>} : vector<256x16xbf16>, vector<16x16xbf16>, vector<256x16xf32> -> vector<256x16xf32>
    %49 = arith.addf %43, %48 : vector<256x16xf32>
    %c1_68 = arith.constant 1 : index
    %c2_69 = arith.constant 2 : index
    %c0_70 = arith.constant 0 : index
    %50 = vector.load %arg9[%c1_68, %c2_69, %c0_70] : memref<18x18x16xbf16, #tpu.memory_space<vmem>>, vector<16x16x16xbf16>
    %51 = vector.shape_cast %50 : vector<16x16x16xbf16> to vector<256x16xbf16>
    %c1_71 = arith.constant 1 : index
    %c2_72 = arith.constant 2 : index
    %c0_73 = arith.constant 0 : index
    %c0_74 = arith.constant 0 : index
    %c0_75 = arith.constant 0 : index
    %52 = vector.load %arg4[%c1_71, %c2_72, %c0_73, %c0_74, %c0_75] : memref<3x3x1x16x16xbf16, #tpu.memory_space<vmem>>, vector<1x1x1x16x16xbf16>
    %53 = vector.shape_cast %52 : vector<1x1x1x16x16xbf16> to vector<16x16xbf16>
    %cst_76 = arith.constant dense<0.000000e+00> : vector<256x16xf32>
    %54 = tpu.matmul %51, %53, %cst_76 {dimension_numbers = #tpu.dot_dimension_numbers<[1], [0], [0], [1], [0, 0, 1, 1], [], []>} : vector<256x16xbf16>, vector<16x16xbf16>, vector<256x16xf32> -> vector<256x16xf32>
    %55 = arith.addf %49, %54 : vector<256x16xf32>
    %c2_77 = arith.constant 2 : index
    %c0_78 = arith.constant 0 : index
    %c0_79 = arith.constant 0 : index
    %56 = vector.load %arg9[%c2_77, %c0_78, %c0_79] : memref<18x18x16xbf16, #tpu.memory_space<vmem>>, vector<16x16x16xbf16>
    %57 = vector.shape_cast %56 : vector<16x16x16xbf16> to vector<256x16xbf16>
    %c2_80 = arith.constant 2 : index
    %c0_81 = arith.constant 0 : index
    %c0_82 = arith.constant 0 : index
    %c0_83 = arith.constant 0 : index
    %c0_84 = arith.constant 0 : index
    %58 = vector.load %arg4[%c2_80, %c0_81, %c0_82, %c0_83, %c0_84] : memref<3x3x1x16x16xbf16, #tpu.memory_space<vmem>>, vector<1x1x1x16x16xbf16>
    %59 = vector.shape_cast %58 : vector<1x1x1x16x16xbf16> to vector<16x16xbf16>
    %cst_85 = arith.constant dense<0.000000e+00> : vector<256x16xf32>
    %60 = tpu.matmul %57, %59, %cst_85 {dimension_numbers = #tpu.dot_dimension_numbers<[1], [0], [0], [1], [0, 0, 1, 1], [], []>} : vector<256x16xbf16>, vector<16x16xbf16>, vector<256x16xf32> -> vector<256x16xf32>
    %61 = arith.addf %55, %60 : vector<256x16xf32>
    %c2_86 = arith.constant 2 : index
    %c1_87 = arith.constant 1 : index
    %c0_88 = arith.constant 0 : index
    %62 = vector.load %arg9[%c2_86, %c1_87, %c0_88] : memref<18x18x16xbf16, #tpu.memory_space<vmem>>, vector<16x16x16xbf16>
    %63 = vector.shape_cast %62 : vector<16x16x16xbf16> to vector<256x16xbf16>
    %c2_89 = arith.constant 2 : index
    %c1_90 = arith.constant 1 : index
    %c0_91 = arith.constant 0 : index
    %c0_92 = arith.constant 0 : index
    %c0_93 = arith.constant 0 : index
    %64 = vector.load %arg4[%c2_89, %c1_90, %c0_91, %c0_92, %c0_93] : memref<3x3x1x16x16xbf16, #tpu.memory_space<vmem>>, vector<1x1x1x16x16xbf16>
    %65 = vector.shape_cast %64 : vector<1x1x1x16x16xbf16> to vector<16x16xbf16>
    %cst_94 = arith.constant dense<0.000000e+00> : vector<256x16xf32>
    %66 = tpu.matmul %63, %65, %cst_94 {dimension_numbers = #tpu.dot_dimension_numbers<[1], [0], [0], [1], [0, 0, 1, 1], [], []>} : vector<256x16xbf16>, vector<16x16xbf16>, vector<256x16xf32> -> vector<256x16xf32>
    %67 = arith.addf %61, %66 : vector<256x16xf32>
    %c2_95 = arith.constant 2 : index
    %c2_96 = arith.constant 2 : index
    %c0_97 = arith.constant 0 : index
    %68 = vector.load %arg9[%c2_95, %c2_96, %c0_97] : memref<18x18x16xbf16, #tpu.memory_space<vmem>>, vector<16x16x16xbf16>
    %69 = vector.shape_cast %68 : vector<16x16x16xbf16> to vector<256x16xbf16>
    %c2_98 = arith.constant 2 : index
    %c2_99 = arith.constant 2 : index
    %c0_100 = arith.constant 0 : index
    %c0_101 = arith.constant 0 : index
    %c0_102 = arith.constant 0 : index
    %70 = vector.load %arg4[%c2_98, %c2_99, %c0_100, %c0_101, %c0_102] : memref<3x3x1x16x16xbf16, #tpu.memory_space<vmem>>, vector<1x1x1x16x16xbf16>
    %71 = vector.shape_cast %70 : vector<1x1x1x16x16xbf16> to vector<16x16xbf16>
    %cst_103 = arith.constant dense<0.000000e+00> : vector<256x16xf32>
    %72 = tpu.matmul %69, %71, %cst_103 {dimension_numbers = #tpu.dot_dimension_numbers<[1], [0], [0], [1], [0, 0, 1, 1], [], []>} : vector<256x16xbf16>, vector<16x16xbf16>, vector<256x16xf32> -> vector<256x16xf32>
    %73 = arith.addf %67, %72 : vector<256x16xf32>
    %c0_104 = arith.constant 0 : index
    %c0_105 = arith.constant 0 : index
    %74 = vector.load %arg5[%c0_104, %c0_105] : memref<1x16xf32, #tpu.memory_space<vmem>>, vector<1x16xf32>
    %75 = vector.broadcast %74 : vector<1x16xf32> to vector<256x16xf32>
    %76 = arith.addf %73, %75 : vector<256x16xf32>
    %cst_106 = arith.constant 0.000000e+00 : f32
    %77 = vector.broadcast %cst_106 : f32 to vector<256x16xf32>
    %78 = arith.maximumf %76, %77 : vector<256x16xf32>
    %79 = arith.truncf %78 : vector<256x16xf32> to vector<256x16xbf16>
    %c0_107 = arith.constant 0 : index
    %c0_108 = arith.constant 0 : index
    %80 = vector.load %arg6[%c0_107, %c0_108] : memref<16x32xbf16, #tpu.memory_space<vmem>>, vector<16x32xbf16>
    %cst_109 = arith.constant dense<0.000000e+00> : vector<256x32xf32>
    %81 = tpu.matmul %79, %80, %cst_109 {dimension_numbers = #tpu.dot_dimension_numbers<[1], [0], [0], [1], [0, 0, 1, 1], [], []>} : vector<256x16xbf16>, vector<16x32xbf16>, vector<256x32xf32> -> vector<256x32xf32>
    %c0_110 = arith.constant 0 : index
    %c0_111 = arith.constant 0 : index
    %82 = vector.load %arg7[%c0_110, %c0_111] : memref<1x32xf32, #tpu.memory_space<vmem>>, vector<1x32xf32>
    %83 = vector.broadcast %82 : vector<1x32xf32> to vector<256x32xf32>
    %84 = arith.addf %81, %83 : vector<256x32xf32>
    %85 = arith.addf %84, %1 : vector<256x32xf32>
    %cst_112 = arith.constant 0.000000e+00 : f32
    %86 = vector.broadcast %cst_112 : f32 to vector<256x32xf32>
    %87 = arith.maximumf %85, %86 : vector<256x32xf32>
    %c0_113 = arith.constant 0 : index
    %c0_114 = arith.constant 0 : index
    %c0_115 = arith.constant 0 : index
    %88 = vector.load %arg8[%c0_113, %c0_114, %c0_115] : memref<1x256x32xf32, #tpu.memory_space<vmem>>, vector<1x256x32xf32>
    %89 = vector.shape_cast %88 : vector<1x256x32xf32> to vector<256x32xf32>
    %90 = vector.shape_cast %87 : vector<256x32xf32> to vector<1x256x32xf32>
    tpu.vector_store %arg8[%c0_113, %c0_114, %c0_115], %90 {strides = array<i32>} : memref<1x256x32xf32, #tpu.memory_space<vmem>>, vector<1x256x32xf32>,
    return
  }
  func.func @transform_0(%arg0: i32) -> (i32, i32, i32) {
    %c0_i32 = arith.constant 0 : i32
    %c0_i32_0 = arith.constant 0 : i32
    %c0_i32_1 = arith.constant 0 : i32
    return %arg0, %c0_i32, %c0_i32_0 : i32, i32, i32
  }
  func.func @transform_1(%arg0: i32) -> (i32, i32) {
    %c0_i32 = arith.constant 0 : i32
    %c0_i32_0 = arith.constant 0 : i32
    %c0_i32_1 = arith.constant 0 : i32
    return %c0_i32, %c0_i32_0 : i32, i32
  }
  func.func @transform_2(%arg0: i32) -> (i32, i32) {
    %c0_i32 = arith.constant 0 : i32
    %c0_i32_0 = arith.constant 0 : i32
    %c0_i32_1 = arith.constant 0 : i32
    return %c0_i32, %c0_i32_0 : i32, i32
  }
  func.func @transform_3(%arg0: i32) -> (i32, i32, i32, i32, i32) {
    %c0_i32 = arith.constant 0 : i32
    %c0_i32_0 = arith.constant 0 : i32
    %c0_i32_1 = arith.constant 0 : i32
    %c0_i32_2 = arith.constant 0 : i32
    %c0_i32_3 = arith.constant 0 : i32
    %c0_i32_4 = arith.constant 0 : i32
    return %c0_i32, %c0_i32_0, %c0_i32_1, %c0_i32_2, %c0_i32_3 : i32, i32, i32, i32, i32
  }
  func.func @transform_4(%arg0: i32) -> (i32, i32) {
    %c0_i32 = arith.constant 0 : i32
    %c0_i32_0 = arith.constant 0 : i32
    %c0_i32_1 = arith.constant 0 : i32
    return %c0_i32, %c0_i32_0 : i32, i32
  }
  func.func @transform_5(%arg0: i32) -> (i32, i32) {
    %c0_i32 = arith.constant 0 : i32
    %c0_i32_0 = arith.constant 0 : i32
    %c0_i32_1 = arith.constant 0 : i32
    return %c0_i32, %c0_i32_0 : i32, i32
  }
  func.func @transform_6(%arg0: i32) -> (i32, i32) {
    %c0_i32 = arith.constant 0 : i32
    %c0_i32_0 = arith.constant 0 : i32
    %c0_i32_1 = arith.constant 0 : i32
    return %c0_i32, %c0_i32_0 : i32, i32
  }
  func.func @transform_7(%arg0: i32) -> (i32, i32, i32) {
    %c0_i32 = arith.constant 0 : i32
    %c0_i32_0 = arith.constant 0 : i32
    %c0_i32_1 = arith.constant 0 : i32
    return %arg0, %c0_i32, %c0_i32_0 : i32, i32, i32
  }
}

</mosaic_0001>

<bundles_post_ra>
// kernel: tpu_custom_call.1
= control target key start
LH: loop header
LB: loop body
LE: loop exit
PB: predicated region body
PF: predicated region fallthrough
CT: control target
= control target key end

     0   :  { %s7785_s24 = smov 0   ;;  %s9706_s0 = inlined_call_operand.vmem [shape: f32[2,256,32], index: 0, kind: input, shape index: {}]   ;;  %s9707_s1 = inlined_call_operand.vmem [shape: bf16[32,16], index: 1, kind: input, shape index: {}]   ;;  %s9708_s2 = inlined_call_operand.vmem [shape: f32[1,16], index: 2, kind: input, shape index: {}]   ;;  %s9709_s3 = inlined_call_operand.vmem [shape: bf16[3,3,1,16,16], index: 3, kind: input, shape index: {}]   ;;  %s9710_s4 = inlined_call_operand.vmem [shape: f32[1,16], index: 4, kind: input, shape index: {}]   ;;  %s9711_s5 = inlined_call_operand.vmem [shape: bf16[16,32], index: 5, kind: input, shape index: {}]   ;;  %s9712_s6 = inlined_call_operand.vmem [shape: f32[1,32], index: 6, kind: input, shape index: {}]   ;;  %s9713_s7 = inlined_call_operand.vmem [shape: f32[2,256,32], index: 7, kind: output, shape index: {}]  }
   0x1 LB: > { %s6303_s25 = sadd.s32 4294967295, %s7742_s24   ;;  %p6307_p0 = scmp.ge.s32.totalorder %s7742_s24, 1  ;;  %s7742_s24 = sphi %s7785_s24, %s17_s24  }
   0x2   : > { %p237_p1 = scmp.lt.s32.totalorder %s7742_s24, 3 }
   0x4   : > { %p238_p2 = pnand %p6307_p0, %p237_p1 }
   0x6   : > { %241 = sbr.rel (%p238_p2) target bundleno = 1159 (0x487), region = 48 }
   0xd   : > { %v7610_v0 = vld [vmem:[%s9707_s1] sm:$0xff]   ;;  %p269_p3 = scmp.lt.s32.totalorder %s6303_s25, 1  ;;  %v7611_v1 = vld [vmem:[%s9707_s1 + $0x8] sm:$0xff]   ;;  %vm351_vm0 = vcmask 261120   ;;  %vm612_vm1 = vcmask 122880   ;;  %v9736_v50 = vmov 0 }
   0xe   : > { %6967 = vmatprep.subr.bf16.mxu0 %v7610_v0  ;;  %vm619_vm2 = vsmask.f32 256  ;;  %v627_v51 = vld [vmem:[#allocation2 + $0x18] sm:$0x1]  ;;  %vm675_vm4 = vsmask.f32 7938 }
   0xf   : > { %s9818_s25 = smov (!%p269_p3, %s6303_s25), 1  ;;  %6968 = vmatpush3.bf16.msra.mxu0 %v7610_v0  ;;  %vm7859_vm3 = vmand %vm612_vm1, %vm619_vm2  ;;  %v624_v53 = vld [vmem:[#allocation2 + $0xc] sm:$0x1]  ;;  %v9739_v55 = vmov 0  ;;  %v683_v56 = vld [vmem:[#allocation2 + $0x20] sm:$0x1] }
  0x10   : > { %6969 = vmatprep.subr.bf16.mxu0 %v7611_v1  ;;  %s6745_s30 = sshll.u32 %s9818_s25, 8  ;;  %v9737_v50 = vsel %vm7859_vm3, 4294967295, %v9736_v50  ;;  %v628_v52 = vsel %vm7859_vm3, 0, %v627_v51  ;;  %v625_v54 = vsel %vm7859_vm3, 0, %v624_v53  ;;  %vm7869_vm5 = vmand %vm612_vm1, %vm675_vm4  ;;  %v680_v58 = vld [vmem:[#allocation2 + $0x14] sm:$0x1] }
  0x11   : > { %s7807_s10 = scalar_lea.vmem %s9706_s0, %s6745_s30  ;;  %9738 = vst [vmem:[#allocation3_spill] sm:$0xff] %v9737_v50  ;;  %629 = vst [vmem:[#allocation2 + $0x18] sm:$0x1] %v628_v52  ;;  %v9740_v55 = vsel %vm7869_vm5, 4294967295, %v9739_v55  ;;  %v684_v57 = vsel %vm7869_vm5, 0, %v683_v56  ;;  %v681_v59 = vsel %vm7869_vm5, 0, %v680_v58  ;;  %s9577_s28 = scalar_lea.vmem %s9713_s7, %s6745_s30 }
  0x12   : > { %v280_v2 = vld [vmem:[%s7807_s10] sm:$0xff]  ;;  %v281_v3 = vld [vmem:[%s7807_s10 + $0x8] sm:$0xff]  ;;  %v282_v4 = vld [vmem:[%s7807_s10 + $0x10] sm:$0xff]  ;;  %9741 = vst [vmem:[#allocation4_spill] sm:$0xff] %v9740_v55  ;;  %vm609_vm6 = vcmask 125952   ;;  %v7744_v0 = vmov 0  }
  0x13   : > { %6970 = vmatpush3.bf16.msra.mxu0 %v7611_v1  ;;  %v312_v5 = vpack.c.bf16 %v281_v3, %v280_v2  ;;  %v283_v6 = vld [vmem:[%s7807_s10 + $0x18] sm:$0xff]  ;;  %v284_v7 = vld [vmem:[%s7807_s10 + $0x20] sm:$0xff]  ;;  %v285_v8 = vld [vmem:[%s7807_s10 + $0x28] sm:$0xff]  ;;  %626 = vst [vmem:[#allocation2 + $0xc] sm:$0x1] %v625_v54  ;;  %vm1742_vm10 = vcmask 130048  }
  0x14   : > { %v313_v9 = vpack.c.bf16 %v283_v6, %v282_v4  ;;  %v314_v10 = vpack.c.bf16 %v285_v8, %v284_v7  ;;  %v286_v11 = vld [vmem:[%s7807_s10 + $0x30] sm:$0xff]  ;;  %v287_v12 = vld [vmem:[%s7807_s10 + $0x38] sm:$0xff]  ;;  %v288_v13 = vld [vmem:[%s7807_s10 + $0x40] sm:$0xff]  ;;  %685 = vst [vmem:[#allocation2 + $0x20] sm:$0x1] %v684_v57  ;;  %vm2295_vm14 = vcmask 1042432  }
  0x15   : > { %6971 = vmatprep.mubr.msk.bf16.mxu0 %vm351_vm0, %v312_v5  ;;  %v289_v14 = vld [vmem:[%s7807_s10 + $0x48] sm:$0xff]  ;;  %v315_v15 = vpack.c.bf16 %v287_v12, %v286_v11  ;;  %v290_v17 = vld [vmem:[%s7807_s10 + $0x50] sm:$0xff]  ;;  %v291_v18 = vld [vmem:[%s7807_s10 + $0x58] sm:$0xff]  ;;  %682 = vst [vmem:[#allocation2 + $0x14] sm:$0x1] %v681_v59  ;;  %vm2296_vm15 = vcmask 1046532  }
  0x16   : > { %6972 = vmatmul.mubr.msk.bf16.vlgmr.msra.gmra.mrb[0].mxu0 %vm351_vm0, %v313_v9  ;;  %v316_v16 = vpack.c.bf16 %v289_v14, %v288_v13  ;;  %v292_v19 = vld [vmem:[%s7807_s10 + $0x60] sm:$0xff]  ;;  %v293_v20 = vld [vmem:[%s7807_s10 + $0x68] sm:$0xff]  ;;  %v317_v21 = vpack.c.bf16 %v291_v18, %v290_v17  ;;  %v294_v23 = vld [vmem:[%s7807_s10 + $0x70] sm:$0xff]  ;;  %610 = vst.msk [vmem:[#allocation2] sm:$0xf] %vm609_vm6, %v7744_v0 }
  0x17   : > { %6975 = vmatprep.mubr.msk.bf16.mxu0 %vm351_vm0, %v314_v10  ;;  %v318_v22 = vpack.c.bf16 %v293_v20, %v292_v19  ;;  %v295_v24 = vld [vmem:[%s7807_s10 + $0x78] sm:$0xff]  ;;  %v296_v25 = vld [vmem:[%s7807_s10 + $0x80] sm:$0xff]  ;;  %v297_v26 = vld [vmem:[%s7807_s10 + $0x88] sm:$0xff]  ;;  %611 = vst.msk [vmem:[#allocation2 + $0x4] sm:$0xf] %vm609_vm6, %v7744_v0 }
  0x18   : > { %v319_v27 = vpack.c.bf16 %v295_v24, %v294_v23  ;;  %v320_v28 = vpack.c.bf16 %v297_v26, %v296_v25  ;;  %v298_v29 = vld [vmem:[%s7807_s10 + $0x90] sm:$0xff]  ;;  %v299_v30 = vld [vmem:[%s7807_s10 + $0x98] sm:$0xff]  ;;  %v300_v31 = vld [vmem:[%s7807_s10 + $0xa0] sm:$0xff]  ;;  %613 = vst.msk [vmem:[#allocation2 + $0x8] sm:$0x1] %vm612_vm1, %v7744_v0 }
  0x19   : > { %v301_v32 = vld [vmem:[%s7807_s10 + $0xa8] sm:$0xff]  ;;  %v321_v33 = vpack.c.bf16 %v299_v30, %v298_v29  ;;  %v302_v35 = vld [vmem:[%s7807_s10 + $0xb0] sm:$0xff]  ;;  %v303_v36 = vld [vmem:[%s7807_s10 + $0xb8] sm:$0xff]  ;;  %615 = vst.msk [vmem:[#allocation2 + $0xcc] sm:$0xf] %vm609_vm6, %v7744_v0 }
  0x1a   : > { %v322_v34 = vpack.c.bf16 %v301_v32, %v300_v31  ;;  %v304_v37 = vld [vmem:[%s7807_s10 + $0xc0] sm:$0xff]  ;;  %v305_v38 = vld [vmem:[%s7807_s10 + $0xc8] sm:$0xff]  ;;  %v323_v39 = vpack.c.bf16 %v303_v36, %v302_v35  ;;  %v306_v41 = vld [vmem:[%s7807_s10 + $0xd0] sm:$0xff]  ;;  %616 = vst.msk [vmem:[#allocation2 + $0xd0] sm:$0xf] %vm609_vm6, %v7744_v0 }
  0x1b   : > { %v324_v40 = vpack.c.bf16 %v305_v38, %v304_v37  ;;  %v307_v42 = vld [vmem:[%s7807_s10 + $0xd8] sm:$0xff]  ;;  %v308_v43 = vld [vmem:[%s7807_s10 + $0xe0] sm:$0xff]  ;;  %v309_v44 = vld [vmem:[%s7807_s10 + $0xe8] sm:$0xff]  ;;  %617 = vst.msk [vmem:[#allocation2 + $0xd4] sm:$0x1] %vm612_vm1, %v7744_v0 }
  0x1c   : > { %v325_v45 = vpack.c.bf16 %v307_v42, %v306_v41  ;;  %v326_v46 = vpack.c.bf16 %v309_v44, %v308_v43  ;;  %v310_v47 = vld [vmem:[%s7807_s10 + $0xf0] sm:$0xff]  ;;  %v311_v48 = vld [vmem:[%s7807_s10 + $0xf8] sm:$0xff]  ;;  %v630_v62 = vld [vmem:[#allocation2 + $0x24] sm:$0x1]  ;;  %vm1298_vm7 = vsmask.f32 3328 }
  0x1d   : > { %v327_v49 = vpack.c.bf16 %v311_v48, %v310_v47  ;;  %v633_v60 = vld [vmem:[#allocation2 + $0x30] sm:$0x1]  ;;  %v631_v63 = vsel %vm7859_vm3, 0, %v630_v62  ;;  %v689_v1 = vld [vmem:[#allocation2 + $0x38] sm:$0x1]  ;;  %vm7976_vm12 = vmand %vm609_vm6, %vm675_vm4 }
  0x1e   : > { %6976 = vmatmul.mubr.msk.bf16.gmra.mrb[4].mxu0 %vm351_vm0, %v315_v15  ;;  %v634_v61 = vsel %vm7859_vm3, 0, %v633_v60  ;;  %632 = vst [vmem:[#allocation2 + $0x24] sm:$0x1] %v631_v63  ;;  %v690_v2 = vsel %vm7869_vm5, 0, %v689_v1  ;;  %v686_v3 = vld [vmem:[#allocation2 + $0x2c] sm:$0x1]  ;;  %vm8617_vm1 = vmor %vm2295_vm14, %vm2296_vm15 }
  0x1f   : > { %6979 = vmatprep.mubr.msk.bf16.mxu0 %vm351_vm0, %v316_v16  ;;  %635 = vst [vmem:[#allocation2 + $0x30] sm:$0x1] %v634_v61  ;;  %691 = vst [vmem:[#allocation2 + $0x38] sm:$0x1] %v690_v2  ;;  %v687_v4 = vsel %vm7869_vm5, 0, %v686_v3  ;;  %v7613_v1 = vld [vmem:[%s9709_s3 + $0x18] sm:$0xff]  }
  0x20   : > { %688 = vst [vmem:[#allocation2 + $0x2c] sm:$0x1] %v687_v4  ;;  %v639_v5 = vld [vmem:[#allocation2 + $0x48] sm:$0x1]  ;;  %v621_v6 = vld [vmem:[#allocation2] sm:$0x1]  ;;  %7343 = vmatprep.subr.bf16.mxu1 %v7613_v1 }
  0x21   : > { %v640_v7 = vsel %vm7859_vm3, 0, %v639_v5  ;;  %v636_v8 = vld [vmem:[#allocation2 + $0x3c] sm:$0x1]  ;;  %v622_v9 = vsel %vm7859_vm3, 0, %v621_v6  ;;  %v695_v11 = vld [vmem:[#allocation2 + $0x50] sm:$0x1]  ;;  %7344 = vmatpush3.bf16.msra.mxu1 %v7613_v1 }
  0x22   : > { %641 = vst [vmem:[#allocation2 + $0x48] sm:$0x1] %v640_v7  ;;  %v637_v10 = vsel %vm7859_vm3, 0, %v636_v8  ;;  %623 = vst [vmem:[#allocation2] sm:$0x1] %v622_v9  ;;  %v696_v12 = vsel %vm7869_vm5, 0, %v695_v11 }
  0x23   : > { %638 = vst [vmem:[#allocation2 + $0x3c] sm:$0x1] %v637_v10  ;;  %697 = vst [vmem:[#allocation2 + $0x50] sm:$0x1] %v696_v12  ;;  %v692_v13 = vld [vmem:[#allocation2 + $0x44] sm:$0x1] }
  0x24   : > { %v677_v14 = vld [vmem:[#allocation2 + $0x8] sm:$0x1]  ;;  %v693_v15 = vsel %vm7869_vm5, 0, %v692_v13  ;;  %v645_v17 = vld [vmem:[#allocation2 + $0x60] sm:$0x1] }
  0x25   : > { %v678_v16 = vsel %vm7869_vm5, 0, %v677_v14  ;;  %694 = vst [vmem:[#allocation2 + $0x44] sm:$0x1] %v693_v15  ;;  %v646_v19 = vsel %vm7859_vm3, 0, %v645_v17  ;;  %v642_v20 = vld [vmem:[#allocation2 + $0x54] sm:$0x1] }
  0x26   : > { %6980 = vmatmul.mubr.msk.bf16.gmra.mrb[8].mxu0 %vm351_vm0, %v317_v21  ;;  %679 = vst [vmem:[#allocation2 + $0x8] sm:$0x1] %v678_v16  ;;  %647 = vst [vmem:[#allocation2 + $0x60] sm:$0x1] %v646_v19  ;;  %v701_v23 = vld [vmem:[#allocation2 + $0x68] sm:$0x1] }
  0x27   : > { %6983 = vmatprep.mubr.msk.bf16.mxu0 %vm351_vm0, %v318_v22  ;;  %v643_v22 = vsel %vm7859_vm3, 0, %v642_v20  ;;  %v1249_v24 = vld [vmem:[#allocation2 + $0x4] sm:$0xf]  ;;  %v702_v26 = vsel %vm7869_vm5, 0, %v701_v23  ;;  %v651_v38 = vld [vmem:[#allocation2 + $0x78] sm:$0x1] }
  0x28   : > { %644 = vst [vmem:[#allocation2 + $0x54] sm:$0x1] %v643_v22  ;;  %703 = vst [vmem:[#allocation2 + $0x68] sm:$0x1] %v702_v26  ;;  %vm1299_vm8 = vsmask.f32 7440 }
  0x29   : > { %v1248_v18 = vld [vmem:[#allocation2] sm:$0xf]  ;;  %v648_v41 = vld [vmem:[#allocation2 + $0x6c] sm:$0x1]  ;;  %vm7918_vm9 = vmor %vm1298_vm7, %vm1299_vm8  ;;  %vm811_vm11 = vsmask.f32 4368 }
  0x2a   : > { %v1302_v21 = vshrl.u32 %v1248_v18, 16  ;;  %v1305_v25 = vshll.u32 %v1248_v18, 16  ;;  %v649_v43 = vsel %vm7859_vm3, 0, %v648_v41  ;;  %v704_v53 = vld [vmem:[#allocation2 + $0x74] sm:$0x1]  ;;  %v7951_v9 = vld [vmem:[%s9709_s3 + $0x20] sm:$0xff]   ;;  %vm7983_vm13 = vmor %vm619_vm2, %vm811_vm11 }
  0x2b   : > { %650 = vst [vmem:[#allocation2 + $0x6c] sm:$0x1] %v649_v43  ;;  %v705_v56 = vsel %vm7869_vm5, 0, %v704_v53  ;;  %v657_v57 = vld [vmem:[#allocation2 + $0x90] sm:$0x1]  ;;  %7139 = vmatprep.subr.bf16.mxu1 %v7951_v9 }
  0x2c   : > { %v1304_v31 = vrot.slane %v1302_v21, 4  ;;  %v1307_v32 = vrot.slane %v1305_v25, 5  ;;  %706 = vst [vmem:[#allocation2 + $0x74] sm:$0x1] %v705_v56  ;;  %v658_v58 = vsel %vm7859_vm3, 0, %v657_v57 }
  0x2d   : > { %v1282_v30 = vld [vmem:[#allocation2 + $0x8] sm:$0x1]  ;;  %659 = vst [vmem:[#allocation2 + $0x90] sm:$0x1] %v658_v58  ;;  %v654_v59 = vld [vmem:[#allocation2 + $0x84] sm:$0x1] }
  0x2e   : > { %6984 = vmatmul.mubr.msk.bf16.gmra.mrb[12].mxu0 %vm351_vm0, %v319_v27  ;;  %v698_v27 = vld [vmem:[#allocation2 + $0x5c] sm:$0x1]  ;;  %v1321_v35 = vshll.u32 %v1282_v30, 16  ;;  %v1308_v36 = vor.u32 %v1307_v32, %v1304_v31  ;;  %v713_v60 = vld [vmem:[#allocation2 + $0x98] sm:$0x1]  ;;  %v655_v61 = vsel %vm7859_vm3, 0, %v654_v59 }
  0x2f   : > { %6987 = vmatprep.mubr.msk.bf16.mxu0 %vm351_vm0, %v320_v28  ;;  %v7612_v28 = vld [vmem:[%s9709_s3 + $0x8] sm:$0xff]   ;;  %v699_v29 = vsel %vm7869_vm5, 0, %v698_v27  ;;  %v714_v62 = vsel %vm7869_vm5, 0, %v713_v60  ;;  %656 = vst [vmem:[#allocation2 + $0x84] sm:$0x1] %v655_v61 }
  0x30   : > { %700 = vst [vmem:[#allocation2 + $0x5c] sm:$0x1] %v699_v29  ;;  %7003 = vmatprep.subr.bf16.mxu0 %v7612_v28  ;;  %v1309_v42 = vrot.slane %v1308_v36, 4  ;;  %v710_v63 = vld [vmem:[#allocation2 + $0x8c] sm:$0x1] }
  0x31   : > { %7004 = vmatpush3.bf16.msra.mxu0 %v7612_v28  ;;  %715 = vst [vmem:[#allocation2 + $0x98] sm:$0x1] %v714_v62  ;;  %v711_v0 = vsel %vm7869_vm5, 0, %v710_v63  ;;  %v663_v2 = vld [vmem:[#allocation2 + $0xa8] sm:$0x1] }
  0x32   : > { %712 = vst [vmem:[#allocation2 + $0x8c] sm:$0x1] %v711_v0  ;;  %v664_v3 = vsel %vm7859_vm3, 0, %v663_v2  ;;  %v660_v4 = vld [vmem:[#allocation2 + $0x9c] sm:$0x1] }
  0x33   : > { %665 = vst [vmem:[#allocation2 + $0xa8] sm:$0x1] %v664_v3  ;;  %v719_v5 = vld [vmem:[#allocation2 + $0xb0] sm:$0x1]  ;;  %v661_v6 = vsel %vm7859_vm3, 0, %v660_v4 }
  0x34   : > { %v720_v7 = vsel %vm7869_vm5, 0, %v719_v5  ;;  %662 = vst [vmem:[#allocation2 + $0x9c] sm:$0x1] %v661_v6  ;;  %v716_v8 = vld [vmem:[#allocation2 + $0xa4] sm:$0x1] }
  0x35   : > { %721 = vst [vmem:[#allocation2 + $0xb0] sm:$0x1] %v720_v7  ;;  %v717_v10 = vsel %vm7869_vm5, 0, %v716_v8  ;;  %v669_v11 = vld [vmem:[#allocation2 + $0xc0] sm:$0x1] }
  0x36   : > { %6988 = vmatmul.mubr.msk.bf16.gmra.mrb[16].mxu0 %vm351_vm0, %v321_v33  ;;  %v1311_v33 = vshll.u32 %v1249_v24, 16  ;;  %718 = vst [vmem:[#allocation2 + $0xa4] sm:$0x1] %v717_v10  ;;  %v670_v12 = vsel %vm7859_vm3, 0, %v669_v11  ;;  %v666_v13 = vld [vmem:[#allocation2 + $0xb4] sm:$0x1] }
  0x37   : > { %6991 = vmatprep.mubr.msk.bf16.mxu0 %vm351_vm0, %v322_v34  ;;  %v1315_v34 = vshrl.u32 %v1249_v24, 16  ;;  %671 = vst [vmem:[#allocation2 + $0xc0] sm:$0x1] %v670_v12  ;;  %v667_v14 = vsel %vm7859_vm3, 0, %v666_v13  ;;  %v725_v15 = vld [vmem:[#allocation2 + $0xc8] sm:$0x1] }
  0x38   : > { %v1313_v37 = vrot.slane %v1311_v33, 5  ;;  %668 = vst [vmem:[#allocation2 + $0xb4] sm:$0x1] %v667_v14  ;;  %v726_v16 = vsel %vm7869_vm5, 0, %v725_v15  ;;  %v722_v17 = vld [vmem:[#allocation2 + $0xbc] sm:$0x1] }
  0x39   : > { %727 = vst [vmem:[#allocation2 + $0xc8] sm:$0x1] %v726_v16  ;;  %v723_v18 = vsel %vm7869_vm5, 0, %v722_v17  ;;  %v7967_v19 = vld [vmem:[%s9708_s2] ss:$0 sm:$0xff] }
  0x3a   : > { %v1314_v47 = vsel %vm7918_vm9, %v1309_v42, %v1313_v37  ;;  %724 = vst [vmem:[#allocation2 + $0xbc] sm:$0x1] %v723_v18  ;;  %v1136_v58 = vld [vmem:[#allocation2 + $0xc] sm:$0xf]  ;;  %v1147_v1 = vld [vmem:[#allocation2 + $0x20] sm:$0x1] }
  0x3b   : > { %v1140_v7 = vld [vmem:[#allocation2 + $0x14] sm:$0x1] }
  0x3e   : > { %6992 = vmatmul.mubr.msk.bf16.gmra.mrb[20].mxu0 %vm351_vm0, %v323_v39  ;;  %v1317_v39 = vrot.slane %v1315_v34, 4 }
  0x3f   : > { %6995 = vmatprep.mubr.msk.bf16.mxu0 %vm351_vm0, %v324_v40  ;;  %v652_v40 = vsel %vm7859_vm3, 0, %v651_v38 }
  0x40   : > { %653 = vst [vmem:[#allocation2 + $0x78] sm:$0x1] %v652_v40  ;;  %v1318_v44 = vor.u32 %v1317_v39, %v1313_v37 }
  0x42   : > { %v1319_v48 = vrot.slane %v1318_v44, 4 }
  0x46   : > { %6996 = vmatmul.mubr.msk.bf16.gmra.mrb[24].mxu0 %vm351_vm0, %v325_v45  ;;  %v1323_v45 = vrot.slane %v1321_v35, 5 }
  0x47   : > { %6999 = vmatprep.mubr.msk.bf16.mxu0 %vm351_vm0, %v326_v46 }
  0x48   : > { %v1324_v52 = vsel %vm7918_vm9, %v1319_v48, %v1323_v45  ;;  %v1143_v48 = vld [vmem:[#allocation2 + $0x18] sm:$0xf] }
  0x49   : > { %v6365_v54 = vcombine.low %v1314_v47, %v1324_v52 }
  0x4e   : > { %7000 = vmatmul.mubr.msk.bf16.gmra.mrb[28].mxu0 %vm351_vm0, %v327_v49  ;;  %v707_v49 = vld [vmem:[#allocation2 + $0x80] sm:$0x1] }
  0x4f   : > { %v708_v51 = vsel %vm7869_vm5, 0, %v707_v49  ;;  %7005 = vmatprep.mubr.msk.bf16.mxu0 %vm1742_vm10, %v6365_v54 }
  0x50   : > { %709 = vst [vmem:[#allocation2 + $0x80] sm:$0x1] %v708_v51 }
  0xe9   : > { %v6973_v20 = vpop.f32.mrb[0].mxu0 }
  0xea   : > { %v443_v21 = vadd.f32 %v6973_v20, %v7967_v19  ;;  %v434_v22 = vpop.f32.mrb[1].mxu0 }
  0xeb   : > { %v435_v23 = vadd.f32 %v7967_v19, %v434_v22  ;;  %v6974_v24 = vpop.f32.mrb[2].mxu0 }
  0xec   : > { %v563_v25 = vmax.f32 %v443_v21, 0.0  ;;  %v446_v26 = vadd.f32 %v6974_v24, %v7967_v19  ;;  %v437_v27 = vpop.f32.mrb[3].mxu0 }
  0xed   : > { %v561_v28 = vmax.f32 %v435_v23, 0.0  ;;  %v438_v29 = vadd.f32 %v7967_v19, %v437_v27 }
  0xee   : > { %v6749_v30 = vpack.c.bf16 %v563_v25, %v563_v25  ;;  %v564_v31 = vmax.f32 %v446_v26, 0.0 }
  0xef   : > { %v6747_v32 = vpack.c.bf16 %v561_v28, %v561_v28  ;;  %v562_v33 = vmax.f32 %v438_v29, 0.0  ;;  %v1157_v28 = vld [vmem:[#allocation2 + $0x30] sm:$0xf] }
  0xf0   : > { %v831_v34 = vshrl.u32 %v6749_v30, 16  ;;  %v6750_v35 = vpack.c.bf16 %v564_v31, %v564_v31  ;;  %v834_v36 = vshll.u32 %v6749_v30, 16 }
  0xf1   : > { %v814_v37 = vshrl.u32 %v6747_v32, 16  ;;  %v817_v38 = vshll.u32 %v6747_v32, 16  ;;  %v6748_v39 = vpack.c.bf16 %v562_v33, %v562_v33  ;;  %v6977_v40 = vpop.f32.mrb[4].mxu0 }
  0xf2   : > { %v833_v41 = vrot.slane %v831_v34, 7  ;;  %v839_v42 = vshrl.u32 %v6750_v35, 16  ;;  %v842_v43 = vshll.u32 %v6750_v35, 16  ;;  %v459_v44 = vadd.f32 %v6977_v40, %v7967_v19  ;;  %v450_v45 = vpop.f32.mrb[5].mxu0  ;;  %v1150_v35 = vld [vmem:[#allocation2 + $0x24] sm:$0xf] }
  0xf3   : > { %v816_v49 = vrot.slane %v814_v37, 7  ;;  %v822_v51 = vshrl.u32 %v6748_v39, 16  ;;  %v825_v52 = vshll.u32 %v6748_v39, 16  ;;  %v451_v53 = vadd.f32 %v7967_v19, %v450_v45  ;;  %v6978_v54 = vpop.f32.mrb[6].mxu0 }
  0xf4   : > { %v836_v56 = vor.u32 %v834_v36, %v833_v41  ;;  %v837_v57 = vrot.slane %v833_v41, 4  ;;  %v841_v59 = vrot.slane %v839_v42, 7  ;;  %v567_v60 = vmax.f32 %v459_v44, 0.0  ;;  %v453_v61 = vpop.f32.mrb[7].mxu0 }
  0xf5   : > { %v819_v62 = vor.u32 %v817_v38, %v816_v49  ;;  %v820_v63 = vrot.slane %v816_v49, 4  ;;  %v824_v2 = vrot.slane %v822_v51, 7  ;;  %v565_v3 = vmax.f32 %v451_v53, 0.0 }
  0xf6   : > { %v1144_v4 = vsel %vm7976_vm12, %v836_v56, %v1143_v48  ;;  %v844_v5 = vor.u32 %v842_v43, %v841_v59  ;;  %v846_v6 = vrot.slane %v841_v59, 4  ;;  %v6753_v8 = vpack.c.bf16 %v567_v60, %v567_v60  ;;  %v1161_v59 = vld [vmem:[#allocation2 + $0x38] sm:$0x1]  ;;  %v1154_v60 = vld [vmem:[#allocation2 + $0x2c] sm:$0x1] }
  0xf7   : > { %1145 = vst [vmem:[#allocation2 + $0x18] sm:$0xf] %v1144_v4  ;;  %v1137_v10 = vsel %vm7976_vm12, %v819_v62, %v1136_v58  ;;  %v827_v11 = vor.u32 %v825_v52, %v824_v2  ;;  %v829_v12 = vrot.slane %v824_v2, 4  ;;  %v6751_v13 = vpack.c.bf16 %v565_v3, %v565_v3 }
  0xf8   : > { %1138 = vst [vmem:[#allocation2 + $0xc] sm:$0xf] %v1137_v10  ;;  %v845_v14 = vsel %vm7983_vm13, %v837_v57, %v844_v5  ;;  %v1148_v15 = vsel %vm7859_vm3, %v846_v6, %v1147_v1  ;;  %v865_v16 = vshrl.u32 %v6753_v8, 16  ;;  %v868_v20 = vshll.u32 %v6753_v8, 16  ;;  %v1171_v10 = vld [vmem:[#allocation2 + $0x48] sm:$0xf] }
  0xf9   : > { %1146 = vst.msk [vmem:[#allocation2 + $0x1c] sm:$0xf] %vm609_vm6, %v845_v14  ;;  %1149 = vst [vmem:[#allocation2 + $0x20] sm:$0x1] %v1148_v15  ;;  %v828_v17 = vsel %vm7983_vm13, %v820_v63, %v827_v11  ;;  %v1141_v18 = vsel %vm7859_vm3, %v829_v12, %v1140_v7  ;;  %v848_v21 = vshrl.u32 %v6751_v13, 16  ;;  %v6981_v22 = vpop.f32.mrb[8].mxu0  ;;  %v462_v24 = vadd.f32 %v6978_v54, %v7967_v19 }
  0xfa   : > { %1139 = vst.msk [vmem:[#allocation2 + $0x10] sm:$0xf] %vm609_vm6, %v828_v17  ;;  %1142 = vst [vmem:[#allocation2 + $0x14] sm:$0x1] %v1141_v18  ;;  %v8001_v23 = vrot.slane %v865_v16, 7  ;;  %v454_v25 = vadd.f32 %v7967_v19, %v453_v61  ;;  %v475_v26 = vadd.f32 %v6981_v22, %v7967_v19  ;;  %v466_v27 = vpop.f32.mrb[9].mxu0 }
  0xfb   : > { %v850_v29 = vrot.slane %v848_v21, 7  ;;  %v851_v30 = vshll.u32 %v6751_v13, 16  ;;  %v467_v31 = vadd.f32 %v7967_v19, %v466_v27  ;;  %v6982_v32 = vpop.f32.mrb[10].mxu0  ;;  %v568_v36 = vmax.f32 %v462_v24, 0.0 }
  0xfc   : > { %v870_v33 = vor.u32 %v868_v20, %v8001_v23  ;;  %v871_v34 = vrot.slane %v8001_v23, 4  ;;  %v566_v37 = vmax.f32 %v454_v25, 0.0  ;;  %v469_v38 = vpop.f32.mrb[11].mxu0  ;;  %v571_v41 = vmax.f32 %v475_v26, 0.0  ;;  %v1164_v20 = vld [vmem:[#allocation2 + $0x3c] sm:$0xf] }
  0xfd   : > { %v853_v39 = vor.u32 %v851_v30, %v850_v29  ;;  %v854_v40 = vrot.slane %v850_v29, 4  ;;  %v569_v42 = vmax.f32 %v467_v31, 0.0  ;;  %v6754_v44 = vpack.c.bf16 %v568_v36, %v568_v36 }
  0xfe   : > { %v1158_v43 = vsel %vm7976_vm12, %v870_v33, %v1157_v28  ;;  %v6752_v45 = vpack.c.bf16 %v566_v37, %v566_v37  ;;  %v478_v48 = vadd.f32 %v6982_v32, %v7967_v19  ;;  %v6757_v51 = vpack.c.bf16 %v571_v41, %v571_v41 }
  0xff   : > { %1159 = vst [vmem:[#allocation2 + $0x30] sm:$0xf] %v1158_v43  ;;  %v1151_v49 = vsel %vm7976_vm12, %v853_v39, %v1150_v35  ;;  %v6755_v52 = vpack.c.bf16 %v569_v42, %v569_v42  ;;  %v470_v53 = vadd.f32 %v7967_v19, %v469_v38  ;;  %v873_v54 = vshrl.u32 %v6754_v44, 16  ;;  %v1175_v43 = vld [vmem:[#allocation2 + $0x50] sm:$0x1] }
 0x100   : > { %1152 = vst [vmem:[#allocation2 + $0x24] sm:$0xf] %v1151_v49  ;;  %v876_v56 = vshll.u32 %v6754_v44, 16  ;;  %v856_v57 = vshrl.u32 %v6752_v45, 16  ;;  %v859_v58 = vshll.u32 %v6752_v45, 16  ;;  %v899_v61 = vshrl.u32 %v6757_v51, 16 }
 0x101   : > { %v902_v62 = vshll.u32 %v6757_v51, 16  ;;  %v882_v63 = vshrl.u32 %v6755_v52, 16  ;;  %v885_v1 = vshll.u32 %v6755_v52, 16  ;;  %v6985_v2 = vpop.f32.mrb[12].mxu0  ;;  %v875_v3 = vrot.slane %v873_v54, 7 }
 0x102   : > { %v858_v4 = vrot.slane %v856_v57, 7  ;;  %v572_v5 = vmax.f32 %v478_v48, 0.0  ;;  %v570_v6 = vmax.f32 %v470_v53, 0.0  ;;  %v482_v7 = vpop.f32.mrb[13].mxu0  ;;  %v8015_v8 = vrot.slane %v899_v61, 7 }
 0x103   : > { %v8017_v11 = vrot.slane %v882_v63, 7  ;;  %v491_v12 = vadd.f32 %v6985_v2, %v7967_v19  ;;  %v483_v13 = vadd.f32 %v7967_v19, %v482_v7  ;;  %v6986_v14 = vpop.f32.mrb[14].mxu0  ;;  %v878_v15 = vor.u32 %v876_v56, %v875_v3  ;;  %v1168_v44 = vld [vmem:[#allocation2 + $0x44] sm:$0x1] }
 0x104   : > { %v880_v16 = vrot.slane %v875_v3, 4  ;;  %v861_v17 = vor.u32 %v859_v58, %v858_v4  ;;  %v863_v18 = vrot.slane %v858_v4, 4  ;;  %v485_v21 = vpop.f32.mrb[15].mxu0  ;;  %v904_v22 = vor.u32 %v902_v62, %v8015_v8 }
 0x105   : > { %v905_v23 = vrot.slane %v8015_v8, 4  ;;  %v887_v24 = vor.u32 %v885_v1, %v8017_v11  ;;  %v888_v25 = vrot.slane %v8017_v11, 4  ;;  %v879_v26 = vsel %vm7983_vm13, %v871_v34, %v878_v15  ;;  %v1185_v15 = vld [vmem:[#allocation2 + $0x60] sm:$0xf] }
 0x106   : > { %v1162_v27 = vsel %vm7859_vm3, %v880_v16, %v1161_v59  ;;  %v862_v28 = vsel %vm7983_vm13, %v854_v40, %v861_v17  ;;  %v1155_v29 = vsel %vm7859_vm3, %v863_v18, %v1154_v60  ;;  %1160 = vst.msk [vmem:[#allocation2 + $0x34] sm:$0xf] %vm609_vm6, %v879_v26  ;;  %v1172_v30 = vsel %vm7976_vm12, %v904_v22, %v1171_v10  ;;  %v1178_v16 = vld [vmem:[#allocation2 + $0x54] sm:$0xf]  ;;  %v1250_v22 = vld [vmem:[#allocation2 + $0xc] sm:$0xf] }
 0x107   : > { %1163 = vst [vmem:[#allocation2 + $0x38] sm:$0x1] %v1162_v27  ;;  %1153 = vst.msk [vmem:[#allocation2 + $0x28] sm:$0xf] %vm609_vm6, %v862_v28  ;;  %v1165_v31 = vsel %vm7976_vm12, %v887_v24, %v1164_v20  ;;  %v6758_v32 = vpack.c.bf16 %v572_v5, %v572_v5  ;;  %v6756_v33 = vpack.c.bf16 %v570_v6, %v570_v6  ;;  %v575_v34 = vmax.f32 %v491_v12, 0.0  ;;  %v8046_v5 = vld [vmem:[%s9709_s3] sm:$0xff]  }
 0x108   : > { %1156 = vst [vmem:[#allocation2 + $0x2c] sm:$0x1] %v1155_v29  ;;  %1173 = vst [vmem:[#allocation2 + $0x48] sm:$0xf] %v1172_v30  ;;  %v573_v35 = vmax.f32 %v483_v13, 0.0  ;;  %v494_v36 = vadd.f32 %v6986_v14, %v7967_v19  ;;  %v486_v37 = vadd.f32 %v7967_v19, %v485_v21  ;;  %7037 = vmatprep.subr.bf16.mxu0 %v8046_v5 }
 0x109   : > { %1166 = vst [vmem:[#allocation2 + $0x3c] sm:$0xf] %v1165_v31  ;;  %v907_v38 = vshrl.u32 %v6758_v32, 16  ;;  %v910_v39 = vshll.u32 %v6758_v32, 16  ;;  %v890_v40 = vshrl.u32 %v6756_v33, 16  ;;  %v893_v41 = vshll.u32 %v6756_v33, 16 }
 0x10a   : > { %v6989_v42 = vpop.f32.mrb[16].mxu0  ;;  %v6761_v45 = vpack.c.bf16 %v575_v34, %v575_v34  ;;  %v6759_v48 = vpack.c.bf16 %v573_v35, %v573_v35  ;;  %v576_v49 = vmax.f32 %v494_v36, 0.0  ;;  %v574_v51 = vmax.f32 %v486_v37, 0.0  ;;  %v1189_v34 = vld [vmem:[#allocation2 + $0x68] sm:$0x1] }
 0x10b   : > { %v498_v52 = vpop.f32.mrb[17].mxu0  ;;  %v909_v53 = vrot.slane %v907_v38, 7  ;;  %v892_v54 = vrot.slane %v890_v40, 7  ;;  %v507_v56 = vadd.f32 %v6989_v42, %v7967_v19  ;;  %v1326_v42 = vshrl.u32 %v1250_v22, 16 }
 0x10c   : > { %v499_v57 = vadd.f32 %v7967_v19, %v498_v52  ;;  %v6990_v58 = vpop.f32.mrb[18].mxu0  ;;  %v933_v59 = vshrl.u32 %v6761_v45, 16  ;;  %v936_v60 = vshll.u32 %v6761_v45, 16  ;;  %v916_v61 = vshrl.u32 %v6759_v48, 16  ;;  %v1251_v52 = vld [vmem:[#allocation2 + $0x10] sm:$0xf] }
 0x10d   : > { %v919_v62 = vshll.u32 %v6759_v48, 16  ;;  %v501_v63 = vpop.f32.mrb[19].mxu0  ;;  %v912_v1 = vor.u32 %v910_v39, %v909_v53  ;;  %v914_v2 = vrot.slane %v909_v53, 4  ;;  %v895_v3 = vor.u32 %v893_v41, %v892_v54  ;;  %v1182_v39 = vld [vmem:[#allocation2 + $0x5c] sm:$0x1] }
 0x10e   : > { %v897_v4 = vrot.slane %v892_v54, 4  ;;  %v935_v6 = vrot.slane %v933_v59, 7  ;;  %v918_v7 = vrot.slane %v916_v61, 7  ;;  %v6762_v8 = vpack.c.bf16 %v576_v49, %v576_v49 }
 0x10f   : > { %v6760_v10 = vpack.c.bf16 %v574_v51, %v574_v51  ;;  %v913_v11 = vsel %vm7983_vm13, %v905_v23, %v912_v1  ;;  %v1176_v12 = vsel %vm7859_vm3, %v914_v2, %v1175_v43  ;;  %v896_v13 = vsel %vm7983_vm13, %v888_v25, %v895_v3 }
 0x110   : > { %v1169_v14 = vsel %vm7859_vm3, %v897_v4, %v1168_v44  ;;  %1174 = vst.msk [vmem:[#allocation2 + $0x4c] sm:$0xf] %vm609_vm6, %v913_v11  ;;  %1177 = vst [vmem:[#allocation2 + $0x50] sm:$0x1] %v1176_v12  ;;  %v938_v17 = vor.u32 %v936_v60, %v935_v6  ;;  %v939_v18 = vrot.slane %v935_v6, 4  ;;  %v921_v20 = vor.u32 %v919_v62, %v918_v7 }
 0x111   : > { %1167 = vst.msk [vmem:[#allocation2 + $0x40] sm:$0xf] %vm609_vm6, %v896_v13  ;;  %1170 = vst [vmem:[#allocation2 + $0x44] sm:$0x1] %v1169_v14  ;;  %v922_v21 = vrot.slane %v918_v7, 4  ;;  %v941_v23 = vshrl.u32 %v6762_v8, 16  ;;  %v510_v36 = vadd.f32 %v6990_v58, %v7967_v19  ;;  %v502_v37 = vadd.f32 %v7967_v19, %v501_v63 }
 0x112   : > { %v944_v24 = vshll.u32 %v6762_v8, 16  ;;  %v924_v25 = vshrl.u32 %v6760_v10, 16  ;;  %v927_v26 = vshll.u32 %v6760_v10, 16  ;;  %v8059_v27 = vpop.f32.mrb[20].mxu0  ;;  %v1186_v28 = vsel %vm7976_vm12, %v938_v17, %v1185_v15  ;;  %v1199_v62 = vld [vmem:[#allocation2 + $0x78] sm:$0xf] }
 0x113   : > { %v1179_v29 = vsel %vm7976_vm12, %v921_v20, %v1178_v16  ;;  %v579_v30 = vmax.f32 %v507_v56, 0.0  ;;  %v577_v31 = vmax.f32 %v499_v57, 0.0  ;;  %v8065_v32 = vpop.f32.mrb[21].mxu0  ;;  %1187 = vst [vmem:[#allocation2 + $0x60] sm:$0xf] %v1186_v28  ;;  %v943_v33 = vrot.slane %v941_v23, 7 }
 0x114   : > { %1180 = vst [vmem:[#allocation2 + $0x54] sm:$0xf] %v1179_v29  ;;  %v926_v35 = vrot.slane %v924_v25, 7  ;;  %v8069_v38 = vpop.f32.mrb[22].mxu0  ;;  %v1329_v43 = vshll.u32 %v1250_v22, 16  ;;  %v580_v3 = vmax.f32 %v510_v36, 0.0 }
 0x115   : > { %v6765_v40 = vpack.c.bf16 %v579_v30, %v579_v30  ;;  %v6763_v41 = vpack.c.bf16 %v577_v31, %v577_v31  ;;  %v8071_v44 = vpop.f32.mrb[23].mxu0  ;;  %v946_v45 = vor.u32 %v944_v24, %v943_v33  ;;  %v948_v48 = vrot.slane %v943_v33, 4  ;;  %v1192_v63 = vld [vmem:[#allocation2 + $0x6c] sm:$0xf]  ;;  %v1283_v6 = vld [vmem:[#allocation2 + $0x14] sm:$0x1] }
 0x116   : > { %v929_v49 = vor.u32 %v927_v26, %v926_v35  ;;  %v931_v51 = vrot.slane %v926_v35, 4  ;;  %v578_v4 = vmax.f32 %v502_v37, 0.0  ;;  %v1328_v7 = vrot.slane %v1326_v42, 4  ;;  %v1252_v23 = vld [vmem:[#allocation2 + $0x18] sm:$0xf] }
 0x117   : > { %v967_v53 = vshrl.u32 %v6765_v40, 16  ;;  %v970_v54 = vshll.u32 %v6765_v40, 16  ;;  %v950_v56 = vshrl.u32 %v6763_v41, 16  ;;  %v953_v57 = vshll.u32 %v6763_v41, 16  ;;  %v1253_v30 = vld [vmem:[#allocation2 + $0x1c] sm:$0xf] }
 0x118   : > { %v947_v58 = vsel %vm7983_vm13, %v939_v18, %v946_v45  ;;  %v1190_v59 = vsel %vm7859_vm3, %v948_v48, %v1189_v34  ;;  %v930_v60 = vsel %vm7983_vm13, %v922_v21, %v929_v49  ;;  %v1183_v61 = vsel %vm7859_vm3, %v931_v51, %v1182_v39  ;;  %v1203_v37 = vld [vmem:[#allocation2 + $0x80] sm:$0x1]  ;;  %v1196_v39 = vld [vmem:[#allocation2 + $0x74] sm:$0x1]  ;;  %v8434_v55 = vld [vmem:[#allocation2 + $0x4c] sm:$0xf] }
 0x119   : > { %1188 = vst.msk [vmem:[#allocation2 + $0x64] sm:$0xf] %vm609_vm6, %v947_v58  ;;  %1191 = vst [vmem:[#allocation2 + $0x68] sm:$0x1] %v1190_v59  ;;  %v8083_v1 = vrot.slane %v967_v53, 7  ;;  %v8085_v2 = vrot.slane %v950_v56, 7  ;;  %v6766_v18 = vpack.c.bf16 %v580_v3, %v580_v3  ;;  %v6764_v20 = vpack.c.bf16 %v578_v4, %v578_v4 }
 0x11a   : > { %1181 = vst.msk [vmem:[#allocation2 + $0x58] sm:$0xf] %vm609_vm6, %v930_v60  ;;  %1184 = vst [vmem:[#allocation2 + $0x5c] sm:$0x1] %v1183_v61  ;;  %v1331_v8 = vrot.slane %v1329_v43, 5  ;;  %v1335_v10 = vshll.u32 %v1251_v52, 16 }
 0x11b   : > { %v1339_v11 = vshrl.u32 %v1251_v52, 16  ;;  %v8087_v12 = vpop.f32.mrb[24].mxu0  ;;  %v972_v13 = vor.u32 %v970_v54, %v8083_v1  ;;  %v973_v14 = vrot.slane %v8083_v1, 4  ;;  %v955_v15 = vor.u32 %v953_v57, %v8085_v2  ;;  %v7625_v52 = vld [vmem:[%s9709_s3 + $0x28] sm:$0xff]   ;;  %9748 = vst [vmem:[#allocation5_spill] sm:$0xff] %v8434_v55 }
 0x11c   : > { %v956_v16 = vrot.slane %v8085_v2, 4  ;;  %v8093_v17 = vpop.f32.mrb[25].mxu0  ;;  %v1332_v21 = vor.u32 %v1331_v8, %v1328_v7  ;;  %v1337_v22 = vrot.slane %v1335_v10, 5  ;;  %v1345_v29 = vshll.u32 %v1283_v6, 16 }
 0x11d   : > { %v8095_v24 = vpop.f32.mrb[26].mxu0  ;;  %v1200_v25 = vsel %vm7976_vm12, %v972_v13, %v1199_v62  ;;  %v1193_v26 = vsel %vm7976_vm12, %v955_v15, %v1192_v63  ;;  %v1341_v28 = vrot.slane %v1339_v11, 4  ;;  %v975_v33 = vshrl.u32 %v6766_v18, 16  ;;  %v1284_v63 = vld [vmem:[#allocation2 + $0x20] sm:$0x1] }
 0x11e   : > { %v8101_v31 = vpop.f32.mrb[27].mxu0  ;;  %1201 = vst [vmem:[#allocation2 + $0x78] sm:$0xf] %v1200_v25  ;;  %1194 = vst [vmem:[#allocation2 + $0x6c] sm:$0xf] %v1193_v26  ;;  %v978_v34 = vshll.u32 %v6766_v18, 16  ;;  %v523_v25 = vadd.f32 %v8059_v27, %v7967_v19  ;;  %v515_v26 = vadd.f32 %v7967_v19, %v8065_v32 }
 0x11f   : > { %v958_v35 = vshrl.u32 %v6764_v20, 16  ;;  %v961_v36 = vshll.u32 %v6764_v20, 16  ;;  %v1333_v40 = vrot.slane %v1332_v21, 4  ;;  %v1342_v41 = vor.u32 %v1341_v28, %v1337_v22  ;;  %v1254_v18 = vld [vmem:[#allocation2 + $0x24] sm:$0xf] }
 0x120   : > { %v1347_v42 = vrot.slane %v1345_v29, 5  ;;  %v1350_v43 = vshrl.u32 %v1252_v23, 16  ;;  %v977_v45 = vrot.slane %v975_v33, 7  ;;  %v1353_v49 = vshll.u32 %v1252_v23, 16  ;;  %v7616_v1 = vld [vmem:[#allocation2 + $0x60] sm:$0xff]  }
 0x121   : > { %v960_v48 = vrot.slane %v958_v35, 7  ;;  %v1359_v51 = vshll.u32 %v1253_v30, 16  ;;  %v1338_v53 = vsel %vm7918_vm9, %v1333_v40, %v1337_v22  ;;  %v1343_v54 = vrot.slane %v1342_v41, 4  ;;  %v7614_v58 = vld [vmem:[#allocation2 + $0x54] sm:$0xff]   ;;  %v8108_v2 = vpop.f32.mrb[28].mxu0 }
 0x122   : > { %v1352_v56 = vrot.slane %v1350_v43, 4  ;;  %v1363_v57 = vshrl.u32 %v1253_v30, 16  ;;  %v980_v59 = vor.u32 %v978_v34, %v977_v45  ;;  %v982_v60 = vrot.slane %v977_v45, 4  ;;  %7119 = vmatprep.mubr.msk.bf16.mxu1 %vm1742_vm10, %v7614_v58  ;;  %v8113_v8 = vpop.f32.mrb[29].mxu0  ;;  %v1213_v58 = vld [vmem:[#allocation2 + $0x90] sm:$0xf] }
 0x123   : > { %v963_v61 = vor.u32 %v961_v36, %v960_v48  ;;  %v965_v62 = vrot.slane %v960_v48, 4  ;;  %v1348_v3 = vsel %vm7918_vm9, %v1343_v54, %v1347_v42  ;;  %v1355_v4 = vrot.slane %v1353_v49, 5  ;;  %7120 = vmatmul.mubr.msk.bf16.vlgmr.msra.gmra.mrb[0].mxu1 %vm1742_vm10, %v7616_v1  ;;  %v8124_v20 = vpop.f32.mrb[30].mxu0  ;;  %v1285_v49 = vld [vmem:[#allocation2 + $0x2c] sm:$0x1] }
 0x124   : > { %v1361_v6 = vrot.slane %v1359_v51, 5  ;;  %v1365_v7 = vrot.slane %v1363_v57, 4  ;;  %v981_v10 = vsel %vm7983_vm13, %v973_v14, %v980_v59  ;;  %v1204_v11 = vsel %vm7859_vm3, %v982_v60, %v1203_v37  ;;  %7140 = vmatpush3.bf16.msra.mxu1 %v7951_v9 }
 0x125   : > { %v964_v13 = vsel %vm7983_vm13, %v956_v16, %v963_v61  ;;  %v1197_v15 = vsel %vm7859_vm3, %v965_v62, %v1196_v39  ;;  %1202 = vst.msk [vmem:[#allocation2 + $0x7c] sm:$0xf] %vm609_vm6, %v981_v10  ;;  %1205 = vst [vmem:[#allocation2 + $0x80] sm:$0x1] %v1204_v11  ;;  %v6366_v14 = vcombine.low %v1338_v53, %v1348_v3  ;;  %v1369_v23 = vshll.u32 %v1284_v63, 16  ;;  %v8129_v16 = vpop.f32.mrb[31].mxu0 }
 0x126   : > { %1195 = vst.msk [vmem:[#allocation2 + $0x70] sm:$0xf] %vm609_vm6, %v964_v13  ;;  %1198 = vst [vmem:[#allocation2 + $0x74] sm:$0x1] %v1197_v15  ;;  %v1356_v21 = vor.u32 %v1355_v4, %v1352_v56  ;;  %v1366_v22 = vor.u32 %v1365_v7, %v1361_v6  ;;  %v526_v28 = vadd.f32 %v8069_v38, %v7967_v19  ;;  %7173 = vmatprep.subr.bf16.mxu1 %v7625_v52  ;;  %v1255_v39 = vld [vmem:[#allocation2 + $0x28] sm:$0xf] }
 0x127   : > { %v518_v29 = vadd.f32 %v7967_v19, %v8071_v44  ;;  %7006 = vmatmul.mubr.msk.bf16.vlgmr.msra.gmra.mrb[32].mxu0 %vm1742_vm10, %v6366_v14  ;;  %v1371_v9 = vrot.slane %v1369_v23, 5  ;;  %v1374_v34 = vshrl.u32 %v1254_v18, 16  ;;  %v583_v35 = vmax.f32 %v523_v25, 0.0  ;;  %v1206_v10 = vld [vmem:[#allocation2 + $0x84] sm:$0xf] }
 0x128   : > { %v1357_v30 = vrot.slane %v1356_v21, 4  ;;  %v1367_v33 = vrot.slane %v1366_v22, 4  ;;  %v581_v36 = vmax.f32 %v515_v26, 0.0  ;;  %v584_v37 = vmax.f32 %v526_v28, 0.0  ;;  %7038 = vmatpush3.bf16.msra.mxu0 %v8046_v5  ;;  %v1217_v25 = vld [vmem:[#allocation2 + $0x98] sm:$0x1] }
 0x129   : > { %v582_v27 = vmax.f32 %v518_v29, 0.0  ;;  %v1376_v44 = vrot.slane %v1374_v34, 4  ;;  %v1377_v40 = vshll.u32 %v1254_v18, 16  ;;  %v6769_v42 = vpack.c.bf16 %v583_v35, %v583_v35  ;;  %v1210_v26 = vld [vmem:[#allocation2 + $0x8c] sm:$0x1] }
 0x12a   : > { %v1362_v32 = vsel %vm7918_vm9, %v1357_v30, %v1361_v6  ;;  %v1372_v38 = vsel %vm7918_vm9, %v1367_v33, %v1371_v9  ;;  %v6767_v43 = vpack.c.bf16 %v581_v36, %v581_v36  ;;  %v6770_v45 = vpack.c.bf16 %v584_v37, %v584_v37  ;;  %v1256_v9 = vld [vmem:[#allocation2 + $0x30] sm:$0xf] }
 0x12b   : > { %v6367_v41 = vcombine.low %v1362_v32, %v1372_v38  ;;  %v6768_v48 = vpack.c.bf16 %v582_v27, %v582_v27  ;;  %v1379_v51 = vrot.slane %v1377_v40, 5  ;;  %v1383_v52 = vshll.u32 %v1255_v39, 16  ;;  %v1257_v27 = vld [vmem:[#allocation2 + $0x34] sm:$0xf] }
 0x12c   : > { %v1387_v53 = vshrl.u32 %v1255_v39, 16  ;;  %v1001_v5 = vshrl.u32 %v6769_v42, 16  ;;  %v1004_v54 = vshll.u32 %v6769_v42, 16  ;;  %v984_v56 = vshrl.u32 %v6767_v43, 16  ;;  %v7618_v7 = vld [vmem:[#allocation2 + $0x78] sm:$0xff]  }
 0x12d   : > { %7009 = vmatprep.mubr.msk.bf16.mxu0 %vm1742_vm10, %v6367_v41  ;;  %v987_v57 = vshll.u32 %v6767_v43, 16  ;;  %v1009_v59 = vshrl.u32 %v6770_v45, 16  ;;  %v1012_v60 = vshll.u32 %v6770_v45, 16  ;;  %v992_v61 = vshrl.u32 %v6768_v48, 16  ;;  %v7617_v63 = vld [vmem:[#allocation2 + $0x6c] sm:$0xff]  }
 0x12e   : > { %v995_v62 = vshll.u32 %v6768_v48, 16  ;;  %v1003_v1 = vrot.slane %v1001_v5, 7  ;;  %v986_v3 = vrot.slane %v984_v56, 7  ;;  %v1380_v4 = vor.u32 %v1379_v51, %v1376_v44  ;;  %7123 = vmatprep.mubr.msk.bf16.mxu1 %vm1742_vm10, %v7617_v63  ;;  %v1286_v39 = vld [vmem:[#allocation2 + $0x38] sm:$0x1] }
 0x12f   : > { %v1385_v6 = vrot.slane %v1383_v52, 5  ;;  %v1011_v11 = vrot.slane %v1009_v59, 7  ;;  %v994_v13 = vrot.slane %v992_v61, 7  ;;  %v1389_v15 = vrot.slane %v1387_v53, 4  ;;  %7124 = vmatmul.mubr.msk.bf16.gmra.mrb[4].mxu1 %vm1742_vm10, %v7618_v7  ;;  %v1258_v48 = vld [vmem:[#allocation2 + $0x3c] sm:$0xf] }
 0x130   : > { %v1393_v18 = vshll.u32 %v1285_v49, 16  ;;  %v1006_v14 = vor.u32 %v1004_v54, %v1003_v1  ;;  %v1007_v21 = vrot.slane %v1003_v1, 4  ;;  %v989_v22 = vor.u32 %v987_v57, %v986_v3 }
 0x131   : > { %v990_v23 = vrot.slane %v986_v3, 4  ;;  %v1014_v28 = vor.u32 %v1012_v60, %v1011_v11  ;;  %v1016_v29 = vrot.slane %v1011_v11, 4  ;;  %v997_v30 = vor.u32 %v995_v62, %v994_v13 }
 0x132   : > { %v999_v33 = vrot.slane %v994_v13, 4  ;;  %v1214_v34 = vsel %vm7976_vm12, %v1006_v14, %v1213_v58  ;;  %v1207_v35 = vsel %vm7976_vm12, %v989_v22, %v1206_v10  ;;  %v1381_v36 = vrot.slane %v1380_v4, 4 }
 0x133   : > { %v1390_v37 = vor.u32 %v1389_v15, %v1385_v6  ;;  %1215 = vst [vmem:[#allocation2 + $0x90] sm:$0xf] %v1214_v34  ;;  %1208 = vst [vmem:[#allocation2 + $0x84] sm:$0xf] %v1207_v35  ;;  %v1015_v32 = vsel %vm7983_vm13, %v1007_v21, %v1014_v28  ;;  %v1218_v38 = vsel %vm7859_vm3, %v1016_v29, %v1217_v25  ;;  %v1395_v43 = vrot.slane %v1393_v18, 5 }
 0x134   : > { %v998_v44 = vsel %vm7983_vm13, %v990_v23, %v997_v30  ;;  %v1211_v40 = vsel %vm7859_vm3, %v999_v33, %v1210_v26  ;;  %1216 = vst.msk [vmem:[#allocation2 + $0x94] sm:$0xf] %vm609_vm6, %v1015_v32  ;;  %1219 = vst [vmem:[#allocation2 + $0x98] sm:$0x1] %v1218_v38  ;;  %v1386_v41 = vsel %vm7918_vm9, %v1381_v36, %v1385_v6  ;;  %v1398_v45 = vshrl.u32 %v1256_v9, 16 }
 0x135   : > { %1209 = vst.msk [vmem:[#allocation2 + $0x88] sm:$0xf] %vm609_vm6, %v998_v44  ;;  %1212 = vst [vmem:[#allocation2 + $0x8c] sm:$0x1] %v1211_v40  ;;  %v1391_v42 = vrot.slane %v1390_v37, 4  ;;  %v1401_v49 = vshll.u32 %v1256_v9, 16  ;;  %v539_v56 = vadd.f32 %v8087_v12, %v7967_v19  ;;  %v531_v57 = vadd.f32 %v7967_v19, %v8093_v17 }
 0x136   : > { %v1407_v51 = vshll.u32 %v1257_v27, 16  ;;  %v1411_v52 = vshrl.u32 %v1257_v27, 16  ;;  %v1417_v53 = vshll.u32 %v1286_v39, 16  ;;  %v1400_v54 = vrot.slane %v1398_v45, 4  ;;  %v1220_v29 = vld [vmem:[#allocation2 + $0x9c] sm:$0xf] }
 0x137   : > { %v1396_v5 = vsel %vm7918_vm9, %v1391_v42, %v1395_v43  ;;  %v1403_v59 = vrot.slane %v1401_v49, 5  ;;  %v587_v63 = vmax.f32 %v539_v56, 0.0  ;;  %v585_v1 = vmax.f32 %v531_v57, 0.0  ;;  %v8179_v37 = vld [vmem:[#allocation2 + $0x40] sm:$0xf] }
 0x138   : > { %v6368_v58 = vcombine.low %v1386_v41, %v1396_v5  ;;  %v1409_v60 = vrot.slane %v1407_v51, 5  ;;  %v1413_v61 = vrot.slane %v1411_v52, 4  ;;  %v1419_v62 = vrot.slane %v1417_v53, 5  ;;  %v1287_v40 = vld [vmem:[#allocation2 + $0x44] sm:$0x1] }
 0x139   : > { %v542_v3 = vadd.f32 %v8095_v24, %v7967_v19  ;;  %v1404_v4 = vor.u32 %v1403_v59, %v1400_v54  ;;  %v534_v12 = vadd.f32 %v7967_v19, %v8101_v31  ;;  %v1422_v7 = vshrl.u32 %v1258_v48, 16  ;;  %v1227_v31 = vld [vmem:[#allocation2 + $0xa8] sm:$0xf]  ;;  %v1231_v54 = vld [vmem:[#allocation2 + $0xb0] sm:$0x1] }
 0x13a   : > { %7010 = vmatmul.mubr.msk.bf16.gmra.mrb[36].mxu0 %vm1742_vm10, %v6368_v58  ;;  %v1414_v6 = vor.u32 %v1413_v61, %v1409_v60  ;;  %v6773_v10 = vpack.c.bf16 %v587_v63, %v587_v63  ;;  %v6771_v17 = vpack.c.bf16 %v585_v1, %v585_v1  ;;  %v1425_v13 = vshll.u32 %v1258_v48, 16  ;;  %v1224_v56 = vld [vmem:[#allocation2 + $0xa4] sm:$0x1]  ;;  %v8190_v63 = vld [vmem:[#allocation2 + $0x48] sm:$0xf] }
 0x13b   : > { %v588_v11 = vmax.f32 %v542_v3, 0.0  ;;  %v1405_v15 = vrot.slane %v1404_v4, 4  ;;  %v586_v14 = vmax.f32 %v534_v12, 0.0  ;;  %v1424_v21 = vrot.slane %v1422_v7, 4  ;;  %v7620_v9 = vld [vmem:[#allocation2 + $0x90] sm:$0xff]  }
 0x13c   : > { %v1415_v18 = vrot.slane %v1414_v6, 4  ;;  %v1035_v22 = vshrl.u32 %v6773_v10, 16  ;;  %v1038_v23 = vshll.u32 %v6773_v10, 16  ;;  %v1018_v25 = vshrl.u32 %v6771_v17, 16  ;;  %v7619_v26 = vld [vmem:[#allocation2 + $0x84] sm:$0xff]  }
 0x13d   : > { %v1021_v24 = vshll.u32 %v6771_v17, 16  ;;  %v1410_v28 = vsel %vm7918_vm9, %v1405_v15, %v1409_v60  ;;  %v6774_v30 = vpack.c.bf16 %v588_v11, %v588_v11  ;;  %v6772_v33 = vpack.c.bf16 %v586_v14, %v586_v14  ;;  %7127 = vmatprep.mubr.msk.bf16.mxu1 %vm1742_vm10, %v7619_v26  ;;  %v8192_v1 = vld [vmem:[#allocation2 + $0x4c] sm:$0xf]  ;;  %v1288_v7 = vld [vmem:[#allocation2 + $0x50] sm:$0x1] }
 0x13e   : > { %v1420_v19 = vsel %vm7918_vm9, %v1415_v18, %v1419_v62  ;;  %v1037_v35 = vrot.slane %v1035_v22, 7  ;;  %v1020_v36 = vrot.slane %v1018_v25, 7  ;;  %v1427_v27 = vrot.slane %v1425_v13, 5  ;;  %7128 = vmatmul.mubr.msk.bf16.gmra.mrb[8].mxu1 %vm1742_vm10, %v7620_v9 }
 0x13f   : > { %v6369_v34 = vcombine.low %v1410_v28, %v1420_v19  ;;  %v1043_v39 = vshrl.u32 %v6774_v30, 16  ;;  %v1046_v32 = vshll.u32 %v6774_v30, 16  ;;  %v1026_v38 = vshrl.u32 %v6772_v33, 16 }
 0x140   : > { %v1029_v44 = vshll.u32 %v6772_v33, 16  ;;  %v1040_v41 = vor.u32 %v1038_v23, %v1037_v35  ;;  %v1041_v42 = vrot.slane %v1037_v35, 4  ;;  %v1023_v43 = vor.u32 %v1021_v24, %v1020_v36  ;;  %v7663_v24 = vld [vmem:[%s9708_s2] ss:$0 sm:$0xff]  ;;  %v8215_v35 = vld [vmem:[#allocation2 + $0x54] sm:$0xf] }
 0x141   : > { %7013 = vmatprep.mubr.msk.bf16.mxu0 %vm1742_vm10, %v6369_v34  ;;  %v1024_v45 = vrot.slane %v1020_v36, 4  ;;  %v1045_v48 = vrot.slane %v1043_v39, 7  ;;  %v1028_v49 = vrot.slane %v1026_v38, 7  ;;  %v1428_v51 = vor.u32 %v1427_v27, %v1424_v21 }
 0x142   : > { %v1431_v52 = vshll.u32 %v8179_v37, 16  ;;  %v1228_v53 = vsel %vm7976_vm12, %v1040_v41, %v1227_v31  ;;  %v1221_v5 = vsel %vm7976_vm12, %v1023_v43, %v1220_v29  ;;  %v1435_v57 = vshrl.u32 %v8179_v37, 16 }
 0x143   : > { %v1441_v58 = vshll.u32 %v1287_v40, 16  ;;  %1229 = vst [vmem:[#allocation2 + $0xa8] sm:$0xf] %v1228_v53  ;;  %1222 = vst [vmem:[#allocation2 + $0x9c] sm:$0xf] %v1221_v5  ;;  %v1048_v59 = vor.u32 %v1046_v32, %v1045_v48  ;;  %v1050_v60 = vrot.slane %v1045_v48, 4  ;;  %v1031_v61 = vor.u32 %v1029_v44, %v1028_v49 }
 0x144   : > { %v1033_v62 = vrot.slane %v1028_v49, 4  ;;  %v1429_v3 = vrot.slane %v1428_v51, 4  ;;  %v1433_v4 = vrot.slane %v1431_v52, 5  ;;  %v1437_v6 = vrot.slane %v1435_v57, 4  ;;  %v1241_v57 = vld [vmem:[#allocation2 + $0xc0] sm:$0xf] }
 0x145   : > { %v1443_v12 = vrot.slane %v1441_v58, 5  ;;  %v1049_v10 = vsel %vm7983_vm13, %v1041_v42, %v1048_v59  ;;  %v1232_v17 = vsel %vm7859_vm3, %v1050_v60, %v1231_v54  ;;  %v1032_v11 = vsel %vm7983_vm13, %v1024_v45, %v1031_v61 }
 0x146   : > { %v1225_v13 = vsel %vm7859_vm3, %v1033_v62, %v1224_v56  ;;  %1230 = vst.msk [vmem:[#allocation2 + $0xac] sm:$0xf] %vm609_vm6, %v1049_v10  ;;  %1233 = vst [vmem:[#allocation2 + $0xb0] sm:$0x1] %v1232_v17  ;;  %v1434_v15 = vsel %vm7918_vm9, %v1429_v3, %v1433_v4  ;;  %v1438_v18 = vor.u32 %v1437_v6, %v1433_v4  ;;  %v1446_v14 = vshrl.u32 %v8190_v63, 16 }
 0x147   : > { %1223 = vst.msk [vmem:[#allocation2 + $0xa0] sm:$0xf] %vm609_vm6, %v1032_v11  ;;  %1226 = vst [vmem:[#allocation2 + $0xa4] sm:$0x1] %v1225_v13  ;;  %v1449_v21 = vshll.u32 %v8190_v63, 16  ;;  %v1455_v22 = vshll.u32 %v8192_v1, 16  ;;  %v555_v26 = vadd.f32 %v7663_v24, %v8108_v2  ;;  %v547_v29 = vadd.f32 %v7663_v24, %v8113_v8 }
 0x148   : > { %v1459_v23 = vshrl.u32 %v8192_v1, 16  ;;  %v1465_v25 = vshll.u32 %v1288_v7, 16  ;;  %v1439_v28 = vrot.slane %v1438_v18, 4  ;;  %v1448_v19 = vrot.slane %v1446_v14, 4  ;;  %v8227_v6 = vld [vmem:[#allocation2 + $0x58] sm:$0xf] }
 0x149   : > { %v1451_v31 = vrot.slane %v1449_v21, 5  ;;  %v1457_v30 = vrot.slane %v1455_v22, 5  ;;  %v591_v34 = vmax.f32 %v555_v26, 0.0  ;;  %v589_v39 = vmax.f32 %v547_v29, 0.0  ;;  %v1234_v10 = vld [vmem:[#allocation2 + $0xb4] sm:$0xf] }
 0x14a   : > { %v1461_v33 = vrot.slane %v1459_v23, 4  ;;  %v1467_v9 = vrot.slane %v1465_v25, 5  ;;  %v1444_v36 = vsel %vm7918_vm9, %v1439_v28, %v1443_v12  ;;  %v558_v32 = vadd.f32 %v7663_v24, %v8124_v20  ;;  %v8234_v13 = vld [vmem:[%s9709_s3 + $0x10] sm:$0xff]   ;;  %v1245_v21 = vld [vmem:[#allocation2 + $0xc8] sm:$0x1] }
 0x14b   : > { %v1452_v27 = vor.u32 %v1451_v31, %v1448_v19  ;;  %v6370_v38 = vcombine.low %v1434_v15, %v1444_v36  ;;  %v6777_v44 = vpack.c.bf16 %v591_v34, %v591_v34  ;;  %v550_v40 = vadd.f32 %v7663_v24, %v8129_v16  ;;  %v1289_v24 = vld [vmem:[#allocation2 + $0x5c] sm:$0x1]  ;;  %7071 = vmatprep.subr.bf16.mxu0 %v8234_v13 }
 0x14c   : > { %v1462_v2 = vor.u32 %v1461_v33, %v1457_v30  ;;  %v6775_v8 = vpack.c.bf16 %v589_v39, %v589_v39  ;;  %v592_v42 = vmax.f32 %v558_v32, 0.0  ;;  %v1470_v43 = vshrl.u32 %v8215_v35, 16  ;;  %v8247_v32 = vld [vmem:[#allocation2 + $0x64] sm:$0xf] }
 0x14d   : > { %v1453_v41 = vrot.slane %v1452_v27, 4  ;;  %7014 = vmatmul.mubr.msk.bf16.gmra.mrb[40].mxu0 %vm1742_vm10, %v6370_v38  ;;  %v1069_v48 = vshrl.u32 %v6777_v44, 16  ;;  %v1072_v49 = vshll.u32 %v6777_v44, 16  ;;  %v590_v51 = vmax.f32 %v550_v40, 0.0  ;;  %v7622_v60 = vld [vmem:[#allocation2 + $0xa8] sm:$0xff]  }
 0x14e   : > { %v1463_v45 = vrot.slane %v1462_v2, 4  ;;  %v1052_v20 = vshrl.u32 %v6775_v8, 16  ;;  %v1055_v53 = vshll.u32 %v6775_v8, 16  ;;  %v6778_v5 = vpack.c.bf16 %v592_v42, %v592_v42  ;;  %v7621_v54 = vld [vmem:[#allocation2 + $0x9c] sm:$0xff]   ;;  %v1290_v40 = vld [vmem:[#allocation2 + $0x68] sm:$0x1] }
 0x14f   : > { %v1458_v52 = vsel %vm7918_vm9, %v1453_v41, %v1457_v30  ;;  %v1071_v56 = vrot.slane %v1069_v48, 7  ;;  %v6776_v58 = vpack.c.bf16 %v590_v51, %v590_v51  ;;  %v1472_v59 = vrot.slane %v1470_v43, 4  ;;  %7131 = vmatprep.mubr.msk.bf16.mxu1 %vm1742_vm10, %v7621_v54  ;;  %v1238_v30 = vld [vmem:[#allocation2 + $0xbc] sm:$0x1] }
 0x150   : > { %v1468_v16 = vsel %vm7918_vm9, %v1463_v45, %v1467_v9  ;;  %v1054_v62 = vrot.slane %v1052_v20, 7  ;;  %v1077_v3 = vshrl.u32 %v6778_v5, 16  ;;  %v1080_v4 = vshll.u32 %v6778_v5, 16  ;;  %7132 = vmatmul.mubr.msk.bf16.gmra.mrb[12].mxu1 %vm1742_vm10, %v7622_v60  ;;  %v8245_v9 = vld [vmem:[#allocation2 + $0x60] sm:$0xf] }
 0x151   : > { %v6371_v61 = vcombine.low %v1458_v52, %v1468_v16  ;;  %v1074_v12 = vor.u32 %v1072_v49, %v1071_v56  ;;  %v1075_v7 = vrot.slane %v1071_v56, 4  ;;  %v1060_v17 = vshrl.u32 %v6776_v58, 16  ;;  %v8259_v45 = vld [vmem:[#allocation2 + $0x6c] sm:$0xf]  ;;  %v8264_v20 = vld [vmem:[#allocation2 + $0x70] sm:$0xf] }
 0x152   : > { %v1063_v11 = vshll.u32 %v6776_v58, 16  ;;  %v1057_v15 = vor.u32 %v1055_v53, %v1054_v62  ;;  %v1058_v18 = vrot.slane %v1054_v62, 4  ;;  %v1079_v14 = vrot.slane %v1077_v3, 7  ;;  %v1291_v16 = vld [vmem:[#allocation2 + $0x74] sm:$0x1] }
 0x153   : > { %7017 = vmatprep.mubr.msk.bf16.mxu0 %vm1742_vm10, %v6371_v61  ;;  %v1473_v22 = vshll.u32 %v8215_v35, 16  ;;  %v1242_v23 = vsel %vm7976_vm12, %v1074_v12, %v1241_v57  ;;  %v1062_v25 = vrot.slane %v1060_v17, 7  ;;  %v1479_v26 = vshll.u32 %v8227_v6, 16  ;;  %v8267_v56 = vld [vmem:[#allocation2 + $0x78] sm:$0xf] }
 0x154   : > { %v1483_v28 = vshrl.u32 %v8227_v6, 16  ;;  %1243 = vst [vmem:[#allocation2 + $0xc0] sm:$0xf] %v1242_v23  ;;  %v1235_v19 = vsel %vm7976_vm12, %v1057_v15, %v1234_v10  ;;  %v1082_v31 = vor.u32 %v1080_v4, %v1079_v14  ;;  %v1084_v29 = vrot.slane %v1079_v14, 4 }
 0x155   : > { %v1475_v33 = vrot.slane %v1473_v22, 5  ;;  %1236 = vst [vmem:[#allocation2 + $0xb4] sm:$0xf] %v1235_v19  ;;  %v1065_v34 = vor.u32 %v1063_v11, %v1062_v25  ;;  %v1067_v36 = vrot.slane %v1062_v25, 4  ;;  %v1481_v27 = vrot.slane %v1479_v26, 5 }
 0x156   : > { %v1485_v39 = vrot.slane %v1483_v28, 4  ;;  %v1083_v38 = vsel %vm7983_vm13, %v1075_v7, %v1082_v31  ;;  %v1246_v47 = vsel %vm7859_vm3, %v1084_v29, %v1245_v21  ;;  %v1489_v44 = vshll.u32 %v1289_v24, 16  ;;  %v8276_v11 = vld [vmem:[#allocation2 + $0x7c] sm:$0xf]  ;;  %v1292_v22 = vld [vmem:[#allocation2 + $0x80] sm:$0x1] }
 0x157   : > { %v1476_v2 = vor.u32 %v1475_v33, %v1472_v59  ;;  %1244 = vst.msk [vmem:[#allocation2 + $0xc4] sm:$0xf] %vm609_vm6, %v1083_v38  ;;  %1247 = vst [vmem:[#allocation2 + $0xc8] sm:$0x1] %v1246_v47  ;;  %v1066_v41 = vsel %vm7983_vm13, %v1058_v18, %v1065_v34  ;;  %v1239_v8 = vsel %vm7859_vm3, %v1067_v36, %v1238_v30  ;;  %v1494_v43 = vshrl.u32 %v8245_v9, 16 }
 0x158   : > { %v1486_v42 = vor.u32 %v1485_v39, %v1481_v27  ;;  %1237 = vst.msk [vmem:[#allocation2 + $0xb8] sm:$0xf] %vm609_vm6, %v1066_v41  ;;  %1240 = vst [vmem:[#allocation2 + $0xbc] sm:$0x1] %v1239_v8  ;;  %v1491_v49 = vrot.slane %v1489_v44, 5  ;;  %v1497_v51 = vshll.u32 %v8245_v9, 16 }
 0x159   : > { %v1477_v48 = vrot.slane %v1476_v2, 4  ;;  %v1503_v52 = vshll.u32 %v8247_v32, 16  ;;  %v1496_v53 = vrot.slane %v1494_v43, 4  ;;  %v1507_v5 = vshrl.u32 %v8247_v32, 16  ;;  %v8285_v39 = vld [vmem:[#allocation2 + $0x84] sm:$0xf] }
 0x15a   : > { %v1487_v0 = vrot.slane %v1486_v42, 4  ;;  %v1513_v54 = vshll.u32 %v1290_v40, 16  ;;  %v1499_v58 = vrot.slane %v1497_v51, 5  ;;  %v1518_v60 = vshrl.u32 %v8259_v45, 16  ;;  %v8290_v41 = vld [vmem:[#allocation2 + $0x88] sm:$0xf] }
 0x15b   : > { %v1482_v57 = vsel %vm7918_vm9, %v1477_v48, %v1481_v27  ;;  %v1505_v59 = vrot.slane %v1503_v52, 5  ;;  %v1509_v62 = vrot.slane %v1507_v5, 4  ;;  %v1521_v4 = vshll.u32 %v8259_v45, 16 }
 0x15c   : > { %v1492_v61 = vsel %vm7918_vm9, %v1487_v0, %v1491_v49  ;;  %v1515_v3 = vrot.slane %v1513_v54, 5  ;;  %v1500_v7 = vor.u32 %v1499_v58, %v1496_v53  ;;  %v1520_v10 = vrot.slane %v1518_v60, 4  ;;  %v1293_v0 = vld [vmem:[#allocation2 + $0x8c] sm:$0x1]  ;;  %v8300_v58 = vld [vmem:[#allocation2 + $0x90] sm:$0xf] }
 0x15d   : > { %v6372_v12 = vcombine.low %v1482_v57, %v1492_v61  ;;  %v1527_v17 = vshll.u32 %v8264_v20, 16  ;;  %v1510_v15 = vor.u32 %v1509_v62, %v1505_v59  ;;  %v1523_v18 = vrot.slane %v1521_v4, 5 }
 0x15e   : > { %v1531_v14 = vshrl.u32 %v8264_v20, 16  ;;  %v1537_v21 = vshll.u32 %v1291_v16, 16  ;;  %v1501_v23 = vrot.slane %v1500_v7, 4  ;;  %v1542_v24 = vshrl.u32 %v8267_v56, 16  ;;  %v7624_v38 = vld [vmem:[#allocation2 + $0xc0] sm:$0xff]  }
 0x15f   : > { %7018 = vmatmul.mubr.msk.bf16.gmra.mrb[44].mxu0 %vm1742_vm10, %v6372_v12  ;;  %v1529_v25 = vrot.slane %v1527_v17, 5  ;;  %v1545_v26 = vshll.u32 %v8267_v56, 16  ;;  %v1511_v28 = vrot.slane %v1510_v15, 4  ;;  %v1524_v19 = vor.u32 %v1523_v18, %v1520_v10  ;;  %v7623_v30 = vld [vmem:[#allocation2 + $0xb4] sm:$0xff]  }
 0x160   : > { %v1533_v31 = vrot.slane %v1531_v14, 4  ;;  %v1539_v29 = vrot.slane %v1537_v21, 5  ;;  %v1506_v33 = vsel %vm7918_vm9, %v1501_v23, %v1505_v59  ;;  %v1544_v34 = vrot.slane %v1542_v24, 4  ;;  %7135 = vmatprep.mubr.msk.bf16.mxu1 %vm1742_vm10, %v7623_v30  ;;  %v1294_v14 = vld [vmem:[#allocation2 + $0x98] sm:$0x1] }
 0x161   : > { %v1547_v36 = vrot.slane %v1545_v26, 5  ;;  %v1551_v27 = vshll.u32 %v8276_v11, 16  ;;  %v1516_v47 = vsel %vm7918_vm9, %v1511_v28, %v1515_v3  ;;  %v1525_v2 = vrot.slane %v1524_v19, 4  ;;  %7136 = vmatmul.mubr.msk.bf16.gmra.mrb[16].mxu1 %vm1742_vm10, %v7624_v38  ;;  %v8305_v3 = vld [vmem:[#allocation2 + $0x94] sm:$0xf] }
 0x162   : > { %v1534_v44 = vor.u32 %v1533_v31, %v1529_v25  ;;  %v1555_v40 = vshrl.u32 %v8276_v11, 16  ;;  %v6373_v8 = vcombine.low %v1506_v33, %v1516_v47  ;;  %v1561_v48 = vshll.u32 %v1292_v22, 16  ;;  %v8314_v26 = vld [vmem:[#allocation2 + $0x9c] sm:$0xf]  ;;  %v8318_v30 = vld [vmem:[#allocation2 + $0xa0] sm:$0xf] }
 0x163   : > { %v1548_v42 = vor.u32 %v1547_v36, %v1544_v34  ;;  %v1553_v43 = vrot.slane %v1551_v27, 5  ;;  %v1530_v49 = vsel %vm7918_vm9, %v1525_v2, %v1529_v25  ;;  %v1566_v53 = vshrl.u32 %v8285_v39, 16  ;;  %v8320_v38 = vld [vmem:[#allocation2 + $0xa8] sm:$0xf] }
 0x164   : > { %v1535_v51 = vrot.slane %v1534_v44, 4  ;;  %v1557_v52 = vrot.slane %v1555_v40, 4  ;;  %7021 = vmatprep.mubr.msk.bf16.mxu0 %vm1742_vm10, %v6373_v8  ;;  %v1563_v54 = vrot.slane %v1561_v48, 5  ;;  %v1569_v16 = vshll.u32 %v8285_v39, 16  ;;  %v1295_v40 = vld [vmem:[#allocation2 + $0xa4] sm:$0x1] }
 0x165   : > { %v1549_v5 = vrot.slane %v1548_v42, 4  ;;  %v1575_v57 = vshll.u32 %v8290_v41, 16  ;;  %v1568_v61 = vrot.slane %v1566_v53, 4  ;;  %v1579_v62 = vshrl.u32 %v8290_v41, 16 }
 0x166   : > { %v1540_v59 = vsel %vm7918_vm9, %v1535_v51, %v1539_v29  ;;  %v1558_v60 = vor.u32 %v1557_v52, %v1553_v43  ;;  %v1571_v7 = vrot.slane %v1569_v16, 5  ;;  %v1585_v18 = vshll.u32 %v1293_v0, 16  ;;  %v8328_v51 = vld [vmem:[#allocation2 + $0xac] sm:$0xf] }
 0x167   : > { %v6374_v4 = vcombine.low %v1530_v49, %v1540_v59  ;;  %v1554_v12 = vsel %vm7918_vm9, %v1549_v5, %v1553_v43  ;;  %v1577_v10 = vrot.slane %v1575_v57, 5  ;;  %v1581_v15 = vrot.slane %v1579_v62, 4 }
 0x168   : > { %v1559_v17 = vrot.slane %v1558_v60, 4  ;;  %v1590_v21 = vshrl.u32 %v8300_v58, 16  ;;  %v1572_v22 = vor.u32 %v1571_v7, %v1568_v61  ;;  %v1593_v23 = vshll.u32 %v8300_v58, 16 }
 0x169   : > { %7022 = vmatmul.mubr.msk.bf16.gmra.mrb[48].mxu0 %vm1742_vm10, %v6374_v4  ;;  %v1599_v25 = vshll.u32 %v8305_v3, 16  ;;  %v1603_v24 = vshrl.u32 %v8305_v3, 16  ;;  %v1582_v19 = vor.u32 %v1581_v15, %v1577_v10  ;;  %v1587_v31 = vrot.slane %v1585_v18, 5  ;;  %v3070_v18 = vld [vmem:[#allocation2 + $0xc] sm:$0xf] }
 0x16a   : > { %v1564_v28 = vsel %vm7918_vm9, %v1559_v17, %v1563_v54  ;;  %v1592_v29 = vrot.slane %v1590_v21, 4  ;;  %v1573_v34 = vrot.slane %v1572_v22, 4  ;;  %v1595_v36 = vrot.slane %v1593_v23, 5 }
 0x16b   : > { %v6375_v33 = vcombine.low %v1554_v12, %v1564_v28  ;;  %v1601_v27 = vrot.slane %v1599_v25, 5  ;;  %v1583_v47 = vrot.slane %v1582_v19, 4  ;;  %v1605_v2 = vrot.slane %v1603_v24, 4  ;;  %v8341_v25 = vld [vmem:[#allocation2 + $0x10] sm:$0xf] }
 0x16c   : > { %v1609_v44 = vshll.u32 %v1294_v14, 16  ;;  %v1614_v8 = vshrl.u32 %v8314_v26, 16  ;;  %v1578_v42 = vsel %vm7918_vm9, %v1573_v34, %v1577_v10  ;;  %v1596_v43 = vor.u32 %v1595_v36, %v1592_v29  ;;  %v1296_v10 = vld [vmem:[#allocation2 + $0xb0] sm:$0x1]  ;;  %v8344_v36 = vld [vmem:[#allocation2 + $0x14] sm:$0x1] }
 0x16d   : > { %7025 = vmatprep.mubr.msk.bf16.mxu0 %vm1742_vm10, %v6375_v33  ;;  %v1617_v48 = vshll.u32 %v8314_v26, 16  ;;  %v1623_v49 = vshll.u32 %v8318_v30, 16  ;;  %v1588_v52 = vsel %vm7918_vm9, %v1583_v47, %v1587_v31  ;;  %v1606_v0 = vor.u32 %v1605_v2, %v1601_v27 }
 0x16e   : > { %v1611_v53 = vrot.slane %v1609_v44, 5  ;;  %v1616_v5 = vrot.slane %v1614_v8, 4  ;;  %v6376_v54 = vcombine.low %v1578_v42, %v1588_v52  ;;  %v1597_v16 = vrot.slane %v1596_v43, 4  ;;  %v8350_v8 = vld [vmem:[#allocation2 + $0xb4] sm:$0xf] }
 0x16f   : > { %v1619_v57 = vrot.slane %v1617_v48, 5  ;;  %v1625_v59 = vrot.slane %v1623_v49, 5  ;;  %v1607_v60 = vrot.slane %v1606_v0, 4  ;;  %v1627_v61 = vshrl.u32 %v8318_v30, 16  ;;  %v8352_v52 = vld [vmem:[#allocation2 + $0xb8] sm:$0xf] }
 0x170   : > { %v1633_v62 = vshll.u32 %v1295_v40, 16  ;;  %v1638_v4 = vshrl.u32 %v8320_v38, 16  ;;  %v1602_v12 = vsel %vm7918_vm9, %v1597_v16, %v1601_v27  ;;  %v1641_v17 = vshll.u32 %v8320_v38, 16  ;;  %v3073_v16 = vld [vmem:[#allocation2 + $0x18] sm:$0xf] }
 0x171   : > { %7026 = vmatmul.mubr.msk.bf16.gmra.mrb[52].mxu0 %vm1742_vm10, %v6376_v54  ;;  %v1620_v7 = vor.u32 %v1619_v57, %v1616_v5  ;;  %v1647_v15 = vshll.u32 %v8328_v51, 16  ;;  %v1612_v14 = vsel %vm7918_vm9, %v1607_v60, %v1611_v53  ;;  %v1629_v21 = vrot.slane %v1627_v61, 4 }
 0x172   : > { %v1635_v22 = vrot.slane %v1633_v62, 5  ;;  %v1640_v23 = vrot.slane %v1638_v4, 4  ;;  %v6377_v24 = vcombine.low %v1602_v12, %v1612_v14  ;;  %v1643_v19 = vrot.slane %v1641_v17, 5 }
 0x173   : > { %v1621_v28 = vrot.slane %v1620_v7, 4  ;;  %v1649_v31 = vrot.slane %v1647_v15, 5  ;;  %v1630_v29 = vor.u32 %v1629_v21, %v1625_v59  ;;  %v1651_v33 = vshrl.u32 %v8328_v51, 16  ;;  %v8362_v21 = vld [vmem:[#allocation2 + $0x1c] sm:$0xf] }
 0x174   : > { %v1657_v34 = vshll.u32 %v1296_v10, 16  ;;  %v3119_v27 = vshrl.u32 %v3070_v18, 16  ;;  %7029 = vmatprep.mubr.msk.bf16.mxu0 %vm1742_vm10, %v6377_v24  ;;  %v1644_v2 = vor.u32 %v1643_v19, %v1640_v23  ;;  %v3122_v44 = vshll.u32 %v3070_v18, 16  ;;  %v1297_v10 = vld [vmem:[#allocation2 + $0xbc] sm:$0x1] }
 0x175   : > { %v1626_v47 = vsel %vm7918_vm9, %v1621_v28, %v1625_v59  ;;  %v3128_v40 = vshll.u32 %v8341_v25, 16  ;;  %v1631_v42 = vrot.slane %v1630_v29, 4  ;;  %v1653_v43 = vrot.slane %v1651_v33, 4  ;;  %v8369_v33 = vld [vmem:[#allocation2 + $0x20] sm:$0x1] }
 0x176   : > { %v1659_v48 = vrot.slane %v1657_v34, 5  ;;  %v3121_v49 = vrot.slane %v3119_v27, 4  ;;  %v1645_v0 = vrot.slane %v1644_v2, 4  ;;  %v3124_v53 = vrot.slane %v3122_v44, 5 }
 0x177   : > { %v3130_v5 = vrot.slane %v3128_v40, 5  ;;  %v3132_v54 = vshrl.u32 %v8341_v25, 16  ;;  %v1636_v57 = vsel %vm7918_vm9, %v1631_v42, %v1635_v22  ;;  %v1654_v59 = vor.u32 %v1653_v43, %v1649_v31  ;;  %v3076_v40 = vld [vmem:[#allocation2 + $0x24] sm:$0xf] }
 0x178   : > { %v3138_v60 = vshll.u32 %v8344_v36, 16  ;;  %v1662_v61 = vshrl.u32 %v8350_v8, 16  ;;  %v6378_v62 = vcombine.low %v1626_v47, %v1636_v57  ;;  %v1650_v4 = vsel %vm7918_vm9, %v1645_v0, %v1649_v31 }
 0x179   : > { %v3125_v12 = vor.u32 %v3124_v53, %v3121_v49  ;;  %v3134_v7 = vrot.slane %v3132_v54, 4  ;;  %v1655_v17 = vrot.slane %v1654_v59, 4  ;;  %v1665_v14 = vshll.u32 %v8350_v8, 16  ;;  %v8373_v53 = vld [vmem:[#allocation2 + $0x28] sm:$0xf] }
 0x17a   : > { %v3140_v15 = vrot.slane %v3138_v60, 5  ;;  %v1664_v18 = vrot.slane %v1662_v61, 4  ;;  %7030 = vmatmul.mubr.msk.bf16.gmra.mrb[56].mxu0 %vm1742_vm10, %v6378_v62  ;;  %v1671_v24 = vshll.u32 %v8352_v52, 16  ;;  %v1675_v28 = vshrl.u32 %v8352_v52, 16 }
 0x17b   : > { %v3126_v22 = vrot.slane %v3125_v12, 4  ;;  %v3135_v23 = vor.u32 %v3134_v7, %v3130_v5  ;;  %v1660_v19 = vsel %vm7918_vm9, %v1655_v17, %v1659_v48  ;;  %v1667_v31 = vrot.slane %v1665_v14, 5 }
 0x17c   : > { %v1681_v29 = vshll.u32 %v1297_v10, 16  ;;  %v3143_v34 = vshrl.u32 %v3073_v16, 16  ;;  %v6379_v27 = vcombine.low %v1650_v4, %v1660_v19  ;;  %v1673_v44 = vrot.slane %v1671_v24, 5  ;;  %v8381_v10 = vld [vmem:[#allocation2 + $0x2c] sm:$0x1] }
 0x17d   : > { %v3131_v47 = vsel %vm7918_vm9, %v3126_v22, %v3130_v5  ;;  %v3136_v2 = vrot.slane %v3135_v23, 4  ;;  %v1668_v42 = vor.u32 %v1667_v31, %v1664_v18  ;;  %v1677_v43 = vrot.slane %v1675_v28, 4  ;;  %v3079_v22 = vld [vmem:[#allocation2 + $0x30] sm:$0xf] }
 0x17e   : > { %v1683_v49 = vrot.slane %v1681_v29, 5  ;;  %v3145_v0 = vrot.slane %v3143_v34, 4  ;;  %7033 = vmatprep.mubr.msk.bf16.mxu0 %vm1742_vm10, %v6379_v27  ;;  %v3146_v54 = vshll.u32 %v3073_v16, 16  ;;  %v3152_v57 = vshll.u32 %v8362_v21, 16 }
 0x17f   : > { %v3141_v48 = vsel %vm7918_vm9, %v3136_v2, %v3140_v15  ;;  %v3156_v59 = vshrl.u32 %v8362_v21, 16  ;;  %v1669_v60 = vrot.slane %v1668_v42, 4  ;;  %v1678_v61 = vor.u32 %v1677_v43, %v1673_v44 }
 0x180   : > { %v6519_v5 = vcombine.low %v3131_v47, %v3141_v48  ;;  %v3162_v62 = vshll.u32 %v8369_v33, 16  ;;  %v3148_v4 = vrot.slane %v3146_v54, 5  ;;  %v3154_v12 = vrot.slane %v3152_v57, 5  ;;  %v8391_v54 = vld [vmem:[#allocation2 + $0x4] sm:$0xf] }
 0x181   : > { %v3158_v7 = vrot.slane %v3156_v59, 4  ;;  %v3167_v17 = vshrl.u32 %v3076_v40, 16  ;;  %v1674_v16 = vsel %vm7918_vm9, %v1669_v60, %v1673_v44  ;;  %v1679_v15 = vrot.slane %v1678_v61, 4  ;;  %v8394_v59 = vld [vmem:[#allocation2 + $0x34] sm:$0xf] }
 0x182   : > { %7141 = vmatprep.mubr.msk.bf16.mxu1 %vm1742_vm10, %v6519_v5  ;;  %v3164_v18 = vrot.slane %v3162_v62, 5  ;;  %v3170_v14 = vshll.u32 %v3076_v40, 16  ;;  %v3149_v23 = vor.u32 %v3148_v4, %v3145_v0  ;;  %v3176_v19 = vshll.u32 %v8373_v53, 16  ;;  %v7664_v0 = vld [vmem:[#allocation2] sm:$0xf] }
 0x183   : > { %v3159_v24 = vor.u32 %v3158_v7, %v3154_v12  ;;  %v3169_v28 = vrot.slane %v3167_v17, 4  ;;  %v1684_v31 = vsel %vm7918_vm9, %v1679_v15, %v1683_v49  ;;  %v3180_v34 = vshrl.u32 %v8373_v53, 16  ;;  %v8396_v49 = vld [vmem:[#allocation2 + $0x38] sm:$0x1]  ;;  %v7666_v61 = vld [vmem:[#allocation2 + $0xc] sm:$0xf] }
 0x184   : > { %v3172_v29 = vrot.slane %v3170_v14, 5  ;;  %v3186_v27 = vshll.u32 %v8381_v10, 16  ;;  %v6380_v47 = vcombine.low %v1674_v16, %v1684_v31  ;;  %v3150_v2 = vrot.slane %v3149_v23, 4  ;;  %v8403_v62 = vld [vmem:[#allocation2 + $0x10] sm:$0xf] }
 0x185   : > { %v3160_v44 = vrot.slane %v3159_v24, 4  ;;  %v3178_v42 = vrot.slane %v3176_v19, 5  ;;  %v3182_v40 = vrot.slane %v3180_v34, 4  ;;  %v6398_v57 = vcombine.low %v7664_v0, %v8391_v54  ;;  %v3082_v23 = vld [vmem:[#allocation2 + $0x3c] sm:$0xf] }
 0x186   : > { %v3173_v43 = vor.u32 %v3172_v29, %v3169_v28  ;;  %v3188_v48 = vrot.slane %v3186_v27, 5  ;;  %7034 = vmatmul.mubr.msk.bf16.gmra.mrb[60].mxu0 %vm1742_vm10, %v6380_v47  ;;  %v3155_v5 = vsel %vm7918_vm9, %v3150_v2, %v3154_v12  ;;  %v6399_v4 = vcombine.low %v7666_v61, %v8403_v62  ;;  %v8410_v12 = vld [vmem:[%s9709_s3 + $0x30] sm:$0xff]   ;;  %v8415_v31 = vld [vmem:[#allocation2 + $0x40] sm:$0xf]  ;;  %v7668_v27 = vld [vmem:[#allocation2 + $0x18] sm:$0xf] }
 0x187   : > { %v3165_v60 = vsel %vm7918_vm9, %v3160_v44, %v3164_v18  ;;  %v3191_v7 = vshrl.u32 %v3079_v22, 16  ;;  %v3183_v15 = vor.u32 %v3182_v40, %v3178_v42  ;;  %7039 = vmatprep.mubr.msk.bf16.mxu0 %vm1742_vm10, %v6398_v57  ;;  %v3194_v14 = vshll.u32 %v3079_v22, 16  ;;  %v8420_v47 = vld [vmem:[#allocation2 + $0x1c] sm:$0xf]  ;;  %v7670_v44 = vld [vmem:[%s9709_s3 + $0x28] sm:$0xff]  }
 0x188   : > { %v6520_v17 = vcombine.low %v3155_v5, %v3165_v60  ;;  %v3174_v16 = vrot.slane %v3173_v43, 4  ;;  %v3200_v18 = vshll.u32 %v8394_v59, 16  ;;  %v3204_v28 = vshrl.u32 %v8394_v59, 16  ;;  %v8426_v57 = vld [vmem:[#allocation2 + $0x44] sm:$0x1] }
 0x189   : > { %v3193_v24 = vrot.slane %v3191_v7, 4  ;;  %v3210_v19 = vshll.u32 %v8396_v49, 16  ;;  %v3184_v29 = vrot.slane %v3183_v15, 4  ;;  %v3196_v34 = vrot.slane %v3194_v14, 5 }
 0x18a   : > { %7142 = vmatmul.mubr.msk.bf16.vlgmr.msra.gmra.mrb[20].mxu1 %vm1742_vm10, %v6520_v17  ;;  %v3179_v22 = vsel %vm7918_vm9, %v3174_v16, %v3178_v42  ;;  %v6400_v2 = vcombine.low %v7668_v27, %v8420_v47  ;;  %v3202_v43 = vrot.slane %v3200_v18, 5  ;;  %v3206_v40 = vrot.slane %v3204_v28, 4  ;;  %v3085_v17 = vld [vmem:[#allocation2 + $0x48] sm:$0xf] }
 0x18b   : > { %7174 = vmatpush3.bf16.msra.mxu1 %v7670_v44  ;;  %v3212_v0 = vrot.slane %v3210_v19, 5  ;;  %v3215_v5 = vshrl.u32 %v3082_v23, 16  ;;  %v3189_v42 = vsel %vm7918_vm9, %v3184_v29, %v3188_v48  ;;  %v3197_v60 = vor.u32 %v3196_v34, %v3193_v24  ;;  %v7671_v24 = vld [vmem:[#allocation2 + $0x24] sm:$0xf]  ;;  %v8438_v29 = vld [vmem:[#allocation2 + $0x28] sm:$0xf] }
 0x18c   : > { %v3218_v61 = vshll.u32 %v3082_v23, 16  ;;  %v3224_v7 = vshll.u32 %v8415_v31, 16  ;;  %7207 = vmatprep.subr.bf16.mxu1 %v8410_v12  ;;  %v6521_v16 = vcombine.low %v3179_v22, %v3189_v42  ;;  %v3207_v15 = vor.u32 %v3206_v40, %v3202_v43 }
 0x18d   : > { %v3217_v14 = vrot.slane %v3215_v5, 4  ;;  %v3228_v18 = vshrl.u32 %v8415_v31, 16  ;;  %v3198_v28 = vrot.slane %v3197_v60, 4  ;;  %v3234_v44 = vshll.u32 %v8426_v57, 16  ;;  %v8444_v60 = vld [vmem:[#allocation2 + $0x50] sm:$0x1] }
 0x18e   : > { %v3220_v19 = vrot.slane %v3218_v61, 5  ;;  %v3226_v27 = vrot.slane %v3224_v7, 5  ;;  %7145 = vmatprep.mubr.msk.bf16.mxu1 %vm1742_vm10, %v6521_v16  ;;  %7040 = vmatmul.mubr.msk.bf16.vlgmr.msra.gmra.mrb[32].mxu0 %vm1742_vm10, %v6399_v4  ;;  %v3208_v48 = vrot.slane %v3207_v15, 4  ;;  %v6401_v22 = vcombine.low %v7671_v24, %v8438_v29  ;;  %9749 = vst [vmem:[#allocation6_spill] sm:$0xff] %v8444_v60 }
 0x18f   : > { %v3230_v23 = vrot.slane %v3228_v18, 4  ;;  %v3239_v34 = vshrl.u32 %v3085_v17, 16  ;;  %v3203_v40 = vsel %vm7918_vm9, %v3198_v28, %v3202_v43  ;;  %7043 = vmatprep.mubr.msk.bf16.mxu0 %vm1742_vm10, %v6400_v2  ;;  %v3236_v42 = vrot.slane %v3234_v44, 5  ;;  %7072 = vmatpush3.bf16.msra.mxu0 %v8234_v13  ;;  %v3088_v18 = vld [vmem:[#allocation2 + $0x54] sm:$0xf]  ;;  %v8453_v43 = vld [vmem:[%s9709_s3 + $0x18] sm:$0xff]  }
 0x190   : > { %v3221_v5 = vor.u32 %v3220_v19, %v3217_v14  ;;  %v3242_v61 = vshll.u32 %v3085_v17, 16  ;;  %v3213_v4 = vsel %vm7918_vm9, %v3208_v48, %v3212_v0  ;;  %v3248_v15 = vshll.u32 %v8434_v55, 16  ;;  %9750 = vst [vmem:[#allocation7_spill] sm:$0xff] %v8453_v43  ;;  %7105 = vmatprep.subr.bf16.mxu0 %v8453_v43  ;;  %v8457_v28 = vld [vmem:[#allocation2 + $0x58] sm:$0xf] }
 0x191   : > { %v3231_v7 = vor.u32 %v3230_v23, %v3226_v27  ;;  %v3241_v16 = vrot.slane %v3239_v34, 4  ;;  %v6522_v2 = vcombine.low %v3203_v40, %v3213_v4  ;;  %v3252_v13 = vshrl.u32 %v8434_v55, 16  ;;  %v7674_v48 = vld [vmem:[#allocation2 + $0x30] sm:$0xf]  ;;  %v8460_v23 = vld [vmem:[#allocation2 + $0x34] sm:$0xf] }
 0x192   : > { %v3222_v14 = vrot.slane %v3221_v5, 4  ;;  %v3244_v17 = vrot.slane %v3242_v61, 5  ;;  %v3250_v19 = vrot.slane %v3248_v15, 5  ;;  %v3258_v44 = vshll.u32 %v8444_v60, 16  ;;  %9751 = vst [vmem:[#allocation8_spill] sm:$0xff] %v8460_v23 }
 0x193   : > { %v3232_v0 = vrot.slane %v3231_v7, 4  ;;  %v6402_v24 = vcombine.low %v7674_v48, %v8460_v23  ;;  %7146 = vmatmul.mubr.msk.bf16.gmra.mrb[24].mxu1 %vm1742_vm10, %v6522_v2  ;;  %v3254_v5 = vrot.slane %v3252_v13, 4  ;;  %v8466_v61 = vld [vmem:[#allocation2 + $0x5c] sm:$0x1]  ;;  %v3263_v4 = vshrl.u32 %v3088_v18, 16 }
 0x194   : > { %v3227_v34 = vsel %vm7918_vm9, %v3222_v14, %v3226_v27  ;;  %v3245_v40 = vor.u32 %v3244_v17, %v3241_v16  ;;  %9752 = vst [vmem:[#allocation9_spill] sm:$0xff] %v8466_v61  ;;  %v3260_v15 = vrot.slane %v3258_v44, 5  ;;  %v3266_v50 = vshll.u32 %v3088_v18, 16  ;;  %v3091_v43 = vld [vmem:[#allocation2 + $0x60] sm:$0xf] }
 0x195   : > { %v3237_v7 = vsel %vm7918_vm9, %v3232_v0, %v3236_v42  ;;  %v3272_v60 = vshll.u32 %v8457_v28, 16  ;;  %v3255_v23 = vor.u32 %v3254_v5, %v3250_v19  ;;  %v3265_v2 = vrot.slane %v3263_v4, 4  ;;  %v8474_v13 = vld [vmem:[#allocation2 + $0x64] sm:$0xf]  ;;  %v7676_v0 = vld [vmem:[#allocation2 + $0x3c] sm:$0xf] }
 0x196   : > { %v6523_v55 = vcombine.low %v3227_v34, %v3237_v7  ;;  %v3246_v48 = vrot.slane %v3245_v40, 4  ;;  %7044 = vmatmul.mubr.msk.bf16.gmra.mrb[36].mxu0 %vm1742_vm10, %v6401_v22  ;;  %v3268_v27 = vrot.slane %v3266_v50, 5  ;;  %v3276_v14 = vshrl.u32 %v8457_v28, 16  ;;  %v8481_v40 = vld [vmem:[#allocation2 + $0x68] sm:$0x1] }
 0x197   : > { %v3274_v16 = vrot.slane %v3272_v60, 5  ;;  %v3282_v17 = vshll.u32 %v8466_v61, 16  ;;  %v3256_v18 = vrot.slane %v3255_v23, 4  ;;  %7047 = vmatprep.mubr.msk.bf16.mxu0 %vm1742_vm10, %v6402_v24  ;;  %v6403_v44 = vcombine.low %v7676_v0, %v8179_v37  ;;  %v3094_v23 = vld [vmem:[#allocation2 + $0x6c] sm:$0xf] }
 0x198   : > { %7149 = vmatprep.mubr.msk.bf16.mxu1 %vm1742_vm10, %v6523_v55  ;;  %v3251_v42 = vsel %vm7918_vm9, %v3246_v48, %v3250_v19  ;;  %v3287_v22 = vshrl.u32 %v3091_v43, 16  ;;  %v3269_v50 = vor.u32 %v3268_v27, %v3265_v2  ;;  %v3278_v60 = vrot.slane %v3276_v14, 4  ;;  %v8487_v0 = vld [vmem:[#allocation2 + $0x70] sm:$0xf] }
 0x199   : > { %v3284_v34 = vrot.slane %v3282_v17, 5  ;;  %v3290_v5 = vshll.u32 %v3091_v43, 16  ;;  %v3261_v4 = vsel %vm7918_vm9, %v3256_v18, %v3260_v15  ;;  %v3296_v7 = vshll.u32 %v8474_v13, 16 }
 0x19a   : > { %v3289_v55 = vrot.slane %v3287_v22, 4  ;;  %v3300_v19 = vshrl.u32 %v8474_v13, 16  ;;  %v6524_v24 = vcombine.low %v3251_v42, %v3261_v4  ;;  %v3270_v48 = vrot.slane %v3269_v50, 4 }
 0x19b   : > { %v3279_v61 = vor.u32 %v3278_v60, %v3274_v16  ;;  %v3292_v37 = vrot.slane %v3290_v5, 5  ;;  %v3298_v2 = vrot.slane %v3296_v7, 5  ;;  %v3306_v14 = vshll.u32 %v8481_v40, 16  ;;  %v8495_v60 = vld [vmem:[#allocation2 + $0x74] sm:$0x1] }
 0x19c   : > { %v3302_v27 = vrot.slane %v3300_v19, 4  ;;  %v6404_v43 = vcombine.low %v8190_v63, %v8192_v1  ;;  %7150 = vmatmul.mubr.msk.bf16.gmra.mrb[28].mxu1 %vm1742_vm10, %v6524_v24  ;;  %v3275_v15 = vsel %vm7918_vm9, %v3270_v48, %v3274_v16  ;;  %v3311_v42 = vshrl.u32 %v3094_v23, 16  ;;  %v3097_v16 = vld [vmem:[#allocation2 + $0x78] sm:$0xf] }
 0x19d   : > { %v3280_v17 = vrot.slane %v3279_v61, 4  ;;  %v3293_v18 = vor.u32 %v3292_v37, %v3289_v55  ;;  %v3308_v50 = vrot.slane %v3306_v14, 5  ;;  %v3314_v5 = vshll.u32 %v3094_v23, 16  ;;  %v8503_v37 = vld [vmem:[#allocation2 + $0x7c] sm:$0xf] }
 0x19e   : > { %v3303_v22 = vor.u32 %v3302_v27, %v3298_v2  ;;  %v3320_v4 = vshll.u32 %v8487_v0, 16  ;;  %7048 = vmatmul.mubr.msk.bf16.gmra.mrb[40].mxu0 %vm1742_vm10, %v6403_v44  ;;  %v3313_v1 = vrot.slane %v3311_v42, 4  ;;  %v3324_v19 = vshrl.u32 %v8487_v0, 16 }
 0x19f   : > { %v3285_v7 = vsel %vm7918_vm9, %v3280_v17, %v3284_v34  ;;  %v3294_v63 = vrot.slane %v3293_v18, 4  ;;  %7051 = vmatprep.mubr.msk.bf16.mxu0 %vm1742_vm10, %v6404_v43  ;;  %v3316_v24 = vrot.slane %v3314_v5, 5  ;;  %v3330_v34 = vshll.u32 %v8495_v60, 16  ;;  %v8513_v43 = vld [vmem:[#allocation2 + $0x80] sm:$0x1] }
 0x1a0   : > { %v6525_v61 = vcombine.low %v3275_v15, %v3285_v7  ;;  %v3304_v55 = vrot.slane %v3303_v22, 4  ;;  %v3322_v48 = vrot.slane %v3320_v4, 5  ;;  %v3326_v27 = vrot.slane %v3324_v19, 4  ;;  %v3100_v4 = vld [vmem:[#allocation2 + $0x84] sm:$0xf] }
 0x1a1   : > { %v3299_v23 = vsel %vm7918_vm9, %v3294_v63, %v3298_v2  ;;  %v6405_v44 = vcombine.low %v8215_v35, %v8227_v6  ;;  %v3317_v15 = vor.u32 %v3316_v24, %v3313_v1  ;;  %v3335_v17 = vshrl.u32 %v3097_v16, 16  ;;  %v8517_v6 = vld [vmem:[#allocation2 + $0x88] sm:$0xf] }
 0x1a2   : > { %7153 = vmatprep.mubr.msk.bf16.mxu1 %vm1742_vm10, %v6525_v61  ;;  %v3309_v14 = vsel %vm7918_vm9, %v3304_v55, %v3308_v50  ;;  %v3338_v18 = vshll.u32 %v3097_v16, 16  ;;  %v3327_v22 = vor.u32 %v3326_v27, %v3322_v48  ;;  %v3332_v5 = vrot.slane %v3330_v34, 5  ;;  %v8525_v27 = vld [vmem:[#allocation2 + $0x8c] sm:$0x1] }
 0x1a3   : > { %v6526_v42 = vcombine.low %v3299_v23, %v3309_v14  ;;  %v3344_v2 = vshll.u32 %v8503_v37, 16  ;;  %v3318_v7 = vrot.slane %v3317_v15, 4  ;;  %v3337_v63 = vrot.slane %v3335_v17, 4 }
 0x1a4   : > { %v3340_v19 = vrot.slane %v3338_v18, 5  ;;  %v3348_v35 = vshrl.u32 %v8503_v37, 16  ;;  %v3328_v50 = vrot.slane %v3327_v22, 4  ;;  %v3354_v61 = vshll.u32 %v8513_v43, 16 }
 0x1a5   : > { %7154 = vmatmul.mubr.msk.bf16.gmra.mrb[0].mxu1 %vm1742_vm10, %v6526_v42  ;;  %v3346_v1 = vrot.slane %v3344_v2, 5  ;;  %v6406_v16 = vcombine.low %v8245_v9, %v8247_v32  ;;  %v3323_v55 = vsel %vm7918_vm9, %v3318_v7, %v3322_v48  ;;  %v3359_v34 = vshrl.u32 %v3100_v4, 16  ;;  %v3103_v42 = vld [vmem:[#allocation2 + $0x90] sm:$0xf] }
 0x1a6   : > { %v3341_v24 = vor.u32 %v3340_v19, %v3337_v63  ;;  %v3350_v23 = vrot.slane %v3348_v35, 4  ;;  %v3333_v14 = vsel %vm7918_vm9, %v3328_v50, %v3332_v5  ;;  %7052 = vmatmul.mubr.msk.bf16.gmra.mrb[44].mxu0 %vm1742_vm10, %v6405_v44  ;;  %v3356_v15 = vrot.slane %v3354_v61, 5  ;;  %v8534_v5 = vld [vmem:[#allocation2 + $0x94] sm:$0xf] }
 0x1a7   : > { %v3362_v17 = vshll.u32 %v3100_v4, 16  ;;  %v3368_v18 = vshll.u32 %v8517_v6, 16  ;;  %v6527_v22 = vcombine.low %v3323_v55, %v3333_v14  ;;  %7055 = vmatprep.mubr.msk.bf16.mxu0 %vm1742_vm10, %v6406_v16  ;;  %v3361_v48 = vrot.slane %v3359_v34, 4 }
 0x1a8   : > { %v3342_v9 = vrot.slane %v3341_v24, 4  ;;  %v3351_v32 = vor.u32 %v3350_v23, %v3346_v1  ;;  %v3372_v63 = vshrl.u32 %v8517_v6, 16  ;;  %v3378_v19 = vshll.u32 %v8525_v27, 16  ;;  %v8541_v24 = vld [vmem:[#allocation2 + $0x98] sm:$0x1] }
 0x1a9   : > { %v3364_v2 = vrot.slane %v3362_v17, 5  ;;  %v3370_v7 = vrot.slane %v3368_v18, 5  ;;  %7157 = vmatprep.mubr.msk.bf16.mxu1 %vm1742_vm10, %v6527_v22  ;;  %v6407_v35 = vcombine.low %v8259_v45, %v8264_v20  ;;  %v3383_v50 = vshrl.u32 %v3103_v42, 16  ;;  %v8547_v20 = vld [vmem:[#allocation2 + $0xa0] sm:$0xf] }
 0x1aa   : > { %v3347_v44 = vsel %vm7918_vm9, %v3342_v9, %v3346_v1  ;;  %v3352_v4 = vrot.slane %v3351_v32, 4  ;;  %v3374_v16 = vrot.slane %v3372_v63, 4  ;;  %v3380_v55 = vrot.slane %v3378_v19, 5  ;;  %v3106_v1 = vld [vmem:[#allocation2 + $0x9c] sm:$0xf] }
 0x1ab   : > { %v3365_v61 = vor.u32 %v3364_v2, %v3361_v48  ;;  %v3386_v23 = vshll.u32 %v3103_v42, 16  ;;  %v3385_v14 = vrot.slane %v3383_v50, 4  ;;  %v3392_v17 = vshll.u32 %v8534_v5, 16 }
 0x1ac   : > { %v3357_v34 = vsel %vm7918_vm9, %v3352_v4, %v3356_v15  ;;  %v3396_v18 = vshrl.u32 %v8534_v5, 16  ;;  %v3375_v32 = vor.u32 %v3374_v16, %v3370_v7  ;;  %v3402_v63 = vshll.u32 %v8541_v24, 16  ;;  %v8557_v16 = vld [vmem:[#allocation2 + $0xa4] sm:$0x1] }
 0x1ad   : > { %v6528_v22 = vcombine.low %v3347_v44, %v3357_v34  ;;  %v3366_v9 = vrot.slane %v3365_v61, 4  ;;  %v3388_v45 = vrot.slane %v3386_v23, 5  ;;  %v3394_v48 = vrot.slane %v3392_v17, 5 }
 0x1ae   : > { %v3398_v2 = vrot.slane %v3396_v18, 4  ;;  %v6408_v42 = vcombine.low %v8267_v56, %v8276_v11  ;;  %v3376_v19 = vrot.slane %v3375_v32, 4  ;;  %7056 = vmatmul.mubr.msk.bf16.gmra.mrb[48].mxu0 %vm1742_vm10, %v6407_v35  ;;  %v3407_v4 = vshrl.u32 %v3106_v1, 16  ;;  %v3109_v18 = vld [vmem:[#allocation2 + $0xa8] sm:$0xf] }
 0x1af   : > { %7158 = vmatmul.mubr.msk.bf16.gmra.mrb[4].mxu1 %vm1742_vm10, %v6528_v22  ;;  %v3371_v15 = vsel %vm7918_vm9, %v3366_v9, %v3370_v7  ;;  %v3389_v44 = vor.u32 %v3388_v45, %v3385_v14  ;;  %v3404_v61 = vrot.slane %v3402_v63, 5  ;;  %v3410_v23 = vshll.u32 %v3106_v1, 16  ;;  %v8563_v32 = vld [vmem:[#allocation2 + $0xac] sm:$0xf] }
 0x1b0   : > { %v3399_v50 = vor.u32 %v3398_v2, %v3394_v48  ;;  %7059 = vmatprep.mubr.msk.bf16.mxu0 %vm1742_vm10, %v6408_v42  ;;  %v3416_v34 = vshll.u32 %v8547_v20, 16  ;;  %v3381_v56 = vsel %vm7918_vm9, %v3376_v19, %v3380_v55  ;;  %v3409_v17 = vrot.slane %v3407_v4, 4 }
 0x1b1   : > { %v3390_v11 = vrot.slane %v3389_v44, 4  ;;  %v3420_v7 = vshrl.u32 %v8547_v20, 16  ;;  %v6529_v35 = vcombine.low %v3371_v15, %v3381_v56  ;;  %v3412_v22 = vrot.slane %v3410_v23, 5  ;;  %v8573_v15 = vld [vmem:[#allocation2 + $0xb0] sm:$0x1] }
 0x1b2   : > { %v3400_v14 = vrot.slane %v3399_v50, 4  ;;  %v3418_v9 = vrot.slane %v3416_v34, 5  ;;  %v3426_v2 = vshll.u32 %v8557_v16, 16  ;;  %v6409_v55 = vcombine.low %v8285_v39, %v8290_v41  ;;  %v3112_v34 = vld [vmem:[#allocation2 + $0xb4] sm:$0xf] }
 0x1b3   : > { %v3395_v45 = vsel %vm7918_vm9, %v3390_v11, %v3394_v48  ;;  %v3422_v1 = vrot.slane %v3420_v7, 4  ;;  %7161 = vmatprep.mubr.msk.bf16.mxu1 %vm1742_vm10, %v6529_v35  ;;  %v3413_v42 = vor.u32 %v3412_v22, %v3409_v17  ;;  %v3431_v19 = vshrl.u32 %v3109_v18, 16  ;;  %v8577_v41 = vld [vmem:[#allocation2 + $0xb8] sm:$0xf] }
 0x1b4   : > { %v3405_v63 = vsel %vm7918_vm9, %v3400_v14, %v3404_v61  ;;  %v3434_v44 = vshll.u32 %v3109_v18, 16  ;;  %v3428_v23 = vrot.slane %v3426_v2, 5  ;;  %v3440_v48 = vshll.u32 %v8563_v32, 16 }
 0x1b5   : > { %v6530_v4 = vcombine.low %v3395_v45, %v3405_v63  ;;  %v3423_v50 = vor.u32 %v3422_v1, %v3418_v9  ;;  %v3414_v56 = vrot.slane %v3413_v42, 4  ;;  %v3433_v11 = vrot.slane %v3431_v19, 4  ;;  %v8589_v63 = vld [vmem:[#allocation2 + $0xbc] sm:$0x1]  ;;  %v3115_v19 = vld [vmem:[#allocation2 + $0xc0] sm:$0xf] }
 0x1b6   : > { %v3436_v7 = vrot.slane %v3434_v44, 5  ;;  %v3444_v39 = vshrl.u32 %v8563_v32, 16  ;;  %7060 = vmatmul.mubr.msk.bf16.gmra.mrb[52].mxu0 %vm1742_vm10, %v6409_v55  ;;  %v3442_v17 = vrot.slane %v3440_v48, 5  ;;  %v3450_v18 = vshll.u32 %v8573_v15, 16 }
 0x1b7   : > { %7162 = vmatmul.mubr.msk.bf16.gmra.mrb[8].mxu1 %vm1742_vm10, %v6530_v4  ;;  %v3424_v61 = vrot.slane %v3423_v50, 4  ;;  %v6410_v35 = vcombine.low %v8300_v58, %v8305_v3  ;;  %v3455_v45 = vshrl.u32 %v3112_v34, 16  ;;  %v3419_v1 = vsel %vm7918_vm9, %v3414_v56, %v3418_v9  ;;  %v8593_v56 = vld [vmem:[#allocation2 + $0xc4] sm:$0xf] }
 0x1b8   : > { %v3437_v14 = vor.u32 %v3436_v7, %v3433_v11  ;;  %v3446_v22 = vrot.slane %v3444_v39, 4  ;;  %v3458_v55 = vshll.u32 %v3112_v34, 16  ;;  %v3464_v42 = vshll.u32 %v8577_v41, 16 }
 0x1b9   : > { %v3429_v2 = vsel %vm7918_vm9, %v3424_v61, %v3428_v23  ;;  %7063 = vmatprep.mubr.msk.bf16.mxu0 %vm1742_vm10, %v6410_v35  ;;  %v3457_v3 = vrot.slane %v3455_v45, 4  ;;  %v3452_v50 = vrot.slane %v3450_v18, 5  ;;  %v3468_v9 = vshrl.u32 %v8577_v41, 16 }
 0x1ba   : > { %v6531_v44 = vcombine.low %v3419_v1, %v3429_v2  ;;  %v3438_v4 = vrot.slane %v3437_v14, 4  ;;  %v3447_v58 = vor.u32 %v3446_v22, %v3442_v17  ;;  %v3460_v48 = vrot.slane %v3458_v55, 5  ;;  %v8601_v14 = vld [vmem:[#allocation2 + $0xc8] sm:$0x1] }
 0x1bb   : > { %v3466_v11 = vrot.slane %v3464_v42, 5  ;;  %v3474_v7 = vshll.u32 %v8589_v63, 16  ;;  %v3479_v39 = vshrl.u32 %v3115_v19, 16  ;;  %v3470_v35 = vrot.slane %v3468_v9, 4  ;;  %v3800_v9 = vld [vmem:[#allocation2 + $0xc] sm:$0xe] }
 0x1bc   : > { %7165 = vmatprep.mubr.msk.bf16.mxu1 %vm1742_vm10, %v6531_v44  ;;  %v3443_v23 = vsel %vm7918_vm9, %v3438_v4, %v3442_v17  ;;  %v3448_v34 = vrot.slane %v3447_v58, 4  ;;  %v3461_v61 = vor.u32 %v3460_v48, %v3457_v3  ;;  %v6411_v18 = vcombine.low %v8314_v26, %v8318_v30 }
 0x1bd   : > { %v3482_v22 = vshll.u32 %v3115_v19, 16  ;;  %v3481_v1 = vrot.slane %v3479_v39, 4  ;;  %v3488_v2 = vshll.u32 %v8593_v56, 16  ;;  %v3492_v17 = vshrl.u32 %v8593_v56, 16 }
 0x1be   : > { %v3453_v45 = vsel %vm7918_vm9, %v3448_v34, %v3452_v50  ;;  %v3462_v42 = vrot.slane %v3461_v61, 4  ;;  %v3471_v44 = vor.u32 %v3470_v35, %v3466_v11  ;;  %7064 = vmatmul.mubr.msk.bf16.gmra.mrb[56].mxu0 %vm1742_vm10, %v6411_v18  ;;  %v3498_v26 = vshll.u32 %v8601_v14, 16 }
 0x1bf   : > { %v6532_v55 = vcombine.low %v3443_v23, %v3453_v45  ;;  %v3484_v4 = vrot.slane %v3482_v22, 5  ;;  %v3490_v58 = vrot.slane %v3488_v2, 5  ;;  %v3494_v3 = vrot.slane %v3492_v17, 4  ;;  %v3801_v45 = vld [vmem:[#allocation2 + $0x18] sm:$0xe] }
 0x1c0   : > { %v6412_v30 = vcombine.low %v8320_v38, %v8328_v51  ;;  %v3472_v19 = vrot.slane %v3471_v44, 4  ;;  %v3476_v50 = vrot.slane %v3474_v7, 5  ;;  %v3467_v34 = vsel %vm7918_vm9, %v3462_v42, %v3466_v11 }
 0x1c1   : > { %7166 = vmatmul.mubr.msk.bf16.gmra.mrb[12].mxu1 %vm1742_vm10, %v6532_v55  ;;  %v3485_v48 = vor.u32 %v3484_v4, %v3481_v1  ;;  %v3495_v23 = vor.u32 %v3494_v3, %v3490_v58  ;;  %v3866_v51 = vrot.slane %v8341_v25, 5  ;;  %v3500_v18 = vrot.slane %v3498_v26, 5  ;;  %v3802_v55 = vld [vmem:[#allocation2 + $0x24] sm:$0xe] }
 0x1c2   : > { %7067 = vmatprep.mubr.msk.bf16.mxu0 %vm1742_vm10, %v6412_v30  ;;  %v3477_v39 = vsel %vm7918_vm9, %v3472_v19, %v3476_v50  ;;  %v6552_v22 = vrot.slane %v3800_v9, 9  ;;  %v3869_v2 = vrot.slane %v8344_v36, 5  ;;  %v6413_v11 = vcombine.low %v8350_v8, %v8352_v52  ;;  %v2247_v36 = vld [vmem:[#allocation2] sm:$0xe]  ;;  %v2248_v50 = vld [vmem:[#allocation2 + $0xc] sm:$0xe] }
 0x1c3   : > { %v3486_v61 = vrot.slane %v3485_v48, 4  ;;  %v6533_v7 = vcombine.low %v3467_v34, %v3477_v39  ;;  %v3496_v35 = vrot.slane %v3495_v23, 4  ;;  %v3868_v1 = vrot.slane %v3866_v51, 4  ;;  %v7677_v23 = vld [vmem:[#allocation2 + $0x8] sm:$0x1] }
 0x1c4   : > { %v3873_v17 = vrot.slane %v8362_v21, 5  ;;  %v3867_v44 = vsel %vm8617_vm1, %v6552_v22, %v3866_v51  ;;  %v3880_v4 = vrot.slane %v8373_v53, 5  ;;  %v3876_v21 = vrot.slane %v8369_v33, 5 }
 0x1c5   : > { %7169 = vmatprep.mubr.msk.bf16.mxu1 %vm1742_vm10, %v6533_v7  ;;  %v3491_v42 = vsel %vm7918_vm9, %v3486_v61, %v3490_v58  ;;  %v3501_v25 = vsel %vm7918_vm9, %v3496_v35, %v3500_v18  ;;  %v3870_v8 = vsel %vm8617_vm1, %v3868_v1, %v3869_v2  ;;  %v6553_v58 = vrot.slane %v3801_v45, 9  ;;  %v3803_v7 = vld [vmem:[#allocation2 + $0x30] sm:$0xe]  ;;  %v7678_v2 = vld [vmem:[#allocation2 + $0x14] sm:$0x1] }
 0x1c6   : > { %v6534_v3 = vcombine.low %v3491_v42, %v3501_v25  ;;  %7068 = vmatmul.mubr.msk.bf16.gmra.mrb[60].mxu0 %vm1742_vm10, %v6413_v11  ;;  %v3875_v52 = vrot.slane %v3873_v17, 4  ;;  %v6570_v26 = vcombine.low %v3867_v44, %v3870_v8  ;;  %v6554_v30 = vrot.slane %v3802_v55, 9  ;;  %v2249_v55 = vld [vmem:[#allocation2 + $0x18] sm:$0xe]  ;;  %v3804_v8 = vld [vmem:[#allocation2 + $0x3c] sm:$0xe] }
 0x1c7   : > { %v3882_v19 = vrot.slane %v3880_v4, 4  ;;  %v6431_v48 = vrot.slane %v2247_v36, 9  ;;  %v2300_v9 = vrot.slane %v8391_v54, 5  ;;  %v2303_v34 = vrot.slane %v7677_v23, 5 }
 0x1c8   : > { %v3877_v53 = vsel %vm8617_vm1, %v3875_v52, %v3876_v21  ;;  %v3874_v33 = vsel %vm8617_vm1, %v6553_v58, %v3873_v17  ;;  %v3881_v39 = vsel %vm8617_vm1, %v6554_v30, %v3880_v4  ;;  %v3883_v61 = vrot.slane %v8381_v10, 5  ;;  %v2250_v30 = vld [vmem:[#allocation2 + $0x24] sm:$0xe] }
 0x1c9   : > { %7170 = vmatmul.mubr.msk.bf16.gmra.mrb[16].mxu1 %vm1742_vm10, %v6534_v3  ;;  %v2307_v51 = vrot.slane %v8403_v62, 5  ;;  %v6571_v35 = vcombine.low %v3874_v33, %v3877_v53  ;;  %v2301_v18 = vsel %vm8617_vm1, %v6431_v48, %v2300_v9  ;;  %v2302_v54 = vrot.slane %v2300_v9, 4 }
 0x1ca   : > { %7175 = vmatprep.mubr.msk.bf16.mxu1 %vm1742_vm10, %v6570_v26  ;;  %v6432_v22 = vrot.slane %v2248_v50, 9  ;;  %v3884_v45 = vsel %vm8617_vm1, %v3882_v19, %v3883_v61  ;;  %v2310_v11 = vrot.slane %v7678_v2, 5  ;;  %v3887_v17 = vrot.slane %v8394_v59, 5  ;;  %v7679_v26 = vld [vmem:[#allocation2 + $0x20] sm:$0x1]  ;;  %v8665_v19 = vld [vmem:[%s9709_s3 + $0x38] sm:$0xff]  }
 0x1cb   : > { %v2309_v1 = vrot.slane %v2307_v51, 4  ;;  %v2304_v10 = vsel %vm8617_vm1, %v2302_v54, %v2303_v34  ;;  %v6555_v42 = vrot.slane %v3803_v7, 9  ;;  %v2314_v25 = vrot.slane %v8420_v47, 5 }
 0x1cc   : > { %v2308_v62 = vsel %vm8617_vm1, %v6432_v22, %v2307_v51  ;;  %v6449_v44 = vcombine.low %v2301_v18, %v2304_v10  ;;  %v3889_v36 = vrot.slane %v3887_v17, 4  ;;  %v3890_v3 = vrot.slane %v8396_v49, 5  ;;  %v3805_v51 = vld [vmem:[#allocation2 + $0x48] sm:$0xe]  ;;  %v7680_v18 = vld [vmem:[#allocation2 + $0x2c] sm:$0x1] }
 0x1cd   : > { %v2311_v4 = vsel %vm8617_vm1, %v2309_v1, %v2310_v11  ;;  %v6433_v59 = vrot.slane %v2249_v55, 9  ;;  %v2316_v21 = vrot.slane %v2314_v25, 4  ;;  %v2317_v58 = vrot.slane %v7679_v26, 5  ;;  %v9755_v22 = vld [vmem:[#allocation5_spill] sm:$0xff]  ;;  %v2251_v1 = vld [vmem:[#allocation2 + $0x30] sm:$0xe] }
 0x1ce   : > { %v6450_v52 = vcombine.low %v2308_v62, %v2311_v4  ;;  %v6572_v47 = vcombine.low %v3881_v39, %v3884_v45  ;;  %7073 = vmatprep.mubr.msk.bf16.mxu0 %vm1742_vm10, %v6449_v44  ;;  %v3888_v50 = vsel %vm8617_vm1, %v6555_v42, %v3887_v17  ;;  %v3891_v49 = vsel %vm8617_vm1, %v3889_v36, %v3890_v3  ;;  %v9757_v11 = vld [vmem:[#allocation8_spill] sm:$0xff]  ;;  %v9758_v42 = vld [vmem:[#allocation6_spill] sm:$0xff] }
 0x1cf   : > { %v3894_v53 = vrot.slane %v8415_v31, 5  ;;  %v2315_v48 = vsel %vm8617_vm1, %v6433_v59, %v2314_v25  ;;  %v2318_v9 = vsel %vm8617_vm1, %v2316_v21, %v2317_v58  ;;  %v6556_v23 = vrot.slane %v3804_v8, 9  ;;  %v3806_v44 = vld [vmem:[#allocation2 + $0x54] sm:$0xe]  ;;  %v7681_v8 = vld [vmem:[#allocation2 + $0x38] sm:$0x1] }
 0x1d0   : > { %7074 = vmatmul.mubr.msk.bf16.vlgmr.msra.gmra.mrb[32].mxu0 %vm1742_vm10, %v6450_v52  ;;  %v2321_v34 = vrot.slane %v8438_v29, 5  ;;  %v6451_v33 = vcombine.low %v2315_v48, %v2318_v9  ;;  %v3897_v31 = vrot.slane %v8426_v57, 5  ;;  %v6434_v61 = vrot.slane %v2250_v30, 9  ;;  %v9756_v29 = vld [vmem:[#allocation7_spill] sm:$0xff] }
 0x1d1   : > { %7176 = vmatmul.mubr.msk.bf16.vlgmr.msra.gmra.mrb[20].mxu1 %vm1742_vm10, %v6571_v35  ;;  %v3896_v39 = vrot.slane %v3894_v53, 4  ;;  %v6573_v7 = vcombine.low %v3888_v50, %v3891_v49  ;;  %v2324_v54 = vrot.slane %v7680_v18, 5  ;;  %v3901_v45 = vrot.slane %v9755_v22, 5  ;;  %7106 = vmatpush3.bf16.msra.mxu0 %v9756_v29  ;;  %v2252_v59 = vld [vmem:[#allocation2 + $0x3c] sm:$0xe] }
 0x1d2   : > { %7208 = vmatpush3.bf16.msra.mxu1 %v8410_v12  ;;  %7179 = vmatprep.mubr.msk.bf16.mxu1 %vm1742_vm10, %v6572_v47  ;;  %v2323_v35 = vrot.slane %v2321_v34, 4  ;;  %v3895_v12 = vsel %vm8617_vm1, %v6556_v23, %v3894_v53  ;;  %v2322_v2 = vsel %vm8617_vm1, %v6434_v61, %v2321_v34  ;;  %v2328_v17 = vrot.slane %v9757_v11, 5  ;;  %v7682_v53 = vld [vmem:[#allocation2 + $0x40] sm:$0xf]  ;;  %v9759_v34 = vld [vmem:[#allocation9_spill] sm:$0xff] }
 0x1d3   : > { %7241 = vmatprep.subr.bf16.mxu1 %v8665_v19  ;;  %7077 = vmatprep.mubr.msk.bf16.mxu0 %vm1742_vm10, %v6451_v33  ;;  %v3898_v57 = vsel %vm8617_vm1, %v3896_v39, %v3897_v31  ;;  %v6557_v10 = vrot.slane %v3805_v51, 9  ;;  %v3903_v62 = vrot.slane %v3901_v45, 4  ;;  %v3904_v25 = vrot.slane %v9758_v42, 5  ;;  %v3807_v31 = vld [vmem:[#allocation2 + $0x60] sm:$0xe] }
 0x1d4   : > { %v2325_v55 = vsel %vm8617_vm1, %v2323_v35, %v2324_v54  ;;  %v6574_v4 = vcombine.low %v3895_v12, %v3898_v57  ;;  %v6435_v36 = vrot.slane %v2251_v1, 9  ;;  %v2330_v3 = vrot.slane %v2328_v17, 4  ;;  %v7683_v51 = vld [vmem:[#allocation2 + $0x44] sm:$0x1]  ;;  %v2253_v54 = vld [vmem:[#allocation2 + $0x48] sm:$0xe] }
 0x1d5   : > { %v2331_v52 = vrot.slane %v7681_v8, 5  ;;  %v6452_v21 = vcombine.low %v2322_v2, %v2325_v55  ;;  %v3902_v26 = vsel %vm8617_vm1, %v6557_v10, %v3901_v45  ;;  %v3905_v58 = vsel %vm8617_vm1, %v3903_v62, %v3904_v25  ;;  %v7684_v1 = vld [vmem:[#allocation2 + $0x4c] sm:$0xf]  ;;  %v7685_v10 = vld [vmem:[#allocation2 + $0x50] sm:$0x1] }
 0x1d6   : > { %v3908_v30 = vrot.slane %v8457_v28, 5  ;;  %v2329_v47 = vsel %vm8617_vm1, %v6435_v36, %v2328_v17  ;;  %v6558_v49 = vrot.slane %v3806_v44, 9  ;;  %v2335_v48 = vrot.slane %v7682_v53, 5  ;;  %v3808_v42 = vld [vmem:[#allocation2 + $0x6c] sm:$0xe] }
 0x1d7   : > { %v2332_v50 = vsel %vm8617_vm1, %v2330_v3, %v2331_v52  ;;  %v3911_v33 = vrot.slane %v9759_v34, 5  ;;  %v6436_v39 = vrot.slane %v2252_v59, 9  ;;  %v6575_v28 = vcombine.low %v3902_v26, %v3905_v58  ;;  %v2254_v3 = vld [vmem:[#allocation2 + $0x54] sm:$0xe]  ;;  %v7686_v59 = vld [vmem:[#allocation2 + $0x58] sm:$0xf] }
 0x1d8   : > { %7078 = vmatmul.mubr.msk.bf16.gmra.mrb[36].mxu0 %vm1742_vm10, %v6452_v21  ;;  %v6453_v9 = vcombine.low %v2329_v47, %v2332_v50  ;;  %v3910_v23 = vrot.slane %v3908_v30, 4  ;;  %v2337_v61 = vrot.slane %v2335_v48, 4  ;;  %v2338_v35 = vrot.slane %v7683_v51, 5  ;;  %v3809_v26 = vld [vmem:[#allocation2 + $0x78] sm:$0xe] }
 0x1d9   : > { %7180 = vmatmul.mubr.msk.bf16.gmra.mrb[24].mxu1 %vm1742_vm10, %v6573_v7  ;;  %v3915_v18 = vrot.slane %v8474_v13, 5  ;;  %v3909_v7 = vsel %vm8617_vm1, %v6558_v49, %v3908_v30  ;;  %v2336_v45 = vsel %vm8617_vm1, %v6436_v39, %v2335_v48  ;;  %v2342_v29 = vrot.slane %v7684_v1, 5  ;;  %v7687_v53 = vld [vmem:[#allocation2 + $0x5c] sm:$0x1]  ;;  %v7688_v39 = vld [vmem:[#allocation2 + $0x64] sm:$0xf] }
 0x1da   : > { %7183 = vmatprep.mubr.msk.bf16.mxu1 %vm1742_vm10, %v6574_v4  ;;  %7081 = vmatprep.mubr.msk.bf16.mxu0 %vm1742_vm10, %v6453_v9  ;;  %v3912_v22 = vsel %vm8617_vm1, %v3910_v23, %v3911_v33  ;;  %v2339_v12 = vsel %vm8617_vm1, %v2337_v61, %v2338_v35  ;;  %v6559_v57 = vrot.slane %v3807_v31, 9  ;;  %v3918_v13 = vrot.slane %v8481_v40, 5  ;;  %v2255_v33 = vld [vmem:[#allocation2 + $0x60] sm:$0xe] }
 0x1db   : > { %v3917_v2 = vrot.slane %v3915_v18, 4  ;;  %v6576_v11 = vcombine.low %v3909_v7, %v3912_v22  ;;  %v6437_v17 = vrot.slane %v2253_v54, 9  ;;  %v2344_v55 = vrot.slane %v2342_v29, 4  ;;  %v7689_v54 = vld [vmem:[#allocation2 + $0x68] sm:$0x1] }
 0x1dc   : > { %v2345_v62 = vrot.slane %v7685_v10, 5  ;;  %v6454_v25 = vcombine.low %v2336_v45, %v2339_v12  ;;  %v3916_v44 = vsel %vm8617_vm1, %v6559_v57, %v3915_v18  ;;  %v3922_v36 = vrot.slane %v8487_v0, 5  ;;  %v3810_v22 = vld [vmem:[#allocation2 + $0x84] sm:$0xe] }
 0x1dd   : > { %v3919_v4 = vsel %vm8617_vm1, %v3917_v2, %v3918_v13  ;;  %v2343_v40 = vsel %vm8617_vm1, %v6437_v17, %v2342_v29  ;;  %v2349_v21 = vrot.slane %v7686_v59, 5  ;;  %v6560_v30 = vrot.slane %v3808_v42, 9  ;;  %v7690_v13 = vld [vmem:[#allocation2 + $0x70] sm:$0xf] }
 0x1de   : > { %v6577_v8 = vcombine.low %v3916_v44, %v3919_v4  ;;  %v2346_v52 = vsel %vm8617_vm1, %v2344_v55, %v2345_v62  ;;  %v3924_v47 = vrot.slane %v3922_v36, 4  ;;  %v3925_v50 = vrot.slane %v8495_v60, 5  ;;  %v3811_v42 = vld [vmem:[#allocation2 + $0x90] sm:$0xe]  ;;  %v2256_v44 = vld [vmem:[#allocation2 + $0x6c] sm:$0xe] }
 0x1df   : > { %v6455_v58 = vcombine.low %v2343_v40, %v2346_v52  ;;  %v6438_v0 = vrot.slane %v2254_v3, 9  ;;  %v2351_v49 = vrot.slane %v2349_v21, 4  ;;  %v2352_v48 = vrot.slane %v7687_v53, 5  ;;  %v7691_v52 = vld [vmem:[#allocation2 + $0x74] sm:$0x1] }
 0x1e0   : > { %7082 = vmatmul.mubr.msk.bf16.gmra.mrb[40].mxu0 %vm1742_vm10, %v6454_v25  ;;  %v3929_v9 = vrot.slane %v8503_v37, 5  ;;  %v3923_v23 = vsel %vm8617_vm1, %v6560_v30, %v3922_v36  ;;  %v3926_v60 = vsel %vm8617_vm1, %v3924_v47, %v3925_v50  ;;  %v6561_v34 = vrot.slane %v3809_v26, 9  ;;  %v2257_v36 = vld [vmem:[#allocation2 + $0x78] sm:$0xe]  ;;  %v3812_v53 = vld [vmem:[#allocation2 + $0x9c] sm:$0xe] }
 0x1e1   : > { %7184 = vmatmul.mubr.msk.bf16.gmra.mrb[28].mxu1 %vm1742_vm10, %v6575_v28  ;;  %7085 = vmatprep.mubr.msk.bf16.mxu0 %vm1742_vm10, %v6455_v58  ;;  %v2356_v31 = vrot.slane %v7688_v39, 5  ;;  %v6578_v28 = vcombine.low %v3923_v23, %v3926_v60  ;;  %v2353_v61 = vsel %vm8617_vm1, %v2351_v49, %v2352_v48  ;;  %v3932_v37 = vrot.slane %v8513_v43, 5  ;;  %v7694_v39 = vld [vmem:[#allocation2 + $0x88] sm:$0xf] }
 0x1e2   : > { %7187 = vmatprep.mubr.msk.bf16.mxu1 %vm1742_vm10, %v6576_v11  ;;  %v3931_v51 = vrot.slane %v3929_v9, 4  ;;  %v2350_v35 = vsel %vm8617_vm1, %v6438_v0, %v2349_v21  ;;  %v2359_v7 = vrot.slane %v7689_v54, 5  ;;  %v8747_v45 = vsel %vm8617_vm1, %v6561_v34, %v3929_v9  ;;  %v7693_v0 = vld [vmem:[#allocation2 + $0x80] sm:$0x1] }
 0x1e3   : > { %v2358_v18 = vrot.slane %v2356_v31, 4  ;;  %v6439_v29 = vrot.slane %v2255_v33, 9  ;;  %v3936_v12 = vrot.slane %v8517_v6, 5  ;;  %v6456_v57 = vcombine.low %v2350_v35, %v2353_v61  ;;  %v3813_v35 = vld [vmem:[#allocation2 + $0xa8] sm:$0xe] }
 0x1e4   : > { %v8751_v1 = vsel %vm8617_vm1, %v3931_v51, %v3932_v37  ;;  %v2363_v11 = vrot.slane %v7690_v13, 5  ;;  %v6562_v55 = vrot.slane %v3810_v22, 9  ;;  %v3939_v62 = vrot.slane %v8525_v27, 5  ;;  %v7692_v27 = vld [vmem:[#allocation2 + $0x7c] sm:$0xf] }
 0x1e5   : > { %v6579_v43 = vcombine.low %v8747_v45, %v8751_v1  ;;  %v2360_v2 = vsel %vm8617_vm1, %v2358_v18, %v2359_v7  ;;  %v2357_v17 = vsel %vm8617_vm1, %v6439_v29, %v2356_v31  ;;  %v3938_v10 = vrot.slane %v3936_v12, 4  ;;  %v2258_v45 = vld [vmem:[#allocation2 + $0x84] sm:$0xe]  ;;  %v2259_v29 = vld [vmem:[#allocation2 + $0x90] sm:$0xe] }
 0x1e6   : > { %v6457_v25 = vcombine.low %v2357_v17, %v2360_v2  ;;  %v2365_v6 = vrot.slane %v2363_v11, 4  ;;  %v3943_v4 = vrot.slane %v8534_v5, 5  ;;  %v3937_v3 = vsel %vm8617_vm1, %v6562_v55, %v3936_v12  ;;  %v7695_v12 = vld [vmem:[#allocation2 + $0x94] sm:$0xf] }
 0x1e7   : > { %v3940_v40 = vsel %vm8617_vm1, %v3938_v10, %v3939_v62  ;;  %v2366_v59 = vrot.slane %v7691_v52, 5  ;;  %v2370_v21 = vrot.slane %v7692_v27, 5  ;;  %v6563_v26 = vrot.slane %v3811_v42, 9  ;;  %v7697_v10 = vld [vmem:[#allocation2 + $0x98] sm:$0x1] }
 0x1e8   : > { %7086 = vmatmul.mubr.msk.bf16.gmra.mrb[44].mxu0 %vm1742_vm10, %v6456_v57  ;;  %v6580_v5 = vcombine.low %v3937_v3, %v3940_v40  ;;  %v3945_v58 = vrot.slane %v3943_v4, 4  ;;  %v6440_v30 = vrot.slane %v2256_v44, 9  ;;  %v6441_v47 = vrot.slane %v2257_v36, 9  ;;  %v7698_v36 = vld [vmem:[#allocation2 + $0xa0] sm:$0xf] }
 0x1e9   : > { %7188 = vmatmul.mubr.msk.bf16.gmra.mrb[0].mxu1 %vm1742_vm10, %v6577_v8  ;;  %7089 = vmatprep.mubr.msk.bf16.mxu0 %vm1742_vm10, %v6457_v25  ;;  %v3946_v8 = vrot.slane %v8541_v24, 5  ;;  %v2372_v50 = vrot.slane %v2370_v21, 4  ;;  %v2373_v49 = vrot.slane %v7693_v0, 5  ;;  %v2367_v48 = vsel %vm8617_vm1, %v2365_v6, %v2366_v59  ;;  %v3815_v52 = vld [vmem:[#allocation2 + $0xc0] sm:$0xe] }
 0x1ea   : > { %7191 = vmatprep.mubr.msk.bf16.mxu1 %vm1742_vm10, %v6578_v28  ;;  %v3944_v9 = vsel %vm8617_vm1, %v6563_v26, %v3943_v4  ;;  %v3950_v60 = vrot.slane %v8547_v20, 5  ;;  %v2364_v24 = vsel %vm8617_vm1, %v6440_v30, %v2363_v11  ;;  %v2377_v31 = vrot.slane %v7694_v39, 5  ;;  %v7696_v11 = vld [vmem:[#allocation2 + $0x8c] sm:$0x1]  ;;  %v7701_v39 = vld [vmem:[#allocation2 + $0xb0] sm:$0x1] }
 0x1eb   : > { %v3947_v23 = vsel %vm8617_vm1, %v3945_v58, %v3946_v8  ;;  %v2374_v33 = vsel %vm8617_vm1, %v2372_v50, %v2373_v49  ;;  %v2371_v28 = vsel %vm8617_vm1, %v6441_v47, %v2370_v21  ;;  %v6564_v61 = vrot.slane %v3812_v53, 9  ;;  %v7699_v58 = vld [vmem:[#allocation2 + $0xac] sm:$0xf]  ;;  %v2260_v53 = vld [vmem:[#allocation2 + $0x9c] sm:$0xe] }
 0x1ec   : > { %v6581_v34 = vcombine.low %v3944_v9, %v3947_v23  ;;  %v3952_v51 = vrot.slane %v3950_v60, 4  ;;  %v3953_v37 = vrot.slane %v8557_v16, 5  ;;  %v6458_v18 = vcombine.low %v2364_v24, %v2367_v48  ;;  %v672_v49 = vld [vmem:[#allocation2 + $0xcc] sm:$0x1]  ;;  %v7700_v9 = vld [vmem:[#allocation2 + $0xa4] sm:$0x1] }
 0x1ed   : > { %v6459_v54 = vcombine.low %v2371_v28, %v2374_v33  ;;  %v3957_v20 = vrot.slane %v8563_v32, 5  ;;  %v3951_v7 = vsel %vm8617_vm1, %v6564_v61, %v3950_v60  ;;  %v2379_v1 = vrot.slane %v2377_v31, 4  ;;  %v2261_v24 = vld [vmem:[#allocation2 + $0xa8] sm:$0xe] }
 0x1ee   : > { %v3954_v22 = vsel %vm8617_vm1, %v3952_v51, %v3953_v37  ;;  %v2384_v57 = vrot.slane %v7695_v12, 5  ;;  %v6565_v2 = vrot.slane %v3813_v35, 9  ;;  %v3960_v32 = vrot.slane %v8573_v15, 5  ;;  %v7702_v35 = vld [vmem:[#allocation2 + $0xb8] sm:$0xf] }
 0x1ef   : > { %v6582_v16 = vcombine.low %v3951_v7, %v3954_v22  ;;  %v3959_v13 = vrot.slane %v3957_v20, 4  ;;  %v2380_v17 = vrot.slane %v7696_v11, 5  ;;  %v2387_v62 = vrot.slane %v7697_v10, 5 }
 0x1f0   : > { %7090 = vmatmul.mubr.msk.bf16.gmra.mrb[48].mxu0 %vm1742_vm10, %v6458_v18  ;;  %v2386_v55 = vrot.slane %v2384_v57, 4  ;;  %v6442_v42 = vrot.slane %v2258_v45, 9  ;;  %v6443_v44 = vrot.slane %v2259_v29, 9  ;;  %v2391_v3 = vrot.slane %v7698_v36, 5  ;;  %v7644_v36 = vld [vmem:[#allocation2 + $0x3c] sm:$0xff]  }
 0x1f1   : > { %7192 = vmatmul.mubr.msk.bf16.gmra.mrb[4].mxu1 %vm1742_vm10, %v6579_v43  ;;  %7093 = vmatprep.mubr.msk.bf16.mxu0 %vm1742_vm10, %v6459_v54  ;;  %v3958_v43 = vsel %vm8617_vm1, %v6565_v2, %v3957_v20  ;;  %v3961_v25 = vsel %vm8617_vm1, %v3959_v13, %v3960_v32  ;;  %v2381_v15 = vsel %vm8617_vm1, %v2379_v1, %v2380_v17  ;;  %v3964_v40 = vrot.slane %v8577_v41, 5  ;;  %v2262_v2 = vld [vmem:[#allocation2 + $0xb4] sm:$0xe]  ;;  %v7703_v13 = vld [vmem:[#allocation2 + $0xbc] sm:$0x1] }
 0x1f2   : > { %7195 = vmatprep.mubr.msk.bf16.mxu1 %vm1742_vm10, %v6580_v5  ;;  %v6583_v6 = vcombine.low %v3958_v43, %v3961_v25  ;;  %v2388_v4 = vsel %vm8617_vm1, %v2386_v55, %v2387_v62  ;;  %v2378_v59 = vsel %vm8617_vm1, %v6442_v42, %v2377_v31  ;;  %v2385_v27 = vsel %vm8617_vm1, %v6443_v44, %v2384_v57  ;;  %v7638_v62 = vld [vmem:[#allocation2 + $0x18] sm:$0xff]   ;;  %v7641_v42 = vld [vmem:[#allocation2 + $0xc] sm:$0xff]   ;;  %v7640_v43 = vld [vmem:[#allocation2 + $0x24] sm:$0xff]  }
 0x1f3   : > { %v3971_v21 = vrot.slane %v8593_v56, 5  ;;  %v6460_v5 = vcombine.low %v2378_v59, %v2381_v15  ;;  %v6461_v26 = vcombine.low %v2385_v27, %v2388_v4  ;;  %v2398_v8 = vrot.slane %v7699_v58, 5  ;;  %v3814_v56 = vld [vmem:[#allocation2 + $0xb4] sm:$0xe]  ;;  %v7643_v25 = vld [vmem:[#allocation2 + $0x18] sm:$0xff]   ;;  %v8848_v44 = vld [vmem:[%s9709_s3 + $0x40] sm:$0xff]  }
 0x1f4   : > { %v2393_v30 = vrot.slane %v2391_v3, 4  ;;  %v6567_v47 = vrot.slane %v3815_v52, 9  ;;  %v3974_v0 = vrot.slane %v8601_v14, 5  ;;  %v3966_v41 = vrot.slane %v3964_v40, 4  ;;  %v7642_v15 = vld [vmem:[#allocation2 + $0x30] sm:$0xff]   ;;  %v7646_v52 = vld [vmem:[#allocation2 + $0x48] sm:$0xff]  }
 0x1f5   : > { %v3973_v50 = vrot.slane %v3971_v21, 4  ;;  %v2400_v48 = vrot.slane %v2398_v8, 4  ;;  %v2394_v23 = vrot.slane %v7700_v9, 5  ;;  %v2401_v31 = vrot.slane %v7701_v39, 5  ;;  %v8856_v4 = vld [vmem:[#allocation2 + $0x1c] sm:$0xf] }
 0x1f6   : > { %v3972_v60 = vsel %vm8617_vm1, %v6567_v47, %v3971_v21  ;;  %v673_v61 = vsel %vm7859_vm3, 0, %v672_v49  ;;  %v6444_v51 = vrot.slane %v2260_v53, 9  ;;  %v2405_v18 = vrot.slane %v7702_v35, 5  ;;  %v7649_v59 = vld [vmem:[#allocation2 + $0x3c] sm:$0xff]   ;;  %v8864_v58 = vld [vmem:[#allocation2 + $0x28] sm:$0xf] }
 0x1f7   : > { %v3975_v14 = vsel %vm8617_vm1, %v3973_v50, %v3974_v0  ;;  %v2395_v37 = vsel %vm8617_vm1, %v2393_v30, %v2394_v23  ;;  %674 = vst [vmem:[#allocation2 + $0xcc] sm:$0x1] %v673_v61  ;;  %v6566_v54 = vrot.slane %v3814_v56, 9  ;;  %v6445_v7 = vrot.slane %v2261_v24, 9  ;;  %v8868_v0 = vld [vmem:[#allocation2 + $0x20] sm:$0x1] }
 0x1f8   : > { %7094 = vmatmul.mubr.msk.bf16.gmra.mrb[52].mxu0 %vm1742_vm10, %v6460_v5  ;;  %v6585_v33 = vcombine.low %v3972_v60, %v3975_v14  ;;  %v2392_v22 = vsel %vm8617_vm1, %v6444_v51, %v2391_v3  ;;  %v2408_v32 = vrot.slane %v7703_v13, 5  ;;  %v6446_v11 = vrot.slane %v2262_v2, 9  ;;  %v7647_v3 = vld [vmem:[#allocation2 + $0x30] sm:$0xff]   ;;  %v7651_v23 = vld [vmem:[#allocation2 + $0x48] sm:$0xff]   ;;  %v7650_v14 = vld [vmem:[#allocation2 + $0x60] sm:$0xff]  }
 0x1f9   : > { %7196 = vmatmul.mubr.msk.bf16.gmra.mrb[8].mxu1 %vm1742_vm10, %v6581_v34  ;;  %7097 = vmatprep.mubr.msk.bf16.mxu0 %vm1742_vm10, %v6461_v26  ;;  %v3967_v34 = vrot.slane %v8589_v63, 5  ;;  %v2402_v63 = vsel %vm8617_vm1, %v2400_v48, %v2401_v31  ;;  %v3965_v45 = vsel %vm8617_vm1, %v6566_v54, %v3964_v40  ;;  %v6462_v1 = vcombine.low %v2392_v22, %v2395_v37  ;;  %v4637_v40 = vld [vmem:[#allocation2 + $0x18] sm:$0xf]  ;;  %v4643_v56 = vld [vmem:[#allocation2 + $0x30] sm:$0xf] }
 0x1fa   : > { %7199 = vmatprep.mubr.msk.bf16.mxu1 %vm1742_vm10, %v6582_v16  ;;  %v2399_v29 = vsel %vm8617_vm1, %v6445_v7, %v2398_v8  ;;  %v2407_v16 = vrot.slane %v2405_v18, 4  ;;  %v2406_v55 = vsel %vm8617_vm1, %v6446_v11, %v2405_v18  ;;  %v4695_v27 = vshll.u32 %v8856_v4, 16  ;;  %v7648_v9 = vld [vmem:[#allocation2 + $0x54] sm:$0xff]   ;;  %v8883_v54 = vld [vmem:[#allocation2 + $0x2c] sm:$0x1] }
 0x1fb   : > { %v3968_v20 = vsel %vm8617_vm1, %v3966_v41, %v3967_v34  ;;  %v6463_v57 = vcombine.low %v2399_v29, %v2402_v63  ;;  %v4699_v21 = vshrl.u32 %v8856_v4, 16  ;;  %v4686_v5 = vshrl.u32 %v4637_v40, 16  ;;  %v8872_v60 = vld [vmem:[#allocation2 + $0x34] sm:$0xf]  ;;  %v4646_v63 = vld [vmem:[#allocation2 + $0x3c] sm:$0xf] }
 0x1fc   : > { %v6584_v12 = vcombine.low %v3965_v45, %v3968_v20  ;;  %v2409_v17 = vsel %vm8617_vm1, %v2407_v16, %v2408_v32  ;;  %v4689_v26 = vshll.u32 %v4637_v40, 16  ;;  %v8866_v8 = vrot.slane %v4695_v27, 5  ;;  %v8891_v32 = vld [vmem:[#allocation2 + $0x40] sm:$0xf]  ;;  %v7652_v11 = vld [vmem:[#allocation2 + $0x6c] sm:$0xff]  }
 0x1fd   : > { %v6464_v10 = vcombine.low %v2406_v55, %v2409_v17  ;;  %v4701_v30 = vrot.slane %v4699_v21, 4  ;;  %v4719_v49 = vshll.u32 %v8864_v58, 16  ;;  %v4723_v41 = vshrl.u32 %v8864_v58, 16 }
 0x1fe   : > { %v4688_v53 = vrot.slane %v4686_v5, 4  ;;  %v4691_v48 = vrot.slane %v4689_v26, 5  ;;  %v4705_v34 = vshll.u32 %v8868_v0, 16  ;;  %v4734_v61 = vshrl.u32 %v4643_v56, 16 }
 0x1ff   : > { %v4702_v24 = vor.u32 %v4701_v30, %v8866_v8  ;;  %v8878_v31 = vrot.slane %v4719_v49, 5  ;;  %v4725_v28 = vrot.slane %v4723_v41, 4  ;;  %v4737_v51 = vshll.u32 %v4643_v56, 16  ;;  %v8906_v30 = vld [vmem:[#allocation2 + $0x58] sm:$0xf] }
 0x200   : > { %7098 = vmatmul.mubr.msk.bf16.gmra.mrb[56].mxu0 %vm1742_vm10, %v6462_v1  ;;  %v4692_v37 = vor.u32 %v4691_v48, %v4688_v53  ;;  %v4743_v35 = vshll.u32 %v8872_v60, 16  ;;  %v4747_v18 = vshrl.u32 %v8872_v60, 16  ;;  %v4707_v22 = vrot.slane %v4705_v34, 5  ;;  %v8886_v1 = vld [vmem:[#allocation2 + $0x38] sm:$0x1] }
 0x201   : > { %7200 = vmatmul.mubr.msk.bf16.gmra.mrb[12].mxu1 %vm1742_vm10, %v6583_v6  ;;  %7101 = vmatprep.mubr.msk.bf16.mxu0 %vm1742_vm10, %v6463_v57  ;;  %v7645_v6 = vld [vmem:[#allocation2 + $0x24] sm:$0xff]   ;;  %v4703_v20 = vrot.slane %v4702_v24, 4  ;;  %v4726_v45 = vor.u32 %v4725_v28, %v8878_v31  ;;  %v4736_v29 = vrot.slane %v4734_v61, 4  ;;  %v4729_v16 = vshll.u32 %v8883_v54, 16 }
 0x202   : > { %7203 = vmatprep.mubr.msk.bf16.mxu1 %vm1742_vm10, %v6584_v12  ;;  %v4739_v12 = vrot.slane %v4737_v51, 5  ;;  %v4693_v57 = vrot.slane %v4692_v37, 4  ;;  %v8889_v2 = vrot.slane %v4743_v35, 5  ;;  %v4749_v13 = vrot.slane %v4747_v18, 4  ;;  %v8913_v49 = vld [vmem:[#allocation2 + $0x44] sm:$0x1] }
 0x203   : > { %v4758_v17 = vshrl.u32 %v4646_v63, 16  ;;  %v4761_v55 = vshll.u32 %v4646_v63, 16  ;;  %v4771_v27 = vshrl.u32 %v8891_v32, 16  ;;  %v4815_v34 = vshll.u32 %v8906_v30, 16  ;;  %v8924_v35 = vld [vmem:[#allocation2 + $0x64] sm:$0xf] }
 0x204   : > { %v4698_v40 = vsel %vm7918_vm9, %v4693_v57, %v8866_v8  ;;  %v4777_v61 = vshll.u32 %v8913_v49, 16  ;;  %v7655_v18 = vld [vmem:[#allocation2 + $0x90] sm:$0xff]   ;;  %v5443_v46 = vrot.slane %v8883_v54, 5 }
 0x205   : > { %v4760_v21 = vrot.slane %v4758_v17, 4  ;;  %v4773_v24 = vrot.slane %v4771_v27, 4  ;;  %v4843_v17 = vshrl.u32 %v8924_v35, 16 }
 0x208   : > { %7102 = vmatmul.mubr.msk.bf16.gmra.mrb[60].mxu0 %vm1742_vm10, %v6464_v10  ;;  %v7653_v10 = vld [vmem:[#allocation2 + $0x78] sm:$0xff]  }
 0x209   : > { %7204 = vmatmul.mubr.msk.bf16.gmra.mrb[16].mxu1 %vm1742_vm10, %v6585_v33  ;;  %7107 = vmatprep.mubr.msk.bf16.mxu0 %vm1742_vm10, %v7641_v42 }
 0x20a   : > { %7209 = vmatprep.mubr.msk.bf16.mxu1 %vm1742_vm10, %v7638_v62  ;;  %v4708_v62 = vsel %vm7918_vm9, %v4703_v20, %v4707_v22 }
 0x210   : > { %7108 = vmatmul.mubr.msk.bf16.vlgmr.msra.gmra.mrb[32].mxu0 %vm1742_vm10, %v7643_v25  ;;  %v4727_v25 = vrot.slane %v4726_v45, 4 }
 0x211   : > { %7210 = vmatmul.mubr.msk.bf16.vlgmr.msra.gmra.mrb[20].mxu1 %vm1742_vm10, %v7640_v43  ;;  %7111 = vmatprep.mubr.msk.bf16.mxu0 %vm1742_vm10, %v7645_v6  ;;  %v4649_v43 = vld [vmem:[#allocation2 + $0x48] sm:$0xf]  ;;  %v4753_v6 = vshll.u32 %v8886_v1, 16 }
 0x212   : > { %7242 = vmatpush3.bf16.msra.mxu1 %v8665_v19  ;;  %7213 = vmatprep.mubr.msk.bf16.mxu1 %vm1742_vm10, %v7642_v15  ;;  %v4640_v19 = vld [vmem:[#allocation2 + $0x24] sm:$0xf]  ;;  %v4740_v15 = vor.u32 %v4739_v12, %v4736_v29  ;;  %v4782_v5 = vshrl.u32 %v4649_v43, 16  ;;  %v4785_v26 = vshll.u32 %v4649_v43, 16  ;;  %v8946_v43 = vld [vmem:[#allocation2 + $0x50] sm:$0x1] }
 0x213   : > { %7275 = vmatprep.subr.bf16.mxu1 %v8848_v44  ;;  %v4710_v47 = vshrl.u32 %v4640_v19, 16  ;;  %v4713_v50 = vshll.u32 %v4640_v19, 16  ;;  %v4763_v19 = vrot.slane %v4761_v55, 5  ;;  %v4755_v56 = vrot.slane %v4753_v6, 5  ;;  %v4658_v55 = vld [vmem:[#allocation2 + $0x6c] sm:$0xf] }
 0x214   : > { %v4741_v48 = vrot.slane %v4740_v15, 4  ;;  %v4784_v51 = vrot.slane %v4782_v5, 4  ;;  %v4787_v37 = vrot.slane %v4785_v26, 5  ;;  %v7656_v5 = vld [vmem:[#allocation2 + $0x9c] sm:$0xff]  }
 0x215   : > { %v4712_v33 = vrot.slane %v4710_v47, 4  ;;  %v4715_v39 = vrot.slane %v4713_v50, 5  ;;  %v8908_v47 = vcombine.low %v4698_v40, %v4708_v62  ;;  %v4764_v28 = vor.u32 %v4763_v19, %v4760_v21  ;;  %v8949_v40 = vld [vmem:[#allocation2 + $0x70] sm:$0xf] }
 0x216   : > { %v4746_v29 = vsel %vm7918_vm9, %v4741_v48, %v8889_v2  ;;  %v4854_v21 = vshrl.u32 %v4658_v55, 16  ;;  %v4857_v19 = vshll.u32 %v4658_v55, 16 }
 0x217   : > { %v4716_v7 = vor.u32 %v4715_v39, %v4712_v33  ;;  %v4819_v33 = vshrl.u32 %v8906_v30, 16  ;;  %v4655_v39 = vld [vmem:[#allocation2 + $0x60] sm:$0xf]  ;;  %v8941_v62 = vrot.slane %v4764_v28, 4 }
 0x218   : > { %7112 = vmatmul.mubr.msk.bf16.gmra.mrb[36].mxu0 %vm1742_vm10, %v7647_v3  ;;  %v8898_v3 = vld [vmem:[#allocation2 + $0x4c] sm:$0xf]  ;;  %v4830_v12 = vshrl.u32 %v4655_v39, 16  ;;  %v4833_v57 = vshll.u32 %v4655_v39, 16 }
 0x219   : > { %7214 = vmatmul.mubr.msk.bf16.gmra.mrb[24].mxu1 %vm1742_vm10, %v7644_v36  ;;  %7115 = vmatprep.mubr.msk.bf16.mxu0 %vm1742_vm10, %v7649_v59  ;;  %v4717_v42 = vrot.slane %v4716_v7, 4  ;;  %v4767_v36 = vshll.u32 %v8891_v32, 16  ;;  %v4750_v59 = vor.u32 %v4749_v13, %v8889_v2  ;;  %v4791_v8 = vshll.u32 %v8898_v3, 16 }
 0x21a   : > { %7217 = vmatprep.mubr.msk.bf16.mxu1 %vm1742_vm10, %v7646_v52  ;;  %v4731_v52 = vrot.slane %v4729_v16, 5  ;;  %v4795_v41 = vshrl.u32 %v8898_v3, 16  ;;  %v8935_v16 = vrot.slane %v4815_v34, 5  ;;  %v4821_v13 = vrot.slane %v4819_v33, 4  ;;  %v7657_v34 = vld [vmem:[#allocation2 + $0xa8] sm:$0xff]  }
 0x21b   : > { %v4722_v50 = vsel %vm7918_vm9, %v4717_v42, %v8878_v31  ;;  %v7654_v31 = vld [vmem:[#allocation2 + $0x84] sm:$0xff]   ;;  %v8926_v20 = vrot.slane %v4791_v8, 5  ;;  %v8944_v2 = vrot.slane %v4777_v61, 5  ;;  %v4835_v27 = vrot.slane %v4833_v57, 5 }
 0x21c   : > { %v4732_v53 = vsel %vm7918_vm9, %v4727_v25, %v4731_v52  ;;  %v4797_v7 = vrot.slane %v4795_v41, 4  ;;  %v4788_v25 = vor.u32 %v4787_v37, %v4784_v51  ;;  %v8951_v52 = vld [vmem:[#allocation2 + $0x5c] sm:$0x1]  ;;  %v4845_v41 = vrot.slane %v4843_v17, 4  ;;  %v8967_v51 = vld [vmem:[#allocation2 + $0x68] sm:$0x1] }
 0x21d   : > { %v8929_v45 = vcombine.low %v4722_v50, %v4732_v53  ;;  %v4822_v50 = vor.u32 %v4821_v13, %v8935_v16  ;;  %v4661_v53 = vld [vmem:[#allocation2 + $0x78] sm:$0xf]  ;;  %v4825_v28 = vshll.u32 %v8951_v52, 16 }
 0x21e   : > { %v4798_v15 = vor.u32 %v4797_v7, %v8926_v20  ;;  %v4789_v39 = vrot.slane %v4788_v25, 4  ;;  %v4859_v7 = vrot.slane %v4857_v19, 5  ;;  %v4881_v55 = vshll.u32 %v4661_v53, 16 }
 0x21f   : > { %v4849_v25 = vshll.u32 %v8967_v51, 16 }
 0x220   : > { %7116 = vmatmul.mubr.msk.bf16.gmra.mrb[40].mxu0 %vm1742_vm10, %v7651_v23  ;;  %v4652_v23 = vld [vmem:[#allocation2 + $0x54] sm:$0xf]  ;;  %v4799_v61 = vrot.slane %v4798_v15, 4  ;;  %v8981_v15 = vld [vmem:[#allocation2 + $0x7c] sm:$0xf] }
 0x221   : > { %7218 = vmatmul.mubr.msk.bf16.gmra.mrb[28].mxu1 %vm1742_vm10, %v7648_v9  ;;  %v8919_v9 = vrot.slane %v4767_v36, 5  ;;  %v4806_v63 = vshrl.u32 %v4652_v23, 16  ;;  %v4809_v22 = vshll.u32 %v4652_v23, 16  ;;  %v4863_v23 = vshll.u32 %v8949_v40, 16 }
 0x222   : > { %7221 = vmatprep.mubr.msk.bf16.mxu1 %vm1742_vm10, %v7650_v14  ;;  %v4751_v14 = vrot.slane %v4750_v59, 4  ;;  %v4832_v59 = vrot.slane %v4830_v12, 4  ;;  %v9037_v12 = vld [vmem:[#allocation2 + $0x94] sm:$0xf] }
 0x223   : > { %v4774_v42 = vor.u32 %v4773_v24, %v8919_v9  ;;  %v4808_v6 = vrot.slane %v4806_v63, 4  ;;  %v4811_v36 = vrot.slane %v4809_v22, 5  ;;  %v728_v24 = vld [vmem:[#allocation2 + $0xd4] sm:$0x1]  ;;  %v4770_v33 = vsel %vm7918_vm9, %v8941_v62, %v8919_v9 }
 0x224   : > { %v4836_v37 = vor.u32 %v4835_v27, %v4832_v59  ;;  %v4823_v63 = vrot.slane %v4822_v50, 4  ;;  %v4878_v9 = vshrl.u32 %v4661_v53, 16  ;;  %v729_v57 = vsel %vm7869_vm5, 0, %v728_v24 }
 0x225   : > { %v4775_v48 = vrot.slane %v4774_v42, 4  ;;  %730 = vst [vmem:[#allocation2 + $0xd4] sm:$0x1] %v729_v57  ;;  %v4827_v42 = vrot.slane %v4825_v28, 5  ;;  %v5447_v57 = vrot.slane %v8872_v60, 5 }
 0x226   : > { %v8997_v50 = vrot.slane %v4878_v9, 4  ;;  %v5380_v9 = vld [vmem:[#allocation2 + $0xb4] sm:$0xe] }
 0x229   : > { %7222 = vmatmul.mubr.msk.bf16.gmra.mrb[0].mxu1 %vm1742_vm10, %v7652_v11  ;;  %v4839_v11 = vshll.u32 %v8924_v35, 16 }
 0x22a   : > { %7225 = vmatprep.mubr.msk.bf16.mxu1 %vm1742_vm10, %v7653_v10  ;;  %v4756_v10 = vsel %vm7918_vm9, %v4751_v14, %v4755_v56  ;;  %v4801_v56 = vshll.u32 %v8946_v43, 16  ;;  %v4867_v14 = vshrl.u32 %v8949_v40, 16 }
 0x22b   : > { %v8953_v26 = vcombine.low %v4746_v29, %v4756_v10  ;;  %v8956_v8 = vrot.slane %v4839_v11, 5  ;;  %v8971_v29 = vld [vmem:[#allocation2 + $0x74] sm:$0x1]  ;;  %v8975_v11 = vrot.slane %v4863_v23, 5  ;;  %v4780_v10 = vsel %vm7918_vm9, %v4775_v48, %v8944_v2 }
 0x22c   : > { %v4803_v13 = vrot.slane %v4801_v56, 5  ;;  %v4869_v17 = vrot.slane %v4867_v14, 4  ;;  %v4873_v27 = vshll.u32 %v8971_v29, 16  ;;  %v4828_v2 = vsel %vm7918_vm9, %v4823_v63, %v4827_v42  ;;  %v9004_v14 = vld [vmem:[#allocation2 + $0x84] sm:$0xf] }
 0x22d   : > { %v4846_v22 = vor.u32 %v4845_v41, %v8956_v8  ;;  %v7658_v41 = vld [vmem:[#allocation2 + $0xb4] sm:$0xff]   ;;  %v9000_v48 = vrot.slane %v4881_v55, 5  ;;  %v4887_v56 = vshll.u32 %v8981_v15, 16  ;;  %v4891_v23 = vshrl.u32 %v8981_v15, 16  ;;  %v5379_v42 = vld [vmem:[#allocation2 + $0xa8] sm:$0xe] }
 0x22e   : > { %v4870_v53 = vor.u32 %v4869_v17, %v8975_v11  ;;  %v9006_v24 = vcombine.low %v4770_v33, %v4780_v10  ;;  %v9024_v33 = vrot.slane %v4873_v27, 5  ;;  %v5370_v27 = vld [vmem:[#allocation2 + $0x3c] sm:$0xe] }
 0x22f   : > { %v8993_v19 = vrot.slane %v4846_v22, 4  ;;  %v9034_v22 = vld [vmem:[#allocation2 + $0x88] sm:$0xf]  ;;  %v9044_v55 = vrot.slane %v4887_v56, 5  ;;  %v9046_v10 = vrot.slane %v4891_v23, 4  ;;  %v6676_v63 = vrot.slane %v5370_v27, 9 }
 0x230   : > { %v5373_v56 = vld [vmem:[#allocation2 + $0x60] sm:$0xe] }
 0x231   : > { %7226 = vmatmul.mubr.msk.bf16.gmra.mrb[4].mxu1 %vm1742_vm10, %v7654_v31  ;;  %v4812_v31 = vor.u32 %v4811_v36, %v4808_v6  ;;  %v4804_v6 = vsel %vm7918_vm9, %v4799_v61, %v4803_v13  ;;  %v8985_v36 = vrot.slane %v4836_v37, 4  ;;  %v9040_v13 = vrot.slane %v4870_v53, 4  ;;  %v9125_v61 = vld [vmem:[#allocation2 + $0xac] sm:$0xf] }
 0x232   : > { %7229 = vmatprep.mubr.msk.bf16.mxu1 %vm1742_vm10, %v7655_v18  ;;  %v4856_v18 = vrot.slane %v4854_v21, 4  ;;  %v4794_v21 = vsel %vm7918_vm9, %v4789_v39, %v8926_v20  ;;  %v7659_v20 = vld [vmem:[#allocation2 + $0xc0] sm:$0xff]   ;;  %v5454_v53 = vrot.slane %v8891_v32, 5  ;;  %v5372_v32 = vld [vmem:[#allocation2 + $0x54] sm:$0xe] }
 0x233   : > { %v4813_v62 = vrot.slane %v4812_v31, 4  ;;  %v9013_v31 = vrot.slane %v4849_v25, 5  ;;  %v6678_v27 = vrot.slane %v5372_v32, 9  ;;  %v5375_v32 = vld [vmem:[#allocation2 + $0x78] sm:$0xe] }
 0x234   : > { %v4860_v59 = vor.u32 %v4859_v7, %v4856_v18  ;;  %v9026_v18 = vld [vmem:[#allocation2 + $0x90] sm:$0xf] }
 0x235   : > { %v4818_v39 = vsel %vm7918_vm9, %v4813_v62, %v8935_v16  ;;  %v5369_v7 = vld [vmem:[#allocation2 + $0x30] sm:$0xe]  ;;  %v5371_v62 = vld [vmem:[#allocation2 + $0x48] sm:$0xe]  ;;  %v5456_v16 = vrot.slane %v5454_v53, 4 }
 0x236   : > { %v9016_v28 = vcombine.low %v4818_v39, %v4828_v2  ;;  %v9022_v37 = vrot.slane %v4860_v59, 4  ;;  %v6675_v25 = vrot.slane %v5369_v7, 9  ;;  %v5450_v59 = vrot.slane %v8886_v1, 5  ;;  %v5377_v7 = vld [vmem:[#allocation2 + $0x90] sm:$0xe] }
 0x237   : > { %v5461_v1 = vrot.slane %v8898_v3, 5  ;;  %v6677_v17 = vrot.slane %v5371_v62, 9  ;;  %v9072_v3 = vsel %vm8617_vm1, %v6676_v63, %v5454_v53  ;;  %v5464_v62 = vrot.slane %v8946_v43, 5  ;;  %v5374_v53 = vld [vmem:[#allocation2 + $0x6c] sm:$0xe] }
 0x238   : > { %v9057_v23 = vsel %vm8617_vm1, %v6675_v25, %v5447_v57  ;;  %v5475_v63 = vrot.slane %v8924_v35, 5  ;;  %v5478_v35 = vrot.slane %v8967_v51, 5  ;;  %v9151_v39 = vld [vmem:[#allocation2 + $0xb0] sm:$0x1] }
 0x239   : > { %7230 = vmatmul.mubr.msk.bf16.gmra.mrb[8].mxu1 %vm1742_vm10, %v7656_v5  ;;  %v8995_v5 = vld [vmem:[#allocation2 + $0x80] sm:$0x1]  ;;  %v5463_v25 = vrot.slane %v5461_v1, 4 }
 0x23a   : > { %7233 = vmatprep.mubr.msk.bf16.mxu1 %vm1742_vm10, %v7657_v34  ;;  %v9008_v34 = vcombine.low %v4794_v21, %v4804_v6  ;;  %v5449_v6 = vrot.slane %v5447_v57, 4  ;;  %v7660_v21 = vld [vmem:[#allocation2 + $0xcc] sm:$0xff]   ;;  %v5457_v57 = vrot.slane %v8913_v49, 5 }
 0x23b   : > { %v9092_v43 = vsel %vm8617_vm1, %v5463_v25, %v5464_v62  ;;  %v5482_v62 = vrot.slane %v8949_v40, 5 }
 0x23c   : > { %v9084_v49 = vsel %vm8617_vm1, %v5456_v16, %v5457_v57 }
 0x23d   : > { %v5484_v40 = vrot.slane %v5482_v62, 4 }
 0x241   : > { %7234 = vmatmul.mubr.msk.bf16.gmra.mrb[12].mxu1 %vm1742_vm10, %v7658_v41  ;;  %v9159_v41 = vld [vmem:[#allocation2 + $0xc4] sm:$0xf] }
 0x242   : > { %7237 = vmatprep.mubr.msk.bf16.mxu1 %vm1742_vm10, %v7659_v20  ;;  %v9061_v20 = vsel %vm8617_vm1, %v5449_v6, %v5450_v59  ;;  %v9076_v6 = vsel %vm8617_vm1, %v6677_v17, %v5461_v1  ;;  %v5468_v59 = vrot.slane %v8906_v30, 5  ;;  %v6679_v1 = vrot.slane %v5373_v56, 9  ;;  %v9110_v17 = vld [vmem:[#allocation2 + $0x8c] sm:$0x1] }
 0x243   : > { %v6680_v56 = vrot.slane %v5374_v53, 9  ;;  %v9791_v54 = vcombine.low %v9076_v6, %v9092_v43 }
 0x244   : > { %v5470_v30 = vrot.slane %v5468_v59, 4  ;;  %v9098_v16 = vsel %vm8617_vm1, %v6678_v27, %v5468_v59  ;;  %v9107_v25 = vsel %vm8617_vm1, %v6679_v1, %v5475_v63  ;;  %v9112_v59 = vld [vmem:[#allocation2 + $0x98] sm:$0x1]  ;;  %v5492_v1 = vrot.slane %v8995_v5, 5 }
 0x245   : > { %9762 = vst [vmem:[#allocation5_spill] sm:$0xff] %v9107_v25  ;;  %v9129_v51 = vsel %vm8617_vm1, %v6680_v56, %v5482_v62  ;;  %v5499_v56 = vrot.slane %v9110_v17, 5  ;;  %v5503_v62 = vrot.slane %v9037_v12, 5  ;;  %v5506_v60 = vrot.slane %v9112_v59, 5 }
 0x246   : > { %9764 = vst [vmem:[#allocation8_spill] sm:$0xff] %v9129_v51  ;;  %v5381_v51 = vld [vmem:[#allocation2 + $0xc0] sm:$0xe] }
 0x247   : > { %v5505_v2 = vrot.slane %v5503_v62, 4 }
 0x249   : > { %7238 = vmatmul.mubr.msk.bf16.gmra.mrb[16].mxu1 %vm1742_vm10, %v7660_v21  ;;  %v5471_v21 = vrot.slane %v8951_v52, 5  ;;  %v5477_v52 = vrot.slane %v5475_v63, 4  ;;  %v5489_v63 = vrot.slane %v8981_v15, 5  ;;  %v9134_v15 = vld [vmem:[#allocation2 + $0xa0] sm:$0xf] }
 0x24a   : > { %7243 = vmatprep.mubr.msk.bf16.mxu1 %vm1742_vm10, %v8908_v47  ;;  %v5376_v47 = vld [vmem:[#allocation2 + $0x84] sm:$0xe] }
 0x24b   : > { %v9103_v57 = vsel %vm8617_vm1, %v5470_v30, %v5471_v21  ;;  %v9118_v27 = vsel %vm8617_vm1, %v5477_v52, %v5478_v35  ;;  %v5485_v21 = vrot.slane %v8971_v29, 5  ;;  %v6681_v30 = vrot.slane %v5375_v32, 9 }
 0x24c   : > { %9763 = vst [vmem:[#allocation7_spill] sm:$0xff] %v9118_v27  ;;  %v5491_v52 = vrot.slane %v5489_v63, 4  ;;  %v6682_v35 = vrot.slane %v5376_v47, 9  ;;  %v5496_v29 = vrot.slane %v9034_v22, 5  ;;  %v5378_v47 = vld [vmem:[#allocation2 + $0x9c] sm:$0xe]  ;;  %v9792_v38 = vcombine.low %v9098_v16, %v9103_v57 }
 0x24d   : > { %v9138_v32 = vsel %vm8617_vm1, %v5484_v40, %v5485_v21  ;;  %v9142_v53 = vsel %vm8617_vm1, %v6681_v30, %v5489_v63  ;;  %v6683_v30 = vrot.slane %v5377_v7, 9  ;;  %v9168_v21 = vld [vmem:[#allocation2 + $0xb8] sm:$0xf] }
 0x24e   : > { %9765 = vst [vmem:[#allocation6_spill] sm:$0xff] %v9138_v32  ;;  %9766 = vst [vmem:[#allocation9_spill] sm:$0xff] %v9142_v53  ;;  %v9157_v63 = vsel %vm8617_vm1, %v5491_v52, %v5492_v1  ;;  %v5498_v40 = vrot.slane %v5496_v29, 4  ;;  %v6684_v52 = vrot.slane %v5378_v47, 9  ;;  %v9187_v53 = vsel %vm8617_vm1, %v5505_v2, %v5506_v60  ;;  %v5382_v2 = vld [vmem:[#allocation2 + $0xcc] sm:$0xe] }
 0x24f   : > { %9767 = vst [vmem:[#allocation3_spill] sm:$0xff] %v9157_v63  ;;  %v9176_v7 = vsel %vm8617_vm1, %v6683_v30, %v5503_v62  ;;  %9771 = vst [vmem:[#allocation12_spill] sm:$0xff] %v9187_v53  ;;  %v5517_v62 = vrot.slane %v9125_v61, 5  ;;  %v6685_v30 = vrot.slane %v5379_v42, 9  ;;  %v5520_v32 = vrot.slane %v9151_v39, 5 }
 0x250   : > { %v9172_v1 = vsel %vm8617_vm1, %v5498_v40, %v5499_v56  ;;  %9770 = vst [vmem:[#allocation11_spill] sm:$0xff] %v9176_v7  ;;  %v5524_v60 = vrot.slane %v9168_v21, 5  ;;  %v5531_v53 = vrot.slane %v9159_v41, 5  ;;  %v6688_v25 = vrot.slane %v5382_v2, 9 }
 0x251   : > { %7244 = vmatmul.mubr.msk.bf16.vlgmr.msra.gmra.mrb[20].mxu1 %vm1742_vm10, %v8929_v45  ;;  %v9149_v45 = vld [vmem:[#allocation2 + $0xa4] sm:$0x1]  ;;  %9769 = vst [vmem:[#allocation10_spill] sm:$0xff] %v9172_v1  ;;  %v5519_v63 = vrot.slane %v5517_v62, 4  ;;  %v6686_v1 = vrot.slane %v5380_v9, 9  ;;  %v9205_v47 = vsel %vm8617_vm1, %v6685_v30, %v5517_v62  ;;  %v9778_v30 = vshll.u32 %v9004_v14, 16 }
 0x252   : > { %7276 = vmatpush3.bf16.msra.mxu1 %v8848_v44  ;;  %7247 = vmatprep.mubr.msk.bf16.mxu1 %vm1742_vm10, %v8953_v26  ;;  %v9165_v26 = vsel %vm8617_vm1, %v6682_v35, %v5496_v29  ;;  %v5510_v44 = vrot.slane %v9134_v15, 5  ;;  %v9179_v35 = vld [vmem:[#allocation2 + $0xbc] sm:$0x1]  ;;  %v9181_v29 = vld [vmem:[#allocation2 + $0xc8] sm:$0x1]  ;;  %v5513_v56 = vrot.slane %v9149_v45, 5 }
 0x253   : > { %9768 = vst [vmem:[#allocation4_spill] sm:$0xff] %v9165_v26  ;;  %v5527_v42 = vrot.slane %v9179_v35, 5  ;;  %v9221_v62 = vld [vmem:[#allocation2 + $0xd4] sm:$0x1]  ;;  %v5534_v7 = vrot.slane %v9181_v29, 5  ;;  %v9228_v9 = vsel %vm8617_vm1, %v6686_v1, %v5524_v60 }
 0x254   : > { %v5512_v40 = vrot.slane %v5510_v44, 4  ;;  %v9196_v27 = vsel %vm8617_vm1, %v6684_v52, %v5510_v44  ;;  %v9211_v44 = vld [vmem:[#allocation2 + $0xd0] sm:$0xf]  ;;  %v9217_v52 = vsel %vm8617_vm1, %v5519_v63, %v5520_v32  ;;  %9773 = vst [vmem:[#allocation14_spill] sm:$0xff] %v9228_v9  ;;  %v9775_v63 = vshrl.u32 %v9004_v14, 16 }
 0x255   : > { %v9784_v14 = vshrl.u32 %v9037_v12, 16 }
 0x256   : > { %v9201_v26 = vsel %vm8617_vm1, %v5512_v40, %v5513_v56  ;;  %v5526_v56 = vrot.slane %v5524_v60, 4  ;;  %v6687_v40 = vrot.slane %v5381_v51, 9  ;;  %v5538_v51 = vrot.slane %v9211_v44, 5 }
 0x257   : > { %9772 = vst [vmem:[#allocation13_spill] sm:$0xff] %v9201_v26  ;;  %v4904_v26 = vrot.slane %v9775_v63, 4  ;;  %v4894_v60 = vor.u32 %v9046_v10, %v9044_v55  ;;  %v9781_v10 = vshrl.u32 %v9026_v18, 16  ;;  %v9805_v57 = vld [vmem:[#allocation11_spill] sm:$0xff] }
 0x258   : > { %v9232_v32 = vsel %vm8617_vm1, %v5526_v56, %v5527_v42  ;;  %v9242_v2 = vsel %vm8617_vm1, %v6687_v40, %v5531_v53  ;;  %v9254_v56 = vsel %vm8617_vm1, %v6688_v25, %v5538_v51  ;;  %v5540_v63 = vrot.slane %v5538_v51, 4  ;;  %v4670_v51 = vld [vmem:[#allocation2 + $0x9c] sm:$0xf] }
 0x259   : > { %7248 = vmatmul.mubr.msk.bf16.gmra.mrb[24].mxu1 %vm1742_vm10, %v9006_v24  ;;  %v5533_v24 = vrot.slane %v5531_v53, 4  ;;  %9774 = vst [vmem:[#allocation15_spill] sm:$0xff] %v9232_v32  ;;  %9776 = vst [vmem:[#allocation16_spill] sm:$0xff] %v9242_v2  ;;  %v4907_v32 = vrot.slane %v9778_v30, 5  ;;  %v9779_v53 = vshll.u32 %v9034_v22, 16  ;;  %v4928_v9 = vrot.slane %v9781_v10, 4 }
 0x25a   : > { %7251 = vmatprep.mubr.msk.bf16.mxu1 %vm1742_vm10, %v9008_v34  ;;  %v5541_v34 = vrot.slane %v9221_v62, 5  ;;  %v9782_v42 = vshll.u32 %v9026_v18, 16  ;;  %v9783_v25 = vshll.u32 %v9037_v12, 16  ;;  %v4941_v30 = vrot.slane %v9784_v14, 4  ;;  %v9802_v43 = vld [vmem:[#allocation4_spill] sm:$0xff] }
 0x25b   : > { %v9246_v1 = vsel %vm8617_vm1, %v5533_v24, %v5534_v7  ;;  %v9260_v40 = vrot.slane %v9779_v53, 5  ;;  %v9780_v7 = vshrl.u32 %v9034_v22, 16  ;;  %v9785_v22 = vsel %vm7918_vm9, %v8993_v19, %v9013_v31 }
 0x25c   : > { %9777 = vst [vmem:[#allocation17_spill] sm:$0xff] %v9246_v1  ;;  %v4931_v1 = vrot.slane %v9782_v42, 5  ;;  %v9270_v2 = vrot.slane %v9783_v25, 5  ;;  %v9276_v53 = vsel %vm8617_vm1, %v5540_v63, %v5541_v34  ;;  %v9786_v18 = vsel %vm7918_vm9, %v8985_v36, %v8956_v8 }
 0x25d   : > { %v4917_v24 = vrot.slane %v9780_v7, 4  ;;  %v6646_v42 = vcombine.low %v9786_v18, %v9785_v22  ;;  %v4876_v12 = vsel %vm7918_vm9, %v9040_v13, %v9024_v33  ;;  %v9787_v34 = vor.u32 %v9000_v48, %v8997_v50 }
 0x25e   : > { %v6706_v7 = vcombine.low %v9254_v56, %v9276_v53  ;;  %v4866_v8 = vsel %vm7918_vm9, %v9022_v37, %v8975_v11  ;;  %v4895_v36 = vrot.slane %v4894_v60, 4  ;;  %v4908_v19 = vor.u32 %v4907_v32, %v4904_v26  ;;  %v4673_v32 = vld [vmem:[#allocation2 + $0xa8] sm:$0xf] }
 0x25f   : > { %v4885_v63 = vrot.slane %v9787_v34, 4  ;;  %v4918_v31 = vor.u32 %v4917_v24, %v9260_v40  ;;  %v4950_v33 = vshrl.u32 %v4670_v51, 16  ;;  %v4953_v50 = vshll.u32 %v4670_v51, 16 }
 0x260   : > { %v6647_v48 = vcombine.low %v4866_v8, %v4876_v12  ;;  %v9788_v13 = vshll.u32 %v8995_v5, 16  ;;  %v4932_v25 = vor.u32 %v4931_v1, %v4928_v9  ;;  %v4921_v11 = vshll.u32 %v9110_v17, 16 }
 0x261   : > { %7252 = vmatmul.mubr.msk.bf16.gmra.mrb[28].mxu1 %vm1742_vm10, %v9016_v28  ;;  %v4942_v28 = vor.u32 %v4941_v30, %v9270_v2  ;;  %v4890_v14 = vsel %vm7918_vm9, %v4885_v63, %v9044_v55  ;;  %v4959_v37 = vshll.u32 %v9134_v15, 16  ;;  %v4963_v26 = vshrl.u32 %v9134_v15, 16 }
 0x262   : > { %7255 = vmatprep.mubr.msk.bf16.mxu1 %vm1742_vm10, %v6646_v42  ;;  %v4899_v10 = vrot.slane %v9788_v13, 5  ;;  %v4945_v5 = vshll.u32 %v9112_v59, 16  ;;  %v4983_v9 = vshll.u32 %v9125_v61, 16  ;;  %v4987_v1 = vshrl.u32 %v9125_v61, 16  ;;  %v4676_v61 = vld [vmem:[#allocation2 + $0xb4] sm:$0xf] }
 0x263   : > { %v4909_v24 = vrot.slane %v4908_v19, 4  ;;  %v4919_v30 = vrot.slane %v4918_v31, 4  ;;  %v4952_v51 = vrot.slane %v4950_v33, 4  ;;  %v4955_v55 = vrot.slane %v4953_v50, 5 }
 0x264   : > { %v4900_v60 = vsel %vm7918_vm9, %v4895_v36, %v4899_v10  ;;  %v4933_v22 = vrot.slane %v4932_v25, 4  ;;  %v4943_v17 = vrot.slane %v4942_v28, 4  ;;  %v4974_v18 = vshrl.u32 %v4673_v32, 16 }
 0x265   : > { %v4977_v42 = vshll.u32 %v4673_v32, 16  ;;  %v6648_v12 = vcombine.low %v4890_v14, %v4900_v60  ;;  %v4923_v15 = vrot.slane %v4921_v11, 5  ;;  %v9319_v34 = vrot.slane %v4959_v37, 5  ;;  %v4679_v37 = vld [vmem:[#allocation2 + $0xc0] sm:$0xf] }
 0x266   : > { %v4965_v63 = vrot.slane %v4963_v26, 4  ;;  %v4947_v59 = vrot.slane %v4945_v5, 5  ;;  %v9322_v8 = vrot.slane %v4983_v9, 5  ;;  %v4989_v36 = vrot.slane %v4987_v1, 4 }
 0x267   : > { %v4914_v19 = vsel %vm7918_vm9, %v4909_v24, %v9260_v40  ;;  %v4924_v31 = vsel %vm7918_vm9, %v4919_v30, %v4923_v15  ;;  %v4956_v33 = vor.u32 %v4955_v55, %v4952_v51  ;;  %v4969_v50 = vshll.u32 %v9149_v45, 16 }
 0x268   : > { %v4948_v13 = vsel %vm7918_vm9, %v4943_v17, %v4947_v59  ;;  %v4976_v10 = vrot.slane %v4974_v18, 4  ;;  %v4979_v25 = vrot.slane %v4977_v42, 5  ;;  %v4966_v28 = vor.u32 %v4965_v63, %v9319_v34 }
 0x269   : > { %7256 = vmatmul.mubr.msk.bf16.gmra.mrb[0].mxu1 %vm1742_vm10, %v6647_v48  ;;  %v4938_v48 = vsel %vm7918_vm9, %v4933_v22, %v9270_v2  ;;  %v4998_v14 = vshrl.u32 %v4676_v61, 16  ;;  %v5007_v40 = vshll.u32 %v9168_v21, 16  ;;  %v5011_v11 = vshrl.u32 %v9168_v21, 16  ;;  %v4682_v22 = vld [vmem:[#allocation2 + $0xcc] sm:$0xf] }
 0x26a   : > { %7259 = vmatprep.mubr.msk.bf16.mxu1 %vm1742_vm10, %v6648_v12  ;;  %v4990_v26 = vor.u32 %v4989_v36, %v9322_v8  ;;  %v5001_v45 = vshll.u32 %v4676_v61, 16  ;;  %v5031_v32 = vshll.u32 %v9159_v41, 16  ;;  %v5035_v2 = vshrl.u32 %v9159_v41, 16 }
 0x26b   : > { %v6649_v60 = vcombine.low %v4914_v19, %v4924_v31  ;;  %v6650_v5 = vcombine.low %v4938_v48, %v4948_v13  ;;  %v4957_v9 = vrot.slane %v4956_v33, 4  ;;  %v4971_v1 = vrot.slane %v4969_v50, 5 }
 0x26c   : > { %v4980_v24 = vor.u32 %v4979_v25, %v4976_v10  ;;  %v4993_v30 = vshll.u32 %v9151_v39, 16  ;;  %v5022_v51 = vshrl.u32 %v4679_v37, 16  ;;  %v5025_v55 = vshll.u32 %v4679_v37, 16 }
 0x26d   : > { %v4967_v17 = vrot.slane %v4966_v28, 4  ;;  %v5000_v21 = vrot.slane %v4998_v14, 4  ;;  %v5009_v18 = vrot.slane %v5007_v40, 5  ;;  %v5013_v42 = vrot.slane %v5011_v11, 4 }
 0x26e   : > { %v4991_v12 = vrot.slane %v4990_v26, 4  ;;  %v5003_v15 = vrot.slane %v5001_v45, 5  ;;  %v5033_v63 = vrot.slane %v5031_v32, 5  ;;  %v5037_v41 = vrot.slane %v5035_v2, 4 }
 0x26f   : > { %v5046_v59 = vshrl.u32 %v4682_v22, 16  ;;  %v5049_v36 = vshll.u32 %v4682_v22, 16  ;;  %v5055_v61 = vshll.u32 %v9211_v44, 16  ;;  %v5059_v39 = vshrl.u32 %v9211_v44, 16 }
 0x270   : > { %v4981_v19 = vrot.slane %v4980_v24, 4  ;;  %v4995_v31 = vrot.slane %v4993_v30, 5  ;;  %v5024_v33 = vrot.slane %v5022_v51, 4  ;;  %v5027_v50 = vrot.slane %v5025_v55, 5 }
 0x271   : > { %7260 = vmatmul.mubr.msk.bf16.gmra.mrb[4].mxu1 %vm1742_vm10, %v6649_v60  ;;  %v4962_v48 = vsel %vm7918_vm9, %v4957_v9, %v9319_v34  ;;  %v4972_v13 = vsel %vm7918_vm9, %v4967_v17, %v4971_v1  ;;  %v5014_v10 = vor.u32 %v5013_v42, %v5009_v18  ;;  %v5004_v28 = vor.u32 %v5003_v15, %v5000_v21  ;;  %v7662_v60 = vld [vmem:[%s9711_s5] sm:$0xff]  }
 0x272   : > { %7263 = vmatprep.mubr.msk.bf16.mxu1 %vm1742_vm10, %v6650_v5  ;;  %v4996_v25 = vsel %vm7918_vm9, %v4991_v12, %v4995_v31  ;;  %v5017_v14 = vshll.u32 %v9179_v35, 16  ;;  %v5038_v40 = vor.u32 %v5037_v41, %v5033_v63  ;;  %v5048_v44 = vrot.slane %v5046_v59, 4  ;;  %7309 = vmatprep.subr.bf16.mxu0 %v7662_v60 }
 0x273   : > { %v5051_v11 = vrot.slane %v5049_v36, 5  ;;  %v5057_v37 = vrot.slane %v5055_v61, 5  ;;  %v5061_v26 = vrot.slane %v5059_v39, 4  ;;  %v6651_v45 = vcombine.low %v4962_v48, %v4972_v13  ;;  %7310 = vmatpush3.bf16.msra.mxu0 %v7662_v60  ;;  %v9808_v60 = vld [vmem:[#allocation13_spill] sm:$0xff] }
 0x274   : > { %v4986_v34 = vsel %vm7918_vm9, %v4981_v19, %v9322_v8  ;;  %v5028_v32 = vor.u32 %v5027_v50, %v5024_v33  ;;  %v5041_v2 = vshll.u32 %v9181_v29, 16  ;;  %v5015_v9 = vrot.slane %v5014_v10, 4 }
 0x275   : > { %v6652_v5 = vcombine.low %v4986_v34, %v4996_v25  ;;  %v5019_v35 = vrot.slane %v5017_v14, 5  ;;  %v5039_v1 = vrot.slane %v5038_v40, 4  ;;  %v5005_v24 = vrot.slane %v5004_v28, 4  ;;  %v5368_v25 = vld [vmem:[#allocation2 + $0x24] sm:$0xe]  ;;  %v9803_v34 = vld [vmem:[#allocation10_spill] sm:$0xff] }
 0x276   : > { %v5052_v30 = vor.u32 %v5051_v11, %v5048_v44  ;;  %v5062_v51 = vor.u32 %v5061_v26, %v5057_v37  ;;  %v5065_v8 = vshll.u32 %v9221_v62, 16  ;;  %v5029_v29 = vrot.slane %v5028_v32, 4  ;;  %v9793_v11 = vld [vmem:[#allocation5_spill] sm:$0xff]  ;;  %v9797_v26 = vld [vmem:[#allocation6_spill] sm:$0xff]  ;;  %v9806_v32 = vld [vmem:[#allocation12_spill] sm:$0xff] }
 0x277   : > { %v5043_v55 = vrot.slane %v5041_v2, 5  ;;  %v5020_v22 = vsel %vm7918_vm9, %v5015_v9, %v5019_v35  ;;  %v5433_v21 = vrot.slane %v8856_v4, 5  ;;  %v5010_v42 = vsel %vm7918_vm9, %v5005_v24, %v5009_v18  ;;  %v5367_v18 = vld [vmem:[#allocation2 + $0x18] sm:$0xe] }
 0x278   : > { %v5053_v12 = vrot.slane %v5052_v30, 4  ;;  %v5063_v15 = vrot.slane %v5062_v51, 4  ;;  %v5067_v41 = vrot.slane %v5065_v8, 5  ;;  %v6653_v59 = vcombine.low %v5010_v42, %v5020_v22  ;;  %v9811_v51 = vld [vmem:[#allocation14_spill] sm:$0xff]  ;;  %v9812_v8 = vld [vmem:[#allocation15_spill] sm:$0xff] }
 0x279   : > { %7264 = vmatmul.mubr.msk.bf16.gmra.mrb[8].mxu1 %vm1742_vm10, %v6651_v45  ;;  %v5044_v17 = vsel %vm7918_vm9, %v5039_v1, %v5043_v55  ;;  %v5034_v62 = vsel %vm7918_vm9, %v5029_v29, %v5033_v63  ;;  %v5435_v61 = vrot.slane %v5433_v21, 4  ;;  %v5436_v19 = vrot.slane %v8868_v0, 5  ;;  %v9800_v45 = vld [vmem:[#allocation3_spill] sm:$0xff]  ;;  %v9815_v55 = vld [vmem:[#allocation17_spill] sm:$0xff] }
 0x27a   : > { %7267 = vmatprep.mubr.msk.bf16.mxu1 %vm1742_vm10, %v6652_v5  ;;  %v6654_v36 = vcombine.low %v5034_v62, %v5044_v17  ;;  %v5058_v39 = vsel %vm7918_vm9, %v5053_v12, %v5057_v37  ;;  %v5068_v4 = vsel %vm7918_vm9, %v5063_v15, %v5067_v41  ;;  %v5440_v31 = vrot.slane %v8864_v58, 5  ;;  %v9794_v37 = vld [vmem:[#allocation7_spill] sm:$0xff] }
 0x27b   : > { %v6655_v33 = vcombine.low %v5058_v39, %v5068_v4  ;;  %v6673_v50 = vrot.slane %v5367_v18, 9  ;;  %v5437_v63 = vsel %vm8617_vm1, %v5435_v61, %v5436_v19  ;;  %v6674_v0 = vrot.slane %v5368_v25, 9 }
 0x27c   : > { %v5442_v10 = vrot.slane %v5440_v31, 4  ;;  %v9789_v40 = vcombine.low %v9057_v23, %v9061_v20  ;;  %v9790_v44 = vcombine.low %v9072_v3, %v9084_v49  ;;  %v9795_v23 = vcombine.low %v9793_v11, %v9794_v37  ;;  %v9796_v20 = vld [vmem:[#allocation8_spill] sm:$0xff]  ;;  %v9799_v49 = vld [vmem:[#allocation9_spill] sm:$0xff] }
 0x27d   : > { %v5434_v48 = vsel %vm8617_vm1, %v6673_v50, %v5433_v21  ;;  %v5441_v28 = vsel %vm8617_vm1, %v6674_v0, %v5440_v31  ;;  %v9798_v3 = vcombine.low %v9796_v20, %v9797_v26  ;;  %v9801_v6 = vcombine.low %v9799_v49, %v9800_v45 }
 0x27e   : > { %v6691_v13 = vcombine.low %v5434_v48, %v5437_v63  ;;  %v5444_v58 = vsel %vm8617_vm1, %v5442_v10, %v5443_v46  ;;  %v9804_v16 = vcombine.low %v9802_v43, %v9803_v34  ;;  %v9807_v2 = vcombine.low %v9805_v57, %v9806_v32 }
 0x27f   : > { %v6692_v14 = vcombine.low %v5441_v28, %v5444_v58  ;;  %v9809_v5 = vcombine.low %v9196_v27, %v9808_v60  ;;  %v9810_v9 = vcombine.low %v9205_v47, %v9217_v52  ;;  %v9813_v29 = vcombine.low %v9811_v51, %v9812_v8  ;;  %v9814_v27 = vld [vmem:[#allocation16_spill] sm:$0xff] }
 0x280   : > { %v9816_v22 = vcombine.low %v9814_v27, %v9815_v55  ;;  %v9493_v58 = vld [vmem:[%s9710_s4] ss:$0 sm:$0xff] }
 0x281   : > { %7268 = vmatmul.mubr.msk.bf16.gmra.mrb[12].mxu1 %vm1742_vm10, %v6653_v59 }
 0x282   : > { %7271 = vmatprep.mubr.msk.bf16.mxu1 %vm1742_vm10, %v6654_v36 }
 0x289   : > { %7272 = vmatmul.mubr.msk.bf16.gmra.mrb[16].mxu1 %vm1742_vm10, %v6655_v33 }
 0x28a   : > { %7277 = vmatprep.mubr.msk.bf16.mxu1 %vm1742_vm10, %v6691_v13 }
 0x291   : > { %7278 = vmatmul.mubr.msk.bf16.vlgmr.msra.gmra.mrb[20].mxu1 %vm1742_vm10, %v6692_v14 }
 0x292   : > { %7281 = vmatprep.mubr.msk.bf16.mxu1 %vm1742_vm10, %v9789_v40 }
 0x299   : > { %7282 = vmatmul.mubr.msk.bf16.gmra.mrb[24].mxu1 %vm1742_vm10, %v9790_v44 }
 0x29a   : > { %7285 = vmatprep.mubr.msk.bf16.mxu1 %vm1742_vm10, %v9791_v54 }
 0x2a1   : > { %7286 = vmatmul.mubr.msk.bf16.gmra.mrb[28].mxu1 %vm1742_vm10, %v9792_v38 }
 0x2a2   : > { %7289 = vmatprep.mubr.msk.bf16.mxu1 %vm1742_vm10, %v9795_v23 }
 0x2a9   : > { %7290 = vmatmul.mubr.msk.bf16.gmra.mrb[0].mxu1 %vm1742_vm10, %v9798_v3 }
 0x2aa   : > { %7293 = vmatprep.mubr.msk.bf16.mxu1 %vm1742_vm10, %v9801_v6 }
 0x2b1   : > { %7294 = vmatmul.mubr.msk.bf16.gmra.mrb[4].mxu1 %vm1742_vm10, %v9804_v16 }
 0x2b2   : > { %7297 = vmatprep.mubr.msk.bf16.mxu1 %vm1742_vm10, %v9807_v2 }
 0x2b9   : > { %7298 = vmatmul.mubr.msk.bf16.gmra.mrb[8].mxu1 %vm1742_vm10, %v9809_v5 }
 0x2ba   : > { %7301 = vmatprep.mubr.msk.bf16.mxu1 %vm1742_vm10, %v9810_v9 }
 0x2bb   : > { %v9438_v35 = vpop.f32.mrb[44].mxu0 }
 0x2bc   : > { %v9440_v1 = vpop.f32.mrb[45].mxu0 }
 0x2bd   : > { %v9442_v24 = vpop.f32.mrb[46].mxu0 }
 0x2be   : > { %v9444_v30 = vpop.f32.mrb[47].mxu0 }
 0x2c1   : > { %7302 = vmatmul.mubr.msk.bf16.gmra.mrb[12].mxu1 %vm1742_vm10, %v9813_v29 }
 0x2c2   : > { %7305 = vmatprep.mubr.msk.bf16.mxu1 %vm1742_vm10, %v9816_v22 }
 0x2c3   : > { %v9454_v47 = vpop.f32.mrb[48].mxu0 }
 0x2c4   : > { %v9456_v52 = vpop.f32.mrb[49].mxu0 }
 0x2c5   : > { %v9458_v17 = vpop.f32.mrb[50].mxu0 }
 0x2c6   : > { %v9460_v21 = vpop.f32.mrb[51].mxu0 }
 0x2c9   : > { %7306 = vmatmul.mubr.msk.bf16.gmra.mrb[16].mxu1 %vm1742_vm10, %v6706_v7 }
 0x2cb   : > { %v9466_v42 = vpop.f32.mrb[52].mxu0 }
 0x2cc   : > { %v9468_v12 = vpop.f32.mrb[53].mxu0 }
 0x2cd   : > { %v9470_v15 = vpop.f32.mrb[54].mxu0 }
 0x2ce   : > { %v9472_v41 = vpop.f32.mrb[55].mxu0 }
 0x2d3   : > { %v9474_v59 = vpop.f32.mrb[56].mxu0 }
 0x2d4   : > { %v9476_v62 = vpop.f32.mrb[57].mxu0 }
 0x2d5   : > { %v9478_v36 = vpop.f32.mrb[58].mxu0 }
 0x2d6   : > { %v9480_v61 = vpop.f32.mrb[59].mxu0 }
 0x2db   : > { %v9482_v39 = vpop.f32.mrb[60].mxu0 }
 0x2dc   : > { %v9484_v56 = vpop.f32.mrb[61].mxu0 }
 0x2dd   : > { %v9486_v53 = vpop.f32.mrb[62].mxu0 }
 0x2de   : > { %v9488_v7 = vpop.f32.mrb[63].mxu0 }
 0x2e3   : > { %v7109_v4 = vpop.f32.mrb[32].mxu0 }
 0x2e4   : > { %v2911_v18 = vpop.f32.mrb[33].mxu0 }
 0x2e5   : > { %v7110_v19 = vpop.f32.mrb[34].mxu0 }
 0x2e6   : > { %v2914_v31 = vpop.f32.mrb[35].mxu0 }
 0x2eb   : > { %v7113_v33 = vpop.f32.mrb[36].mxu0 }
 0x2ec   : > { %v2927_v50 = vpop.f32.mrb[37].mxu0 }
 0x2ed   : > { %v7114_v63 = vpop.f32.mrb[38].mxu0 }
 0x2ee   : > { %v2930_v48 = vpop.f32.mrb[39].mxu0 }
 0x2f3   : > { %v7117_v13 = vpop.f32.mrb[40].mxu0 }
 0x2f4   : > { %v2943_v10 = vpop.f32.mrb[41].mxu0 }
 0x2f5   : > { %v7118_v25 = vpop.f32.mrb[42].mxu0 }
 0x2f6   : > { %v2946_v46 = vpop.f32.mrb[43].mxu0 }
 0x364   : > { %v7279_v0 = vpop.f32.mrb[20].mxu1 }
 0x365   : > { %v7345_v28 = vadd.f32 %v7279_v0, %v7109_v4  ;;  %v5682_v14 = vpop.f32.mrb[21].mxu1 }
 0x366   : > { %v7346_v40 = vadd.f32 %v5682_v14, %v2911_v18  ;;  %v7280_v44 = vpop.f32.mrb[22].mxu1 }
 0x367   : > { %v5850_v54 = vadd.f32 %v7345_v28, %v9493_v58  ;;  %v7347_v38 = vadd.f32 %v7280_v44, %v7110_v19  ;;  %v5685_v11 = vpop.f32.mrb[23].mxu1 }
 0x368   : > { %v5848_v37 = vadd.f32 %v7346_v40, %v9493_v58  ;;  %v7348_v23 = vadd.f32 %v5685_v11, %v2914_v31 }
 0x369   : > { %v5851_v20 = vadd.f32 %v7347_v38, %v9493_v58  ;;  %v5882_v3 = vmax.f32 %v5850_v54, 0.0 }
 0x36a   : > { %v5849_v26 = vadd.f32 %v7348_v23, %v9493_v58  ;;  %v5880_v45 = vmax.f32 %v5848_v37, 0.0 }
 0x36b   : > { %v5883_v49 = vmax.f32 %v5851_v20, 0.0 }
 0x36c   : > { %v5881_v6 = vmax.f32 %v5849_v26, 0.0  ;;  %v7283_v43 = vpop.f32.mrb[24].mxu1 }
 0x36d   : > { %v5913_v34 = vpack.c.bf16 %v5883_v49, %v5882_v3  ;;  %v7349_v16 = vadd.f32 %v7283_v43, %v7113_v33  ;;  %v5698_v57 = vpop.f32.mrb[25].mxu1 }
 0x36e   : > { %v5912_v32 = vpack.c.bf16 %v5881_v6, %v5880_v45  ;;  %v7350_v2 = vadd.f32 %v5698_v57, %v2927_v50  ;;  %v7284_v60 = vpop.f32.mrb[26].mxu1 }
 0x36f   : > { %v5854_v5 = vadd.f32 %v7349_v16, %v9493_v58  ;;  %v7351_v9 = vadd.f32 %v7284_v60, %v7114_v63  ;;  %v5701_v51 = vpop.f32.mrb[27].mxu1 }
 0x370   : > { %v5852_v8 = vadd.f32 %v7350_v2, %v9493_v58  ;;  %v7352_v29 = vadd.f32 %v5701_v51, %v2930_v48  ;;  %7311 = vmatprep.mubr.msk.bf16.mxu0 %vm1742_vm10, %v5912_v32 }
 0x371   : > { %v5855_v27 = vadd.f32 %v7351_v9, %v9493_v58  ;;  %7312 = vmatmul.mubr.msk.bf16.vlgmr.msra.gmra.mrb[64].mxu0 %vm1742_vm10, %v5913_v34  ;;  %v5886_v22 = vmax.f32 %v5854_v5, 0.0 }
 0x372   : > { %v5853_v55 = vadd.f32 %v7352_v29, %v9493_v58  ;;  %v5884_v18 = vmax.f32 %v5852_v8, 0.0 }
 0x373   : > { %v5887_v4 = vmax.f32 %v5855_v27, 0.0 }
 0x374   : > { %v5885_v19 = vmax.f32 %v5853_v55, 0.0  ;;  %v7287_v31 = vpop.f32.mrb[28].mxu1 }
 0x375   : > { %v5915_v33 = vpack.c.bf16 %v5887_v4, %v5886_v22  ;;  %v7353_v50 = vadd.f32 %v7287_v31, %v7117_v13  ;;  %v5714_v63 = vpop.f32.mrb[29].mxu1 }
 0x376   : > { %v5914_v0 = vpack.c.bf16 %v5885_v19, %v5884_v18  ;;  %v7354_v28 = vadd.f32 %v5714_v63, %v2943_v10  ;;  %v7288_v14 = vpop.f32.mrb[30].mxu1 }
 0x377   : > { %v5858_v48 = vadd.f32 %v7353_v50, %v9493_v58  ;;  %v7355_v40 = vadd.f32 %v7288_v14, %v7118_v25  ;;  %v5717_v44 = vpop.f32.mrb[31].mxu1 }
 0x378   : > { %v5856_v54 = vadd.f32 %v7354_v28, %v9493_v58  ;;  %v7356_v38 = vadd.f32 %v5717_v44, %v2946_v46  ;;  %7315 = vmatprep.mubr.msk.bf16.mxu0 %vm1742_vm10, %v5914_v0 }
 0x379   : > { %v5859_v11 = vadd.f32 %v7355_v40, %v9493_v58  ;;  %7316 = vmatmul.mubr.msk.bf16.gmra.mrb[68].mxu0 %vm1742_vm10, %v5915_v33  ;;  %v5890_v13 = vmax.f32 %v5858_v48, 0.0 }
 0x37a   : > { %v5857_v37 = vadd.f32 %v7356_v38, %v9493_v58  ;;  %v5888_v20 = vmax.f32 %v5856_v54, 0.0 }
 0x37b   : > { %v5891_v23 = vmax.f32 %v5859_v11, 0.0 }
 0x37c   : > { %v5889_v10 = vmax.f32 %v5857_v37, 0.0  ;;  %v7291_v26 = vpop.f32.mrb[0].mxu1 }
 0x37d   : > { %v5917_v3 = vpack.c.bf16 %v5891_v23, %v5890_v13  ;;  %v7357_v25 = vadd.f32 %v7291_v26, %v9438_v35  ;;  %v5730_v49 = vpop.f32.mrb[1].mxu1 }
 0x37e   : > { %v5916_v45 = vpack.c.bf16 %v5889_v10, %v5888_v20  ;;  %v7358_v46 = vadd.f32 %v5730_v49, %v9440_v1  ;;  %v7292_v6 = vpop.f32.mrb[2].mxu1 }
 0x37f   : > { %v5862_v43 = vadd.f32 %v7357_v25, %v9493_v58  ;;  %v7359_v34 = vadd.f32 %v7292_v6, %v9442_v24  ;;  %v5733_v16 = vpop.f32.mrb[3].mxu1 }
 0x380   : > { %v5860_v57 = vadd.f32 %v7358_v46, %v9493_v58  ;;  %v7360_v32 = vadd.f32 %v5733_v16, %v9444_v30  ;;  %7319 = vmatprep.mubr.msk.bf16.mxu0 %vm1742_vm10, %v5916_v45 }
 0x381   : > { %v5863_v2 = vadd.f32 %v7359_v34, %v9493_v58  ;;  %7320 = vmatmul.mubr.msk.bf16.gmra.mrb[72].mxu0 %vm1742_vm10, %v5917_v3  ;;  %v5894_v60 = vmax.f32 %v5862_v43, 0.0 }
 0x382   : > { %v5861_v35 = vadd.f32 %v7360_v32, %v9493_v58  ;;  %v5892_v5 = vmax.f32 %v5860_v57, 0.0 }
 0x383   : > { %v5895_v1 = vmax.f32 %v5863_v2, 0.0 }
 0x384   : > { %v5893_v9 = vmax.f32 %v5861_v35, 0.0  ;;  %v7295_v51 = vpop.f32.mrb[4].mxu1 }
 0x385   : > { %v5919_v8 = vpack.c.bf16 %v5895_v1, %v5894_v60  ;;  %v7361_v24 = vadd.f32 %v7295_v51, %v9454_v47  ;;  %v5746_v29 = vpop.f32.mrb[5].mxu1 }
 0x386   : > { %v5918_v27 = vpack.c.bf16 %v5893_v9, %v5892_v5  ;;  %v7362_v30 = vadd.f32 %v5746_v29, %v9456_v52  ;;  %v7296_v55 = vpop.f32.mrb[6].mxu1 }
 0x387   : > { %v5866_v22 = vadd.f32 %v7361_v24, %v9493_v58  ;;  %v7363_v4 = vadd.f32 %v7296_v55, %v9458_v17  ;;  %v5749_v18 = vpop.f32.mrb[7].mxu1 }
 0x388   : > { %v5864_v19 = vadd.f32 %v7362_v30, %v9493_v58  ;;  %v7364_v31 = vadd.f32 %v5749_v18, %v9460_v21  ;;  %7323 = vmatprep.mubr.msk.bf16.mxu0 %vm1742_vm10, %v5918_v27 }
 0x389   : > { %v5867_v33 = vadd.f32 %v7363_v4, %v9493_v58  ;;  %7324 = vmatmul.mubr.msk.bf16.gmra.mrb[76].mxu0 %vm1742_vm10, %v5919_v8  ;;  %v5898_v50 = vmax.f32 %v5866_v22, 0.0 }
 0x38a   : > { %v5865_v47 = vadd.f32 %v7364_v31, %v9493_v58  ;;  %v5896_v63 = vmax.f32 %v5864_v19, 0.0 }
 0x38b   : > { %v5899_v52 = vmax.f32 %v5867_v33, 0.0 }
 0x38c   : > { %v5897_v0 = vmax.f32 %v5865_v47, 0.0  ;;  %v7299_v28 = vpop.f32.mrb[8].mxu1 }
 0x38d   : > { %v5921_v14 = vpack.c.bf16 %v5899_v52, %v5898_v50  ;;  %v7365_v17 = vadd.f32 %v7299_v28, %v9466_v42  ;;  %v5762_v48 = vpop.f32.mrb[9].mxu1 }
 0x38e   : > { %v5920_v40 = vpack.c.bf16 %v5897_v0, %v5896_v63  ;;  %v7366_v21 = vadd.f32 %v5762_v48, %v9468_v12  ;;  %v7300_v44 = vpop.f32.mrb[10].mxu1  ;;  %v7704_v63 = vld [vmem:[%s7807_s10 + $0x10] sm:$0xff] }
 0x38f   : > { %v5870_v54 = vadd.f32 %v7365_v17, %v9493_v58  ;;  %v7367_v38 = vadd.f32 %v7300_v44, %v9470_v15  ;;  %v5765_v11 = vpop.f32.mrb[11].mxu1  ;;  %v7705_v17 = vld [vmem:[%s7807_s10] sm:$0xff]  ;;  %v7706_v44 = vld [vmem:[%s7807_s10 + $0x18] sm:$0xff] }
 0x390   : > { %v5868_v37 = vadd.f32 %v7366_v21, %v9493_v58  ;;  %v7368_v13 = vadd.f32 %v5765_v11, %v9472_v41  ;;  %7327 = vmatprep.mubr.msk.bf16.mxu0 %vm1742_vm10, %v5920_v40  ;;  %v7707_v11 = vld [vmem:[%s7807_s10 + $0x8] sm:$0xff] }
 0x391   : > { %v5871_v23 = vadd.f32 %v7367_v38, %v9493_v58  ;;  %7328 = vmatmul.mubr.msk.bf16.gmra.mrb[80].mxu0 %vm1742_vm10, %v5921_v14  ;;  %v5902_v20 = vmax.f32 %v5870_v54, 0.0 }
 0x392   : > { %v5869_v42 = vadd.f32 %v7368_v13, %v9493_v58  ;;  %v5900_v10 = vmax.f32 %v5868_v37, 0.0 }
 0x393   : > { %v5903_v12 = vmax.f32 %v5871_v23, 0.0 }
 0x394   : > { %v5901_v26 = vmax.f32 %v5869_v42, 0.0  ;;  %v7303_v3 = vpop.f32.mrb[12].mxu1 }
 0x395   : > { %v5923_v25 = vpack.c.bf16 %v5903_v12, %v5902_v20  ;;  %v7369_v15 = vadd.f32 %v7303_v3, %v9474_v59  ;;  %v5778_v49 = vpop.f32.mrb[13].mxu1  ;;  %v7708_v3 = vld [vmem:[%s7807_s10 + $0x30] sm:$0xff] }
 0x396   : > { %v5922_v45 = vpack.c.bf16 %v5901_v26, %v5900_v10  ;;  %v7370_v41 = vadd.f32 %v5778_v49, %v9476_v62  ;;  %v7304_v46 = vpop.f32.mrb[14].mxu1 }
 0x397   : > { %v5874_v6 = vadd.f32 %v7369_v15, %v9493_v58  ;;  %v7371_v43 = vadd.f32 %v7304_v46, %v9478_v36  ;;  %v5781_v34 = vpop.f32.mrb[15].mxu1 }
 0x398   : > { %v5872_v16 = vadd.f32 %v7370_v41, %v9493_v58  ;;  %v7372_v57 = vadd.f32 %v5781_v34, %v9480_v61  ;;  %7331 = vmatprep.mubr.msk.bf16.mxu0 %vm1742_vm10, %v5922_v45  ;;  %v7709_v45 = vld [vmem:[%s7807_s10 + $0x20] sm:$0xff] }
 0x399   : > { %v5875_v32 = vadd.f32 %v7371_v43, %v9493_v58  ;;  %7332 = vmatmul.mubr.msk.bf16.gmra.mrb[84].mxu0 %vm1742_vm10, %v5923_v25  ;;  %v5906_v2 = vmax.f32 %v5874_v6, 0.0  ;;  %v7710_v43 = vld [vmem:[%s7807_s10 + $0x38] sm:$0xff] }
 0x39a   : > { %v5873_v59 = vadd.f32 %v7372_v57, %v9493_v58  ;;  %v5904_v35 = vmax.f32 %v5872_v16, 0.0  ;;  %v7711_v57 = vld [vmem:[%s7807_s10 + $0x28] sm:$0xff] }
 0x39b   : > { %v5907_v62 = vmax.f32 %v5875_v32, 0.0 }
 0x39c   : > { %v5905_v60 = vmax.f32 %v5873_v59, 0.0  ;;  %v7307_v1 = vpop.f32.mrb[16].mxu1 }
 0x39d   : > { %v5925_v5 = vpack.c.bf16 %v5907_v62, %v5906_v2  ;;  %v7373_v36 = vadd.f32 %v7307_v1, %v9482_v39  ;;  %v5794_v9 = vpop.f32.mrb[17].mxu1 }
 0x39e   : > { %v5924_v51 = vpack.c.bf16 %v5905_v60, %v5904_v35  ;;  %v7374_v61 = vadd.f32 %v5794_v9, %v9484_v56  ;;  %v7308_v8 = vpop.f32.mrb[18].mxu1 }
 0x39f   : > { %v5878_v24 = vadd.f32 %v7373_v36, %v9493_v58  ;;  %v7375_v29 = vadd.f32 %v7308_v8, %v9486_v53  ;;  %v5797_v27 = vpop.f32.mrb[19].mxu1  ;;  %v7712_v36 = vld [vmem:[%s7807_s10 + $0x50] sm:$0xff]  ;;  %v7713_v8 = vld [vmem:[%s7807_s10 + $0x40] sm:$0xff] }
 0x3a0   : > { %v5876_v30 = vadd.f32 %v7374_v61, %v9493_v58  ;;  %v7376_v55 = vadd.f32 %v5797_v27, %v9488_v7  ;;  %7335 = vmatprep.mubr.msk.bf16.mxu0 %vm1742_vm10, %v5924_v51  ;;  %v9566_v7 = vld [vmem:[%s9712_s6] ss:$0 sm:$0xff] }
 0x3a1   : > { %v5879_v22 = vadd.f32 %v7375_v29, %v9493_v58  ;;  %7336 = vmatmul.mubr.msk.bf16.gmra.mrb[88].mxu0 %vm1742_vm10, %v5925_v5  ;;  %v5910_v56 = vmax.f32 %v5878_v24, 0.0 }
 0x3a2   : > { %v5877_v39 = vadd.f32 %v7376_v55, %v9493_v58  ;;  %v5908_v18 = vmax.f32 %v5876_v30, 0.0  ;;  %v7714_v30 = vld [vmem:[%s7807_s10 + $0x58] sm:$0xff] }
 0x3a3   : > { %v5911_v4 = vmax.f32 %v5879_v22, 0.0 }
 0x3a4   : > { %v5909_v19 = vmax.f32 %v5877_v39, 0.0  ;;  %v7715_v39 = vld [vmem:[%s7807_s10 + $0x48] sm:$0xff] }
 0x3a5   : > { %v5927_v53 = vpack.c.bf16 %v5911_v4, %v5910_v56 }
 0x3a6   : > { %v5926_v31 = vpack.c.bf16 %v5909_v19, %v5908_v18 }
 0x3a8   : > { %7339 = vmatprep.mubr.msk.bf16.mxu0 %vm1742_vm10, %v5926_v31 }
 0x3a9   : > { %7340 = vmatmul.mubr.msk.bf16.gmra.mrb[92].mxu0 %vm1742_vm10, %v5927_v53 }
 0x444   : > { %v7313_v33 = vpop.f32.mrb[64].mxu0 }
 0x445   : > { %v6034_v58 = vadd.f32 %v7313_v33, %v9566_v7  ;;  %v6025_v47 = vpop.f32.mrb[65].mxu0 }
 0x446   : > { %v6026_v50 = vadd.f32 %v9566_v7, %v6025_v47  ;;  %v7314_v52 = vpop.f32.mrb[66].mxu0  ;;  %v7716_v47 = vld [vmem:[%s7807_s10 + $0x70] sm:$0xff] }
 0x447   : > { %v6154_v0 = vadd.f32 %v7704_v63, %v6034_v58  ;;  %v6037_v28 = vadd.f32 %v7314_v52, %v9566_v7  ;;  %v6028_v14 = vpop.f32.mrb[67].mxu0 }
 0x448   : > { %v6152_v48 = vadd.f32 %v7705_v17, %v6026_v50  ;;  %v6029_v40 = vadd.f32 %v9566_v7, %v6028_v14 }
 0x449   : > { %v6186_v21 = vmax.f32 %v6154_v0, 0.0  ;;  %v6155_v54 = vadd.f32 %v7706_v44, %v6037_v28  ;;  %v7717_v0 = vld [vmem:[%s7807_s10 + $0x60] sm:$0xff]  ;;  %v7719_v44 = vld [vmem:[%s7807_s10 + $0x68] sm:$0xff] }
 0x44a   : > { %v6184_v38 = vmax.f32 %v6152_v48, 0.0  ;;  %v6153_v37 = vadd.f32 %v7707_v11, %v6029_v40  ;;  %v7718_v48 = vld [vmem:[%s7807_s10 + $0x78] sm:$0xff] }
 0x44b   : > { %6218 = vst.msk [vmem:[%s9577_s28 + $0x10] sm:$0xff] %vm351_vm0, %v6186_v21  ;;  %v6187_v13 = vmax.f32 %v6155_v54, 0.0 }
 0x44c   : > { %6216 = vst.msk [vmem:[%s9577_s28] sm:$0xff] %vm351_vm0, %v6184_v38  ;;  %v6185_v23 = vmax.f32 %v6153_v37, 0.0  ;;  %v7317_v42 = vpop.f32.mrb[68].mxu0 }
 0x44d   : > { %6219 = vst.msk [vmem:[%s9577_s28 + $0x18] sm:$0xff] %vm351_vm0, %v6187_v13  ;;  %v6050_v20 = vadd.f32 %v7317_v42, %v9566_v7  ;;  %v6041_v12 = vpop.f32.mrb[69].mxu0 }
 0x44e   : > { %6217 = vst.msk [vmem:[%s9577_s28 + $0x8] sm:$0xff] %vm351_vm0, %v6185_v23  ;;  %v6042_v10 = vadd.f32 %v9566_v7, %v6041_v12  ;;  %v7318_v26 = vpop.f32.mrb[70].mxu0  ;;  %v7720_v12 = vld [vmem:[%s7807_s10 + $0x90] sm:$0xff] }
 0x44f   : > { %v6158_v25 = vadd.f32 %v7708_v3, %v6050_v20  ;;  %v6053_v15 = vadd.f32 %v7318_v26, %v9566_v7  ;;  %v6044_v49 = vpop.f32.mrb[71].mxu0 }
 0x450   : > { %v6156_v41 = vadd.f32 %v7709_v45, %v6042_v10  ;;  %v6045_v46 = vadd.f32 %v9566_v7, %v6044_v49 }
 0x451   : > { %v6190_v6 = vmax.f32 %v6158_v25, 0.0  ;;  %v6159_v34 = vadd.f32 %v7710_v43, %v6053_v15  ;;  %v7721_v25 = vld [vmem:[%s7807_s10 + $0x80] sm:$0xff]  ;;  %v7723_v43 = vld [vmem:[%s7807_s10 + $0x88] sm:$0xff] }
 0x452   : > { %v6188_v16 = vmax.f32 %v6156_v41, 0.0  ;;  %v6157_v32 = vadd.f32 %v7711_v57, %v6045_v46  ;;  %v7722_v41 = vld [vmem:[%s7807_s10 + $0x98] sm:$0xff] }
 0x453   : > { %6222 = vst.msk [vmem:[%s9577_s28 + $0x30] sm:$0xff] %vm351_vm0, %v6190_v6  ;;  %v6191_v59 = vmax.f32 %v6159_v34, 0.0 }
 0x454   : > { %6220 = vst.msk [vmem:[%s9577_s28 + $0x20] sm:$0xff] %vm351_vm0, %v6188_v16  ;;  %v6189_v2 = vmax.f32 %v6157_v32, 0.0  ;;  %v7321_v62 = vpop.f32.mrb[72].mxu0 }
 0x455   : > { %6223 = vst.msk [vmem:[%s9577_s28 + $0x38] sm:$0xff] %vm351_vm0, %v6191_v59  ;;  %v6066_v35 = vadd.f32 %v7321_v62, %v9566_v7  ;;  %v6057_v60 = vpop.f32.mrb[73].mxu0 }
 0x456   : > { %6221 = vst.msk [vmem:[%s9577_s28 + $0x28] sm:$0xff] %vm351_vm0, %v6189_v2  ;;  %v6058_v1 = vadd.f32 %v9566_v7, %v6057_v60  ;;  %v7322_v5 = vpop.f32.mrb[74].mxu0  ;;  %v7724_v60 = vld [vmem:[%s7807_s10 + $0xb0] sm:$0xff] }
 0x457   : > { %v6162_v9 = vadd.f32 %v7712_v36, %v6066_v35  ;;  %v6069_v51 = vadd.f32 %v7322_v5, %v9566_v7  ;;  %v6060_v61 = vpop.f32.mrb[75].mxu0 }
 0x458   : > { %v6160_v24 = vadd.f32 %v7713_v8, %v6058_v1  ;;  %v6061_v29 = vadd.f32 %v9566_v7, %v6060_v61 }
 0x459   : > { %v6194_v27 = vmax.f32 %v6162_v9, 0.0  ;;  %v6163_v55 = vadd.f32 %v7714_v30, %v6069_v51  ;;  %v7725_v9 = vld [vmem:[%s7807_s10 + $0xa0] sm:$0xff]  ;;  %v7727_v30 = vld [vmem:[%s7807_s10 + $0xa8] sm:$0xff] }
 0x45a   : > { %v6192_v22 = vmax.f32 %v6160_v24, 0.0  ;;  %v6161_v56 = vadd.f32 %v7715_v39, %v6061_v29  ;;  %v7726_v24 = vld [vmem:[%s7807_s10 + $0xb8] sm:$0xff] }
 0x45b   : > { %6226 = vst.msk [vmem:[%s9577_s28 + $0x50] sm:$0xff] %vm351_vm0, %v6194_v27  ;;  %v6195_v4 = vmax.f32 %v6163_v55, 0.0 }
 0x45c   : > { %6224 = vst.msk [vmem:[%s9577_s28 + $0x40] sm:$0xff] %vm351_vm0, %v6192_v22  ;;  %v6193_v18 = vmax.f32 %v6161_v56, 0.0  ;;  %v7325_v19 = vpop.f32.mrb[76].mxu0 }
 0x45d   : > { %6227 = vst.msk [vmem:[%s9577_s28 + $0x58] sm:$0xff] %vm351_vm0, %v6195_v4  ;;  %v6082_v53 = vadd.f32 %v7325_v19, %v9566_v7  ;;  %v6073_v31 = vpop.f32.mrb[77].mxu0 }
 0x45e   : > { %6225 = vst.msk [vmem:[%s9577_s28 + $0x48] sm:$0xff] %vm351_vm0, %v6193_v18  ;;  %v6074_v33 = vadd.f32 %v9566_v7, %v6073_v31  ;;  %v7326_v58 = vpop.f32.mrb[78].mxu0  ;;  %v7728_v31 = vld [vmem:[%s7807_s10 + $0xd0] sm:$0xff] }
 0x45f   : > { %v6166_v50 = vadd.f32 %v7716_v47, %v6082_v53  ;;  %v6085_v52 = vadd.f32 %v7326_v58, %v9566_v7  ;;  %v6076_v63 = vpop.f32.mrb[79].mxu0 }
 0x460   : > { %v6164_v28 = vadd.f32 %v7717_v0, %v6074_v33  ;;  %v6077_v14 = vadd.f32 %v9566_v7, %v6076_v63 }
 0x461   : > { %v6198_v17 = vmax.f32 %v6166_v50, 0.0  ;;  %v6167_v40 = vadd.f32 %v7718_v48, %v6085_v52  ;;  %v7729_v50 = vld [vmem:[%s7807_s10 + $0xc0] sm:$0xff]  ;;  %v7731_v48 = vld [vmem:[%s7807_s10 + $0xc8] sm:$0xff] }
 0x462   : > { %v6196_v21 = vmax.f32 %v6164_v28, 0.0  ;;  %v6165_v54 = vadd.f32 %v7719_v44, %v6077_v14  ;;  %v7730_v28 = vld [vmem:[%s7807_s10 + $0xd8] sm:$0xff] }
 0x463   : > { %6230 = vst.msk [vmem:[%s9577_s28 + $0x70] sm:$0xff] %vm351_vm0, %v6198_v17  ;;  %v6199_v38 = vmax.f32 %v6167_v40, 0.0 }
 0x464   : > { %6228 = vst.msk [vmem:[%s9577_s28 + $0x60] sm:$0xff] %vm351_vm0, %v6196_v21  ;;  %v6197_v11 = vmax.f32 %v6165_v54, 0.0  ;;  %v7329_v37 = vpop.f32.mrb[80].mxu0 }
 0x465   : > { %6231 = vst.msk [vmem:[%s9577_s28 + $0x78] sm:$0xff] %vm351_vm0, %v6199_v38  ;;  %v6098_v13 = vadd.f32 %v7329_v37, %v9566_v7  ;;  %v6089_v23 = vpop.f32.mrb[81].mxu0 }
 0x466   : > { %6229 = vst.msk [vmem:[%s9577_s28 + $0x68] sm:$0xff] %vm351_vm0, %v6197_v11  ;;  %v6090_v42 = vadd.f32 %v9566_v7, %v6089_v23  ;;  %v7330_v20 = vpop.f32.mrb[82].mxu0  ;;  %v7732_v23 = vld [vmem:[%s7807_s10 + $0xf0] sm:$0xff] }
 0x467   : > { %v6170_v10 = vadd.f32 %v7720_v12, %v6098_v13  ;;  %v6101_v26 = vadd.f32 %v7330_v20, %v9566_v7  ;;  %v6092_v3 = vpop.f32.mrb[83].mxu0 }
 0x468   : > { %v6168_v15 = vadd.f32 %v7721_v25, %v6090_v42  ;;  %v6093_v49 = vadd.f32 %v9566_v7, %v6092_v3 }
 0x469   : > { %v6202_v45 = vmax.f32 %v6170_v10, 0.0  ;;  %v6171_v46 = vadd.f32 %v7722_v41, %v6101_v26  ;;  %v7733_v10 = vld [vmem:[%s7807_s10 + $0xe0] sm:$0xff]  ;;  %v7735_v41 = vld [vmem:[%s7807_s10 + $0xe8] sm:$0xff] }
 0x46a   : > { %v6200_v6 = vmax.f32 %v6168_v15, 0.0  ;;  %v6169_v34 = vadd.f32 %v7723_v43, %v6093_v49  ;;  %v7734_v15 = vld [vmem:[%s7807_s10 + $0xf8] sm:$0xff] }
 0x46b   : > { %6234 = vst.msk [vmem:[%s9577_s28 + $0x90] sm:$0xff] %vm351_vm0, %v6202_v45  ;;  %v6203_v16 = vmax.f32 %v6171_v46, 0.0 }
 0x46c   : > { %6232 = vst.msk [vmem:[%s9577_s28 + $0x80] sm:$0xff] %vm351_vm0, %v6200_v6  ;;  %v6201_v57 = vmax.f32 %v6169_v34, 0.0  ;;  %v7333_v32 = vpop.f32.mrb[84].mxu0 }
 0x46d   : > { %6235 = vst.msk [vmem:[%s9577_s28 + $0x98] sm:$0xff] %vm351_vm0, %v6203_v16  ;;  %v6114_v59 = vadd.f32 %v7333_v32, %v9566_v7  ;;  %v6105_v2 = vpop.f32.mrb[85].mxu0 }
 0x46e   : > { %6233 = vst.msk [vmem:[%s9577_s28 + $0x88] sm:$0xff] %vm351_vm0, %v6201_v57  ;;  %v6106_v62 = vadd.f32 %v9566_v7, %v6105_v2  ;;  %v7334_v35 = vpop.f32.mrb[86].mxu0 }
 0x46f   : > { %v6174_v1 = vadd.f32 %v7724_v60, %v6114_v59  ;;  %v6117_v5 = vadd.f32 %v7334_v35, %v9566_v7  ;;  %v6108_v36 = vpop.f32.mrb[87].mxu0 }
 0x470   : > { %v6172_v51 = vadd.f32 %v7725_v9, %v6106_v62  ;;  %v6109_v61 = vadd.f32 %v9566_v7, %v6108_v36 }
 0x471   : > { %v6206_v8 = vmax.f32 %v6174_v1, 0.0  ;;  %v6175_v29 = vadd.f32 %v7726_v24, %v6117_v5 }
 0x472   : > { %v6204_v27 = vmax.f32 %v6172_v51, 0.0  ;;  %v6173_v55 = vadd.f32 %v7727_v30, %v6109_v61 }
 0x473   : > { %6238 = vst.msk [vmem:[%s9577_s28 + $0xb0] sm:$0xff] %vm351_vm0, %v6206_v8  ;;  %v6207_v22 = vmax.f32 %v6175_v29, 0.0 }
 0x474   : > { %6236 = vst.msk [vmem:[%s9577_s28 + $0xa0] sm:$0xff] %vm351_vm0, %v6204_v27  ;;  %v6205_v39 = vmax.f32 %v6173_v55, 0.0  ;;  %v7337_v56 = vpop.f32.mrb[88].mxu0 }
 0x475   : > { %6239 = vst.msk [vmem:[%s9577_s28 + $0xb8] sm:$0xff] %vm351_vm0, %v6207_v22  ;;  %v6130_v4 = vadd.f32 %v7337_v56, %v9566_v7  ;;  %v6121_v18 = vpop.f32.mrb[89].mxu0 }
 0x476   : > { %6237 = vst.msk [vmem:[%s9577_s28 + $0xa8] sm:$0xff] %vm351_vm0, %v6205_v39  ;;  %v6122_v19 = vadd.f32 %v9566_v7, %v6121_v18  ;;  %v7338_v53 = vpop.f32.mrb[90].mxu0 }
 0x477   : > { %v6178_v33 = vadd.f32 %v7728_v31, %v6130_v4  ;;  %v6133_v58 = vadd.f32 %v7338_v53, %v9566_v7  ;;  %v6124_v47 = vpop.f32.mrb[91].mxu0 }
 0x478   : > { %v6176_v52 = vadd.f32 %v7729_v50, %v6122_v19  ;;  %v6125_v63 = vadd.f32 %v9566_v7, %v6124_v47 }
 0x479   : > { %v6210_v0 = vmax.f32 %v6178_v33, 0.0  ;;  %v6179_v14 = vadd.f32 %v7730_v28, %v6133_v58 }
 0x47a   : > { %v6208_v17 = vmax.f32 %v6176_v52, 0.0  ;;  %v6177_v40 = vadd.f32 %v7731_v48, %v6125_v63 }
 0x47b   : > { %6242 = vst.msk [vmem:[%s9577_s28 + $0xd0] sm:$0xff] %vm351_vm0, %v6210_v0  ;;  %v6211_v21 = vmax.f32 %v6179_v14, 0.0 }
 0x47c   : > { %6240 = vst.msk [vmem:[%s9577_s28 + $0xc0] sm:$0xff] %vm351_vm0, %v6208_v17  ;;  %v6209_v44 = vmax.f32 %v6177_v40, 0.0  ;;  %v7341_v54 = vpop.f32.mrb[92].mxu0 }
 0x47d   : > { %6243 = vst.msk [vmem:[%s9577_s28 + $0xd8] sm:$0xff] %vm351_vm0, %v6211_v21  ;;  %v6146_v38 = vadd.f32 %v7341_v54, %v9566_v7  ;;  %v6137_v11 = vpop.f32.mrb[93].mxu0 }
 0x47e   : > { %6241 = vst.msk [vmem:[%s9577_s28 + $0xc8] sm:$0xff] %vm351_vm0, %v6209_v44  ;;  %v6138_v37 = vadd.f32 %v9566_v7, %v6137_v11  ;;  %v7342_v13 = vpop.f32.mrb[94].mxu0 }
 0x47f   : > { %v6182_v42 = vadd.f32 %v7732_v23, %v6146_v38  ;;  %v6149_v20 = vadd.f32 %v7342_v13, %v9566_v7  ;;  %v6140_v12 = vpop.f32.mrb[95].mxu0 }
 0x480   : > { %v6180_v26 = vadd.f32 %v7733_v10, %v6138_v37  ;;  %v6141_v3 = vadd.f32 %v9566_v7, %v6140_v12 }
 0x481   : > { %v6214_v25 = vmax.f32 %v6182_v42, 0.0  ;;  %v6183_v49 = vadd.f32 %v7734_v15, %v6149_v20 }
 0x482   : > { %v6212_v45 = vmax.f32 %v6180_v26, 0.0  ;;  %v6181_v46 = vadd.f32 %v7735_v41, %v6141_v3 }
 0x483   : > { %6246 = vst.msk [vmem:[%s9577_s28 + $0xf0] sm:$0xff] %vm351_vm0, %v6214_v25  ;;  %v6215_v6 = vmax.f32 %v6183_v49, 0.0 }
 0x484   : > { %6244 = vst.msk [vmem:[%s9577_s28 + $0xe0] sm:$0xff] %vm351_vm0, %v6212_v45  ;;  %v6213_v43 = vmax.f32 %v6181_v46, 0.0 }
 0x485   : > { %6247 = vst.msk [vmem:[%s9577_s28 + $0xf8] sm:$0xff] %vm351_vm0, %v6215_v6 }
 0x486   : > { %6245 = vst.msk [vmem:[%s9577_s28 + $0xe8] sm:$0xff] %vm351_vm0, %v6213_v43 }
 0x487 PF: > { %s17_s24 = sadd.s32 1, %s7742_s24  }
 0x488   : > { %p14_p4 = scmp.ge.s32.totalorder %s17_s24, 4  }
 0x48a   :  { %16 = sbr.rel (!%p14_p4) target bundleno = 1 (0x1), region = 89 }

// kernel: tpu_custom_call.1
= control target key start
LH: loop header
LB: loop body
LE: loop exit
PB: predicated region body
PF: predicated region fallthrough
CT: control target
= control target key end

     0   :  { %s7785_s24 = smov 0   ;;  %s9706_s0 = inlined_call_operand.vmem [shape: f32[2,256,32], index: 0, kind: input, shape index: {}]   ;;  %s9707_s1 = inlined_call_operand.vmem [shape: bf16[32,16], index: 1, kind: input, shape index: {}]   ;;  %s9708_s2 = inlined_call_operand.vmem [shape: f32[1,16], index: 2, kind: input, shape index: {}]   ;;  %s9709_s3 = inlined_call_operand.vmem [shape: bf16[3,3,1,16,16], index: 3, kind: input, shape index: {}]   ;;  %s9710_s4 = inlined_call_operand.vmem [shape: f32[1,16], index: 4, kind: input, shape index: {}]   ;;  %s9711_s5 = inlined_call_operand.vmem [shape: bf16[16,32], index: 5, kind: input, shape index: {}]   ;;  %s9712_s6 = inlined_call_operand.vmem [shape: f32[1,32], index: 6, kind: input, shape index: {}]   ;;  %s9713_s7 = inlined_call_operand.vmem [shape: f32[2,256,32], index: 7, kind: output, shape index: {}]  }
   0x1 LB: > { %s6303_s25 = sadd.s32 4294967295, %s7742_s24   ;;  %p6307_p0 = scmp.ge.s32.totalorder %s7742_s24, 1  ;;  %s7742_s24 = sphi %s7785_s24, %s17_s24  }
   0x2   : > { %p237_p1 = scmp.lt.s32.totalorder %s7742_s24, 3 }
   0x4   : > { %p238_p2 = pnand %p6307_p0, %p237_p1 }
   0x6   : > { %241 = sbr.rel (%p238_p2) target bundleno = 1159 (0x487), region = 48 }
   0xd   : > { %v7610_v0 = vld [vmem:[%s9707_s1] sm:$0xff]   ;;  %p269_p3 = scmp.lt.s32.totalorder %s6303_s25, 1  ;;  %v7611_v1 = vld [vmem:[%s9707_s1 + $0x8] sm:$0xff]   ;;  %vm351_vm0 = vcmask 261120   ;;  %vm612_vm1 = vcmask 122880   ;;  %v9736_v50 = vmov 0 }
   0xe   : > { %6967 = vmatprep.subr.bf16.mxu0 %v7610_v0  ;;  %vm619_vm2 = vsmask.f32 256  ;;  %v627_v51 = vld [vmem:[#allocation2 + $0x18] sm:$0x1]  ;;  %vm675_vm4 = vsmask.f32 7938 }
   0xf   : > { %s9818_s25 = smov (!%p269_p3, %s6303_s25), 1  ;;  %6968 = vmatpush3.bf16.msra.mxu0 %v7610_v0  ;;  %vm7859_vm3 = vmand %vm612_vm1, %vm619_vm2  ;;  %v624_v53 = vld [vmem:[#allocation2 + $0xc] sm:$0x1]  ;;  %v9739_v55 = vmov 0  ;;  %v683_v56 = vld [vmem:[#allocation2 + $0x20] sm:$0x1] }
  0x10   : > { %6969 = vmatprep.subr.bf16.mxu0 %v7611_v1  ;;  %s6745_s30 = sshll.u32 %s9818_s25, 8  ;;  %v9737_v50 = vsel %vm7859_vm3, 4294967295, %v9736_v50  ;;  %v628_v52 = vsel %vm7859_vm3, 0, %v627_v51  ;;  %v625_v54 = vsel %vm7859_vm3, 0, %v624_v53  ;;  %vm7869_vm5 = vmand %vm612_vm1, %vm675_vm4  ;;  %v680_v58 = vld [vmem:[#allocation2 + $0x14] sm:$0x1] }
  0x11   : > { %s7807_s10 = scalar_lea.vmem %s9706_s0, %s6745_s30  ;;  %9738 = vst [vmem:[#allocation3_spill] sm:$0xff] %v9737_v50  ;;  %629 = vst [vmem:[#allocation2 + $0x18] sm:$0x1] %v628_v52  ;;  %v9740_v55 = vsel %vm7869_vm5, 4294967295, %v9739_v55  ;;  %v684_v57 = vsel %vm7869_vm5, 0, %v683_v56  ;;  %v681_v59 = vsel %vm7869_vm5, 0, %v680_v58  ;;  %s9577_s28 = scalar_lea.vmem %s9713_s7, %s6745_s30 }
  0x12   : > { %v280_v2 = vld [vmem:[%s7807_s10] sm:$0xff]  ;;  %v281_v3 = vld [vmem:[%s7807_s10 + $0x8] sm:$0xff]  ;;  %v282_v4 = vld [vmem:[%s7807_s10 + $0x10] sm:$0xff]  ;;  %9741 = vst [vmem:[#allocation4_spill] sm:$0xff] %v9740_v55  ;;  %vm609_vm6 = vcmask 125952   ;;  %v7744_v0 = vmov 0  }
  0x13   : > { %6970 = vmatpush3.bf16.msra.mxu0 %v7611_v1  ;;  %v312_v5 = vpack.c.bf16 %v281_v3, %v280_v2  ;;  %v283_v6 = vld [vmem:[%s7807_s10 + $0x18] sm:$0xff]  ;;  %v284_v7 = vld [vmem:[%s7807_s10 + $0x20] sm:$0xff]  ;;  %v285_v8 = vld [vmem:[%s7807_s10 + $0x28] sm:$0xff]  ;;  %626 = vst [vmem:[#allocation2 + $0xc] sm:$0x1] %v625_v54  ;;  %vm1742_vm10 = vcmask 130048  }
  0x14   : > { %v313_v9 = vpack.c.bf16 %v283_v6, %v282_v4  ;;  %v314_v10 = vpack.c.bf16 %v285_v8, %v284_v7  ;;  %v286_v11 = vld [vmem:[%s7807_s10 + $0x30] sm:$0xff]  ;;  %v287_v12 = vld [vmem:[%s7807_s10 + $0x38] sm:$0xff]  ;;  %v288_v13 = vld [vmem:[%s7807_s10 + $0x40] sm:$0xff]  ;;  %685 = vst [vmem:[#allocation2 + $0x20] sm:$0x1] %v684_v57  ;;  %vm2295_vm14 = vcmask 1042432  }
  0x15   : > { %6971 = vmatprep.mubr.msk.bf16.mxu0 %vm351_vm0, %v312_v5  ;;  %v289_v14 = vld [vmem:[%s7807_s10 + $0x48] sm:$0xff]  ;;  %v315_v15 = vpack.c.bf16 %v287_v12, %v286_v11  ;;  %v290_v17 = vld [vmem:[%s7807_s10 + $0x50] sm:$0xff]  ;;  %v291_v18 = vld [vmem:[%s7807_s10 + $0x58] sm:$0xff]  ;;  %682 = vst [vmem:[#allocation2 + $0x14] sm:$0x1] %v681_v59  ;;  %vm2296_vm15 = vcmask 1046532  }
  0x16   : > { %6972 = vmatmul.mubr.msk.bf16.vlgmr.msra.gmra.mrb[0].mxu0 %vm351_vm0, %v313_v9  ;;  %v316_v16 = vpack.c.bf16 %v289_v14, %v288_v13  ;;  %v292_v19 = vld [vmem:[%s7807_s10 + $0x60] sm:$0xff]  ;;  %v293_v20 = vld [vmem:[%s7807_s10 + $0x68] sm:$0xff]  ;;  %v317_v21 = vpack.c.bf16 %v291_v18, %v290_v17  ;;  %v294_v23 = vld [vmem:[%s7807_s10 + $0x70] sm:$0xff]  ;;  %610 = vst.msk [vmem:[#allocation2] sm:$0xf] %vm609_vm6, %v7744_v0 }
  0x17   : > { %6975 = vmatprep.mubr.msk.bf16.mxu0 %vm351_vm0, %v314_v10  ;;  %v318_v22 = vpack.c.bf16 %v293_v20, %v292_v19  ;;  %v295_v24 = vld [vmem:[%s7807_s10 + $0x78] sm:$0xff]  ;;  %v296_v25 = vld [vmem:[%s7807_s10 + $0x80] sm:$0xff]  ;;  %v297_v26 = vld [vmem:[%s7807_s10 + $0x88] sm:$0xff]  ;;  %611 = vst.msk [vmem:[#allocation2 + $0x4] sm:$0xf] %vm609_vm6, %v7744_v0 }
  0x18   : > { %v319_v27 = vpack.c.bf16 %v295_v24, %v294_v23  ;;  %v320_v28 = vpack.c.bf16 %v297_v26, %v296_v25  ;;  %v298_v29 = vld [vmem:[%s7807_s10 + $0x90] sm:$0xff]  ;;  %v299_v30 = vld [vmem:[%s7807_s10 + $0x98] sm:$0xff]  ;;  %v300_v31 = vld [vmem:[%s7807_s10 + $0xa0] sm:$0xff]  ;;  %613 = vst.msk [vmem:[#allocation2 + $0x8] sm:$0x1] %vm612_vm1, %v7744_v0 }
  0x19   : > { %v301_v32 = vld [vmem:[%s7807_s10 + $0xa8] sm:$0xff]  ;;  %v321_v33 = vpack.c.bf16 %v299_v30, %v298_v29  ;;  %v302_v35 = vld [vmem:[%s7807_s10 + $0xb0] sm:$0xff]  ;;  %v303_v36 = vld [vmem:[%s7807_s10 + $0xb8] sm:$0xff]  ;;  %615 = vst.msk [vmem:[#allocation2 + $0xcc] sm:$0xf] %vm609_vm6, %v7744_v0 }
  0x1a   : > { %v322_v34 = vpack.c.bf16 %v301_v32, %v300_v31  ;;  %v304_v37 = vld [vmem:[%s7807_s10 + $0xc0] sm:$0xff]  ;;  %v305_v38 = vld [vmem:[%s7807_s10 + $0xc8] sm:$0xff]  ;;  %v323_v39 = vpack.c.bf16 %v303_v36, %v302_v35  ;;  %v306_v41 = vld [vmem:[%s7807_s10 + $0xd0] sm:$0xff]  ;;  %616 = vst.msk [vmem:[#allocation2 + $0xd0] sm:$0xf] %vm609_vm6, %v7744_v0 }
  0x1b   : > { %v324_v40 = vpack.c.bf16 %v305_v38, %v304_v37  ;;  %v307_v42 = vld [vmem:[%s7807_s10 + $0xd8] sm:$0xff]  ;;  %v308_v43 = vld [vmem:[%s7807_s10 + $0xe0] sm:$0xff]  ;;  %v309_v44 = vld [vmem:[%s7807_s10 + $0xe8] sm:$0xff]  ;;  %617 = vst.msk [vmem:[#allocation2 + $0xd4] sm:$0x1] %vm612_vm1, %v7744_v0 }
  0x1c   : > { %v325_v45 = vpack.c.bf16 %v307_v42, %v306_v41  ;;  %v326_v46 = vpack.c.bf16 %v309_v44, %v308_v43  ;;  %v310_v47 = vld [vmem:[%s7807_s10 + $0xf0] sm:$0xff]  ;;  %v311_v48 = vld [vmem:[%s7807_s10 + $0xf8] sm:$0xff]  ;;  %v630_v62 = vld [vmem:[#allocation2 + $0x24] sm:$0x1]  ;;  %vm1298_vm7 = vsmask.f32 3328 }
  0x1d   : > { %v327_v49 = vpack.c.bf16 %v311_v48, %v310_v47  ;;  %v633_v60 = vld [vmem:[#allocation2 + $0x30] sm:$0x1]  ;;  %v631_v63 = vsel %vm7859_vm3, 0, %v630_v62  ;;  %v689_v1 = vld [vmem:[#allocation2 + $0x38] sm:$0x1]  ;;  %vm7976_vm12 = vmand %vm609_vm6, %vm675_vm4 }
  0x1e   : > { %6976 = vmatmul.mubr.msk.bf16.gmra.mrb[4].mxu0 %vm351_vm0, %v315_v15  ;;  %v634_v61 = vsel %vm7859_vm3, 0, %v633_v60  ;;  %632 = vst [vmem:[#allocation2 + $0x24] sm:$0x1] %v631_v63  ;;  %v690_v2 = vsel %vm7869_vm5, 0, %v689_v1  ;;  %v686_v3 = vld [vmem:[#allocation2 + $0x2c] sm:$0x1]  ;;  %vm8617_vm1 = vmor %vm2295_vm14, %vm2296_vm15 }
  0x1f   : > { %6979 = vmatprep.mubr.msk.bf16.mxu0 %vm351_vm0, %v316_v16  ;;  %635 = vst [vmem:[#allocation2 + $0x30] sm:$0x1] %v634_v61  ;;  %691 = vst [vmem:[#allocation2 + $0x38] sm:$0x1] %v690_v2  ;;  %v687_v4 = vsel %vm7869_vm5, 0, %v686_v3  ;;  %v7613_v1 = vld [vmem:[%s9709_s3 + $0x18] sm:$0xff]  }
  0x20   : > { %688 = vst [vmem:[#allocation2 + $0x2c] sm:$0x1] %v687_v4  ;;  %v639_v5 = vld [vmem:[#allocation2 + $0x48] sm:$0x1]  ;;  %v621_v6 = vld [vmem:[#allocation2] sm:$0x1]  ;;  %7343 = vmatprep.subr.bf16.mxu1 %v7613_v1 }
  0x21   : > { %v640_v7 = vsel %vm7859_vm3, 0, %v639_v5  ;;  %v636_v8 = vld [vmem:[#allocation2 + $0x3c] sm:$0x1]  ;;  %v622_v9 = vsel %vm7859_vm3, 0, %v621_v6  ;;  %v695_v11 = vld [vmem:[#allocation2 + $0x50] sm:$0x1]  ;;  %7344 = vmatpush3.bf16.msra.mxu1 %v7613_v1 }
  0x22   : > { %641 = vst [vmem:[#allocation2 + $0x48] sm:$0x1] %v640_v7  ;;  %v637_v10 = vsel %vm7859_vm3, 0, %v636_v8  ;;  %623 = vst [vmem:[#allocation2] sm:$0x1] %v622_v9  ;;  %v696_v12 = vsel %vm7869_vm5, 0, %v695_v11 }
  0x23   : > { %638 = vst [vmem:[#allocation2 + $0x3c] sm:$0x1] %v637_v10  ;;  %697 = vst [vmem:[#allocation2 + $0x50] sm:$0x1] %v696_v12  ;;  %v692_v13 = vld [vmem:[#allocation2 + $0x44] sm:$0x1] }
  0x24   : > { %v677_v14 = vld [vmem:[#allocation2 + $0x8] sm:$0x1]  ;;  %v693_v15 = vsel %vm7869_vm5, 0, %v692_v13  ;;  %v645_v17 = vld [vmem:[#allocation2 + $0x60] sm:$0x1] }
  0x25   : > { %v678_v16 = vsel %vm7869_vm5, 0, %v677_v14  ;;  %694 = vst [vmem:[#allocation2 + $0x44] sm:$0x1] %v693_v15  ;;  %v646_v19 = vsel %vm7859_vm3, 0, %v645_v17  ;;  %v642_v20 = vld [vmem:[#allocation2 + $0x54] sm:$0x1] }
  0x26   : > { %6980 = vmatmul.mubr.msk.bf16.gmra.mrb[8].mxu0 %vm351_vm0, %v317_v21  ;;  %679 = vst [vmem:[#allocation2 + $0x8] sm:$0x1] %v678_v16  ;;  %647 = vst [vmem:[#allocation2 + $0x60] sm:$0x1] %v646_v19  ;;  %v701_v23 = vld [vmem:[#allocation2 + $0x68] sm:$0x1] }
  0x27   : > { %6983 = vmatprep.mubr.msk.bf16.mxu0 %vm351_vm0, %v318_v22  ;;  %v643_v22 = vsel %vm7859_vm3, 0, %v642_v20  ;;  %v1249_v24 = vld [vmem:[#allocation2 + $0x4] sm:$0xf]  ;;  %v702_v26 = vsel %vm7869_vm5, 0, %v701_v23  ;;  %v651_v38 = vld [vmem:[#allocation2 + $0x78] sm:$0x1] }
  0x28   : > { %644 = vst [vmem:[#allocation2 + $0x54] sm:$0x1] %v643_v22  ;;  %703 = vst [vmem:[#allocation2 + $0x68] sm:$0x1] %v702_v26  ;;  %vm1299_vm8 = vsmask.f32 7440 }
  0x29   : > { %v1248_v18 = vld [vmem:[#allocation2] sm:$0xf]  ;;  %v648_v41 = vld [vmem:[#allocation2 + $0x6c] sm:$0x1]  ;;  %vm7918_vm9 = vmor %vm1298_vm7, %vm1299_vm8  ;;  %vm811_vm11 = vsmask.f32 4368 }
  0x2a   : > { %v1302_v21 = vshrl.u32 %v1248_v18, 16  ;;  %v1305_v25 = vshll.u32 %v1248_v18, 16  ;;  %v649_v43 = vsel %vm7859_vm3, 0, %v648_v41  ;;  %v704_v53 = vld [vmem:[#allocation2 + $0x74] sm:$0x1]  ;;  %v7951_v9 = vld [vmem:[%s9709_s3 + $0x20] sm:$0xff]   ;;  %vm7983_vm13 = vmor %vm619_vm2, %vm811_vm11 }
  0x2b   : > { %650 = vst [vmem:[#allocation2 + $0x6c] sm:$0x1] %v649_v43  ;;  %v705_v56 = vsel %vm7869_vm5, 0, %v704_v53  ;;  %v657_v57 = vld [vmem:[#allocation2 + $0x90] sm:$0x1]  ;;  %7139 = vmatprep.subr.bf16.mxu1 %v7951_v9 }
  0x2c   : > { %v1304_v31 = vrot.slane %v1302_v21, 4  ;;  %v1307_v32 = vrot.slane %v1305_v25, 5  ;;  %706 = vst [vmem:[#allocation2 + $0x74] sm:$0x1] %v705_v56  ;;  %v658_v58 = vsel %vm7859_vm3, 0, %v657_v57 }
  0x2d   : > { %v1282_v30 = vld [vmem:[#allocation2 + $0x8] sm:$0x1]  ;;  %659 = vst [vmem:[#allocation2 + $0x90] sm:$0x1] %v658_v58  ;;  %v654_v59 = vld [vmem:[#allocation2 + $0x84] sm:$0x1] }
  0x2e   : > { %6984 = vmatmul.mubr.msk.bf16.gmra.mrb[12].mxu0 %vm351_vm0, %v319_v27  ;;  %v698_v27 = vld [vmem:[#allocation2 + $0x5c] sm:$0x1]  ;;  %v1321_v35 = vshll.u32 %v1282_v30, 16  ;;  %v1308_v36 = vor.u32 %v1307_v32, %v1304_v31  ;;  %v713_v60 = vld [vmem:[#allocation2 + $0x98] sm:$0x1]  ;;  %v655_v61 = vsel %vm7859_vm3, 0, %v654_v59 }
  0x2f   : > { %6987 = vmatprep.mubr.msk.bf16.mxu0 %vm351_vm0, %v320_v28  ;;  %v7612_v28 = vld [vmem:[%s9709_s3 + $0x8] sm:$0xff]   ;;  %v699_v29 = vsel %vm7869_vm5, 0, %v698_v27  ;;  %v714_v62 = vsel %vm7869_vm5, 0, %v713_v60  ;;  %656 = vst [vmem:[#allocation2 + $0x84] sm:$0x1] %v655_v61 }
  0x30   : > { %700 = vst [vmem:[#allocation2 + $0x5c] sm:$0x1] %v699_v29  ;;  %7003 = vmatprep.subr.bf16.mxu0 %v7612_v28  ;;  %v1309_v42 = vrot.slane %v1308_v36, 4  ;;  %v710_v63 = vld [vmem:[#allocation2 + $0x8c] sm:$0x1] }
  0x31   : > { %7004 = vmatpush3.bf16.msra.mxu0 %v7612_v28  ;;  %715 = vst [vmem:[#allocation2 + $0x98] sm:$0x1] %v714_v62  ;;  %v711_v0 = vsel %vm7869_vm5, 0, %v710_v63  ;;  %v663_v2 = vld [vmem:[#allocation2 + $0xa8] sm:$0x1] }
  0x32   : > { %712 = vst [vmem:[#allocation2 + $0x8c] sm:$0x1] %v711_v0  ;;  %v664_v3 = vsel %vm7859_vm3, 0, %v663_v2  ;;  %v660_v4 = vld [vmem:[#allocation2 + $0x9c] sm:$0x1] }
  0x33   : > { %665 = vst [vmem:[#allocation2 + $0xa8] sm:$0x1] %v664_v3  ;;  %v719_v5 = vld [vmem:[#allocation2 + $0xb0] sm:$0x1]  ;;  %v661_v6 = vsel %vm7859_vm3, 0, %v660_v4 }
  0x34   : > { %v720_v7 = vsel %vm7869_vm5, 0, %v719_v5  ;;  %662 = vst [vmem:[#allocation2 + $0x9c] sm:$0x1] %v661_v6  ;;  %v716_v8 = vld [vmem:[#allocation2 + $0xa4] sm:$0x1] }
  0x35   : > { %721 = vst [vmem:[#allocation2 + $0xb0] sm:$0x1] %v720_v7  ;;  %v717_v10 = vsel %vm7869_vm5, 0, %v716_v8  ;;  %v669_v11 = vld [vmem:[#allocation2 + $0xc0] sm:$0x1] }
  0x36   : > { %6988 = vmatmul.mubr.msk.bf16.gmra.mrb[16].mxu0 %vm351_vm0, %v321_v33  ;;  %v1311_v33 = vshll.u32 %v1249_v24, 16  ;;  %718 = vst [vmem:[#allocation2 + $0xa4] sm:$0x1] %v717_v10  ;;  %v670_v12 = vsel %vm7859_vm3, 0, %v669_v11  ;;  %v666_v13 = vld [vmem:[#allocation2 + $0xb4] sm:$0x1] }
  0x37   : > { %6991 = vmatprep.mubr.msk.bf16.mxu0 %vm351_vm0, %v322_v34  ;;  %v1315_v34 = vshrl.u32 %v1249_v24, 16  ;;  %671 = vst [vmem:[#allocation2 + $0xc0] sm:$0x1] %v670_v12  ;;  %v667_v14 = vsel %vm7859_vm3, 0, %v666_v13  ;;  %v725_v15 = vld [vmem:[#allocation2 + $0xc8] sm:$0x1] }
  0x38   : > { %v1313_v37 = vrot.slane %v1311_v33, 5  ;;  %668 = vst [vmem:[#allocation2 + $0xb4] sm:$0x1] %v667_v14  ;;  %v726_v16 = vsel %vm7869_vm5, 0, %v725_v15  ;;  %v722_v17 = vld [vmem:[#allocation2 + $0xbc] sm:$0x1] }
  0x39   : > { %727 = vst [vmem:[#allocation2 + $0xc8] sm:$0x1] %v726_v16  ;;  %v723_v18 = vsel %vm7869_vm5, 0, %v722_v17  ;;  %v7967_v19 = vld [vmem:[%s9708_s2] ss:$0 sm:$0xff] }
  0x3a   : > { %v1314_v47 = vsel %vm7918_vm9, %v1309_v42, %v1313_v37  ;;  %724 = vst [vmem:[#allocation2 + $0xbc] sm:$0x1] %v723_v18  ;;  %v1136_v58 = vld [vmem:[#allocation2 + $0xc] sm:$0xf]  ;;  %v1147_v1 = vld [vmem:[#allocation2 + $0x20] sm:$0x1] }
  0x3b   : > { %v1140_v7 = vld [vmem:[#allocation2 + $0x14] sm:$0x1] }
  0x3e   : > { %6992 = vmatmul.mubr.msk.bf16.gmra.mrb[20].mxu0 %vm351_vm0, %v323_v39  ;;  %v1317_v39 = vrot.slane %v1315_v34, 4 }
  0x3f   : > { %6995 = vmatprep.mubr.msk.bf16.mxu0 %vm351_vm0, %v324_v40  ;;  %v652_v40 = vsel %vm7859_vm3, 0, %v651_v38 }
  0x40   : > { %653 = vst [vmem:[#allocation2 + $0x78] sm:$0x1] %v652_v40  ;;  %v1318_v44 = vor.u32 %v1317_v39, %v1313_v37 }
  0x42   : > { %v1319_v48 = vrot.slane %v1318_v44, 4 }
  0x46   : > { %6996 = vmatmul.mubr.msk.bf16.gmra.mrb[24].mxu0 %vm351_vm0, %v325_v45  ;;  %v1323_v45 = vrot.slane %v1321_v35, 5 }
  0x47   : > { %6999 = vmatprep.mubr.msk.bf16.mxu0 %vm351_vm0, %v326_v46 }
  0x48   : > { %v1324_v52 = vsel %vm7918_vm9, %v1319_v48, %v1323_v45  ;;  %v1143_v48 = vld [vmem:[#allocation2 + $0x18] sm:$0xf] }
  0x49   : > { %v6365_v54 = vcombine.low %v1314_v47, %v1324_v52 }
  0x4e   : > { %7000 = vmatmul.mubr.msk.bf16.gmra.mrb[28].mxu0 %vm351_vm0, %v327_v49  ;;  %v707_v49 = vld [vmem:[#allocation2 + $0x80] sm:$0x1] }
  0x4f   : > { %v708_v51 = vsel %vm7869_vm5, 0, %v707_v49  ;;  %7005 = vmatprep.mubr.msk.bf16.mxu0 %vm1742_vm10, %v6365_v54 }
  0x50   : > { %709 = vst [vmem:[#allocation2 + $0x80] sm:$0x1] %v708_v51 }
  0xe9   : > { %v6973_v20 = vpop.f32.mrb[0].mxu0 }
  0xea   : > { %v443_v21 = vadd.f32 %v6973_v20, %v7967_v19  ;;  %v434_v22 = vpop.f32.mrb[1].mxu0 }
  0xeb   : > { %v435_v23 = vadd.f32 %v7967_v19, %v434_v22  ;;  %v6974_v24 = vpop.f32.mrb[2].mxu0 }
  0xec   : > { %v563_v25 = vmax.f32 %v443_v21, 0.0  ;;  %v446_v26 = vadd.f32 %v6974_v24, %v7967_v19  ;;  %v437_v27 = vpop.f32.mrb[3].mxu0 }
  0xed   : > { %v561_v28 = vmax.f32 %v435_v23, 0.0  ;;  %v438_v29 = vadd.f32 %v7967_v19, %v437_v27 }
  0xee   : > { %v6749_v30 = vpack.c.bf16 %v563_v25, %v563_v25  ;;  %v564_v31 = vmax.f32 %v446_v26, 0.0 }
  0xef   : > { %v6747_v32 = vpack.c.bf16 %v561_v28, %v561_v28  ;;  %v562_v33 = vmax.f32 %v438_v29, 0.0  ;;  %v1157_v28 = vld [vmem:[#allocation2 + $0x30] sm:$0xf] }
  0xf0   : > { %v831_v34 = vshrl.u32 %v6749_v30, 16  ;;  %v6750_v35 = vpack.c.bf16 %v564_v31, %v564_v31  ;;  %v834_v36 = vshll.u32 %v6749_v30, 16 }
  0xf1   : > { %v814_v37 = vshrl.u32 %v6747_v32, 16  ;;  %v817_v38 = vshll.u32 %v6747_v32, 16  ;;  %v6748_v39 = vpack.c.bf16 %v562_v33, %v562_v33  ;;  %v6977_v40 = vpop.f32.mrb[4].mxu0 }
  0xf2   : > { %v833_v41 = vrot.slane %v831_v34, 7  ;;  %v839_v42 = vshrl.u32 %v6750_v35, 16  ;;  %v842_v43 = vshll.u32 %v6750_v35, 16  ;;  %v459_v44 = vadd.f32 %v6977_v40, %v7967_v19  ;;  %v450_v45 = vpop.f32.mrb[5].mxu0  ;;  %v1150_v35 = vld [vmem:[#allocation2 + $0x24] sm:$0xf] }
  0xf3   : > { %v816_v49 = vrot.slane %v814_v37, 7  ;;  %v822_v51 = vshrl.u32 %v6748_v39, 16  ;;  %v825_v52 = vshll.u32 %v6748_v39, 16  ;;  %v451_v53 = vadd.f32 %v7967_v19, %v450_v45  ;;  %v6978_v54 = vpop.f32.mrb[6].mxu0 }
  0xf4   : > { %v836_v56 = vor.u32 %v834_v36, %v833_v41  ;;  %v837_v57 = vrot.slane %v833_v41, 4  ;;  %v841_v59 = vrot.slane %v839_v42, 7  ;;  %v567_v60 = vmax.f32 %v459_v44, 0.0  ;;  %v453_v61 = vpop.f32.mrb[7].mxu0 }
  0xf5   : > { %v819_v62 = vor.u32 %v817_v38, %v816_v49  ;;  %v820_v63 = vrot.slane %v816_v49, 4  ;;  %v824_v2 = vrot.slane %v822_v51, 7  ;;  %v565_v3 = vmax.f32 %v451_v53, 0.0 }
  0xf6   : > { %v1144_v4 = vsel %vm7976_vm12, %v836_v56, %v1143_v48  ;;  %v844_v5 = vor.u32 %v842_v43, %v841_v59  ;;  %v846_v6 = vrot.slane %v841_v59, 4  ;;  %v6753_v8 = vpack.c.bf16 %v567_v60, %v567_v60  ;;  %v1161_v59 = vld [vmem:[#allocation2 + $0x38] sm:$0x1]  ;;  %v1154_v60 = vld [vmem:[#allocation2 + $0x2c] sm:$0x1] }
  0xf7   : > { %1145 = vst [vmem:[#allocation2 + $0x18] sm:$0xf] %v1144_v4  ;;  %v1137_v10 = vsel %vm7976_vm12, %v819_v62, %v1136_v58  ;;  %v827_v11 = vor.u32 %v825_v52, %v824_v2  ;;  %v829_v12 = vrot.slane %v824_v2, 4  ;;  %v6751_v13 = vpack.c.bf16 %v565_v3, %v565_v3 }
  0xf8   : > { %1138 = vst [vmem:[#allocation2 + $0xc] sm:$0xf] %v1137_v10  ;;  %v845_v14 = vsel %vm7983_vm13, %v837_v57, %v844_v5  ;;  %v1148_v15 = vsel %vm7859_vm3, %v846_v6, %v1147_v1  ;;  %v865_v16 = vshrl.u32 %v6753_v8, 16  ;;  %v868_v20 = vshll.u32 %v6753_v8, 16  ;;  %v1171_v10 = vld [vmem:[#allocation2 + $0x48] sm:$0xf] }
  0xf9   : > { %1146 = vst.msk [vmem:[#allocation2 + $0x1c] sm:$0xf] %vm609_vm6, %v845_v14  ;;  %1149 = vst [vmem:[#allocation2 + $0x20] sm:$0x1] %v1148_v15  ;;  %v828_v17 = vsel %vm7983_vm13, %v820_v63, %v827_v11  ;;  %v1141_v18 = vsel %vm7859_vm3, %v829_v12, %v1140_v7  ;;  %v848_v21 = vshrl.u32 %v6751_v13, 16  ;;  %v6981_v22 = vpop.f32.mrb[8].mxu0  ;;  %v462_v24 = vadd.f32 %v6978_v54, %v7967_v19 }
  0xfa   : > { %1139 = vst.msk [vmem:[#allocation2 + $0x10] sm:$0xf] %vm609_vm6, %v828_v17  ;;  %1142 = vst [vmem:[#allocation2 + $0x14] sm:$0x1] %v1141_v18  ;;  %v8001_v23 = vrot.slane %v865_v16, 7  ;;  %v454_v25 = vadd.f32 %v7967_v19, %v453_v61  ;;  %v475_v26 = vadd.f32 %v6981_v22, %v7967_v19  ;;  %v466_v27 = vpop.f32.mrb[9].mxu0 }
  0xfb   : > { %v850_v29 = vrot.slane %v848_v21, 7  ;;  %v851_v30 = vshll.u32 %v6751_v13, 16  ;;  %v467_v31 = vadd.f32 %v7967_v19, %v466_v27  ;;  %v6982_v32 = vpop.f32.mrb[10].mxu0  ;;  %v568_v36 = vmax.f32 %v462_v24, 0.0 }
  0xfc   : > { %v870_v33 = vor.u32 %v868_v20, %v8001_v23  ;;  %v871_v34 = vrot.slane %v8001_v23, 4  ;;  %v566_v37 = vmax.f32 %v454_v25, 0.0  ;;  %v469_v38 = vpop.f32.mrb[11].mxu0  ;;  %v571_v41 = vmax.f32 %v475_v26, 0.0  ;;  %v1164_v20 = vld [vmem:[#allocation2 + $0x3c] sm:$0xf] }
  0xfd   : > { %v853_v39 = vor.u32 %v851_v30, %v850_v29  ;;  %v854_v40 = vrot.slane %v850_v29, 4  ;;  %v569_v42 = vmax.f32 %v467_v31, 0.0  ;;  %v6754_v44 = vpack.c.bf16 %v568_v36, %v568_v36 }
  0xfe   : > { %v1158_v43 = vsel %vm7976_vm12, %v870_v33, %v1157_v28  ;;  %v6752_v45 = vpack.c.bf16 %v566_v37, %v566_v37  ;;  %v478_v48 = vadd.f32 %v6982_v32, %v7967_v19  ;;  %v6757_v51 = vpack.c.bf16 %v571_v41, %v571_v41 }
  0xff   : > { %1159 = vst [vmem:[#allocation2 + $0x30] sm:$0xf] %v1158_v43  ;;  %v1151_v49 = vsel %vm7976_vm12, %v853_v39, %v1150_v35  ;;  %v6755_v52 = vpack.c.bf16 %v569_v42, %v569_v42  ;;  %v470_v53 = vadd.f32 %v7967_v19, %v469_v38  ;;  %v873_v54 = vshrl.u32 %v6754_v44, 16  ;;  %v1175_v43 = vld [vmem:[#allocation2 + $0x50] sm:$0x1] }
 0x100   : > { %1152 = vst [vmem:[#allocation2 + $0x24] sm:$0xf] %v1151_v49  ;;  %v876_v56 = vshll.u32 %v6754_v44, 16  ;;  %v856_v57 = vshrl.u32 %v6752_v45, 16  ;;  %v859_v58 = vshll.u32 %v6752_v45, 16  ;;  %v899_v61 = vshrl.u32 %v6757_v51, 16 }
 0x101   : > { %v902_v62 = vshll.u32 %v6757_v51, 16  ;;  %v882_v63 = vshrl.u32 %v6755_v52, 16  ;;  %v885_v1 = vshll.u32 %v6755_v52, 16  ;;  %v6985_v2 = vpop.f32.mrb[12].mxu0  ;;  %v875_v3 = vrot.slane %v873_v54, 7 }
 0x102   : > { %v858_v4 = vrot.slane %v856_v57, 7  ;;  %v572_v5 = vmax.f32 %v478_v48, 0.0  ;;  %v570_v6 = vmax.f32 %v470_v53, 0.0  ;;  %v482_v7 = vpop.f32.mrb[13].mxu0  ;;  %v8015_v8 = vrot.slane %v899_v61, 7 }
 0x103   : > { %v8017_v11 = vrot.slane %v882_v63, 7  ;;  %v491_v12 = vadd.f32 %v6985_v2, %v7967_v19  ;;  %v483_v13 = vadd.f32 %v7967_v19, %v482_v7  ;;  %v6986_v14 = vpop.f32.mrb[14].mxu0  ;;  %v878_v15 = vor.u32 %v876_v56, %v875_v3  ;;  %v1168_v44 = vld [vmem:[#allocation2 + $0x44] sm:$0x1] }
 0x104   : > { %v880_v16 = vrot.slane %v875_v3, 4  ;;  %v861_v17 = vor.u32 %v859_v58, %v858_v4  ;;  %v863_v18 = vrot.slane %v858_v4, 4  ;;  %v485_v21 = vpop.f32.mrb[15].mxu0  ;;  %v904_v22 = vor.u32 %v902_v62, %v8015_v8 }
 0x105   : > { %v905_v23 = vrot.slane %v8015_v8, 4  ;;  %v887_v24 = vor.u32 %v885_v1, %v8017_v11  ;;  %v888_v25 = vrot.slane %v8017_v11, 4  ;;  %v879_v26 = vsel %vm7983_vm13, %v871_v34, %v878_v15  ;;  %v1185_v15 = vld [vmem:[#allocation2 + $0x60] sm:$0xf] }
 0x106   : > { %v1162_v27 = vsel %vm7859_vm3, %v880_v16, %v1161_v59  ;;  %v862_v28 = vsel %vm7983_vm13, %v854_v40, %v861_v17  ;;  %v1155_v29 = vsel %vm7859_vm3, %v863_v18, %v1154_v60  ;;  %1160 = vst.msk [vmem:[#allocation2 + $0x34] sm:$0xf] %vm609_vm6, %v879_v26  ;;  %v1172_v30 = vsel %vm7976_vm12, %v904_v22, %v1171_v10  ;;  %v1178_v16 = vld [vmem:[#allocation2 + $0x54] sm:$0xf]  ;;  %v1250_v22 = vld [vmem:[#allocation2 + $0xc] sm:$0xf] }
 0x107   : > { %1163 = vst [vmem:[#allocation2 + $0x38] sm:$0x1] %v1162_v27  ;;  %1153 = vst.msk [vmem:[#allocation2 + $0x28] sm:$0xf] %vm609_vm6, %v862_v28  ;;  %v1165_v31 = vsel %vm7976_vm12, %v887_v24, %v1164_v20  ;;  %v6758_v32 = vpack.c.bf16 %v572_v5, %v572_v5  ;;  %v6756_v33 = vpack.c.bf16 %v570_v6, %v570_v6  ;;  %v575_v34 = vmax.f32 %v491_v12, 0.0  ;;  %v8046_v5 = vld [vmem:[%s9709_s3] sm:$0xff]  }
 0x108   : > { %1156 = vst [vmem:[#allocation2 + $0x2c] sm:$0x1] %v1155_v29  ;;  %1173 = vst [vmem:[#allocation2 + $0x48] sm:$0xf] %v1172_v30  ;;  %v573_v35 = vmax.f32 %v483_v13, 0.0  ;;  %v494_v36 = vadd.f32 %v6986_v14, %v7967_v19  ;;  %v486_v37 = vadd.f32 %v7967_v19, %v485_v21  ;;  %7037 = vmatprep.subr.bf16.mxu0 %v8046_v5 }
 0x109   : > { %1166 = vst [vmem:[#allocation2 + $0x3c] sm:$0xf] %v1165_v31  ;;  %v907_v38 = vshrl.u32 %v6758_v32, 16  ;;  %v910_v39 = vshll.u32 %v6758_v32, 16  ;;  %v890_v40 = vshrl.u32 %v6756_v33, 16  ;;  %v893_v41 = vshll.u32 %v6756_v33, 16 }
 0x10a   : > { %v6989_v42 = vpop.f32.mrb[16].mxu0  ;;  %v6761_v45 = vpack.c.bf16 %v575_v34, %v575_v34  ;;  %v6759_v48 = vpack.c.bf16 %v573_v35, %v573_v35  ;;  %v576_v49 = vmax.f32 %v494_v36, 0.0  ;;  %v574_v51 = vmax.f32 %v486_v37, 0.0  ;;  %v1189_v34 = vld [vmem:[#allocation2 + $0x68] sm:$0x1] }
 0x10b   : > { %v498_v52 = vpop.f32.mrb[17].mxu0  ;;  %v909_v53 = vrot.slane %v907_v38, 7  ;;  %v892_v54 = vrot.slane %v890_v40, 7  ;;  %v507_v56 = vadd.f32 %v6989_v42, %v7967_v19  ;;  %v1326_v42 = vshrl.u32 %v1250_v22, 16 }
 0x10c   : > { %v499_v57 = vadd.f32 %v7967_v19, %v498_v52  ;;  %v6990_v58 = vpop.f32.mrb[18].mxu0  ;;  %v933_v59 = vshrl.u32 %v6761_v45, 16  ;;  %v936_v60 = vshll.u32 %v6761_v45, 16  ;;  %v916_v61 = vshrl.u32 %v6759_v48, 16  ;;  %v1251_v52 = vld [vmem:[#allocation2 + $0x10] sm:$0xf] }
 0x10d   : > { %v919_v62 = vshll.u32 %v6759_v48, 16  ;;  %v501_v63 = vpop.f32.mrb[19].mxu0  ;;  %v912_v1 = vor.u32 %v910_v39, %v909_v53  ;;  %v914_v2 = vrot.slane %v909_v53, 4  ;;  %v895_v3 = vor.u32 %v893_v41, %v892_v54  ;;  %v1182_v39 = vld [vmem:[#allocation2 + $0x5c] sm:$0x1] }
 0x10e   : > { %v897_v4 = vrot.slane %v892_v54, 4  ;;  %v935_v6 = vrot.slane %v933_v59, 7  ;;  %v918_v7 = vrot.slane %v916_v61, 7  ;;  %v6762_v8 = vpack.c.bf16 %v576_v49, %v576_v49 }
 0x10f   : > { %v6760_v10 = vpack.c.bf16 %v574_v51, %v574_v51  ;;  %v913_v11 = vsel %vm7983_vm13, %v905_v23, %v912_v1  ;;  %v1176_v12 = vsel %vm7859_vm3, %v914_v2, %v1175_v43  ;;  %v896_v13 = vsel %vm7983_vm13, %v888_v25, %v895_v3 }
 0x110   : > { %v1169_v14 = vsel %vm7859_vm3, %v897_v4, %v1168_v44  ;;  %1174 = vst.msk [vmem:[#allocation2 + $0x4c] sm:$0xf] %vm609_vm6, %v913_v11  ;;  %1177 = vst [vmem:[#allocation2 + $0x50] sm:$0x1] %v1176_v12  ;;  %v938_v17 = vor.u32 %v936_v60, %v935_v6  ;;  %v939_v18 = vrot.slane %v935_v6, 4  ;;  %v921_v20 = vor.u32 %v919_v62, %v918_v7 }
 0x111   : > { %1167 = vst.msk [vmem:[#allocation2 + $0x40] sm:$0xf] %vm609_vm6, %v896_v13  ;;  %1170 = vst [vmem:[#allocation2 + $0x44] sm:$0x1] %v1169_v14  ;;  %v922_v21 = vrot.slane %v918_v7, 4  ;;  %v941_v23 = vshrl.u32 %v6762_v8, 16  ;;  %v510_v36 = vadd.f32 %v6990_v58, %v7967_v19  ;;  %v502_v37 = vadd.f32 %v7967_v19, %v501_v63 }
 0x112   : > { %v944_v24 = vshll.u32 %v6762_v8, 16  ;;  %v924_v25 = vshrl.u32 %v6760_v10, 16  ;;  %v927_v26 = vshll.u32 %v6760_v10, 16  ;;  %v8059_v27 = vpop.f32.mrb[20].mxu0  ;;  %v1186_v28 = vsel %vm7976_vm12, %v938_v17, %v1185_v15  ;;  %v1199_v62 = vld [vmem:[#allocation2 + $0x78] sm:$0xf] }
 0x113   : > { %v1179_v29 = vsel %vm7976_vm12, %v921_v20, %v1178_v16  ;;  %v579_v30 = vmax.f32 %v507_v56, 0.0  ;;  %v577_v31 = vmax.f32 %v499_v57, 0.0  ;;  %v8065_v32 = vpop.f32.mrb[21].mxu0  ;;  %1187 = vst [vmem:[#allocation2 + $0x60] sm:$0xf] %v1186_v28  ;;  %v943_v33 = vrot.slane %v941_v23, 7 }
 0x114   : > { %1180 = vst [vmem:[#allocation2 + $0x54] sm:$0xf] %v1179_v29  ;;  %v926_v35 = vrot.slane %v924_v25, 7  ;;  %v8069_v38 = vpop.f32.mrb[22].mxu0  ;;  %v1329_v43 = vshll.u32 %v1250_v22, 16  ;;  %v580_v3 = vmax.f32 %v510_v36, 0.0 }
 0x115   : > { %v6765_v40 = vpack.c.bf16 %v579_v30, %v579_v30  ;;  %v6763_v41 = vpack.c.bf16 %v577_v31, %v577_v31  ;;  %v8071_v44 = vpop.f32.mrb[23].mxu0  ;;  %v946_v45 = vor.u32 %v944_v24, %v943_v33  ;;  %v948_v48 = vrot.slane %v943_v33, 4  ;;  %v1192_v63 = vld [vmem:[#allocation2 + $0x6c] sm:$0xf]  ;;  %v1283_v6 = vld [vmem:[#allocation2 + $0x14] sm:$0x1] }
 0x116   : > { %v929_v49 = vor.u32 %v927_v26, %v926_v35  ;;  %v931_v51 = vrot.slane %v926_v35, 4  ;;  %v578_v4 = vmax.f32 %v502_v37, 0.0  ;;  %v1328_v7 = vrot.slane %v1326_v42, 4  ;;  %v1252_v23 = vld [vmem:[#allocation2 + $0x18] sm:$0xf] }
 0x117   : > { %v967_v53 = vshrl.u32 %v6765_v40, 16  ;;  %v970_v54 = vshll.u32 %v6765_v40, 16  ;;  %v950_v56 = vshrl.u32 %v6763_v41, 16  ;;  %v953_v57 = vshll.u32 %v6763_v41, 16  ;;  %v1253_v30 = vld [vmem:[#allocation2 + $0x1c] sm:$0xf] }
 0x118   : > { %v947_v58 = vsel %vm7983_vm13, %v939_v18, %v946_v45  ;;  %v1190_v59 = vsel %vm7859_vm3, %v948_v48, %v1189_v34  ;;  %v930_v60 = vsel %vm7983_vm13, %v922_v21, %v929_v49  ;;  %v1183_v61 = vsel %vm7859_vm3, %v931_v51, %v1182_v39  ;;  %v1203_v37 = vld [vmem:[#allocation2 + $0x80] sm:$0x1]  ;;  %v1196_v39 = vld [vmem:[#allocation2 + $0x74] sm:$0x1]  ;;  %v8434_v55 = vld [vmem:[#allocation2 + $0x4c] sm:$0xf] }
 0x119   : > { %1188 = vst.msk [vmem:[#allocation2 + $0x64] sm:$0xf] %vm609_vm6, %v947_v58  ;;  %1191 = vst [vmem:[#allocation2 + $0x68] sm:$0x1] %v1190_v59  ;;  %v8083_v1 = vrot.slane %v967_v53, 7  ;;  %v8085_v2 = vrot.slane %v950_v56, 7  ;;  %v6766_v18 = vpack.c.bf16 %v580_v3, %v580_v3  ;;  %v6764_v20 = vpack.c.bf16 %v578_v4, %v578_v4 }
 0x11a   : > { %1181 = vst.msk [vmem:[#allocation2 + $0x58] sm:$0xf] %vm609_vm6, %v930_v60  ;;  %1184 = vst [vmem:[#allocation2 + $0x5c] sm:$0x1] %v1183_v61  ;;  %v1331_v8 = vrot.slane %v1329_v43, 5  ;;  %v1335_v10 = vshll.u32 %v1251_v52, 16 }
 0x11b   : > { %v1339_v11 = vshrl.u32 %v1251_v52, 16  ;;  %v8087_v12 = vpop.f32.mrb[24].mxu0  ;;  %v972_v13 = vor.u32 %v970_v54, %v8083_v1  ;;  %v973_v14 = vrot.slane %v8083_v1, 4  ;;  %v955_v15 = vor.u32 %v953_v57, %v8085_v2  ;;  %v7625_v52 = vld [vmem:[%s9709_s3 + $0x28] sm:$0xff]   ;;  %9748 = vst [vmem:[#allocation5_spill] sm:$0xff] %v8434_v55 }
 0x11c   : > { %v956_v16 = vrot.slane %v8085_v2, 4  ;;  %v8093_v17 = vpop.f32.mrb[25].mxu0  ;;  %v1332_v21 = vor.u32 %v1331_v8, %v1328_v7  ;;  %v1337_v22 = vrot.slane %v1335_v10, 5  ;;  %v1345_v29 = vshll.u32 %v1283_v6, 16 }
 0x11d   : > { %v8095_v24 = vpop.f32.mrb[26].mxu0  ;;  %v1200_v25 = vsel %vm7976_vm12, %v972_v13, %v1199_v62  ;;  %v1193_v26 = vsel %vm7976_vm12, %v955_v15, %v1192_v63  ;;  %v1341_v28 = vrot.slane %v1339_v11, 4  ;;  %v975_v33 = vshrl.u32 %v6766_v18, 16  ;;  %v1284_v63 = vld [vmem:[#allocation2 + $0x20] sm:$0x1] }
 0x11e   : > { %v8101_v31 = vpop.f32.mrb[27].mxu0  ;;  %1201 = vst [vmem:[#allocation2 + $0x78] sm:$0xf] %v1200_v25  ;;  %1194 = vst [vmem:[#allocation2 + $0x6c] sm:$0xf] %v1193_v26  ;;  %v978_v34 = vshll.u32 %v6766_v18, 16  ;;  %v523_v25 = vadd.f32 %v8059_v27, %v7967_v19  ;;  %v515_v26 = vadd.f32 %v7967_v19, %v8065_v32 }
 0x11f   : > { %v958_v35 = vshrl.u32 %v6764_v20, 16  ;;  %v961_v36 = vshll.u32 %v6764_v20, 16  ;;  %v1333_v40 = vrot.slane %v1332_v21, 4  ;;  %v1342_v41 = vor.u32 %v1341_v28, %v1337_v22  ;;  %v1254_v18 = vld [vmem:[#allocation2 + $0x24] sm:$0xf] }
 0x120   : > { %v1347_v42 = vrot.slane %v1345_v29, 5  ;;  %v1350_v43 = vshrl.u32 %v1252_v23, 16  ;;  %v977_v45 = vrot.slane %v975_v33, 7  ;;  %v1353_v49 = vshll.u32 %v1252_v23, 16  ;;  %v7616_v1 = vld [vmem:[#allocation2 + $0x60] sm:$0xff]  }
 0x121   : > { %v960_v48 = vrot.slane %v958_v35, 7  ;;  %v1359_v51 = vshll.u32 %v1253_v30, 16  ;;  %v1338_v53 = vsel %vm7918_vm9, %v1333_v40, %v1337_v22  ;;  %v1343_v54 = vrot.slane %v1342_v41, 4  ;;  %v7614_v58 = vld [vmem:[#allocation2 + $0x54] sm:$0xff]   ;;  %v8108_v2 = vpop.f32.mrb[28].mxu0 }
 0x122   : > { %v1352_v56 = vrot.slane %v1350_v43, 4  ;;  %v1363_v57 = vshrl.u32 %v1253_v30, 16  ;;  %v980_v59 = vor.u32 %v978_v34, %v977_v45  ;;  %v982_v60 = vrot.slane %v977_v45, 4  ;;  %7119 = vmatprep.mubr.msk.bf16.mxu1 %vm1742_vm10, %v7614_v58  ;;  %v8113_v8 = vpop.f32.mrb[29].mxu0  ;;  %v1213_v58 = vld [vmem:[#allocation2 + $0x90] sm:$0xf] }
 0x123   : > { %v963_v61 = vor.u32 %v961_v36, %v960_v48  ;;  %v965_v62 = vrot.slane %v960_v48, 4  ;;  %v1348_v3 = vsel %vm7918_vm9, %v1343_v54, %v1347_v42  ;;  %v1355_v4 = vrot.slane %v1353_v49, 5  ;;  %7120 = vmatmul.mubr.msk.bf16.vlgmr.msra.gmra.mrb[0].mxu1 %vm1742_vm10, %v7616_v1  ;;  %v8124_v20 = vpop.f32.mrb[30].mxu0  ;;  %v1285_v49 = vld [vmem:[#allocation2 + $0x2c] sm:$0x1] }
 0x124   : > { %v1361_v6 = vrot.slane %v1359_v51, 5  ;;  %v1365_v7 = vrot.slane %v1363_v57, 4  ;;  %v981_v10 = vsel %vm7983_vm13, %v973_v14, %v980_v59  ;;  %v1204_v11 = vsel %vm7859_vm3, %v982_v60, %v1203_v37  ;;  %7140 = vmatpush3.bf16.msra.mxu1 %v7951_v9 }
 0x125   : > { %v964_v13 = vsel %vm7983_vm13, %v956_v16, %v963_v61  ;;  %v1197_v15 = vsel %vm7859_vm3, %v965_v62, %v1196_v39  ;;  %1202 = vst.msk [vmem:[#allocation2 + $0x7c] sm:$0xf] %vm609_vm6, %v981_v10  ;;  %1205 = vst [vmem:[#allocation2 + $0x80] sm:$0x1] %v1204_v11  ;;  %v6366_v14 = vcombine.low %v1338_v53, %v1348_v3  ;;  %v1369_v23 = vshll.u32 %v1284_v63, 16  ;;  %v8129_v16 = vpop.f32.mrb[31].mxu0 }
 0x126   : > { %1195 = vst.msk [vmem:[#allocation2 + $0x70] sm:$0xf] %vm609_vm6, %v964_v13  ;;  %1198 = vst [vmem:[#allocation2 + $0x74] sm:$0x1] %v1197_v15  ;;  %v1356_v21 = vor.u32 %v1355_v4, %v1352_v56  ;;  %v1366_v22 = vor.u32 %v1365_v7, %v1361_v6  ;;  %v526_v28 = vadd.f32 %v8069_v38, %v7967_v19  ;;  %7173 = vmatprep.subr.bf16.mxu1 %v7625_v52  ;;  %v1255_v39 = vld [vmem:[#allocation2 + $0x28] sm:$0xf] }
 0x127   : > { %v518_v29 = vadd.f32 %v7967_v19, %v8071_v44  ;;  %7006 = vmatmul.mubr.msk.bf16.vlgmr.msra.gmra.mrb[32].mxu0 %vm1742_vm10, %v6366_v14  ;;  %v1371_v9 = vrot.slane %v1369_v23, 5  ;;  %v1374_v34 = vshrl.u32 %v1254_v18, 16  ;;  %v583_v35 = vmax.f32 %v523_v25, 0.0  ;;  %v1206_v10 = vld [vmem:[#allocation2 + $0x84] sm:$0xf] }
 0x128   : > { %v1357_v30 = vrot.slane %v1356_v21, 4  ;;  %v1367_v33 = vrot.slane %v1366_v22, 4  ;;  %v581_v36 = vmax.f32 %v515_v26, 0.0  ;;  %v584_v37 = vmax.f32 %v526_v28, 0.0  ;;  %7038 = vmatpush3.bf16.msra.mxu0 %v8046_v5  ;;  %v1217_v25 = vld [vmem:[#allocation2 + $0x98] sm:$0x1] }
 0x129   : > { %v582_v27 = vmax.f32 %v518_v29, 0.0  ;;  %v1376_v44 = vrot.slane %v1374_v34, 4  ;;  %v1377_v40 = vshll.u32 %v1254_v18, 16  ;;  %v6769_v42 = vpack.c.bf16 %v583_v35, %v583_v35  ;;  %v1210_v26 = vld [vmem:[#allocation2 + $0x8c] sm:$0x1] }
 0x12a   : > { %v1362_v32 = vsel %vm7918_vm9, %v1357_v30, %v1361_v6  ;;  %v1372_v38 = vsel %vm7918_vm9, %v1367_v33, %v1371_v9  ;;  %v6767_v43 = vpack.c.bf16 %v581_v36, %v581_v36  ;;  %v6770_v45 = vpack.c.bf16 %v584_v37, %v584_v37  ;;  %v1256_v9 = vld [vmem:[#allocation2 + $0x30] sm:$0xf] }
 0x12b   : > { %v6367_v41 = vcombine.low %v1362_v32, %v1372_v38  ;;  %v6768_v48 = vpack.c.bf16 %v582_v27, %v582_v27  ;;  %v1379_v51 = vrot.slane %v1377_v40, 5  ;;  %v1383_v52 = vshll.u32 %v1255_v39, 16  ;;  %v1257_v27 = vld [vmem:[#allocation2 + $0x34] sm:$0xf] }
 0x12c   : > { %v1387_v53 = vshrl.u32 %v1255_v39, 16  ;;  %v1001_v5 = vshrl.u32 %v6769_v42, 16  ;;  %v1004_v54 = vshll.u32 %v6769_v42, 16  ;;  %v984_v56 = vshrl.u32 %v6767_v43, 16  ;;  %v7618_v7 = vld [vmem:[#allocation2 + $0x78] sm:$0xff]  }
 0x12d   : > { %7009 = vmatprep.mubr.msk.bf16.mxu0 %vm1742_vm10, %v6367_v41  ;;  %v987_v57 = vshll.u32 %v6767_v43, 16  ;;  %v1009_v59 = vshrl.u32 %v6770_v45, 16  ;;  %v1012_v60 = vshll.u32 %v6770_v45, 16  ;;  %v992_v61 = vshrl.u32 %v6768_v48, 16  ;;  %v7617_v63 = vld [vmem:[#allocation2 + $0x6c] sm:$0xff]  }
 0x12e   : > { %v995_v62 = vshll.u32 %v6768_v48, 16  ;;  %v1003_v1 = vrot.slane %v1001_v5, 7  ;;  %v986_v3 = vrot.slane %v984_v56, 7  ;;  %v1380_v4 = vor.u32 %v1379_v51, %v1376_v44  ;;  %7123 = vmatprep.mubr.msk.bf16.mxu1 %vm1742_vm10, %v7617_v63  ;;  %v1286_v39 = vld [vmem:[#allocation2 + $0x38] sm:$0x1] }
 0x12f   : > { %v1385_v6 = vrot.slane %v1383_v52, 5  ;;  %v1011_v11 = vrot.slane %v1009_v59, 7  ;;  %v994_v13 = vrot.slane %v992_v61, 7  ;;  %v1389_v15 = vrot.slane %v1387_v53, 4  ;;  %7124 = vmatmul.mubr.msk.bf16.gmra.mrb[4].mxu1 %vm1742_vm10, %v7618_v7  ;;  %v1258_v48 = vld [vmem:[#allocation2 + $0x3c] sm:$0xf] }
 0x130   : > { %v1393_v18 = vshll.u32 %v1285_v49, 16  ;;  %v1006_v14 = vor.u32 %v1004_v54, %v1003_v1  ;;  %v1007_v21 = vrot.slane %v1003_v1, 4  ;;  %v989_v22 = vor.u32 %v987_v57, %v986_v3 }
 0x131   : > { %v990_v23 = vrot.slane %v986_v3, 4  ;;  %v1014_v28 = vor.u32 %v1012_v60, %v1011_v11  ;;  %v1016_v29 = vrot.slane %v1011_v11, 4  ;;  %v997_v30 = vor.u32 %v995_v62, %v994_v13 }
 0x132   : > { %v999_v33 = vrot.slane %v994_v13, 4  ;;  %v1214_v34 = vsel %vm7976_vm12, %v1006_v14, %v1213_v58  ;;  %v1207_v35 = vsel %vm7976_vm12, %v989_v22, %v1206_v10  ;;  %v1381_v36 = vrot.slane %v1380_v4, 4 }
 0x133   : > { %v1390_v37 = vor.u32 %v1389_v15, %v1385_v6  ;;  %1215 = vst [vmem:[#allocation2 + $0x90] sm:$0xf] %v1214_v34  ;;  %1208 = vst [vmem:[#allocation2 + $0x84] sm:$0xf] %v1207_v35  ;;  %v1015_v32 = vsel %vm7983_vm13, %v1007_v21, %v1014_v28  ;;  %v1218_v38 = vsel %vm7859_vm3, %v1016_v29, %v1217_v25  ;;  %v1395_v43 = vrot.slane %v1393_v18, 5 }
 0x134   : > { %v998_v44 = vsel %vm7983_vm13, %v990_v23, %v997_v30  ;;  %v1211_v40 = vsel %vm7859_vm3, %v999_v33, %v1210_v26  ;;  %1216 = vst.msk [vmem:[#allocation2 + $0x94] sm:$0xf] %vm609_vm6, %v1015_v32  ;;  %1219 = vst [vmem:[#allocation2 + $0x98] sm:$0x1] %v1218_v38  ;;  %v1386_v41 = vsel %vm7918_vm9, %v1381_v36, %v1385_v6  ;;  %v1398_v45 = vshrl.u32 %v1256_v9, 16 }
 0x135   : > { %1209 = vst.msk [vmem:[#allocation2 + $0x88] sm:$0xf] %vm609_vm6, %v998_v44  ;;  %1212 = vst [vmem:[#allocation2 + $0x8c] sm:$0x1] %v1211_v40  ;;  %v1391_v42 = vrot.slane %v1390_v37, 4  ;;  %v1401_v49 = vshll.u32 %v1256_v9, 16  ;;  %v539_v56 = vadd.f32 %v8087_v12, %v7967_v19  ;;  %v531_v57 = vadd.f32 %v7967_v19, %v8093_v17 }
 0x136   : > { %v1407_v51 = vshll.u32 %v1257_v27, 16  ;;  %v1411_v52 = vshrl.u32 %v1257_v27, 16  ;;  %v1417_v53 = vshll.u32 %v1286_v39, 16  ;;  %v1400_v54 = vrot.slane %v1398_v45, 4  ;;  %v1220_v29 = vld [vmem:[#allocation2 + $0x9c] sm:$0xf] }
 0x137   : > { %v1396_v5 = vsel %vm7918_vm9, %v1391_v42, %v1395_v43  ;;  %v1403_v59 = vrot.slane %v1401_v49, 5  ;;  %v587_v63 = vmax.f32 %v539_v56, 0.0  ;;  %v585_v1 = vmax.f32 %v531_v57, 0.0  ;;  %v8179_v37 = vld [vmem:[#allocation2 + $0x40] sm:$0xf] }
 0x138   : > { %v6368_v58 = vcombine.low %v1386_v41, %v1396_v5  ;;  %v1409_v60 = vrot.slane %v1407_v51, 5  ;;  %v1413_v61 = vrot.slane %v1411_v52, 4  ;;  %v1419_v62 = vrot.slane %v1417_v53, 5  ;;  %v1287_v40 = vld [vmem:[#allocation2 + $0x44] sm:$0x1] }
 0x139   : > { %v542_v3 = vadd.f32 %v8095_v24, %v7967_v19  ;;  %v1404_v4 = vor.u32 %v1403_v59, %v1400_v54  ;;  %v534_v12 = vadd.f32 %v7967_v19, %v8101_v31  ;;  %v1422_v7 = vshrl.u32 %v1258_v48, 16  ;;  %v1227_v31 = vld [vmem:[#allocation2 + $0xa8] sm:$0xf]  ;;  %v1231_v54 = vld [vmem:[#allocation2 + $0xb0] sm:$0x1] }
 0x13a   : > { %7010 = vmatmul.mubr.msk.bf16.gmra.mrb[36].mxu0 %vm1742_vm10, %v6368_v58  ;;  %v1414_v6 = vor.u32 %v1413_v61, %v1409_v60  ;;  %v6773_v10 = vpack.c.bf16 %v587_v63, %v587_v63  ;;  %v6771_v17 = vpack.c.bf16 %v585_v1, %v585_v1  ;;  %v1425_v13 = vshll.u32 %v1258_v48, 16  ;;  %v1224_v56 = vld [vmem:[#allocation2 + $0xa4] sm:$0x1]  ;;  %v8190_v63 = vld [vmem:[#allocation2 + $0x48] sm:$0xf] }
 0x13b   : > { %v588_v11 = vmax.f32 %v542_v3, 0.0  ;;  %v1405_v15 = vrot.slane %v1404_v4, 4  ;;  %v586_v14 = vmax.f32 %v534_v12, 0.0  ;;  %v1424_v21 = vrot.slane %v1422_v7, 4  ;;  %v7620_v9 = vld [vmem:[#allocation2 + $0x90] sm:$0xff]  }
 0x13c   : > { %v1415_v18 = vrot.slane %v1414_v6, 4  ;;  %v1035_v22 = vshrl.u32 %v6773_v10, 16  ;;  %v1038_v23 = vshll.u32 %v6773_v10, 16  ;;  %v1018_v25 = vshrl.u32 %v6771_v17, 16  ;;  %v7619_v26 = vld [vmem:[#allocation2 + $0x84] sm:$0xff]  }
 0x13d   : > { %v1021_v24 = vshll.u32 %v6771_v17, 16  ;;  %v1410_v28 = vsel %vm7918_vm9, %v1405_v15, %v1409_v60  ;;  %v6774_v30 = vpack.c.bf16 %v588_v11, %v588_v11  ;;  %v6772_v33 = vpack.c.bf16 %v586_v14, %v586_v14  ;;  %7127 = vmatprep.mubr.msk.bf16.mxu1 %vm1742_vm10, %v7619_v26  ;;  %v8192_v1 = vld [vmem:[#allocation2 + $0x4c] sm:$0xf]  ;;  %v1288_v7 = vld [vmem:[#allocation2 + $0x50] sm:$0x1] }
 0x13e   : > { %v1420_v19 = vsel %vm7918_vm9, %v1415_v18, %v1419_v62  ;;  %v1037_v35 = vrot.slane %v1035_v22, 7  ;;  %v1020_v36 = vrot.slane %v1018_v25, 7  ;;  %v1427_v27 = vrot.slane %v1425_v13, 5  ;;  %7128 = vmatmul.mubr.msk.bf16.gmra.mrb[8].mxu1 %vm1742_vm10, %v7620_v9 }
 0x13f   : > { %v6369_v34 = vcombine.low %v1410_v28, %v1420_v19  ;;  %v1043_v39 = vshrl.u32 %v6774_v30, 16  ;;  %v1046_v32 = vshll.u32 %v6774_v30, 16  ;;  %v1026_v38 = vshrl.u32 %v6772_v33, 16 }
 0x140   : > { %v1029_v44 = vshll.u32 %v6772_v33, 16  ;;  %v1040_v41 = vor.u32 %v1038_v23, %v1037_v35  ;;  %v1041_v42 = vrot.slane %v1037_v35, 4  ;;  %v1023_v43 = vor.u32 %v1021_v24, %v1020_v36  ;;  %v7663_v24 = vld [vmem:[%s9708_s2] ss:$0 sm:$0xff]  ;;  %v8215_v35 = vld [vmem:[#allocation2 + $0x54] sm:$0xf] }
 0x141   : > { %7013 = vmatprep.mubr.msk.bf16.mxu0 %vm1742_vm10, %v6369_v34  ;;  %v1024_v45 = vrot.slane %v1020_v36, 4  ;;  %v1045_v48 = vrot.slane %v1043_v39, 7  ;;  %v1028_v49 = vrot.slane %v1026_v38, 7  ;;  %v1428_v51 = vor.u32 %v1427_v27, %v1424_v21 }
 0x142   : > { %v1431_v52 = vshll.u32 %v8179_v37, 16  ;;  %v1228_v53 = vsel %vm7976_vm12, %v1040_v41, %v1227_v31  ;;  %v1221_v5 = vsel %vm7976_vm12, %v1023_v43, %v1220_v29  ;;  %v1435_v57 = vshrl.u32 %v8179_v37, 16 }
 0x143   : > { %v1441_v58 = vshll.u32 %v1287_v40, 16  ;;  %1229 = vst [vmem:[#allocation2 + $0xa8] sm:$0xf] %v1228_v53  ;;  %1222 = vst [vmem:[#allocation2 + $0x9c] sm:$0xf] %v1221_v5  ;;  %v1048_v59 = vor.u32 %v1046_v32, %v1045_v48  ;;  %v1050_v60 = vrot.slane %v1045_v48, 4  ;;  %v1031_v61 = vor.u32 %v1029_v44, %v1028_v49 }
 0x144   : > { %v1033_v62 = vrot.slane %v1028_v49, 4  ;;  %v1429_v3 = vrot.slane %v1428_v51, 4  ;;  %v1433_v4 = vrot.slane %v1431_v52, 5  ;;  %v1437_v6 = vrot.slane %v1435_v57, 4  ;;  %v1241_v57 = vld [vmem:[#allocation2 + $0xc0] sm:$0xf] }
 0x145   : > { %v1443_v12 = vrot.slane %v1441_v58, 5  ;;  %v1049_v10 = vsel %vm7983_vm13, %v1041_v42, %v1048_v59  ;;  %v1232_v17 = vsel %vm7859_vm3, %v1050_v60, %v1231_v54  ;;  %v1032_v11 = vsel %vm7983_vm13, %v1024_v45, %v1031_v61 }
 0x146   : > { %v1225_v13 = vsel %vm7859_vm3, %v1033_v62, %v1224_v56  ;;  %1230 = vst.msk [vmem:[#allocation2 + $0xac] sm:$0xf] %vm609_vm6, %v1049_v10  ;;  %1233 = vst [vmem:[#allocation2 + $0xb0] sm:$0x1] %v1232_v17  ;;  %v1434_v15 = vsel %vm7918_vm9, %v1429_v3, %v1433_v4  ;;  %v1438_v18 = vor.u32 %v1437_v6, %v1433_v4  ;;  %v1446_v14 = vshrl.u32 %v8190_v63, 16 }
 0x147   : > { %1223 = vst.msk [vmem:[#allocation2 + $0xa0] sm:$0xf] %vm609_vm6, %v1032_v11  ;;  %1226 = vst [vmem:[#allocation2 + $0xa4] sm:$0x1] %v1225_v13  ;;  %v1449_v21 = vshll.u32 %v8190_v63, 16  ;;  %v1455_v22 = vshll.u32 %v8192_v1, 16  ;;  %v555_v26 = vadd.f32 %v7663_v24, %v8108_v2  ;;  %v547_v29 = vadd.f32 %v7663_v24, %v8113_v8 }
 0x148   : > { %v1459_v23 = vshrl.u32 %v8192_v1, 16  ;;  %v1465_v25 = vshll.u32 %v1288_v7, 16  ;;  %v1439_v28 = vrot.slane %v1438_v18, 4  ;;  %v1448_v19 = vrot.slane %v1446_v14, 4  ;;  %v8227_v6 = vld [vmem:[#allocation2 + $0x58] sm:$0xf] }
 0x149   : > { %v1451_v31 = vrot.slane %v1449_v21, 5  ;;  %v1457_v30 = vrot.slane %v1455_v22, 5  ;;  %v591_v34 = vmax.f32 %v555_v26, 0.0  ;;  %v589_v39 = vmax.f32 %v547_v29, 0.0  ;;  %v1234_v10 = vld [vmem:[#allocation2 + $0xb4] sm:$0xf] }
 0x14a   : > { %v1461_v33 = vrot.slane %v1459_v23, 4  ;;  %v1467_v9 = vrot.slane %v1465_v25, 5  ;;  %v1444_v36 = vsel %vm7918_vm9, %v1439_v28, %v1443_v12  ;;  %v558_v32 = vadd.f32 %v7663_v24, %v8124_v20  ;;  %v8234_v13 = vld [vmem:[%s9709_s3 + $0x10] sm:$0xff]   ;;  %v1245_v21 = vld [vmem:[#allocation2 + $0xc8] sm:$0x1] }
 0x14b   : > { %v1452_v27 = vor.u32 %v1451_v31, %v1448_v19  ;;  %v6370_v38 = vcombine.low %v1434_v15, %v1444_v36  ;;  %v6777_v44 = vpack.c.bf16 %v591_v34, %v591_v34  ;;  %v550_v40 = vadd.f32 %v7663_v24, %v8129_v16  ;;  %v1289_v24 = vld [vmem:[#allocation2 + $0x5c] sm:$0x1]  ;;  %7071 = vmatprep.subr.bf16.mxu0 %v8234_v13 }
 0x14c   : > { %v1462_v2 = vor.u32 %v1461_v33, %v1457_v30  ;;  %v6775_v8 = vpack.c.bf16 %v589_v39, %v589_v39  ;;  %v592_v42 = vmax.f32 %v558_v32, 0.0  ;;  %v1470_v43 = vshrl.u32 %v8215_v35, 16  ;;  %v8247_v32 = vld [vmem:[#allocation2 + $0x64] sm:$0xf] }
 0x14d   : > { %v1453_v41 = vrot.slane %v1452_v27, 4  ;;  %7014 = vmatmul.mubr.msk.bf16.gmra.mrb[40].mxu0 %vm1742_vm10, %v6370_v38  ;;  %v1069_v48 = vshrl.u32 %v6777_v44, 16  ;;  %v1072_v49 = vshll.u32 %v6777_v44, 16  ;;  %v590_v51 = vmax.f32 %v550_v40, 0.0  ;;  %v7622_v60 = vld [vmem:[#allocation2 + $0xa8] sm:$0xff]  }
 0x14e   : > { %v1463_v45 = vrot.slane %v1462_v2, 4  ;;  %v1052_v20 = vshrl.u32 %v6775_v8, 16  ;;  %v1055_v53 = vshll.u32 %v6775_v8, 16  ;;  %v6778_v5 = vpack.c.bf16 %v592_v42, %v592_v42  ;;  %v7621_v54 = vld [vmem:[#allocation2 + $0x9c] sm:$0xff]   ;;  %v1290_v40 = vld [vmem:[#allocation2 + $0x68] sm:$0x1] }
 0x14f   : > { %v1458_v52 = vsel %vm7918_vm9, %v1453_v41, %v1457_v30  ;;  %v1071_v56 = vrot.slane %v1069_v48, 7  ;;  %v6776_v58 = vpack.c.bf16 %v590_v51, %v590_v51  ;;  %v1472_v59 = vrot.slane %v1470_v43, 4  ;;  %7131 = vmatprep.mubr.msk.bf16.mxu1 %vm1742_vm10, %v7621_v54  ;;  %v1238_v30 = vld [vmem:[#allocation2 + $0xbc] sm:$0x1] }
 0x150   : > { %v1468_v16 = vsel %vm7918_vm9, %v1463_v45, %v1467_v9  ;;  %v1054_v62 = vrot.slane %v1052_v20, 7  ;;  %v1077_v3 = vshrl.u32 %v6778_v5, 16  ;;  %v1080_v4 = vshll.u32 %v6778_v5, 16  ;;  %7132 = vmatmul.mubr.msk.bf16.gmra.mrb[12].mxu1 %vm1742_vm10, %v7622_v60  ;;  %v8245_v9 = vld [vmem:[#allocation2 + $0x60] sm:$0xf] }
 0x151   : > { %v6371_v61 = vcombine.low %v1458_v52, %v1468_v16  ;;  %v1074_v12 = vor.u32 %v1072_v49, %v1071_v56  ;;  %v1075_v7 = vrot.slane %v1071_v56, 4  ;;  %v1060_v17 = vshrl.u32 %v6776_v58, 16  ;;  %v8259_v45 = vld [vmem:[#allocation2 + $0x6c] sm:$0xf]  ;;  %v8264_v20 = vld [vmem:[#allocation2 + $0x70] sm:$0xf] }
 0x152   : > { %v1063_v11 = vshll.u32 %v6776_v58, 16  ;;  %v1057_v15 = vor.u32 %v1055_v53, %v1054_v62  ;;  %v1058_v18 = vrot.slane %v1054_v62, 4  ;;  %v1079_v14 = vrot.slane %v1077_v3, 7  ;;  %v1291_v16 = vld [vmem:[#allocation2 + $0x74] sm:$0x1] }
 0x153   : > { %7017 = vmatprep.mubr.msk.bf16.mxu0 %vm1742_vm10, %v6371_v61  ;;  %v1473_v22 = vshll.u32 %v8215_v35, 16  ;;  %v1242_v23 = vsel %vm7976_vm12, %v1074_v12, %v1241_v57  ;;  %v1062_v25 = vrot.slane %v1060_v17, 7  ;;  %v1479_v26 = vshll.u32 %v8227_v6, 16  ;;  %v8267_v56 = vld [vmem:[#allocation2 + $0x78] sm:$0xf] }
 0x154   : > { %v1483_v28 = vshrl.u32 %v8227_v6, 16  ;;  %1243 = vst [vmem:[#allocation2 + $0xc0] sm:$0xf] %v1242_v23  ;;  %v1235_v19 = vsel %vm7976_vm12, %v1057_v15, %v1234_v10  ;;  %v1082_v31 = vor.u32 %v1080_v4, %v1079_v14  ;;  %v1084_v29 = vrot.slane %v1079_v14, 4 }
 0x155   : > { %v1475_v33 = vrot.slane %v1473_v22, 5  ;;  %1236 = vst [vmem:[#allocation2 + $0xb4] sm:$0xf] %v1235_v19  ;;  %v1065_v34 = vor.u32 %v1063_v11, %v1062_v25  ;;  %v1067_v36 = vrot.slane %v1062_v25, 4  ;;  %v1481_v27 = vrot.slane %v1479_v26, 5 }
 0x156   : > { %v1485_v39 = vrot.slane %v1483_v28, 4  ;;  %v1083_v38 = vsel %vm7983_vm13, %v1075_v7, %v1082_v31  ;;  %v1246_v47 = vsel %vm7859_vm3, %v1084_v29, %v1245_v21  ;;  %v1489_v44 = vshll.u32 %v1289_v24, 16  ;;  %v8276_v11 = vld [vmem:[#allocation2 + $0x7c] sm:$0xf]  ;;  %v1292_v22 = vld [vmem:[#allocation2 + $0x80] sm:$0x1] }
 0x157   : > { %v1476_v2 = vor.u32 %v1475_v33, %v1472_v59  ;;  %1244 = vst.msk [vmem:[#allocation2 + $0xc4] sm:$0xf] %vm609_vm6, %v1083_v38  ;;  %1247 = vst [vmem:[#allocation2 + $0xc8] sm:$0x1] %v1246_v47  ;;  %v1066_v41 = vsel %vm7983_vm13, %v1058_v18, %v1065_v34  ;;  %v1239_v8 = vsel %vm7859_vm3, %v1067_v36, %v1238_v30  ;;  %v1494_v43 = vshrl.u32 %v8245_v9, 16 }
 0x158   : > { %v1486_v42 = vor.u32 %v1485_v39, %v1481_v27  ;;  %1237 = vst.msk [vmem:[#allocation2 + $0xb8] sm:$0xf] %vm609_vm6, %v1066_v41  ;;  %1240 = vst [vmem:[#allocation2 + $0xbc] sm:$0x1] %v1239_v8  ;;  %v1491_v49 = vrot.slane %v1489_v44, 5  ;;  %v1497_v51 = vshll.u32 %v8245_v9, 16 }
 0x159   : > { %v1477_v48 = vrot.slane %v1476_v2, 4  ;;  %v1503_v52 = vshll.u32 %v8247_v32, 16  ;;  %v1496_v53 = vrot.slane %v1494_v43, 4  ;;  %v1507_v5 = vshrl.u32 %v8247_v32, 16  ;;  %v8285_v39 = vld [vmem:[#allocation2 + $0x84] sm:$0xf] }
 0x15a   : > { %v1487_v0 = vrot.slane %v1486_v42, 4  ;;  %v1513_v54 = vshll.u32 %v1290_v40, 16  ;;  %v1499_v58 = vrot.slane %v1497_v51, 5  ;;  %v1518_v60 = vshrl.u32 %v8259_v45, 16  ;;  %v8290_v41 = vld [vmem:[#allocation2 + $0x88] sm:$0xf] }
 0x15b   : > { %v1482_v57 = vsel %vm7918_vm9, %v1477_v48, %v1481_v27  ;;  %v1505_v59 = vrot.slane %v1503_v52, 5  ;;  %v1509_v62 = vrot.slane %v1507_v5, 4  ;;  %v1521_v4 = vshll.u32 %v8259_v45, 16 }
 0x15c   : > { %v1492_v61 = vsel %vm7918_vm9, %v1487_v0, %v1491_v49  ;;  %v1515_v3 = vrot.slane %v1513_v54, 5  ;;  %v1500_v7 = vor.u32 %v1499_v58, %v1496_v53  ;;  %v1520_v10 = vrot.slane %v1518_v60, 4  ;;  %v1293_v0 = vld [vmem:[#allocation2 + $0x8c] sm:$0x1]  ;;  %v8300_v58 = vld [vmem:[#allocation2 + $0x90] sm:$0xf] }
 0x15d   : > { %v6372_v12 = vcombine.low %v1482_v57, %v1492_v61  ;;  %v1527_v17 = vshll.u32 %v8264_v20, 16  ;;  %v1510_v15 = vor.u32 %v1509_v62, %v1505_v59  ;;  %v1523_v18 = vrot.slane %v1521_v4, 5 }
 0x15e   : > { %v1531_v14 = vshrl.u32 %v8264_v20, 16  ;;  %v1537_v21 = vshll.u32 %v1291_v16, 16  ;;  %v1501_v23 = vrot.slane %v1500_v7, 4  ;;  %v1542_v24 = vshrl.u32 %v8267_v56, 16  ;;  %v7624_v38 = vld [vmem:[#allocation2 + $0xc0] sm:$0xff]  }
 0x15f   : > { %7018 = vmatmul.mubr.msk.bf16.gmra.mrb[44].mxu0 %vm1742_vm10, %v6372_v12  ;;  %v1529_v25 = vrot.slane %v1527_v17, 5  ;;  %v1545_v26 = vshll.u32 %v8267_v56, 16  ;;  %v1511_v28 = vrot.slane %v1510_v15, 4  ;;  %v1524_v19 = vor.u32 %v1523_v18, %v1520_v10  ;;  %v7623_v30 = vld [vmem:[#allocation2 + $0xb4] sm:$0xff]  }
 0x160   : > { %v1533_v31 = vrot.slane %v1531_v14, 4  ;;  %v1539_v29 = vrot.slane %v1537_v21, 5  ;;  %v1506_v33 = vsel %vm7918_vm9, %v1501_v23, %v1505_v59  ;;  %v1544_v34 = vrot.slane %v1542_v24, 4  ;;  %7135 = vmatprep.mubr.msk.bf16.mxu1 %vm1742_vm10, %v7623_v30  ;;  %v1294_v14 = vld [vmem:[#allocation2 + $0x98] sm:$0x1] }
 0x161   : > { %v1547_v36 = vrot.slane %v1545_v26, 5  ;;  %v1551_v27 = vshll.u32 %v8276_v11, 16  ;;  %v1516_v47 = vsel %vm7918_vm9, %v1511_v28, %v1515_v3  ;;  %v1525_v2 = vrot.slane %v1524_v19, 4  ;;  %7136 = vmatmul.mubr.msk.bf16.gmra.mrb[16].mxu1 %vm1742_vm10, %v7624_v38  ;;  %v8305_v3 = vld [vmem:[#allocation2 + $0x94] sm:$0xf] }
 0x162   : > { %v1534_v44 = vor.u32 %v1533_v31, %v1529_v25  ;;  %v1555_v40 = vshrl.u32 %v8276_v11, 16  ;;  %v6373_v8 = vcombine.low %v1506_v33, %v1516_v47  ;;  %v1561_v48 = vshll.u32 %v1292_v22, 16  ;;  %v8314_v26 = vld [vmem:[#allocation2 + $0x9c] sm:$0xf]  ;;  %v8318_v30 = vld [vmem:[#allocation2 + $0xa0] sm:$0xf] }
 0x163   : > { %v1548_v42 = vor.u32 %v1547_v36, %v1544_v34  ;;  %v1553_v43 = vrot.slane %v1551_v27, 5  ;;  %v1530_v49 = vsel %vm7918_vm9, %v1525_v2, %v1529_v25  ;;  %v1566_v53 = vshrl.u32 %v8285_v39, 16  ;;  %v8320_v38 = vld [vmem:[#allocation2 + $0xa8] sm:$0xf] }
 0x164   : > { %v1535_v51 = vrot.slane %v1534_v44, 4  ;;  %v1557_v52 = vrot.slane %v1555_v40, 4  ;;  %7021 = vmatprep.mubr.msk.bf16.mxu0 %vm1742_vm10, %v6373_v8  ;;  %v1563_v54 = vrot.slane %v1561_v48, 5  ;;  %v1569_v16 = vshll.u32 %v8285_v39, 16  ;;  %v1295_v40 = vld [vmem:[#allocation2 + $0xa4] sm:$0x1] }
 0x165   : > { %v1549_v5 = vrot.slane %v1548_v42, 4  ;;  %v1575_v57 = vshll.u32 %v8290_v41, 16  ;;  %v1568_v61 = vrot.slane %v1566_v53, 4  ;;  %v1579_v62 = vshrl.u32 %v8290_v41, 16 }
 0x166   : > { %v1540_v59 = vsel %vm7918_vm9, %v1535_v51, %v1539_v29  ;;  %v1558_v60 = vor.u32 %v1557_v52, %v1553_v43  ;;  %v1571_v7 = vrot.slane %v1569_v16, 5  ;;  %v1585_v18 = vshll.u32 %v1293_v0, 16  ;;  %v8328_v51 = vld [vmem:[#allocation2 + $0xac] sm:$0xf] }
 0x167   : > { %v6374_v4 = vcombine.low %v1530_v49, %v1540_v59  ;;  %v1554_v12 = vsel %vm7918_vm9, %v1549_v5, %v1553_v43  ;;  %v1577_v10 = vrot.slane %v1575_v57, 5  ;;  %v1581_v15 = vrot.slane %v1579_v62, 4 }
 0x168   : > { %v1559_v17 = vrot.slane %v1558_v60, 4  ;;  %v1590_v21 = vshrl.u32 %v8300_v58, 16  ;;  %v1572_v22 = vor.u32 %v1571_v7, %v1568_v61  ;;  %v1593_v23 = vshll.u32 %v8300_v58, 16 }
 0x169   : > { %7022 = vmatmul.mubr.msk.bf16.gmra.mrb[48].mxu0 %vm1742_vm10, %v6374_v4  ;;  %v1599_v25 = vshll.u32 %v8305_v3, 16  ;;  %v1603_v24 = vshrl.u32 %v8305_v3, 16  ;;  %v1582_v19 = vor.u32 %v1581_v15, %v1577_v10  ;;  %v1587_v31 = vrot.slane %v1585_v18, 5  ;;  %v3070_v18 = vld [vmem:[#allocation2 + $0xc] sm:$0xf] }
 0x16a   : > { %v1564_v28 = vsel %vm7918_vm9, %v1559_v17, %v1563_v54  ;;  %v1592_v29 = vrot.slane %v1590_v21, 4  ;;  %v1573_v34 = vrot.slane %v1572_v22, 4  ;;  %v1595_v36 = vrot.slane %v1593_v23, 5 }
 0x16b   : > { %v6375_v33 = vcombine.low %v1554_v12, %v1564_v28  ;;  %v1601_v27 = vrot.slane %v1599_v25, 5  ;;  %v1583_v47 = vrot.slane %v1582_v19, 4  ;;  %v1605_v2 = vrot.slane %v1603_v24, 4  ;;  %v8341_v25 = vld [vmem:[#allocation2 + $0x10] sm:$0xf] }
 0x16c   : > { %v1609_v44 = vshll.u32 %v1294_v14, 16  ;;  %v1614_v8 = vshrl.u32 %v8314_v26, 16  ;;  %v1578_v42 = vsel %vm7918_vm9, %v1573_v34, %v1577_v10  ;;  %v1596_v43 = vor.u32 %v1595_v36, %v1592_v29  ;;  %v1296_v10 = vld [vmem:[#allocation2 + $0xb0] sm:$0x1]  ;;  %v8344_v36 = vld [vmem:[#allocation2 + $0x14] sm:$0x1] }
 0x16d   : > { %7025 = vmatprep.mubr.msk.bf16.mxu0 %vm1742_vm10, %v6375_v33  ;;  %v1617_v48 = vshll.u32 %v8314_v26, 16  ;;  %v1623_v49 = vshll.u32 %v8318_v30, 16  ;;  %v1588_v52 = vsel %vm7918_vm9, %v1583_v47, %v1587_v31  ;;  %v1606_v0 = vor.u32 %v1605_v2, %v1601_v27 }
 0x16e   : > { %v1611_v53 = vrot.slane %v1609_v44, 5  ;;  %v1616_v5 = vrot.slane %v1614_v8, 4  ;;  %v6376_v54 = vcombine.low %v1578_v42, %v1588_v52  ;;  %v1597_v16 = vrot.slane %v1596_v43, 4  ;;  %v8350_v8 = vld [vmem:[#allocation2 + $0xb4] sm:$0xf] }
 0x16f   : > { %v1619_v57 = vrot.slane %v1617_v48, 5  ;;  %v1625_v59 = vrot.slane %v1623_v49, 5  ;;  %v1607_v60 = vrot.slane %v1606_v0, 4  ;;  %v1627_v61 = vshrl.u32 %v8318_v30, 16  ;;  %v8352_v52 = vld [vmem:[#allocation2 + $0xb8] sm:$0xf] }
 0x170   : > { %v1633_v62 = vshll.u32 %v1295_v40, 16  ;;  %v1638_v4 = vshrl.u32 %v8320_v38, 16  ;;  %v1602_v12 = vsel %vm7918_vm9, %v1597_v16, %v1601_v27  ;;  %v1641_v17 = vshll.u32 %v8320_v38, 16  ;;  %v3073_v16 = vld [vmem:[#allocation2 + $0x18] sm:$0xf] }
 0x171   : > { %7026 = vmatmul.mubr.msk.bf16.gmra.mrb[52].mxu0 %vm1742_vm10, %v6376_v54  ;;  %v1620_v7 = vor.u32 %v1619_v57, %v1616_v5  ;;  %v1647_v15 = vshll.u32 %v8328_v51, 16  ;;  %v1612_v14 = vsel %vm7918_vm9, %v1607_v60, %v1611_v53  ;;  %v1629_v21 = vrot.slane %v1627_v61, 4 }
 0x172   : > { %v1635_v22 = vrot.slane %v1633_v62, 5  ;;  %v1640_v23 = vrot.slane %v1638_v4, 4  ;;  %v6377_v24 = vcombine.low %v1602_v12, %v1612_v14  ;;  %v1643_v19 = vrot.slane %v1641_v17, 5 }
 0x173   : > { %v1621_v28 = vrot.slane %v1620_v7, 4  ;;  %v1649_v31 = vrot.slane %v1647_v15, 5  ;;  %v1630_v29 = vor.u32 %v1629_v21, %v1625_v59  ;;  %v1651_v33 = vshrl.u32 %v8328_v51, 16  ;;  %v8362_v21 = vld [vmem:[#allocation2 + $0x1c] sm:$0xf] }
 0x174   : > { %v1657_v34 = vshll.u32 %v1296_v10, 16  ;;  %v3119_v27 = vshrl.u32 %v3070_v18, 16  ;;  %7029 = vmatprep.mubr.msk.bf16.mxu0 %vm1742_vm10, %v6377_v24  ;;  %v1644_v2 = vor.u32 %v1643_v19, %v1640_v23  ;;  %v3122_v44 = vshll.u32 %v3070_v18, 16  ;;  %v1297_v10 = vld [vmem:[#allocation2 + $0xbc] sm:$0x1] }
 0x175   : > { %v1626_v47 = vsel %vm7918_vm9, %v1621_v28, %v1625_v59  ;;  %v3128_v40 = vshll.u32 %v8341_v25, 16  ;;  %v1631_v42 = vrot.slane %v1630_v29, 4  ;;  %v1653_v43 = vrot.slane %v1651_v33, 4  ;;  %v8369_v33 = vld [vmem:[#allocation2 + $0x20] sm:$0x1] }
 0x176   : > { %v1659_v48 = vrot.slane %v1657_v34, 5  ;;  %v3121_v49 = vrot.slane %v3119_v27, 4  ;;  %v1645_v0 = vrot.slane %v1644_v2, 4  ;;  %v3124_v53 = vrot.slane %v3122_v44, 5 }
 0x177   : > { %v3130_v5 = vrot.slane %v3128_v40, 5  ;;  %v3132_v54 = vshrl.u32 %v8341_v25, 16  ;;  %v1636_v57 = vsel %vm7918_vm9, %v1631_v42, %v1635_v22  ;;  %v1654_v59 = vor.u32 %v1653_v43, %v1649_v31  ;;  %v3076_v40 = vld [vmem:[#allocation2 + $0x24] sm:$0xf] }
 0x178   : > { %v3138_v60 = vshll.u32 %v8344_v36, 16  ;;  %v1662_v61 = vshrl.u32 %v8350_v8, 16  ;;  %v6378_v62 = vcombine.low %v1626_v47, %v1636_v57  ;;  %v1650_v4 = vsel %vm7918_vm9, %v1645_v0, %v1649_v31 }
 0x179   : > { %v3125_v12 = vor.u32 %v3124_v53, %v3121_v49  ;;  %v3134_v7 = vrot.slane %v3132_v54, 4  ;;  %v1655_v17 = vrot.slane %v1654_v59, 4  ;;  %v1665_v14 = vshll.u32 %v8350_v8, 16  ;;  %v8373_v53 = vld [vmem:[#allocation2 + $0x28] sm:$0xf] }
 0x17a   : > { %v3140_v15 = vrot.slane %v3138_v60, 5  ;;  %v1664_v18 = vrot.slane %v1662_v61, 4  ;;  %7030 = vmatmul.mubr.msk.bf16.gmra.mrb[56].mxu0 %vm1742_vm10, %v6378_v62  ;;  %v1671_v24 = vshll.u32 %v8352_v52, 16  ;;  %v1675_v28 = vshrl.u32 %v8352_v52, 16 }
 0x17b   : > { %v3126_v22 = vrot.slane %v3125_v12, 4  ;;  %v3135_v23 = vor.u32 %v3134_v7, %v3130_v5  ;;  %v1660_v19 = vsel %vm7918_vm9, %v1655_v17, %v1659_v48  ;;  %v1667_v31 = vrot.slane %v1665_v14, 5 }
 0x17c   : > { %v1681_v29 = vshll.u32 %v1297_v10, 16  ;;  %v3143_v34 = vshrl.u32 %v3073_v16, 16  ;;  %v6379_v27 = vcombine.low %v1650_v4, %v1660_v19  ;;  %v1673_v44 = vrot.slane %v1671_v24, 5  ;;  %v8381_v10 = vld [vmem:[#allocation2 + $0x2c] sm:$0x1] }
 0x17d   : > { %v3131_v47 = vsel %vm7918_vm9, %v3126_v22, %v3130_v5  ;;  %v3136_v2 = vrot.slane %v3135_v23, 4  ;;  %v1668_v42 = vor.u32 %v1667_v31, %v1664_v18  ;;  %v1677_v43 = vrot.slane %v1675_v28, 4  ;;  %v3079_v22 = vld [vmem:[#allocation2 + $0x30] sm:$0xf] }
 0x17e   : > { %v1683_v49 = vrot.slane %v1681_v29, 5  ;;  %v3145_v0 = vrot.slane %v3143_v34, 4  ;;  %7033 = vmatprep.mubr.msk.bf16.mxu0 %vm1742_vm10, %v6379_v27  ;;  %v3146_v54 = vshll.u32 %v3073_v16, 16  ;;  %v3152_v57 = vshll.u32 %v8362_v21, 16 }
 0x17f   : > { %v3141_v48 = vsel %vm7918_vm9, %v3136_v2, %v3140_v15  ;;  %v3156_v59 = vshrl.u32 %v8362_v21, 16  ;;  %v1669_v60 = vrot.slane %v1668_v42, 4  ;;  %v1678_v61 = vor.u32 %v1677_v43, %v1673_v44 }
 0x180   : > { %v6519_v5 = vcombine.low %v3131_v47, %v3141_v48  ;;  %v3162_v62 = vshll.u32 %v8369_v33, 16  ;;  %v3148_v4 = vrot.slane %v3146_v54, 5  ;;  %v3154_v12 = vrot.slane %v3152_v57, 5  ;;  %v8391_v54 = vld [vmem:[#allocation2 + $0x4] sm:$0xf] }
 0x181   : > { %v3158_v7 = vrot.slane %v3156_v59, 4  ;;  %v3167_v17 = vshrl.u32 %v3076_v40, 16  ;;  %v1674_v16 = vsel %vm7918_vm9, %v1669_v60, %v1673_v44  ;;  %v1679_v15 = vrot.slane %v1678_v61, 4  ;;  %v8394_v59 = vld [vmem:[#allocation2 + $0x34] sm:$0xf] }
 0x182   : > { %7141 = vmatprep.mubr.msk.bf16.mxu1 %vm1742_vm10, %v6519_v5  ;;  %v3164_v18 = vrot.slane %v3162_v62, 5  ;;  %v3170_v14 = vshll.u32 %v3076_v40, 16  ;;  %v3149_v23 = vor.u32 %v3148_v4, %v3145_v0  ;;  %v3176_v19 = vshll.u32 %v8373_v53, 16  ;;  %v7664_v0 = vld [vmem:[#allocation2] sm:$0xf] }
 0x183   : > { %v3159_v24 = vor.u32 %v3158_v7, %v3154_v12  ;;  %v3169_v28 = vrot.slane %v3167_v17, 4  ;;  %v1684_v31 = vsel %vm7918_vm9, %v1679_v15, %v1683_v49  ;;  %v3180_v34 = vshrl.u32 %v8373_v53, 16  ;;  %v8396_v49 = vld [vmem:[#allocation2 + $0x38] sm:$0x1]  ;;  %v7666_v61 = vld [vmem:[#allocation2 + $0xc] sm:$0xf] }
 0x184   : > { %v3172_v29 = vrot.slane %v3170_v14, 5  ;;  %v3186_v27 = vshll.u32 %v8381_v10, 16  ;;  %v6380_v47 = vcombine.low %v1674_v16, %v1684_v31  ;;  %v3150_v2 = vrot.slane %v3149_v23, 4  ;;  %v8403_v62 = vld [vmem:[#allocation2 + $0x10] sm:$0xf] }
 0x185   : > { %v3160_v44 = vrot.slane %v3159_v24, 4  ;;  %v3178_v42 = vrot.slane %v3176_v19, 5  ;;  %v3182_v40 = vrot.slane %v3180_v34, 4  ;;  %v6398_v57 = vcombine.low %v7664_v0, %v8391_v54  ;;  %v3082_v23 = vld [vmem:[#allocation2 + $0x3c] sm:$0xf] }
 0x186   : > { %v3173_v43 = vor.u32 %v3172_v29, %v3169_v28  ;;  %v3188_v48 = vrot.slane %v3186_v27, 5  ;;  %7034 = vmatmul.mubr.msk.bf16.gmra.mrb[60].mxu0 %vm1742_vm10, %v6380_v47  ;;  %v3155_v5 = vsel %vm7918_vm9, %v3150_v2, %v3154_v12  ;;  %v6399_v4 = vcombine.low %v7666_v61, %v8403_v62  ;;  %v8410_v12 = vld [vmem:[%s9709_s3 + $0x30] sm:$0xff]   ;;  %v8415_v31 = vld [vmem:[#allocation2 + $0x40] sm:$0xf]  ;;  %v7668_v27 = vld [vmem:[#allocation2 + $0x18] sm:$0xf] }
 0x187   : > { %v3165_v60 = vsel %vm7918_vm9, %v3160_v44, %v3164_v18  ;;  %v3191_v7 = vshrl.u32 %v3079_v22, 16  ;;  %v3183_v15 = vor.u32 %v3182_v40, %v3178_v42  ;;  %7039 = vmatprep.mubr.msk.bf16.mxu0 %vm1742_vm10, %v6398_v57  ;;  %v3194_v14 = vshll.u32 %v3079_v22, 16  ;;  %v8420_v47 = vld [vmem:[#allocation2 + $0x1c] sm:$0xf]  ;;  %v7670_v44 = vld [vmem:[%s9709_s3 + $0x28] sm:$0xff]  }
 0x188   : > { %v6520_v17 = vcombine.low %v3155_v5, %v3165_v60  ;;  %v3174_v16 = vrot.slane %v3173_v43, 4  ;;  %v3200_v18 = vshll.u32 %v8394_v59, 16  ;;  %v3204_v28 = vshrl.u32 %v8394_v59, 16  ;;  %v8426_v57 = vld [vmem:[#allocation2 + $0x44] sm:$0x1] }
 0x189   : > { %v3193_v24 = vrot.slane %v3191_v7, 4  ;;  %v3210_v19 = vshll.u32 %v8396_v49, 16  ;;  %v3184_v29 = vrot.slane %v3183_v15, 4  ;;  %v3196_v34 = vrot.slane %v3194_v14, 5 }
 0x18a   : > { %7142 = vmatmul.mubr.msk.bf16.vlgmr.msra.gmra.mrb[20].mxu1 %vm1742_vm10, %v6520_v17  ;;  %v3179_v22 = vsel %vm7918_vm9, %v3174_v16, %v3178_v42  ;;  %v6400_v2 = vcombine.low %v7668_v27, %v8420_v47  ;;  %v3202_v43 = vrot.slane %v3200_v18, 5  ;;  %v3206_v40 = vrot.slane %v3204_v28, 4  ;;  %v3085_v17 = vld [vmem:[#allocation2 + $0x48] sm:$0xf] }
 0x18b   : > { %7174 = vmatpush3.bf16.msra.mxu1 %v7670_v44  ;;  %v3212_v0 = vrot.slane %v3210_v19, 5  ;;  %v3215_v5 = vshrl.u32 %v3082_v23, 16  ;;  %v3189_v42 = vsel %vm7918_vm9, %v3184_v29, %v3188_v48  ;;  %v3197_v60 = vor.u32 %v3196_v34, %v3193_v24  ;;  %v7671_v24 = vld [vmem:[#allocation2 + $0x24] sm:$0xf]  ;;  %v8438_v29 = vld [vmem:[#allocation2 + $0x28] sm:$0xf] }
 0x18c   : > { %v3218_v61 = vshll.u32 %v3082_v23, 16  ;;  %v3224_v7 = vshll.u32 %v8415_v31, 16  ;;  %7207 = vmatprep.subr.bf16.mxu1 %v8410_v12  ;;  %v6521_v16 = vcombine.low %v3179_v22, %v3189_v42  ;;  %v3207_v15 = vor.u32 %v3206_v40, %v3202_v43 }
 0x18d   : > { %v3217_v14 = vrot.slane %v3215_v5, 4  ;;  %v3228_v18 = vshrl.u32 %v8415_v31, 16  ;;  %v3198_v28 = vrot.slane %v3197_v60, 4  ;;  %v3234_v44 = vshll.u32 %v8426_v57, 16  ;;  %v8444_v60 = vld [vmem:[#allocation2 + $0x50] sm:$0x1] }
 0x18e   : > { %v3220_v19 = vrot.slane %v3218_v61, 5  ;;  %v3226_v27 = vrot.slane %v3224_v7, 5  ;;  %7145 = vmatprep.mubr.msk.bf16.mxu1 %vm1742_vm10, %v6521_v16  ;;  %7040 = vmatmul.mubr.msk.bf16.vlgmr.msra.gmra.mrb[32].mxu0 %vm1742_vm10, %v6399_v4  ;;  %v3208_v48 = vrot.slane %v3207_v15, 4  ;;  %v6401_v22 = vcombine.low %v7671_v24, %v8438_v29  ;;  %9749 = vst [vmem:[#allocation6_spill] sm:$0xff] %v8444_v60 }
 0x18f   : > { %v3230_v23 = vrot.slane %v3228_v18, 4  ;;  %v3239_v34 = vshrl.u32 %v3085_v17, 16  ;;  %v3203_v40 = vsel %vm7918_vm9, %v3198_v28, %v3202_v43  ;;  %7043 = vmatprep.mubr.msk.bf16.mxu0 %vm1742_vm10, %v6400_v2  ;;  %v3236_v42 = vrot.slane %v3234_v44, 5  ;;  %7072 = vmatpush3.bf16.msra.mxu0 %v8234_v13  ;;  %v3088_v18 = vld [vmem:[#allocation2 + $0x54] sm:$0xf]  ;;  %v8453_v43 = vld [vmem:[%s9709_s3 + $0x18] sm:$0xff]  }
 0x190   : > { %v3221_v5 = vor.u32 %v3220_v19, %v3217_v14  ;;  %v3242_v61 = vshll.u32 %v3085_v17, 16  ;;  %v3213_v4 = vsel %vm7918_vm9, %v3208_v48, %v3212_v0  ;;  %v3248_v15 = vshll.u32 %v8434_v55, 16  ;;  %9750 = vst [vmem:[#allocation7_spill] sm:$0xff] %v8453_v43  ;;  %7105 = vmatprep.subr.bf16.mxu0 %v8453_v43  ;;  %v8457_v28 = vld [vmem:[#allocation2 + $0x58] sm:$0xf] }
 0x191   : > { %v3231_v7 = vor.u32 %v3230_v23, %v3226_v27  ;;  %v3241_v16 = vrot.slane %v3239_v34, 4  ;;  %v6522_v2 = vcombine.low %v3203_v40, %v3213_v4  ;;  %v3252_v13 = vshrl.u32 %v8434_v55, 16  ;;  %v7674_v48 = vld [vmem:[#allocation2 + $0x30] sm:$0xf]  ;;  %v8460_v23 = vld [vmem:[#allocation2 + $0x34] sm:$0xf] }
 0x192   : > { %v3222_v14 = vrot.slane %v3221_v5, 4  ;;  %v3244_v17 = vrot.slane %v3242_v61, 5  ;;  %v3250_v19 = vrot.slane %v3248_v15, 5  ;;  %v3258_v44 = vshll.u32 %v8444_v60, 16  ;;  %9751 = vst [vmem:[#allocation8_spill] sm:$0xff] %v8460_v23 }
 0x193   : > { %v3232_v0 = vrot.slane %v3231_v7, 4  ;;  %v6402_v24 = vcombine.low %v7674_v48, %v8460_v23  ;;  %7146 = vmatmul.mubr.msk.bf16.gmra.mrb[24].mxu1 %vm1742_vm10, %v6522_v2  ;;  %v3254_v5 = vrot.slane %v3252_v13, 4  ;;  %v8466_v61 = vld [vmem:[#allocation2 + $0x5c] sm:$0x1]  ;;  %v3263_v4 = vshrl.u32 %v3088_v18, 16 }
 0x194   : > { %v3227_v34 = vsel %vm7918_vm9, %v3222_v14, %v3226_v27  ;;  %v3245_v40 = vor.u32 %v3244_v17, %v3241_v16  ;;  %9752 = vst [vmem:[#allocation9_spill] sm:$0xff] %v8466_v61  ;;  %v3260_v15 = vrot.slane %v3258_v44, 5  ;;  %v3266_v50 = vshll.u32 %v3088_v18, 16  ;;  %v3091_v43 = vld [vmem:[#allocation2 + $0x60] sm:$0xf] }
 0x195   : > { %v3237_v7 = vsel %vm7918_vm9, %v3232_v0, %v3236_v42  ;;  %v3272_v60 = vshll.u32 %v8457_v28, 16  ;;  %v3255_v23 = vor.u32 %v3254_v5, %v3250_v19  ;;  %v3265_v2 = vrot.slane %v3263_v4, 4  ;;  %v8474_v13 = vld [vmem:[#allocation2 + $0x64] sm:$0xf]  ;;  %v7676_v0 = vld [vmem:[#allocation2 + $0x3c] sm:$0xf] }
 0x196   : > { %v6523_v55 = vcombine.low %v3227_v34, %v3237_v7  ;;  %v3246_v48 = vrot.slane %v3245_v40, 4  ;;  %7044 = vmatmul.mubr.msk.bf16.gmra.mrb[36].mxu0 %vm1742_vm10, %v6401_v22  ;;  %v3268_v27 = vrot.slane %v3266_v50, 5  ;;  %v3276_v14 = vshrl.u32 %v8457_v28, 16  ;;  %v8481_v40 = vld [vmem:[#allocation2 + $0x68] sm:$0x1] }
 0x197   : > { %v3274_v16 = vrot.slane %v3272_v60, 5  ;;  %v3282_v17 = vshll.u32 %v8466_v61, 16  ;;  %v3256_v18 = vrot.slane %v3255_v23, 4  ;;  %7047 = vmatprep.mubr.msk.bf16.mxu0 %vm1742_vm10, %v6402_v24  ;;  %v6403_v44 = vcombine.low %v7676_v0, %v8179_v37  ;;  %v3094_v23 = vld [vmem:[#allocation2 + $0x6c] sm:$0xf] }
 0x198   : > { %7149 = vmatprep.mubr.msk.bf16.mxu1 %vm1742_vm10, %v6523_v55  ;;  %v3251_v42 = vsel %vm7918_vm9, %v3246_v48, %v3250_v19  ;;  %v3287_v22 = vshrl.u32 %v3091_v43, 16  ;;  %v3269_v50 = vor.u32 %v3268_v27, %v3265_v2  ;;  %v3278_v60 = vrot.slane %v3276_v14, 4  ;;  %v8487_v0 = vld [vmem:[#allocation2 + $0x70] sm:$0xf] }
 0x199   : > { %v3284_v34 = vrot.slane %v3282_v17, 5  ;;  %v3290_v5 = vshll.u32 %v3091_v43, 16  ;;  %v3261_v4 = vsel %vm7918_vm9, %v3256_v18, %v3260_v15  ;;  %v3296_v7 = vshll.u32 %v8474_v13, 16 }
 0x19a   : > { %v3289_v55 = vrot.slane %v3287_v22, 4  ;;  %v3300_v19 = vshrl.u32 %v8474_v13, 16  ;;  %v6524_v24 = vcombine.low %v3251_v42, %v3261_v4  ;;  %v3270_v48 = vrot.slane %v3269_v50, 4 }
 0x19b   : > { %v3279_v61 = vor.u32 %v3278_v60, %v3274_v16  ;;  %v3292_v37 = vrot.slane %v3290_v5, 5  ;;  %v3298_v2 = vrot.slane %v3296_v7, 5  ;;  %v3306_v14 = vshll.u32 %v8481_v40, 16  ;;  %v8495_v60 = vld [vmem:[#allocation2 + $0x74] sm:$0x1] }
 0x19c   : > { %v3302_v27 = vrot.slane %v3300_v19, 4  ;;  %v6404_v43 = vcombine.low %v8190_v63, %v8192_v1  ;;  %7150 = vmatmul.mubr.msk.bf16.gmra.mrb[28].mxu1 %vm1742_vm10, %v6524_v24  ;;  %v3275_v15 = vsel %vm7918_vm9, %v3270_v48, %v3274_v16  ;;  %v3311_v42 = vshrl.u32 %v3094_v23, 16  ;;  %v3097_v16 = vld [vmem:[#allocation2 + $0x78] sm:$0xf] }
 0x19d   : > { %v3280_v17 = vrot.slane %v3279_v61, 4  ;;  %v3293_v18 = vor.u32 %v3292_v37, %v3289_v55  ;;  %v3308_v50 = vrot.slane %v3306_v14, 5  ;;  %v3314_v5 = vshll.u32 %v3094_v23, 16  ;;  %v8503_v37 = vld [vmem:[#allocation2 + $0x7c] sm:$0xf] }
 0x19e   : > { %v3303_v22 = vor.u32 %v3302_v27, %v3298_v2  ;;  %v3320_v4 = vshll.u32 %v8487_v0, 16  ;;  %7048 = vmatmul.mubr.msk.bf16.gmra.mrb[40].mxu0 %vm1742_vm10, %v6403_v44  ;;  %v3313_v1 = vrot.slane %v3311_v42, 4  ;;  %v3324_v19 = vshrl.u32 %v8487_v0, 16 }
 0x19f   : > { %v3285_v7 = vsel %vm7918_vm9, %v3280_v17, %v3284_v34  ;;  %v3294_v63 = vrot.slane %v3293_v18, 4  ;;  %7051 = vmatprep.mubr.msk.bf16.mxu0 %vm1742_vm10, %v6404_v43  ;;  %v3316_v24 = vrot.slane %v3314_v5, 5  ;;  %v3330_v34 = vshll.u32 %v8495_v60, 16  ;;  %v8513_v43 = vld [vmem:[#allocation2 + $0x80] sm:$0x1] }
 0x1a0   : > { %v6525_v61 = vcombine.low %v3275_v15, %v3285_v7  ;;  %v3304_v55 = vrot.slane %v3303_v22, 4  ;;  %v3322_v48 = vrot.slane %v3320_v4, 5  ;;  %v3326_v27 = vrot.slane %v3324_v19, 4  ;;  %v3100_v4 = vld [vmem:[#allocation2 + $0x84] sm:$0xf] }
 0x1a1   : > { %v3299_v23 = vsel %vm7918_vm9, %v3294_v63, %v3298_v2  ;;  %v6405_v44 = vcombine.low %v8215_v35, %v8227_v6  ;;  %v3317_v15 = vor.u32 %v3316_v24, %v3313_v1  ;;  %v3335_v17 = vshrl.u32 %v3097_v16, 16  ;;  %v8517_v6 = vld [vmem:[#allocation2 + $0x88] sm:$0xf] }
 0x1a2   : > { %7153 = vmatprep.mubr.msk.bf16.mxu1 %vm1742_vm10, %v6525_v61  ;;  %v3309_v14 = vsel %vm7918_vm9, %v3304_v55, %v3308_v50  ;;  %v3338_v18 = vshll.u32 %v3097_v16, 16  ;;  %v3327_v22 = vor.u32 %v3326_v27, %v3322_v48  ;;  %v3332_v5 = vrot.slane %v3330_v34, 5  ;;  %v8525_v27 = vld [vmem:[#allocation2 + $0x8c] sm:$0x1] }
 0x1a3   : > { %v6526_v42 = vcombine.low %v3299_v23, %v3309_v14  ;;  %v3344_v2 = vshll.u32 %v8503_v37, 16  ;;  %v3318_v7 = vrot.slane %v3317_v15, 4  ;;  %v3337_v63 = vrot.slane %v3335_v17, 4 }
 0x1a4   : > { %v3340_v19 = vrot.slane %v3338_v18, 5  ;;  %v3348_v35 = vshrl.u32 %v8503_v37, 16  ;;  %v3328_v50 = vrot.slane %v3327_v22, 4  ;;  %v3354_v61 = vshll.u32 %v8513_v43, 16 }
 0x1a5   : > { %7154 = vmatmul.mubr.msk.bf16.gmra.mrb[0].mxu1 %vm1742_vm10, %v6526_v42  ;;  %v3346_v1 = vrot.slane %v3344_v2, 5  ;;  %v6406_v16 = vcombine.low %v8245_v9, %v8247_v32  ;;  %v3323_v55 = vsel %vm7918_vm9, %v3318_v7, %v3322_v48  ;;  %v3359_v34 = vshrl.u32 %v3100_v4, 16  ;;  %v3103_v42 = vld [vmem:[#allocation2 + $0x90] sm:$0xf] }
 0x1a6   : > { %v3341_v24 = vor.u32 %v3340_v19, %v3337_v63  ;;  %v3350_v23 = vrot.slane %v3348_v35, 4  ;;  %v3333_v14 = vsel %vm7918_vm9, %v3328_v50, %v3332_v5  ;;  %7052 = vmatmul.mubr.msk.bf16.gmra.mrb[44].mxu0 %vm1742_vm10, %v6405_v44  ;;  %v3356_v15 = vrot.slane %v3354_v61, 5  ;;  %v8534_v5 = vld [vmem:[#allocation2 + $0x94] sm:$0xf] }
 0x1a7   : > { %v3362_v17 = vshll.u32 %v3100_v4, 16  ;;  %v3368_v18 = vshll.u32 %v8517_v6, 16  ;;  %v6527_v22 = vcombine.low %v3323_v55, %v3333_v14  ;;  %7055 = vmatprep.mubr.msk.bf16.mxu0 %vm1742_vm10, %v6406_v16  ;;  %v3361_v48 = vrot.slane %v3359_v34, 4 }
 0x1a8   : > { %v3342_v9 = vrot.slane %v3341_v24, 4  ;;  %v3351_v32 = vor.u32 %v3350_v23, %v3346_v1  ;;  %v3372_v63 = vshrl.u32 %v8517_v6, 16  ;;  %v3378_v19 = vshll.u32 %v8525_v27, 16  ;;  %v8541_v24 = vld [vmem:[#allocation2 + $0x98] sm:$0x1] }
 0x1a9   : > { %v3364_v2 = vrot.slane %v3362_v17, 5  ;;  %v3370_v7 = vrot.slane %v3368_v18, 5  ;;  %7157 = vmatprep.mubr.msk.bf16.mxu1 %vm1742_vm10, %v6527_v22  ;;  %v6407_v35 = vcombine.low %v8259_v45, %v8264_v20  ;;  %v3383_v50 = vshrl.u32 %v3103_v42, 16  ;;  %v8547_v20 = vld [vmem:[#allocation2 + $0xa0] sm:$0xf] }
 0x1aa   : > { %v3347_v44 = vsel %vm7918_vm9, %v3342_v9, %v3346_v1  ;;  %v3352_v4 = vrot.slane %v3351_v32, 4  ;;  %v3374_v16 = vrot.slane %v3372_v63, 4  ;;  %v3380_v55 = vrot.slane %v3378_v19, 5  ;;  %v3106_v1 = vld [vmem:[#allocation2 + $0x9c] sm:$0xf] }
 0x1ab   : > { %v3365_v61 = vor.u32 %v3364_v2, %v3361_v48  ;;  %v3386_v23 = vshll.u32 %v3103_v42, 16  ;;  %v3385_v14 = vrot.slane %v3383_v50, 4  ;;  %v3392_v17 = vshll.u32 %v8534_v5, 16 }
 0x1ac   : > { %v3357_v34 = vsel %vm7918_vm9, %v3352_v4, %v3356_v15  ;;  %v3396_v18 = vshrl.u32 %v8534_v5, 16  ;;  %v3375_v32 = vor.u32 %v3374_v16, %v3370_v7  ;;  %v3402_v63 = vshll.u32 %v8541_v24, 16  ;;  %v8557_v16 = vld [vmem:[#allocation2 + $0xa4] sm:$0x1] }
 0x1ad   : > { %v6528_v22 = vcombine.low %v3347_v44, %v3357_v34  ;;  %v3366_v9 = vrot.slane %v3365_v61, 4  ;;  %v3388_v45 = vrot.slane %v3386_v23, 5  ;;  %v3394_v48 = vrot.slane %v3392_v17, 5 }
 0x1ae   : > { %v3398_v2 = vrot.slane %v3396_v18, 4  ;;  %v6408_v42 = vcombine.low %v8267_v56, %v8276_v11  ;;  %v3376_v19 = vrot.slane %v3375_v32, 4  ;;  %7056 = vmatmul.mubr.msk.bf16.gmra.mrb[48].mxu0 %vm1742_vm10, %v6407_v35  ;;  %v3407_v4 = vshrl.u32 %v3106_v1, 16  ;;  %v3109_v18 = vld [vmem:[#allocation2 + $0xa8] sm:$0xf] }
 0x1af   : > { %7158 = vmatmul.mubr.msk.bf16.gmra.mrb[4].mxu1 %vm1742_vm10, %v6528_v22  ;;  %v3371_v15 = vsel %vm7918_vm9, %v3366_v9, %v3370_v7  ;;  %v3389_v44 = vor.u32 %v3388_v45, %v3385_v14  ;;  %v3404_v61 = vrot.slane %v3402_v63, 5  ;;  %v3410_v23 = vshll.u32 %v3106_v1, 16  ;;  %v8563_v32 = vld [vmem:[#allocation2 + $0xac] sm:$0xf] }
 0x1b0   : > { %v3399_v50 = vor.u32 %v3398_v2, %v3394_v48  ;;  %7059 = vmatprep.mubr.msk.bf16.mxu0 %vm1742_vm10, %v6408_v42  ;;  %v3416_v34 = vshll.u32 %v8547_v20, 16  ;;  %v3381_v56 = vsel %vm7918_vm9, %v3376_v19, %v3380_v55  ;;  %v3409_v17 = vrot.slane %v3407_v4, 4 }
 0x1b1   : > { %v3390_v11 = vrot.slane %v3389_v44, 4  ;;  %v3420_v7 = vshrl.u32 %v8547_v20, 16  ;;  %v6529_v35 = vcombine.low %v3371_v15, %v3381_v56  ;;  %v3412_v22 = vrot.slane %v3410_v23, 5  ;;  %v8573_v15 = vld [vmem:[#allocation2 + $0xb0] sm:$0x1] }
 0x1b2   : > { %v3400_v14 = vrot.slane %v3399_v50, 4  ;;  %v3418_v9 = vrot.slane %v3416_v34, 5  ;;  %v3426_v2 = vshll.u32 %v8557_v16, 16  ;;  %v6409_v55 = vcombine.low %v8285_v39, %v8290_v41  ;;  %v3112_v34 = vld [vmem:[#allocation2 + $0xb4] sm:$0xf] }
 0x1b3   : > { %v3395_v45 = vsel %vm7918_vm9, %v3390_v11, %v3394_v48  ;;  %v3422_v1 = vrot.slane %v3420_v7, 4  ;;  %7161 = vmatprep.mubr.msk.bf16.mxu1 %vm1742_vm10, %v6529_v35  ;;  %v3413_v42 = vor.u32 %v3412_v22, %v3409_v17  ;;  %v3431_v19 = vshrl.u32 %v3109_v18, 16  ;;  %v8577_v41 = vld [vmem:[#allocation2 + $0xb8] sm:$0xf] }
 0x1b4   : > { %v3405_v63 = vsel %vm7918_vm9, %v3400_v14, %v3404_v61  ;;  %v3434_v44 = vshll.u32 %v3109_v18, 16  ;;  %v3428_v23 = vrot.slane %v3426_v2, 5  ;;  %v3440_v48 = vshll.u32 %v8563_v32, 16 }
 0x1b5   : > { %v6530_v4 = vcombine.low %v3395_v45, %v3405_v63  ;;  %v3423_v50 = vor.u32 %v3422_v1, %v3418_v9  ;;  %v3414_v56 = vrot.slane %v3413_v42, 4  ;;  %v3433_v11 = vrot.slane %v3431_v19, 4  ;;  %v8589_v63 = vld [vmem:[#allocation2 + $0xbc] sm:$0x1]  ;;  %v3115_v19 = vld [vmem:[#allocation2 + $0xc0] sm:$0xf] }
 0x1b6   : > { %v3436_v7 = vrot.slane %v3434_v44, 5  ;;  %v3444_v39 = vshrl.u32 %v8563_v32, 16  ;;  %7060 = vmatmul.mubr.msk.bf16.gmra.mrb[52].mxu0 %vm1742_vm10, %v6409_v55  ;;  %v3442_v17 = vrot.slane %v3440_v48, 5  ;;  %v3450_v18 = vshll.u32 %v8573_v15, 16 }
 0x1b7   : > { %7162 = vmatmul.mubr.msk.bf16.gmra.mrb[8].mxu1 %vm1742_vm10, %v6530_v4  ;;  %v3424_v61 = vrot.slane %v3423_v50, 4  ;;  %v6410_v35 = vcombine.low %v8300_v58, %v8305_v3  ;;  %v3455_v45 = vshrl.u32 %v3112_v34, 16  ;;  %v3419_v1 = vsel %vm7918_vm9, %v3414_v56, %v3418_v9  ;;  %v8593_v56 = vld [vmem:[#allocation2 + $0xc4] sm:$0xf] }
 0x1b8   : > { %v3437_v14 = vor.u32 %v3436_v7, %v3433_v11  ;;  %v3446_v22 = vrot.slane %v3444_v39, 4  ;;  %v3458_v55 = vshll.u32 %v3112_v34, 16  ;;  %v3464_v42 = vshll.u32 %v8577_v41, 16 }
 0x1b9   : > { %v3429_v2 = vsel %vm7918_vm9, %v3424_v61, %v3428_v23  ;;  %7063 = vmatprep.mubr.msk.bf16.mxu0 %vm1742_vm10, %v6410_v35  ;;  %v3457_v3 = vrot.slane %v3455_v45, 4  ;;  %v3452_v50 = vrot.slane %v3450_v18, 5  ;;  %v3468_v9 = vshrl.u32 %v8577_v41, 16 }
 0x1ba   : > { %v6531_v44 = vcombine.low %v3419_v1, %v3429_v2  ;;  %v3438_v4 = vrot.slane %v3437_v14, 4  ;;  %v3447_v58 = vor.u32 %v3446_v22, %v3442_v17  ;;  %v3460_v48 = vrot.slane %v3458_v55, 5  ;;  %v8601_v14 = vld [vmem:[#allocation2 + $0xc8] sm:$0x1] }
 0x1bb   : > { %v3466_v11 = vrot.slane %v3464_v42, 5  ;;  %v3474_v7 = vshll.u32 %v8589_v63, 16  ;;  %v3479_v39 = vshrl.u32 %v3115_v19, 16  ;;  %v3470_v35 = vrot.slane %v3468_v9, 4  ;;  %v3800_v9 = vld [vmem:[#allocation2 + $0xc] sm:$0xe] }
 0x1bc   : > { %7165 = vmatprep.mubr.msk.bf16.mxu1 %vm1742_vm10, %v6531_v44  ;;  %v3443_v23 = vsel %vm7918_vm9, %v3438_v4, %v3442_v17  ;;  %v3448_v34 = vrot.slane %v3447_v58, 4  ;;  %v3461_v61 = vor.u32 %v3460_v48, %v3457_v3  ;;  %v6411_v18 = vcombine.low %v8314_v26, %v8318_v30 }
 0x1bd   : > { %v3482_v22 = vshll.u32 %v3115_v19, 16  ;;  %v3481_v1 = vrot.slane %v3479_v39, 4  ;;  %v3488_v2 = vshll.u32 %v8593_v56, 16  ;;  %v3492_v17 = vshrl.u32 %v8593_v56, 16 }
 0x1be   : > { %v3453_v45 = vsel %vm7918_vm9, %v3448_v34, %v3452_v50  ;;  %v3462_v42 = vrot.slane %v3461_v61, 4  ;;  %v3471_v44 = vor.u32 %v3470_v35, %v3466_v11  ;;  %7064 = vmatmul.mubr.msk.bf16.gmra.mrb[56].mxu0 %vm1742_vm10, %v6411_v18  ;;  %v3498_v26 = vshll.u32 %v8601_v14, 16 }
 0x1bf   : > { %v6532_v55 = vcombine.low %v3443_v23, %v3453_v45  ;;  %v3484_v4 = vrot.slane %v3482_v22, 5  ;;  %v3490_v58 = vrot.slane %v3488_v2, 5  ;;  %v3494_v3 = vrot.slane %v3492_v17, 4  ;;  %v3801_v45 = vld [vmem:[#allocation2 + $0x18] sm:$0xe] }
 0x1c0   : > { %v6412_v30 = vcombine.low %v8320_v38, %v8328_v51  ;;  %v3472_v19 = vrot.slane %v3471_v44, 4  ;;  %v3476_v50 = vrot.slane %v3474_v7, 5  ;;  %v3467_v34 = vsel %vm7918_vm9, %v3462_v42, %v3466_v11 }
 0x1c1   : > { %7166 = vmatmul.mubr.msk.bf16.gmra.mrb[12].mxu1 %vm1742_vm10, %v6532_v55  ;;  %v3485_v48 = vor.u32 %v3484_v4, %v3481_v1  ;;  %v3495_v23 = vor.u32 %v3494_v3, %v3490_v58  ;;  %v3866_v51 = vrot.slane %v8341_v25, 5  ;;  %v3500_v18 = vrot.slane %v3498_v26, 5  ;;  %v3802_v55 = vld [vmem:[#allocation2 + $0x24] sm:$0xe] }
 0x1c2   : > { %7067 = vmatprep.mubr.msk.bf16.mxu0 %vm1742_vm10, %v6412_v30  ;;  %v3477_v39 = vsel %vm7918_vm9, %v3472_v19, %v3476_v50  ;;  %v6552_v22 = vrot.slane %v3800_v9, 9  ;;  %v3869_v2 = vrot.slane %v8344_v36, 5  ;;  %v6413_v11 = vcombine.low %v8350_v8, %v8352_v52  ;;  %v2247_v36 = vld [vmem:[#allocation2] sm:$0xe]  ;;  %v2248_v50 = vld [vmem:[#allocation2 + $0xc] sm:$0xe] }
 0x1c3   : > { %v3486_v61 = vrot.slane %v3485_v48, 4  ;;  %v6533_v7 = vcombine.low %v3467_v34, %v3477_v39  ;;  %v3496_v35 = vrot.slane %v3495_v23, 4  ;;  %v3868_v1 = vrot.slane %v3866_v51, 4  ;;  %v7677_v23 = vld [vmem:[#allocation2 + $0x8] sm:$0x1] }
 0x1c4   : > { %v3873_v17 = vrot.slane %v8362_v21, 5  ;;  %v3867_v44 = vsel %vm8617_vm1, %v6552_v22, %v3866_v51  ;;  %v3880_v4 = vrot.slane %v8373_v53, 5  ;;  %v3876_v21 = vrot.slane %v8369_v33, 5 }
 0x1c5   : > { %7169 = vmatprep.mubr.msk.bf16.mxu1 %vm1742_vm10, %v6533_v7  ;;  %v3491_v42 = vsel %vm7918_vm9, %v3486_v61, %v3490_v58  ;;  %v3501_v25 = vsel %vm7918_vm9, %v3496_v35, %v3500_v18  ;;  %v3870_v8 = vsel %vm8617_vm1, %v3868_v1, %v3869_v2  ;;  %v6553_v58 = vrot.slane %v3801_v45, 9  ;;  %v3803_v7 = vld [vmem:[#allocation2 + $0x30] sm:$0xe]  ;;  %v7678_v2 = vld [vmem:[#allocation2 + $0x14] sm:$0x1] }
 0x1c6   : > { %v6534_v3 = vcombine.low %v3491_v42, %v3501_v25  ;;  %7068 = vmatmul.mubr.msk.bf16.gmra.mrb[60].mxu0 %vm1742_vm10, %v6413_v11  ;;  %v3875_v52 = vrot.slane %v3873_v17, 4  ;;  %v6570_v26 = vcombine.low %v3867_v44, %v3870_v8  ;;  %v6554_v30 = vrot.slane %v3802_v55, 9  ;;  %v2249_v55 = vld [vmem:[#allocation2 + $0x18] sm:$0xe]  ;;  %v3804_v8 = vld [vmem:[#allocation2 + $0x3c] sm:$0xe] }
 0x1c7   : > { %v3882_v19 = vrot.slane %v3880_v4, 4  ;;  %v6431_v48 = vrot.slane %v2247_v36, 9  ;;  %v2300_v9 = vrot.slane %v8391_v54, 5  ;;  %v2303_v34 = vrot.slane %v7677_v23, 5 }
 0x1c8   : > { %v3877_v53 = vsel %vm8617_vm1, %v3875_v52, %v3876_v21  ;;  %v3874_v33 = vsel %vm8617_vm1, %v6553_v58, %v3873_v17  ;;  %v3881_v39 = vsel %vm8617_vm1, %v6554_v30, %v3880_v4  ;;  %v3883_v61 = vrot.slane %v8381_v10, 5  ;;  %v2250_v30 = vld [vmem:[#allocation2 + $0x24] sm:$0xe] }
 0x1c9   : > { %7170 = vmatmul.mubr.msk.bf16.gmra.mrb[16].mxu1 %vm1742_vm10, %v6534_v3  ;;  %v2307_v51 = vrot.slane %v8403_v62, 5  ;;  %v6571_v35 = vcombine.low %v3874_v33, %v3877_v53  ;;  %v2301_v18 = vsel %vm8617_vm1, %v6431_v48, %v2300_v9  ;;  %v2302_v54 = vrot.slane %v2300_v9, 4 }
 0x1ca   : > { %7175 = vmatprep.mubr.msk.bf16.mxu1 %vm1742_vm10, %v6570_v26  ;;  %v6432_v22 = vrot.slane %v2248_v50, 9  ;;  %v3884_v45 = vsel %vm8617_vm1, %v3882_v19, %v3883_v61  ;;  %v2310_v11 = vrot.slane %v7678_v2, 5  ;;  %v3887_v17 = vrot.slane %v8394_v59, 5  ;;  %v7679_v26 = vld [vmem:[#allocation2 + $0x20] sm:$0x1]  ;;  %v8665_v19 = vld [vmem:[%s9709_s3 + $0x38] sm:$0xff]  }
 0x1cb   : > { %v2309_v1 = vrot.slane %v2307_v51, 4  ;;  %v2304_v10 = vsel %vm8617_vm1, %v2302_v54, %v2303_v34  ;;  %v6555_v42 = vrot.slane %v3803_v7, 9  ;;  %v2314_v25 = vrot.slane %v8420_v47, 5 }
 0x1cc   : > { %v2308_v62 = vsel %vm8617_vm1, %v6432_v22, %v2307_v51  ;;  %v6449_v44 = vcombine.low %v2301_v18, %v2304_v10  ;;  %v3889_v36 = vrot.slane %v3887_v17, 4  ;;  %v3890_v3 = vrot.slane %v8396_v49, 5  ;;  %v3805_v51 = vld [vmem:[#allocation2 + $0x48] sm:$0xe]  ;;  %v7680_v18 = vld [vmem:[#allocation2 + $0x2c] sm:$0x1] }
 0x1cd   : > { %v2311_v4 = vsel %vm8617_vm1, %v2309_v1, %v2310_v11  ;;  %v6433_v59 = vrot.slane %v2249_v55, 9  ;;  %v2316_v21 = vrot.slane %v2314_v25, 4  ;;  %v2317_v58 = vrot.slane %v7679_v26, 5  ;;  %v9755_v22 = vld [vmem:[#allocation5_spill] sm:$0xff]  ;;  %v2251_v1 = vld [vmem:[#allocation2 + $0x30] sm:$0xe] }
 0x1ce   : > { %v6450_v52 = vcombine.low %v2308_v62, %v2311_v4  ;;  %v6572_v47 = vcombine.low %v3881_v39, %v3884_v45  ;;  %7073 = vmatprep.mubr.msk.bf16.mxu0 %vm1742_vm10, %v6449_v44  ;;  %v3888_v50 = vsel %vm8617_vm1, %v6555_v42, %v3887_v17  ;;  %v3891_v49 = vsel %vm8617_vm1, %v3889_v36, %v3890_v3  ;;  %v9757_v11 = vld [vmem:[#allocation8_spill] sm:$0xff]  ;;  %v9758_v42 = vld [vmem:[#allocation6_spill] sm:$0xff] }
 0x1cf   : > { %v3894_v53 = vrot.slane %v8415_v31, 5  ;;  %v2315_v48 = vsel %vm8617_vm1, %v6433_v59, %v2314_v25  ;;  %v2318_v9 = vsel %vm8617_vm1, %v2316_v21, %v2317_v58  ;;  %v6556_v23 = vrot.slane %v3804_v8, 9  ;;  %v3806_v44 = vld [vmem:[#allocation2 + $0x54] sm:$0xe]  ;;  %v7681_v8 = vld [vmem:[#allocation2 + $0x38] sm:$0x1] }
 0x1d0   : > { %7074 = vmatmul.mubr.msk.bf16.vlgmr.msra.gmra.mrb[32].mxu0 %vm1742_vm10, %v6450_v52  ;;  %v2321_v34 = vrot.slane %v8438_v29, 5  ;;  %v6451_v33 = vcombine.low %v2315_v48, %v2318_v9  ;;  %v3897_v31 = vrot.slane %v8426_v57, 5  ;;  %v6434_v61 = vrot.slane %v2250_v30, 9  ;;  %v9756_v29 = vld [vmem:[#allocation7_spill] sm:$0xff] }
 0x1d1   : > { %7176 = vmatmul.mubr.msk.bf16.vlgmr.msra.gmra.mrb[20].mxu1 %vm1742_vm10, %v6571_v35  ;;  %v3896_v39 = vrot.slane %v3894_v53, 4  ;;  %v6573_v7 = vcombine.low %v3888_v50, %v3891_v49  ;;  %v2324_v54 = vrot.slane %v7680_v18, 5  ;;  %v3901_v45 = vrot.slane %v9755_v22, 5  ;;  %7106 = vmatpush3.bf16.msra.mxu0 %v9756_v29  ;;  %v2252_v59 = vld [vmem:[#allocation2 + $0x3c] sm:$0xe] }
 0x1d2   : > { %7208 = vmatpush3.bf16.msra.mxu1 %v8410_v12  ;;  %7179 = vmatprep.mubr.msk.bf16.mxu1 %vm1742_vm10, %v6572_v47  ;;  %v2323_v35 = vrot.slane %v2321_v34, 4  ;;  %v3895_v12 = vsel %vm8617_vm1, %v6556_v23, %v3894_v53  ;;  %v2322_v2 = vsel %vm8617_vm1, %v6434_v61, %v2321_v34  ;;  %v2328_v17 = vrot.slane %v9757_v11, 5  ;;  %v7682_v53 = vld [vmem:[#allocation2 + $0x40] sm:$0xf]  ;;  %v9759_v34 = vld [vmem:[#allocation9_spill] sm:$0xff] }
 0x1d3   : > { %7241 = vmatprep.subr.bf16.mxu1 %v8665_v19  ;;  %7077 = vmatprep.mubr.msk.bf16.mxu0 %vm1742_vm10, %v6451_v33  ;;  %v3898_v57 = vsel %vm8617_vm1, %v3896_v39, %v3897_v31  ;;  %v6557_v10 = vrot.slane %v3805_v51, 9  ;;  %v3903_v62 = vrot.slane %v3901_v45, 4  ;;  %v3904_v25 = vrot.slane %v9758_v42, 5  ;;  %v3807_v31 = vld [vmem:[#allocation2 + $0x60] sm:$0xe] }
 0x1d4   : > { %v2325_v55 = vsel %vm8617_vm1, %v2323_v35, %v2324_v54  ;;  %v6574_v4 = vcombine.low %v3895_v12, %v3898_v57  ;;  %v6435_v36 = vrot.slane %v2251_v1, 9  ;;  %v2330_v3 = vrot.slane %v2328_v17, 4  ;;  %v7683_v51 = vld [vmem:[#allocation2 + $0x44] sm:$0x1]  ;;  %v2253_v54 = vld [vmem:[#allocation2 + $0x48] sm:$0xe] }
 0x1d5   : > { %v2331_v52 = vrot.slane %v7681_v8, 5  ;;  %v6452_v21 = vcombine.low %v2322_v2, %v2325_v55  ;;  %v3902_v26 = vsel %vm8617_vm1, %v6557_v10, %v3901_v45  ;;  %v3905_v58 = vsel %vm8617_vm1, %v3903_v62, %v3904_v25  ;;  %v7684_v1 = vld [vmem:[#allocation2 + $0x4c] sm:$0xf]  ;;  %v7685_v10 = vld [vmem:[#allocation2 + $0x50] sm:$0x1] }
 0x1d6   : > { %v3908_v30 = vrot.slane %v8457_v28, 5  ;;  %v2329_v47 = vsel %vm8617_vm1, %v6435_v36, %v2328_v17  ;;  %v6558_v49 = vrot.slane %v3806_v44, 9  ;;  %v2335_v48 = vrot.slane %v7682_v53, 5  ;;  %v3808_v42 = vld [vmem:[#allocation2 + $0x6c] sm:$0xe] }
 0x1d7   : > { %v2332_v50 = vsel %vm8617_vm1, %v2330_v3, %v2331_v52  ;;  %v3911_v33 = vrot.slane %v9759_v34, 5  ;;  %v6436_v39 = vrot.slane %v2252_v59, 9  ;;  %v6575_v28 = vcombine.low %v3902_v26, %v3905_v58  ;;  %v2254_v3 = vld [vmem:[#allocation2 + $0x54] sm:$0xe]  ;;  %v7686_v59 = vld [vmem:[#allocation2 + $0x58] sm:$0xf] }
 0x1d8   : > { %7078 = vmatmul.mubr.msk.bf16.gmra.mrb[36].mxu0 %vm1742_vm10, %v6452_v21  ;;  %v6453_v9 = vcombine.low %v2329_v47, %v2332_v50  ;;  %v3910_v23 = vrot.slane %v3908_v30, 4  ;;  %v2337_v61 = vrot.slane %v2335_v48, 4  ;;  %v2338_v35 = vrot.slane %v7683_v51, 5  ;;  %v3809_v26 = vld [vmem:[#allocation2 + $0x78] sm:$0xe] }
 0x1d9   : > { %7180 = vmatmul.mubr.msk.bf16.gmra.mrb[24].mxu1 %vm1742_vm10, %v6573_v7  ;;  %v3915_v18 = vrot.slane %v8474_v13, 5  ;;  %v3909_v7 = vsel %vm8617_vm1, %v6558_v49, %v3908_v30  ;;  %v2336_v45 = vsel %vm8617_vm1, %v6436_v39, %v2335_v48  ;;  %v2342_v29 = vrot.slane %v7684_v1, 5  ;;  %v7687_v53 = vld [vmem:[#allocation2 + $0x5c] sm:$0x1]  ;;  %v7688_v39 = vld [vmem:[#allocation2 + $0x64] sm:$0xf] }
 0x1da   : > { %7183 = vmatprep.mubr.msk.bf16.mxu1 %vm1742_vm10, %v6574_v4  ;;  %7081 = vmatprep.mubr.msk.bf16.mxu0 %vm1742_vm10, %v6453_v9  ;;  %v3912_v22 = vsel %vm8617_vm1, %v3910_v23, %v3911_v33  ;;  %v2339_v12 = vsel %vm8617_vm1, %v2337_v61, %v2338_v35  ;;  %v6559_v57 = vrot.slane %v3807_v31, 9  ;;  %v3918_v13 = vrot.slane %v8481_v40, 5  ;;  %v2255_v33 = vld [vmem:[#allocation2 + $0x60] sm:$0xe] }
 0x1db   : > { %v3917_v2 = vrot.slane %v3915_v18, 4  ;;  %v6576_v11 = vcombine.low %v3909_v7, %v3912_v22  ;;  %v6437_v17 = vrot.slane %v2253_v54, 9  ;;  %v2344_v55 = vrot.slane %v2342_v29, 4  ;;  %v7689_v54 = vld [vmem:[#allocation2 + $0x68] sm:$0x1] }
 0x1dc   : > { %v2345_v62 = vrot.slane %v7685_v10, 5  ;;  %v6454_v25 = vcombine.low %v2336_v45, %v2339_v12  ;;  %v3916_v44 = vsel %vm8617_vm1, %v6559_v57, %v3915_v18  ;;  %v3922_v36 = vrot.slane %v8487_v0, 5  ;;  %v3810_v22 = vld [vmem:[#allocation2 + $0x84] sm:$0xe] }
 0x1dd   : > { %v3919_v4 = vsel %vm8617_vm1, %v3917_v2, %v3918_v13  ;;  %v2343_v40 = vsel %vm8617_vm1, %v6437_v17, %v2342_v29  ;;  %v2349_v21 = vrot.slane %v7686_v59, 5  ;;  %v6560_v30 = vrot.slane %v3808_v42, 9  ;;  %v7690_v13 = vld [vmem:[#allocation2 + $0x70] sm:$0xf] }
 0x1de   : > { %v6577_v8 = vcombine.low %v3916_v44, %v3919_v4  ;;  %v2346_v52 = vsel %vm8617_vm1, %v2344_v55, %v2345_v62  ;;  %v3924_v47 = vrot.slane %v3922_v36, 4  ;;  %v3925_v50 = vrot.slane %v8495_v60, 5  ;;  %v3811_v42 = vld [vmem:[#allocation2 + $0x90] sm:$0xe]  ;;  %v2256_v44 = vld [vmem:[#allocation2 + $0x6c] sm:$0xe] }
 0x1df   : > { %v6455_v58 = vcombine.low %v2343_v40, %v2346_v52  ;;  %v6438_v0 = vrot.slane %v2254_v3, 9  ;;  %v2351_v49 = vrot.slane %v2349_v21, 4  ;;  %v2352_v48 = vrot.slane %v7687_v53, 5  ;;  %v7691_v52 = vld [vmem:[#allocation2 + $0x74] sm:$0x1] }
 0x1e0   : > { %7082 = vmatmul.mubr.msk.bf16.gmra.mrb[40].mxu0 %vm1742_vm10, %v6454_v25  ;;  %v3929_v9 = vrot.slane %v8503_v37, 5  ;;  %v3923_v23 = vsel %vm8617_vm1, %v6560_v30, %v3922_v36  ;;  %v3926_v60 = vsel %vm8617_vm1, %v3924_v47, %v3925_v50  ;;  %v6561_v34 = vrot.slane %v3809_v26, 9  ;;  %v2257_v36 = vld [vmem:[#allocation2 + $0x78] sm:$0xe]  ;;  %v3812_v53 = vld [vmem:[#allocation2 + $0x9c] sm:$0xe] }
 0x1e1   : > { %7184 = vmatmul.mubr.msk.bf16.gmra.mrb[28].mxu1 %vm1742_vm10, %v6575_v28  ;;  %7085 = vmatprep.mubr.msk.bf16.mxu0 %vm1742_vm10, %v6455_v58  ;;  %v2356_v31 = vrot.slane %v7688_v39, 5  ;;  %v6578_v28 = vcombine.low %v3923_v23, %v3926_v60  ;;  %v2353_v61 = vsel %vm8617_vm1, %v2351_v49, %v2352_v48  ;;  %v3932_v37 = vrot.slane %v8513_v43, 5  ;;  %v7694_v39 = vld [vmem:[#allocation2 + $0x88] sm:$0xf] }
 0x1e2   : > { %7187 = vmatprep.mubr.msk.bf16.mxu1 %vm1742_vm10, %v6576_v11  ;;  %v3931_v51 = vrot.slane %v3929_v9, 4  ;;  %v2350_v35 = vsel %vm8617_vm1, %v6438_v0, %v2349_v21  ;;  %v2359_v7 = vrot.slane %v7689_v54, 5  ;;  %v8747_v45 = vsel %vm8617_vm1, %v6561_v34, %v3929_v9  ;;  %v7693_v0 = vld [vmem:[#allocation2 + $0x80] sm:$0x1] }
 0x1e3   : > { %v2358_v18 = vrot.slane %v2356_v31, 4  ;;  %v6439_v29 = vrot.slane %v2255_v33, 9  ;;  %v3936_v12 = vrot.slane %v8517_v6, 5  ;;  %v6456_v57 = vcombine.low %v2350_v35, %v2353_v61  ;;  %v3813_v35 = vld [vmem:[#allocation2 + $0xa8] sm:$0xe] }
 0x1e4   : > { %v8751_v1 = vsel %vm8617_vm1, %v3931_v51, %v3932_v37  ;;  %v2363_v11 = vrot.slane %v7690_v13, 5  ;;  %v6562_v55 = vrot.slane %v3810_v22, 9  ;;  %v3939_v62 = vrot.slane %v8525_v27, 5  ;;  %v7692_v27 = vld [vmem:[#allocation2 + $0x7c] sm:$0xf] }
 0x1e5   : > { %v6579_v43 = vcombine.low %v8747_v45, %v8751_v1  ;;  %v2360_v2 = vsel %vm8617_vm1, %v2358_v18, %v2359_v7  ;;  %v2357_v17 = vsel %vm8617_vm1, %v6439_v29, %v2356_v31  ;;  %v3938_v10 = vrot.slane %v3936_v12, 4  ;;  %v2258_v45 = vld [vmem:[#allocation2 + $0x84] sm:$0xe]  ;;  %v2259_v29 = vld [vmem:[#allocation2 + $0x90] sm:$0xe] }
 0x1e6   : > { %v6457_v25 = vcombine.low %v2357_v17, %v2360_v2  ;;  %v2365_v6 = vrot.slane %v2363_v11, 4  ;;  %v3943_v4 = vrot.slane %v8534_v5, 5  ;;  %v3937_v3 = vsel %vm8617_vm1, %v6562_v55, %v3936_v12  ;;  %v7695_v12 = vld [vmem:[#allocation2 + $0x94] sm:$0xf] }
 0x1e7   : > { %v3940_v40 = vsel %vm8617_vm1, %v3938_v10, %v3939_v62  ;;  %v2366_v59 = vrot.slane %v7691_v52, 5  ;;  %v2370_v21 = vrot.slane %v7692_v27, 5  ;;  %v6563_v26 = vrot.slane %v3811_v42, 9  ;;  %v7697_v10 = vld [vmem:[#allocation2 + $0x98] sm:$0x1] }
 0x1e8   : > { %7086 = vmatmul.mubr.msk.bf16.gmra.mrb[44].mxu0 %vm1742_vm10, %v6456_v57  ;;  %v6580_v5 = vcombine.low %v3937_v3, %v3940_v40  ;;  %v3945_v58 = vrot.slane %v3943_v4, 4  ;;  %v6440_v30 = vrot.slane %v2256_v44, 9  ;;  %v6441_v47 = vrot.slane %v2257_v36, 9  ;;  %v7698_v36 = vld [vmem:[#allocation2 + $0xa0] sm:$0xf] }
 0x1e9   : > { %7188 = vmatmul.mubr.msk.bf16.gmra.mrb[0].mxu1 %vm1742_vm10, %v6577_v8  ;;  %7089 = vmatprep.mubr.msk.bf16.mxu0 %vm1742_vm10, %v6457_v25  ;;  %v3946_v8 = vrot.slane %v8541_v24, 5  ;;  %v2372_v50 = vrot.slane %v2370_v21, 4  ;;  %v2373_v49 = vrot.slane %v7693_v0, 5  ;;  %v2367_v48 = vsel %vm8617_vm1, %v2365_v6, %v2366_v59  ;;  %v3815_v52 = vld [vmem:[#allocation2 + $0xc0] sm:$0xe] }
 0x1ea   : > { %7191 = vmatprep.mubr.msk.bf16.mxu1 %vm1742_vm10, %v6578_v28  ;;  %v3944_v9 = vsel %vm8617_vm1, %v6563_v26, %v3943_v4  ;;  %v3950_v60 = vrot.slane %v8547_v20, 5  ;;  %v2364_v24 = vsel %vm8617_vm1, %v6440_v30, %v2363_v11  ;;  %v2377_v31 = vrot.slane %v7694_v39, 5  ;;  %v7696_v11 = vld [vmem:[#allocation2 + $0x8c] sm:$0x1]  ;;  %v7701_v39 = vld [vmem:[#allocation2 + $0xb0] sm:$0x1] }
 0x1eb   : > { %v3947_v23 = vsel %vm8617_vm1, %v3945_v58, %v3946_v8  ;;  %v2374_v33 = vsel %vm8617_vm1, %v2372_v50, %v2373_v49  ;;  %v2371_v28 = vsel %vm8617_vm1, %v6441_v47, %v2370_v21  ;;  %v6564_v61 = vrot.slane %v3812_v53, 9  ;;  %v7699_v58 = vld [vmem:[#allocation2 + $0xac] sm:$0xf]  ;;  %v2260_v53 = vld [vmem:[#allocation2 + $0x9c] sm:$0xe] }
 0x1ec   : > { %v6581_v34 = vcombine.low %v3944_v9, %v3947_v23  ;;  %v3952_v51 = vrot.slane %v3950_v60, 4  ;;  %v3953_v37 = vrot.slane %v8557_v16, 5  ;;  %v6458_v18 = vcombine.low %v2364_v24, %v2367_v48  ;;  %v672_v49 = vld [vmem:[#allocation2 + $0xcc] sm:$0x1]  ;;  %v7700_v9 = vld [vmem:[#allocation2 + $0xa4] sm:$0x1] }
 0x1ed   : > { %v6459_v54 = vcombine.low %v2371_v28, %v2374_v33  ;;  %v3957_v20 = vrot.slane %v8563_v32, 5  ;;  %v3951_v7 = vsel %vm8617_vm1, %v6564_v61, %v3950_v60  ;;  %v2379_v1 = vrot.slane %v2377_v31, 4  ;;  %v2261_v24 = vld [vmem:[#allocation2 + $0xa8] sm:$0xe] }
 0x1ee   : > { %v3954_v22 = vsel %vm8617_vm1, %v3952_v51, %v3953_v37  ;;  %v2384_v57 = vrot.slane %v7695_v12, 5  ;;  %v6565_v2 = vrot.slane %v3813_v35, 9  ;;  %v3960_v32 = vrot.slane %v8573_v15, 5  ;;  %v7702_v35 = vld [vmem:[#allocation2 + $0xb8] sm:$0xf] }
 0x1ef   : > { %v6582_v16 = vcombine.low %v3951_v7, %v3954_v22  ;;  %v3959_v13 = vrot.slane %v3957_v20, 4  ;;  %v2380_v17 = vrot.slane %v7696_v11, 5  ;;  %v2387_v62 = vrot.slane %v7697_v10, 5 }
 0x1f0   : > { %7090 = vmatmul.mubr.msk.bf16.gmra.mrb[48].mxu0 %vm1742_vm10, %v6458_v18  ;;  %v2386_v55 = vrot.slane %v2384_v57, 4  ;;  %v6442_v42 = vrot.slane %v2258_v45, 9  ;;  %v6443_v44 = vrot.slane %v2259_v29, 9  ;;  %v2391_v3 = vrot.slane %v7698_v36, 5  ;;  %v7644_v36 = vld [vmem:[#allocation2 + $0x3c] sm:$0xff]  }
 0x1f1   : > { %7192 = vmatmul.mubr.msk.bf16.gmra.mrb[4].mxu1 %vm1742_vm10, %v6579_v43  ;;  %7093 = vmatprep.mubr.msk.bf16.mxu0 %vm1742_vm10, %v6459_v54  ;;  %v3958_v43 = vsel %vm8617_vm1, %v6565_v2, %v3957_v20  ;;  %v3961_v25 = vsel %vm8617_vm1, %v3959_v13, %v3960_v32  ;;  %v2381_v15 = vsel %vm8617_vm1, %v2379_v1, %v2380_v17  ;;  %v3964_v40 = vrot.slane %v8577_v41, 5  ;;  %v2262_v2 = vld [vmem:[#allocation2 + $0xb4] sm:$0xe]  ;;  %v7703_v13 = vld [vmem:[#allocation2 + $0xbc] sm:$0x1] }
 0x1f2   : > { %7195 = vmatprep.mubr.msk.bf16.mxu1 %vm1742_vm10, %v6580_v5  ;;  %v6583_v6 = vcombine.low %v3958_v43, %v3961_v25  ;;  %v2388_v4 = vsel %vm8617_vm1, %v2386_v55, %v2387_v62  ;;  %v2378_v59 = vsel %vm8617_vm1, %v6442_v42, %v2377_v31  ;;  %v2385_v27 = vsel %vm8617_vm1, %v6443_v44, %v2384_v57  ;;  %v7638_v62 = vld [vmem:[#allocation2 + $0x18] sm:$0xff]   ;;  %v7641_v42 = vld [vmem:[#allocation2 + $0xc] sm:$0xff]   ;;  %v7640_v43 = vld [vmem:[#allocation2 + $0x24] sm:$0xff]  }
 0x1f3   : > { %v3971_v21 = vrot.slane %v8593_v56, 5  ;;  %v6460_v5 = vcombine.low %v2378_v59, %v2381_v15  ;;  %v6461_v26 = vcombine.low %v2385_v27, %v2388_v4  ;;  %v2398_v8 = vrot.slane %v7699_v58, 5  ;;  %v3814_v56 = vld [vmem:[#allocation2 + $0xb4] sm:$0xe]  ;;  %v7643_v25 = vld [vmem:[#allocation2 + $0x18] sm:$0xff]   ;;  %v8848_v44 = vld [vmem:[%s9709_s3 + $0x40] sm:$0xff]  }
 0x1f4   : > { %v2393_v30 = vrot.slane %v2391_v3, 4  ;;  %v6567_v47 = vrot.slane %v3815_v52, 9  ;;  %v3974_v0 = vrot.slane %v8601_v14, 5  ;;  %v3966_v41 = vrot.slane %v3964_v40, 4  ;;  %v7642_v15 = vld [vmem:[#allocation2 + $0x30] sm:$0xff]   ;;  %v7646_v52 = vld [vmem:[#allocation2 + $0x48] sm:$0xff]  }
 0x1f5   : > { %v3973_v50 = vrot.slane %v3971_v21, 4  ;;  %v2400_v48 = vrot.slane %v2398_v8, 4  ;;  %v2394_v23 = vrot.slane %v7700_v9, 5  ;;  %v2401_v31 = vrot.slane %v7701_v39, 5  ;;  %v8856_v4 = vld [vmem:[#allocation2 + $0x1c] sm:$0xf] }
 0x1f6   : > { %v3972_v60 = vsel %vm8617_vm1, %v6567_v47, %v3971_v21  ;;  %v673_v61 = vsel %vm7859_vm3, 0, %v672_v49  ;;  %v6444_v51 = vrot.slane %v2260_v53, 9  ;;  %v2405_v18 = vrot.slane %v7702_v35, 5  ;;  %v7649_v59 = vld [vmem:[#allocation2 + $0x3c] sm:$0xff]   ;;  %v8864_v58 = vld [vmem:[#allocation2 + $0x28] sm:$0xf] }
 0x1f7   : > { %v3975_v14 = vsel %vm8617_vm1, %v3973_v50, %v3974_v0  ;;  %v2395_v37 = vsel %vm8617_vm1, %v2393_v30, %v2394_v23  ;;  %674 = vst [vmem:[#allocation2 + $0xcc] sm:$0x1] %v673_v61  ;;  %v6566_v54 = vrot.slane %v3814_v56, 9  ;;  %v6445_v7 = vrot.slane %v2261_v24, 9  ;;  %v8868_v0 = vld [vmem:[#allocation2 + $0x20] sm:$0x1] }
 0x1f8   : > { %7094 = vmatmul.mubr.msk.bf16.gmra.mrb[52].mxu0 %vm1742_vm10, %v6460_v5  ;;  %v6585_v33 = vcombine.low %v3972_v60, %v3975_v14  ;;  %v2392_v22 = vsel %vm8617_vm1, %v6444_v51, %v2391_v3  ;;  %v2408_v32 = vrot.slane %v7703_v13, 5  ;;  %v6446_v11 = vrot.slane %v2262_v2, 9  ;;  %v7647_v3 = vld [vmem:[#allocation2 + $0x30] sm:$0xff]   ;;  %v7651_v23 = vld [vmem:[#allocation2 + $0x48] sm:$0xff]   ;;  %v7650_v14 = vld [vmem:[#allocation2 + $0x60] sm:$0xff]  }
 0x1f9   : > { %7196 = vmatmul.mubr.msk.bf16.gmra.mrb[8].mxu1 %vm1742_vm10, %v6581_v34  ;;  %7097 = vmatprep.mubr.msk.bf16.mxu0 %vm1742_vm10, %v6461_v26  ;;  %v3967_v34 = vrot.slane %v8589_v63, 5  ;;  %v2402_v63 = vsel %vm8617_vm1, %v2400_v48, %v2401_v31  ;;  %v3965_v45 = vsel %vm8617_vm1, %v6566_v54, %v3964_v40  ;;  %v6462_v1 = vcombine.low %v2392_v22, %v2395_v37  ;;  %v4637_v40 = vld [vmem:[#allocation2 + $0x18] sm:$0xf]  ;;  %v4643_v56 = vld [vmem:[#allocation2 + $0x30] sm:$0xf] }
 0x1fa   : > { %7199 = vmatprep.mubr.msk.bf16.mxu1 %vm1742_vm10, %v6582_v16  ;;  %v2399_v29 = vsel %vm8617_vm1, %v6445_v7, %v2398_v8  ;;  %v2407_v16 = vrot.slane %v2405_v18, 4  ;;  %v2406_v55 = vsel %vm8617_vm1, %v6446_v11, %v2405_v18  ;;  %v4695_v27 = vshll.u32 %v8856_v4, 16  ;;  %v7648_v9 = vld [vmem:[#allocation2 + $0x54] sm:$0xff]   ;;  %v8883_v54 = vld [vmem:[#allocation2 + $0x2c] sm:$0x1] }
 0x1fb   : > { %v3968_v20 = vsel %vm8617_vm1, %v3966_v41, %v3967_v34  ;;  %v6463_v57 = vcombine.low %v2399_v29, %v2402_v63  ;;  %v4699_v21 = vshrl.u32 %v8856_v4, 16  ;;  %v4686_v5 = vshrl.u32 %v4637_v40, 16  ;;  %v8872_v60 = vld [vmem:[#allocation2 + $0x34] sm:$0xf]  ;;  %v4646_v63 = vld [vmem:[#allocation2 + $0x3c] sm:$0xf] }
 0x1fc   : > { %v6584_v12 = vcombine.low %v3965_v45, %v3968_v20  ;;  %v2409_v17 = vsel %vm8617_vm1, %v2407_v16, %v2408_v32  ;;  %v4689_v26 = vshll.u32 %v4637_v40, 16  ;;  %v8866_v8 = vrot.slane %v4695_v27, 5  ;;  %v8891_v32 = vld [vmem:[#allocation2 + $0x40] sm:$0xf]  ;;  %v7652_v11 = vld [vmem:[#allocation2 + $0x6c] sm:$0xff]  }
 0x1fd   : > { %v6464_v10 = vcombine.low %v2406_v55, %v2409_v17  ;;  %v4701_v30 = vrot.slane %v4699_v21, 4  ;;  %v4719_v49 = vshll.u32 %v8864_v58, 16  ;;  %v4723_v41 = vshrl.u32 %v8864_v58, 16 }
 0x1fe   : > { %v4688_v53 = vrot.slane %v4686_v5, 4  ;;  %v4691_v48 = vrot.slane %v4689_v26, 5  ;;  %v4705_v34 = vshll.u32 %v8868_v0, 16  ;;  %v4734_v61 = vshrl.u32 %v4643_v56, 16 }
 0x1ff   : > { %v4702_v24 = vor.u32 %v4701_v30, %v8866_v8  ;;  %v8878_v31 = vrot.slane %v4719_v49, 5  ;;  %v4725_v28 = vrot.slane %v4723_v41, 4  ;;  %v4737_v51 = vshll.u32 %v4643_v56, 16  ;;  %v8906_v30 = vld [vmem:[#allocation2 + $0x58] sm:$0xf] }
 0x200   : > { %7098 = vmatmul.mubr.msk.bf16.gmra.mrb[56].mxu0 %vm1742_vm10, %v6462_v1  ;;  %v4692_v37 = vor.u32 %v4691_v48, %v4688_v53  ;;  %v4743_v35 = vshll.u32 %v8872_v60, 16  ;;  %v4747_v18 = vshrl.u32 %v8872_v60, 16  ;;  %v4707_v22 = vrot.slane %v4705_v34, 5  ;;  %v8886_v1 = vld [vmem:[#allocation2 + $0x38] sm:$0x1] }
 0x201   : > { %7200 = vmatmul.mubr.msk.bf16.gmra.mrb[12].mxu1 %vm1742_vm10, %v6583_v6  ;;  %7101 = vmatprep.mubr.msk.bf16.mxu0 %vm1742_vm10, %v6463_v57  ;;  %v7645_v6 = vld [vmem:[#allocation2 + $0x24] sm:$0xff]   ;;  %v4703_v20 = vrot.slane %v4702_v24, 4  ;;  %v4726_v45 = vor.u32 %v4725_v28, %v8878_v31  ;;  %v4736_v29 = vrot.slane %v4734_v61, 4  ;;  %v4729_v16 = vshll.u32 %v8883_v54, 16 }
 0x202   : > { %7203 = vmatprep.mubr.msk.bf16.mxu1 %vm1742_vm10, %v6584_v12  ;;  %v4739_v12 = vrot.slane %v4737_v51, 5  ;;  %v4693_v57 = vrot.slane %v4692_v37, 4  ;;  %v8889_v2 = vrot.slane %v4743_v35, 5  ;;  %v4749_v13 = vrot.slane %v4747_v18, 4  ;;  %v8913_v49 = vld [vmem:[#allocation2 + $0x44] sm:$0x1] }
 0x203   : > { %v4758_v17 = vshrl.u32 %v4646_v63, 16  ;;  %v4761_v55 = vshll.u32 %v4646_v63, 16  ;;  %v4771_v27 = vshrl.u32 %v8891_v32, 16  ;;  %v4815_v34 = vshll.u32 %v8906_v30, 16  ;;  %v8924_v35 = vld [vmem:[#allocation2 + $0x64] sm:$0xf] }
 0x204   : > { %v4698_v40 = vsel %vm7918_vm9, %v4693_v57, %v8866_v8  ;;  %v4777_v61 = vshll.u32 %v8913_v49, 16  ;;  %v7655_v18 = vld [vmem:[#allocation2 + $0x90] sm:$0xff]   ;;  %v5443_v46 = vrot.slane %v8883_v54, 5 }
 0x205   : > { %v4760_v21 = vrot.slane %v4758_v17, 4  ;;  %v4773_v24 = vrot.slane %v4771_v27, 4  ;;  %v4843_v17 = vshrl.u32 %v8924_v35, 16 }
 0x208   : > { %7102 = vmatmul.mubr.msk.bf16.gmra.mrb[60].mxu0 %vm1742_vm10, %v6464_v10  ;;  %v7653_v10 = vld [vmem:[#allocation2 + $0x78] sm:$0xff]  }
 0x209   : > { %7204 = vmatmul.mubr.msk.bf16.gmra.mrb[16].mxu1 %vm1742_vm10, %v6585_v33  ;;  %7107 = vmatprep.mubr.msk.bf16.mxu0 %vm1742_vm10, %v7641_v42 }
 0x20a   : > { %7209 = vmatprep.mubr.msk.bf16.mxu1 %vm1742_vm10, %v7638_v62  ;;  %v4708_v62 = vsel %vm7918_vm9, %v4703_v20, %v4707_v22 }
 0x210   : > { %7108 = vmatmul.mubr.msk.bf16.vlgmr.msra.gmra.mrb[32].mxu0 %vm1742_vm10, %v7643_v25  ;;  %v4727_v25 = vrot.slane %v4726_v45, 4 }
 0x211   : > { %7210 = vmatmul.mubr.msk.bf16.vlgmr.msra.gmra.mrb[20].mxu1 %vm1742_vm10, %v7640_v43  ;;  %7111 = vmatprep.mubr.msk.bf16.mxu0 %vm1742_vm10, %v7645_v6  ;;  %v4649_v43 = vld [vmem:[#allocation2 + $0x48] sm:$0xf]  ;;  %v4753_v6 = vshll.u32 %v8886_v1, 16 }
 0x212   : > { %7242 = vmatpush3.bf16.msra.mxu1 %v8665_v19  ;;  %7213 = vmatprep.mubr.msk.bf16.mxu1 %vm1742_vm10, %v7642_v15  ;;  %v4640_v19 = vld [vmem:[#allocation2 + $0x24] sm:$0xf]  ;;  %v4740_v15 = vor.u32 %v4739_v12, %v4736_v29  ;;  %v4782_v5 = vshrl.u32 %v4649_v43, 16  ;;  %v4785_v26 = vshll.u32 %v4649_v43, 16  ;;  %v8946_v43 = vld [vmem:[#allocation2 + $0x50] sm:$0x1] }
 0x213   : > { %7275 = vmatprep.subr.bf16.mxu1 %v8848_v44  ;;  %v4710_v47 = vshrl.u32 %v4640_v19, 16  ;;  %v4713_v50 = vshll.u32 %v4640_v19, 16  ;;  %v4763_v19 = vrot.slane %v4761_v55, 5  ;;  %v4755_v56 = vrot.slane %v4753_v6, 5  ;;  %v4658_v55 = vld [vmem:[#allocation2 + $0x6c] sm:$0xf] }
 0x214   : > { %v4741_v48 = vrot.slane %v4740_v15, 4  ;;  %v4784_v51 = vrot.slane %v4782_v5, 4  ;;  %v4787_v37 = vrot.slane %v4785_v26, 5  ;;  %v7656_v5 = vld [vmem:[#allocation2 + $0x9c] sm:$0xff]  }
 0x215   : > { %v4712_v33 = vrot.slane %v4710_v47, 4  ;;  %v4715_v39 = vrot.slane %v4713_v50, 5  ;;  %v8908_v47 = vcombine.low %v4698_v40, %v4708_v62  ;;  %v4764_v28 = vor.u32 %v4763_v19, %v4760_v21  ;;  %v8949_v40 = vld [vmem:[#allocation2 + $0x70] sm:$0xf] }
 0x216   : > { %v4746_v29 = vsel %vm7918_vm9, %v4741_v48, %v8889_v2  ;;  %v4854_v21 = vshrl.u32 %v4658_v55, 16  ;;  %v4857_v19 = vshll.u32 %v4658_v55, 16 }
 0x217   : > { %v4716_v7 = vor.u32 %v4715_v39, %v4712_v33  ;;  %v4819_v33 = vshrl.u32 %v8906_v30, 16  ;;  %v4655_v39 = vld [vmem:[#allocation2 + $0x60] sm:$0xf]  ;;  %v8941_v62 = vrot.slane %v4764_v28, 4 }
 0x218   : > { %7112 = vmatmul.mubr.msk.bf16.gmra.mrb[36].mxu0 %vm1742_vm10, %v7647_v3  ;;  %v8898_v3 = vld [vmem:[#allocation2 + $0x4c] sm:$0xf]  ;;  %v4830_v12 = vshrl.u32 %v4655_v39, 16  ;;  %v4833_v57 = vshll.u32 %v4655_v39, 16 }
 0x219   : > { %7214 = vmatmul.mubr.msk.bf16.gmra.mrb[24].mxu1 %vm1742_vm10, %v7644_v36  ;;  %7115 = vmatprep.mubr.msk.bf16.mxu0 %vm1742_vm10, %v7649_v59  ;;  %v4717_v42 = vrot.slane %v4716_v7, 4  ;;  %v4767_v36 = vshll.u32 %v8891_v32, 16  ;;  %v4750_v59 = vor.u32 %v4749_v13, %v8889_v2  ;;  %v4791_v8 = vshll.u32 %v8898_v3, 16 }
 0x21a   : > { %7217 = vmatprep.mubr.msk.bf16.mxu1 %vm1742_vm10, %v7646_v52  ;;  %v4731_v52 = vrot.slane %v4729_v16, 5  ;;  %v4795_v41 = vshrl.u32 %v8898_v3, 16  ;;  %v8935_v16 = vrot.slane %v4815_v34, 5  ;;  %v4821_v13 = vrot.slane %v4819_v33, 4  ;;  %v7657_v34 = vld [vmem:[#allocation2 + $0xa8] sm:$0xff]  }
 0x21b   : > { %v4722_v50 = vsel %vm7918_vm9, %v4717_v42, %v8878_v31  ;;  %v7654_v31 = vld [vmem:[#allocation2 + $0x84] sm:$0xff]   ;;  %v8926_v20 = vrot.slane %v4791_v8, 5  ;;  %v8944_v2 = vrot.slane %v4777_v61, 5  ;;  %v4835_v27 = vrot.slane %v4833_v57, 5 }
 0x21c   : > { %v4732_v53 = vsel %vm7918_vm9, %v4727_v25, %v4731_v52  ;;  %v4797_v7 = vrot.slane %v4795_v41, 4  ;;  %v4788_v25 = vor.u32 %v4787_v37, %v4784_v51  ;;  %v8951_v52 = vld [vmem:[#allocation2 + $0x5c] sm:$0x1]  ;;  %v4845_v41 = vrot.slane %v4843_v17, 4  ;;  %v8967_v51 = vld [vmem:[#allocation2 + $0x68] sm:$0x1] }
 0x21d   : > { %v8929_v45 = vcombine.low %v4722_v50, %v4732_v53  ;;  %v4822_v50 = vor.u32 %v4821_v13, %v8935_v16  ;;  %v4661_v53 = vld [vmem:[#allocation2 + $0x78] sm:$0xf]  ;;  %v4825_v28 = vshll.u32 %v8951_v52, 16 }
 0x21e   : > { %v4798_v15 = vor.u32 %v4797_v7, %v8926_v20  ;;  %v4789_v39 = vrot.slane %v4788_v25, 4  ;;  %v4859_v7 = vrot.slane %v4857_v19, 5  ;;  %v4881_v55 = vshll.u32 %v4661_v53, 16 }
 0x21f   : > { %v4849_v25 = vshll.u32 %v8967_v51, 16 }
 0x220   : > { %7116 = vmatmul.mubr.msk.bf16.gmra.mrb[40].mxu0 %vm1742_vm10, %v7651_v23  ;;  %v4652_v23 = vld [vmem:[#allocation2 + $0x54] sm:$0xf]  ;;  %v4799_v61 = vrot.slane %v4798_v15, 4  ;;  %v8981_v15 = vld [vmem:[#allocation2 + $0x7c] sm:$0xf] }
 0x221   : > { %7218 = vmatmul.mubr.msk.bf16.gmra.mrb[28].mxu1 %vm1742_vm10, %v7648_v9  ;;  %v8919_v9 = vrot.slane %v4767_v36, 5  ;;  %v4806_v63 = vshrl.u32 %v4652_v23, 16  ;;  %v4809_v22 = vshll.u32 %v4652_v23, 16  ;;  %v4863_v23 = vshll.u32 %v8949_v40, 16 }
 0x222   : > { %7221 = vmatprep.mubr.msk.bf16.mxu1 %vm1742_vm10, %v7650_v14  ;;  %v4751_v14 = vrot.slane %v4750_v59, 4  ;;  %v4832_v59 = vrot.slane %v4830_v12, 4  ;;  %v9037_v12 = vld [vmem:[#allocation2 + $0x94] sm:$0xf] }
 0x223   : > { %v4774_v42 = vor.u32 %v4773_v24, %v8919_v9  ;;  %v4808_v6 = vrot.slane %v4806_v63, 4  ;;  %v4811_v36 = vrot.slane %v4809_v22, 5  ;;  %v728_v24 = vld [vmem:[#allocation2 + $0xd4] sm:$0x1]  ;;  %v4770_v33 = vsel %vm7918_vm9, %v8941_v62, %v8919_v9 }
 0x224   : > { %v4836_v37 = vor.u32 %v4835_v27, %v4832_v59  ;;  %v4823_v63 = vrot.slane %v4822_v50, 4  ;;  %v4878_v9 = vshrl.u32 %v4661_v53, 16  ;;  %v729_v57 = vsel %vm7869_vm5, 0, %v728_v24 }
 0x225   : > { %v4775_v48 = vrot.slane %v4774_v42, 4  ;;  %730 = vst [vmem:[#allocation2 + $0xd4] sm:$0x1] %v729_v57  ;;  %v4827_v42 = vrot.slane %v4825_v28, 5  ;;  %v5447_v57 = vrot.slane %v8872_v60, 5 }
 0x226   : > { %v8997_v50 = vrot.slane %v4878_v9, 4  ;;  %v5380_v9 = vld [vmem:[#allocation2 + $0xb4] sm:$0xe] }
 0x229   : > { %7222 = vmatmul.mubr.msk.bf16.gmra.mrb[0].mxu1 %vm1742_vm10, %v7652_v11  ;;  %v4839_v11 = vshll.u32 %v8924_v35, 16 }
 0x22a   : > { %7225 = vmatprep.mubr.msk.bf16.mxu1 %vm1742_vm10, %v7653_v10  ;;  %v4756_v10 = vsel %vm7918_vm9, %v4751_v14, %v4755_v56  ;;  %v4801_v56 = vshll.u32 %v8946_v43, 16  ;;  %v4867_v14 = vshrl.u32 %v8949_v40, 16 }
 0x22b   : > { %v8953_v26 = vcombine.low %v4746_v29, %v4756_v10  ;;  %v8956_v8 = vrot.slane %v4839_v11, 5  ;;  %v8971_v29 = vld [vmem:[#allocation2 + $0x74] sm:$0x1]  ;;  %v8975_v11 = vrot.slane %v4863_v23, 5  ;;  %v4780_v10 = vsel %vm7918_vm9, %v4775_v48, %v8944_v2 }
 0x22c   : > { %v4803_v13 = vrot.slane %v4801_v56, 5  ;;  %v4869_v17 = vrot.slane %v4867_v14, 4  ;;  %v4873_v27 = vshll.u32 %v8971_v29, 16  ;;  %v4828_v2 = vsel %vm7918_vm9, %v4823_v63, %v4827_v42  ;;  %v9004_v14 = vld [vmem:[#allocation2 + $0x84] sm:$0xf] }
 0x22d   : > { %v4846_v22 = vor.u32 %v4845_v41, %v8956_v8  ;;  %v7658_v41 = vld [vmem:[#allocation2 + $0xb4] sm:$0xff]   ;;  %v9000_v48 = vrot.slane %v4881_v55, 5  ;;  %v4887_v56 = vshll.u32 %v8981_v15, 16  ;;  %v4891_v23 = vshrl.u32 %v8981_v15, 16  ;;  %v5379_v42 = vld [vmem:[#allocation2 + $0xa8] sm:$0xe] }
 0x22e   : > { %v4870_v53 = vor.u32 %v4869_v17, %v8975_v11  ;;  %v9006_v24 = vcombine.low %v4770_v33, %v4780_v10  ;;  %v9024_v33 = vrot.slane %v4873_v27, 5  ;;  %v5370_v27 = vld [vmem:[#allocation2 + $0x3c] sm:$0xe] }
 0x22f   : > { %v8993_v19 = vrot.slane %v4846_v22, 4  ;;  %v9034_v22 = vld [vmem:[#allocation2 + $0x88] sm:$0xf]  ;;  %v9044_v55 = vrot.slane %v4887_v56, 5  ;;  %v9046_v10 = vrot.slane %v4891_v23, 4  ;;  %v6676_v63 = vrot.slane %v5370_v27, 9 }
 0x230   : > { %v5373_v56 = vld [vmem:[#allocation2 + $0x60] sm:$0xe] }
 0x231   : > { %7226 = vmatmul.mubr.msk.bf16.gmra.mrb[4].mxu1 %vm1742_vm10, %v7654_v31  ;;  %v4812_v31 = vor.u32 %v4811_v36, %v4808_v6  ;;  %v4804_v6 = vsel %vm7918_vm9, %v4799_v61, %v4803_v13  ;;  %v8985_v36 = vrot.slane %v4836_v37, 4  ;;  %v9040_v13 = vrot.slane %v4870_v53, 4  ;;  %v9125_v61 = vld [vmem:[#allocation2 + $0xac] sm:$0xf] }
 0x232   : > { %7229 = vmatprep.mubr.msk.bf16.mxu1 %vm1742_vm10, %v7655_v18  ;;  %v4856_v18 = vrot.slane %v4854_v21, 4  ;;  %v4794_v21 = vsel %vm7918_vm9, %v4789_v39, %v8926_v20  ;;  %v7659_v20 = vld [vmem:[#allocation2 + $0xc0] sm:$0xff]   ;;  %v5454_v53 = vrot.slane %v8891_v32, 5  ;;  %v5372_v32 = vld [vmem:[#allocation2 + $0x54] sm:$0xe] }
 0x233   : > { %v4813_v62 = vrot.slane %v4812_v31, 4  ;;  %v9013_v31 = vrot.slane %v4849_v25, 5  ;;  %v6678_v27 = vrot.slane %v5372_v32, 9  ;;  %v5375_v32 = vld [vmem:[#allocation2 + $0x78] sm:$0xe] }
 0x234   : > { %v4860_v59 = vor.u32 %v4859_v7, %v4856_v18  ;;  %v9026_v18 = vld [vmem:[#allocation2 + $0x90] sm:$0xf] }
 0x235   : > { %v4818_v39 = vsel %vm7918_vm9, %v4813_v62, %v8935_v16  ;;  %v5369_v7 = vld [vmem:[#allocation2 + $0x30] sm:$0xe]  ;;  %v5371_v62 = vld [vmem:[#allocation2 + $0x48] sm:$0xe]  ;;  %v5456_v16 = vrot.slane %v5454_v53, 4 }
 0x236   : > { %v9016_v28 = vcombine.low %v4818_v39, %v4828_v2  ;;  %v9022_v37 = vrot.slane %v4860_v59, 4  ;;  %v6675_v25 = vrot.slane %v5369_v7, 9  ;;  %v5450_v59 = vrot.slane %v8886_v1, 5  ;;  %v5377_v7 = vld [vmem:[#allocation2 + $0x90] sm:$0xe] }
 0x237   : > { %v5461_v1 = vrot.slane %v8898_v3, 5  ;;  %v6677_v17 = vrot.slane %v5371_v62, 9  ;;  %v9072_v3 = vsel %vm8617_vm1, %v6676_v63, %v5454_v53  ;;  %v5464_v62 = vrot.slane %v8946_v43, 5  ;;  %v5374_v53 = vld [vmem:[#allocation2 + $0x6c] sm:$0xe] }
 0x238   : > { %v9057_v23 = vsel %vm8617_vm1, %v6675_v25, %v5447_v57  ;;  %v5475_v63 = vrot.slane %v8924_v35, 5  ;;  %v5478_v35 = vrot.slane %v8967_v51, 5  ;;  %v9151_v39 = vld [vmem:[#allocation2 + $0xb0] sm:$0x1] }
 0x239   : > { %7230 = vmatmul.mubr.msk.bf16.gmra.mrb[8].mxu1 %vm1742_vm10, %v7656_v5  ;;  %v8995_v5 = vld [vmem:[#allocation2 + $0x80] sm:$0x1]  ;;  %v5463_v25 = vrot.slane %v5461_v1, 4 }
 0x23a   : > { %7233 = vmatprep.mubr.msk.bf16.mxu1 %vm1742_vm10, %v7657_v34  ;;  %v9008_v34 = vcombine.low %v4794_v21, %v4804_v6  ;;  %v5449_v6 = vrot.slane %v5447_v57, 4  ;;  %v7660_v21 = vld [vmem:[#allocation2 + $0xcc] sm:$0xff]   ;;  %v5457_v57 = vrot.slane %v8913_v49, 5 }
 0x23b   : > { %v9092_v43 = vsel %vm8617_vm1, %v5463_v25, %v5464_v62  ;;  %v5482_v62 = vrot.slane %v8949_v40, 5 }
 0x23c   : > { %v9084_v49 = vsel %vm8617_vm1, %v5456_v16, %v5457_v57 }
 0x23d   : > { %v5484_v40 = vrot.slane %v5482_v62, 4 }
 0x241   : > { %7234 = vmatmul.mubr.msk.bf16.gmra.mrb[12].mxu1 %vm1742_vm10, %v7658_v41  ;;  %v9159_v41 = vld [vmem:[#allocation2 + $0xc4] sm:$0xf] }
 0x242   : > { %7237 = vmatprep.mubr.msk.bf16.mxu1 %vm1742_vm10, %v7659_v20  ;;  %v9061_v20 = vsel %vm8617_vm1, %v5449_v6, %v5450_v59  ;;  %v9076_v6 = vsel %vm8617_vm1, %v6677_v17, %v5461_v1  ;;  %v5468_v59 = vrot.slane %v8906_v30, 5  ;;  %v6679_v1 = vrot.slane %v5373_v56, 9  ;;  %v9110_v17 = vld [vmem:[#allocation2 + $0x8c] sm:$0x1] }
 0x243   : > { %v6680_v56 = vrot.slane %v5374_v53, 9  ;;  %v9791_v54 = vcombine.low %v9076_v6, %v9092_v43 }
 0x244   : > { %v5470_v30 = vrot.slane %v5468_v59, 4  ;;  %v9098_v16 = vsel %vm8617_vm1, %v6678_v27, %v5468_v59  ;;  %v9107_v25 = vsel %vm8617_vm1, %v6679_v1, %v5475_v63  ;;  %v9112_v59 = vld [vmem:[#allocation2 + $0x98] sm:$0x1]  ;;  %v5492_v1 = vrot.slane %v8995_v5, 5 }
 0x245   : > { %9762 = vst [vmem:[#allocation5_spill] sm:$0xff] %v9107_v25  ;;  %v9129_v51 = vsel %vm8617_vm1, %v6680_v56, %v5482_v62  ;;  %v5499_v56 = vrot.slane %v9110_v17, 5  ;;  %v5503_v62 = vrot.slane %v9037_v12, 5  ;;  %v5506_v60 = vrot.slane %v9112_v59, 5 }
 0x246   : > { %9764 = vst [vmem:[#allocation8_spill] sm:$0xff] %v9129_v51  ;;  %v5381_v51 = vld [vmem:[#allocation2 + $0xc0] sm:$0xe] }
 0x247   : > { %v5505_v2 = vrot.slane %v5503_v62, 4 }
 0x249   : > { %7238 = vmatmul.mubr.msk.bf16.gmra.mrb[16].mxu1 %vm1742_vm10, %v7660_v21  ;;  %v5471_v21 = vrot.slane %v8951_v52, 5  ;;  %v5477_v52 = vrot.slane %v5475_v63, 4  ;;  %v5489_v63 = vrot.slane %v8981_v15, 5  ;;  %v9134_v15 = vld [vmem:[#allocation2 + $0xa0] sm:$0xf] }
 0x24a   : > { %7243 = vmatprep.mubr.msk.bf16.mxu1 %vm1742_vm10, %v8908_v47  ;;  %v5376_v47 = vld [vmem:[#allocation2 + $0x84] sm:$0xe] }
 0x24b   : > { %v9103_v57 = vsel %vm8617_vm1, %v5470_v30, %v5471_v21  ;;  %v9118_v27 = vsel %vm8617_vm1, %v5477_v52, %v5478_v35  ;;  %v5485_v21 = vrot.slane %v8971_v29, 5  ;;  %v6681_v30 = vrot.slane %v5375_v32, 9 }
 0x24c   : > { %9763 = vst [vmem:[#allocation7_spill] sm:$0xff] %v9118_v27  ;;  %v5491_v52 = vrot.slane %v5489_v63, 4  ;;  %v6682_v35 = vrot.slane %v5376_v47, 9  ;;  %v5496_v29 = vrot.slane %v9034_v22, 5  ;;  %v5378_v47 = vld [vmem:[#allocation2 + $0x9c] sm:$0xe]  ;;  %v9792_v38 = vcombine.low %v9098_v16, %v9103_v57 }
 0x24d   : > { %v9138_v32 = vsel %vm8617_vm1, %v5484_v40, %v5485_v21  ;;  %v9142_v53 = vsel %vm8617_vm1, %v6681_v30, %v5489_v63  ;;  %v6683_v30 = vrot.slane %v5377_v7, 9  ;;  %v9168_v21 = vld [vmem:[#allocation2 + $0xb8] sm:$0xf] }
 0x24e   : > { %9765 = vst [vmem:[#allocation6_spill] sm:$0xff] %v9138_v32  ;;  %9766 = vst [vmem:[#allocation9_spill] sm:$0xff] %v9142_v53  ;;  %v9157_v63 = vsel %vm8617_vm1, %v5491_v52, %v5492_v1  ;;  %v5498_v40 = vrot.slane %v5496_v29, 4  ;;  %v6684_v52 = vrot.slane %v5378_v47, 9  ;;  %v9187_v53 = vsel %vm8617_vm1, %v5505_v2, %v5506_v60  ;;  %v5382_v2 = vld [vmem:[#allocation2 + $0xcc] sm:$0xe] }
 0x24f   : > { %9767 = vst [vmem:[#allocation3_spill] sm:$0xff] %v9157_v63  ;;  %v9176_v7 = vsel %vm8617_vm1, %v6683_v30, %v5503_v62  ;;  %9771 = vst [vmem:[#allocation12_spill] sm:$0xff] %v9187_v53  ;;  %v5517_v62 = vrot.slane %v9125_v61, 5  ;;  %v6685_v30 = vrot.slane %v5379_v42, 9  ;;  %v5520_v32 = vrot.slane %v9151_v39, 5 }
 0x250   : > { %v9172_v1 = vsel %vm8617_vm1, %v5498_v40, %v5499_v56  ;;  %9770 = vst [vmem:[#allocation11_spill] sm:$0xff] %v9176_v7  ;;  %v5524_v60 = vrot.slane %v9168_v21, 5  ;;  %v5531_v53 = vrot.slane %v9159_v41, 5  ;;  %v6688_v25 = vrot.slane %v5382_v2, 9 }
 0x251   : > { %7244 = vmatmul.mubr.msk.bf16.vlgmr.msra.gmra.mrb[20].mxu1 %vm1742_vm10, %v8929_v45  ;;  %v9149_v45 = vld [vmem:[#allocation2 + $0xa4] sm:$0x1]  ;;  %9769 = vst [vmem:[#allocation10_spill] sm:$0xff] %v9172_v1  ;;  %v5519_v63 = vrot.slane %v5517_v62, 4  ;;  %v6686_v1 = vrot.slane %v5380_v9, 9  ;;  %v9205_v47 = vsel %vm8617_vm1, %v6685_v30, %v5517_v62  ;;  %v9778_v30 = vshll.u32 %v9004_v14, 16 }
 0x252   : > { %7276 = vmatpush3.bf16.msra.mxu1 %v8848_v44  ;;  %7247 = vmatprep.mubr.msk.bf16.mxu1 %vm1742_vm10, %v8953_v26  ;;  %v9165_v26 = vsel %vm8617_vm1, %v6682_v35, %v5496_v29  ;;  %v5510_v44 = vrot.slane %v9134_v15, 5  ;;  %v9179_v35 = vld [vmem:[#allocation2 + $0xbc] sm:$0x1]  ;;  %v9181_v29 = vld [vmem:[#allocation2 + $0xc8] sm:$0x1]  ;;  %v5513_v56 = vrot.slane %v9149_v45, 5 }
 0x253   : > { %9768 = vst [vmem:[#allocation4_spill] sm:$0xff] %v9165_v26  ;;  %v5527_v42 = vrot.slane %v9179_v35, 5  ;;  %v9221_v62 = vld [vmem:[#allocation2 + $0xd4] sm:$0x1]  ;;  %v5534_v7 = vrot.slane %v9181_v29, 5  ;;  %v9228_v9 = vsel %vm8617_vm1, %v6686_v1, %v5524_v60 }
 0x254   : > { %v5512_v40 = vrot.slane %v5510_v44, 4  ;;  %v9196_v27 = vsel %vm8617_vm1, %v6684_v52, %v5510_v44  ;;  %v9211_v44 = vld [vmem:[#allocation2 + $0xd0] sm:$0xf]  ;;  %v9217_v52 = vsel %vm8617_vm1, %v5519_v63, %v5520_v32  ;;  %9773 = vst [vmem:[#allocation14_spill] sm:$0xff] %v9228_v9  ;;  %v9775_v63 = vshrl.u32 %v9004_v14, 16 }
 0x255   : > { %v9784_v14 = vshrl.u32 %v9037_v12, 16 }
 0x256   : > { %v9201_v26 = vsel %vm8617_vm1, %v5512_v40, %v5513_v56  ;;  %v5526_v56 = vrot.slane %v5524_v60, 4  ;;  %v6687_v40 = vrot.slane %v5381_v51, 9  ;;  %v5538_v51 = vrot.slane %v9211_v44, 5 }
 0x257   : > { %9772 = vst [vmem:[#allocation13_spill] sm:$0xff] %v9201_v26  ;;  %v4904_v26 = vrot.slane %v9775_v63, 4  ;;  %v4894_v60 = vor.u32 %v9046_v10, %v9044_v55  ;;  %v9781_v10 = vshrl.u32 %v9026_v18, 16  ;;  %v9805_v57 = vld [vmem:[#allocation11_spill] sm:$0xff] }
 0x258   : > { %v9232_v32 = vsel %vm8617_vm1, %v5526_v56, %v5527_v42  ;;  %v9242_v2 = vsel %vm8617_vm1, %v6687_v40, %v5531_v53  ;;  %v9254_v56 = vsel %vm8617_vm1, %v6688_v25, %v5538_v51  ;;  %v5540_v63 = vrot.slane %v5538_v51, 4  ;;  %v4670_v51 = vld [vmem:[#allocation2 + $0x9c] sm:$0xf] }
 0x259   : > { %7248 = vmatmul.mubr.msk.bf16.gmra.mrb[24].mxu1 %vm1742_vm10, %v9006_v24  ;;  %v5533_v24 = vrot.slane %v5531_v53, 4  ;;  %9774 = vst [vmem:[#allocation15_spill] sm:$0xff] %v9232_v32  ;;  %9776 = vst [vmem:[#allocation16_spill] sm:$0xff] %v9242_v2  ;;  %v4907_v32 = vrot.slane %v9778_v30, 5  ;;  %v9779_v53 = vshll.u32 %v9034_v22, 16  ;;  %v4928_v9 = vrot.slane %v9781_v10, 4 }
 0x25a   : > { %7251 = vmatprep.mubr.msk.bf16.mxu1 %vm1742_vm10, %v9008_v34  ;;  %v5541_v34 = vrot.slane %v9221_v62, 5  ;;  %v9782_v42 = vshll.u32 %v9026_v18, 16  ;;  %v9783_v25 = vshll.u32 %v9037_v12, 16  ;;  %v4941_v30 = vrot.slane %v9784_v14, 4  ;;  %v9802_v43 = vld [vmem:[#allocation4_spill] sm:$0xff] }
 0x25b   : > { %v9246_v1 = vsel %vm8617_vm1, %v5533_v24, %v5534_v7  ;;  %v9260_v40 = vrot.slane %v9779_v53, 5  ;;  %v9780_v7 = vshrl.u32 %v9034_v22, 16  ;;  %v9785_v22 = vsel %vm7918_vm9, %v8993_v19, %v9013_v31 }
 0x25c   : > { %9777 = vst [vmem:[#allocation17_spill] sm:$0xff] %v9246_v1  ;;  %v4931_v1 = vrot.slane %v9782_v42, 5  ;;  %v9270_v2 = vrot.slane %v9783_v25, 5  ;;  %v9276_v53 = vsel %vm8617_vm1, %v5540_v63, %v5541_v34  ;;  %v9786_v18 = vsel %vm7918_vm9, %v8985_v36, %v8956_v8 }
 0x25d   : > { %v4917_v24 = vrot.slane %v9780_v7, 4  ;;  %v6646_v42 = vcombine.low %v9786_v18, %v9785_v22  ;;  %v4876_v12 = vsel %vm7918_vm9, %v9040_v13, %v9024_v33  ;;  %v9787_v34 = vor.u32 %v9000_v48, %v8997_v50 }
 0x25e   : > { %v6706_v7 = vcombine.low %v9254_v56, %v9276_v53  ;;  %v4866_v8 = vsel %vm7918_vm9, %v9022_v37, %v8975_v11  ;;  %v4895_v36 = vrot.slane %v4894_v60, 4  ;;  %v4908_v19 = vor.u32 %v4907_v32, %v4904_v26  ;;  %v4673_v32 = vld [vmem:[#allocation2 + $0xa8] sm:$0xf] }
 0x25f   : > { %v4885_v63 = vrot.slane %v9787_v34, 4  ;;  %v4918_v31 = vor.u32 %v4917_v24, %v9260_v40  ;;  %v4950_v33 = vshrl.u32 %v4670_v51, 16  ;;  %v4953_v50 = vshll.u32 %v4670_v51, 16 }
 0x260   : > { %v6647_v48 = vcombine.low %v4866_v8, %v4876_v12  ;;  %v9788_v13 = vshll.u32 %v8995_v5, 16  ;;  %v4932_v25 = vor.u32 %v4931_v1, %v4928_v9  ;;  %v4921_v11 = vshll.u32 %v9110_v17, 16 }
 0x261   : > { %7252 = vmatmul.mubr.msk.bf16.gmra.mrb[28].mxu1 %vm1742_vm10, %v9016_v28  ;;  %v4942_v28 = vor.u32 %v4941_v30, %v9270_v2  ;;  %v4890_v14 = vsel %vm7918_vm9, %v4885_v63, %v9044_v55  ;;  %v4959_v37 = vshll.u32 %v9134_v15, 16  ;;  %v4963_v26 = vshrl.u32 %v9134_v15, 16 }
 0x262   : > { %7255 = vmatprep.mubr.msk.bf16.mxu1 %vm1742_vm10, %v6646_v42  ;;  %v4899_v10 = vrot.slane %v9788_v13, 5  ;;  %v4945_v5 = vshll.u32 %v9112_v59, 16  ;;  %v4983_v9 = vshll.u32 %v9125_v61, 16  ;;  %v4987_v1 = vshrl.u32 %v9125_v61, 16  ;;  %v4676_v61 = vld [vmem:[#allocation2 + $0xb4] sm:$0xf] }
 0x263   : > { %v4909_v24 = vrot.slane %v4908_v19, 4  ;;  %v4919_v30 = vrot.slane %v4918_v31, 4  ;;  %v4952_v51 = vrot.slane %v4950_v33, 4  ;;  %v4955_v55 = vrot.slane %v4953_v50, 5 }
 0x264   : > { %v4900_v60 = vsel %vm7918_vm9, %v4895_v36, %v4899_v10  ;;  %v4933_v22 = vrot.slane %v4932_v25, 4  ;;  %v4943_v17 = vrot.slane %v4942_v28, 4  ;;  %v4974_v18 = vshrl.u32 %v4673_v32, 16 }
 0x265   : > { %v4977_v42 = vshll.u32 %v4673_v32, 16  ;;  %v6648_v12 = vcombine.low %v4890_v14, %v4900_v60  ;;  %v4923_v15 = vrot.slane %v4921_v11, 5  ;;  %v9319_v34 = vrot.slane %v4959_v37, 5  ;;  %v4679_v37 = vld [vmem:[#allocation2 + $0xc0] sm:$0xf] }
 0x266   : > { %v4965_v63 = vrot.slane %v4963_v26, 4  ;;  %v4947_v59 = vrot.slane %v4945_v5, 5  ;;  %v9322_v8 = vrot.slane %v4983_v9, 5  ;;  %v4989_v36 = vrot.slane %v4987_v1, 4 }
 0x267   : > { %v4914_v19 = vsel %vm7918_vm9, %v4909_v24, %v9260_v40  ;;  %v4924_v31 = vsel %vm7918_vm9, %v4919_v30, %v4923_v15  ;;  %v4956_v33 = vor.u32 %v4955_v55, %v4952_v51  ;;  %v4969_v50 = vshll.u32 %v9149_v45, 16 }
 0x268   : > { %v4948_v13 = vsel %vm7918_vm9, %v4943_v17, %v4947_v59  ;;  %v4976_v10 = vrot.slane %v4974_v18, 4  ;;  %v4979_v25 = vrot.slane %v4977_v42, 5  ;;  %v4966_v28 = vor.u32 %v4965_v63, %v9319_v34 }
 0x269   : > { %7256 = vmatmul.mubr.msk.bf16.gmra.mrb[0].mxu1 %vm1742_vm10, %v6647_v48  ;;  %v4938_v48 = vsel %vm7918_vm9, %v4933_v22, %v9270_v2  ;;  %v4998_v14 = vshrl.u32 %v4676_v61, 16  ;;  %v5007_v40 = vshll.u32 %v9168_v21, 16  ;;  %v5011_v11 = vshrl.u32 %v9168_v21, 16  ;;  %v4682_v22 = vld [vmem:[#allocation2 + $0xcc] sm:$0xf] }
 0x26a   : > { %7259 = vmatprep.mubr.msk.bf16.mxu1 %vm1742_vm10, %v6648_v12  ;;  %v4990_v26 = vor.u32 %v4989_v36, %v9322_v8  ;;  %v5001_v45 = vshll.u32 %v4676_v61, 16  ;;  %v5031_v32 = vshll.u32 %v9159_v41, 16  ;;  %v5035_v2 = vshrl.u32 %v9159_v41, 16 }
 0x26b   : > { %v6649_v60 = vcombine.low %v4914_v19, %v4924_v31  ;;  %v6650_v5 = vcombine.low %v4938_v48, %v4948_v13  ;;  %v4957_v9 = vrot.slane %v4956_v33, 4  ;;  %v4971_v1 = vrot.slane %v4969_v50, 5 }
 0x26c   : > { %v4980_v24 = vor.u32 %v4979_v25, %v4976_v10  ;;  %v4993_v30 = vshll.u32 %v9151_v39, 16  ;;  %v5022_v51 = vshrl.u32 %v4679_v37, 16  ;;  %v5025_v55 = vshll.u32 %v4679_v37, 16 }
 0x26d   : > { %v4967_v17 = vrot.slane %v4966_v28, 4  ;;  %v5000_v21 = vrot.slane %v4998_v14, 4  ;;  %v5009_v18 = vrot.slane %v5007_v40, 5  ;;  %v5013_v42 = vrot.slane %v5011_v11, 4 }
 0x26e   : > { %v4991_v12 = vrot.slane %v4990_v26, 4  ;;  %v5003_v15 = vrot.slane %v5001_v45, 5  ;;  %v5033_v63 = vrot.slane %v5031_v32, 5  ;;  %v5037_v41 = vrot.slane %v5035_v2, 4 }
 0x26f   : > { %v5046_v59 = vshrl.u32 %v4682_v22, 16  ;;  %v5049_v36 = vshll.u32 %v4682_v22, 16  ;;  %v5055_v61 = vshll.u32 %v9211_v44, 16  ;;  %v5059_v39 = vshrl.u32 %v9211_v44, 16 }
 0x270   : > { %v4981_v19 = vrot.slane %v4980_v24, 4  ;;  %v4995_v31 = vrot.slane %v4993_v30, 5  ;;  %v5024_v33 = vrot.slane %v5022_v51, 4  ;;  %v5027_v50 = vrot.slane %v5025_v55, 5 }
 0x271   : > { %7260 = vmatmul.mubr.msk.bf16.gmra.mrb[4].mxu1 %vm1742_vm10, %v6649_v60  ;;  %v4962_v48 = vsel %vm7918_vm9, %v4957_v9, %v9319_v34  ;;  %v4972_v13 = vsel %vm7918_vm9, %v4967_v17, %v4971_v1  ;;  %v5014_v10 = vor.u32 %v5013_v42, %v5009_v18  ;;  %v5004_v28 = vor.u32 %v5003_v15, %v5000_v21  ;;  %v7662_v60 = vld [vmem:[%s9711_s5] sm:$0xff]  }
 0x272   : > { %7263 = vmatprep.mubr.msk.bf16.mxu1 %vm1742_vm10, %v6650_v5  ;;  %v4996_v25 = vsel %vm7918_vm9, %v4991_v12, %v4995_v31  ;;  %v5017_v14 = vshll.u32 %v9179_v35, 16  ;;  %v5038_v40 = vor.u32 %v5037_v41, %v5033_v63  ;;  %v5048_v44 = vrot.slane %v5046_v59, 4  ;;  %7309 = vmatprep.subr.bf16.mxu0 %v7662_v60 }
 0x273   : > { %v5051_v11 = vrot.slane %v5049_v36, 5  ;;  %v5057_v37 = vrot.slane %v5055_v61, 5  ;;  %v5061_v26 = vrot.slane %v5059_v39, 4  ;;  %v6651_v45 = vcombine.low %v4962_v48, %v4972_v13  ;;  %7310 = vmatpush3.bf16.msra.mxu0 %v7662_v60  ;;  %v9808_v60 = vld [vmem:[#allocation13_spill] sm:$0xff] }
 0x274   : > { %v4986_v34 = vsel %vm7918_vm9, %v4981_v19, %v9322_v8  ;;  %v5028_v32 = vor.u32 %v5027_v50, %v5024_v33  ;;  %v5041_v2 = vshll.u32 %v9181_v29, 16  ;;  %v5015_v9 = vrot.slane %v5014_v10, 4 }
 0x275   : > { %v6652_v5 = vcombine.low %v4986_v34, %v4996_v25  ;;  %v5019_v35 = vrot.slane %v5017_v14, 5  ;;  %v5039_v1 = vrot.slane %v5038_v40, 4  ;;  %v5005_v24 = vrot.slane %v5004_v28, 4  ;;  %v5368_v25 = vld [vmem:[#allocation2 + $0x24] sm:$0xe]  ;;  %v9803_v34 = vld [vmem:[#allocation10_spill] sm:$0xff] }
 0x276   : > { %v5052_v30 = vor.u32 %v5051_v11, %v5048_v44  ;;  %v5062_v51 = vor.u32 %v5061_v26, %v5057_v37  ;;  %v5065_v8 = vshll.u32 %v9221_v62, 16  ;;  %v5029_v29 = vrot.slane %v5028_v32, 4  ;;  %v9793_v11 = vld [vmem:[#allocation5_spill] sm:$0xff]  ;;  %v9797_v26 = vld [vmem:[#allocation6_spill] sm:$0xff]  ;;  %v9806_v32 = vld [vmem:[#allocation12_spill] sm:$0xff] }
 0x277   : > { %v5043_v55 = vrot.slane %v5041_v2, 5  ;;  %v5020_v22 = vsel %vm7918_vm9, %v5015_v9, %v5019_v35  ;;  %v5433_v21 = vrot.slane %v8856_v4, 5  ;;  %v5010_v42 = vsel %vm7918_vm9, %v5005_v24, %v5009_v18  ;;  %v5367_v18 = vld [vmem:[#allocation2 + $0x18] sm:$0xe] }
 0x278   : > { %v5053_v12 = vrot.slane %v5052_v30, 4  ;;  %v5063_v15 = vrot.slane %v5062_v51, 4  ;;  %v5067_v41 = vrot.slane %v5065_v8, 5  ;;  %v6653_v59 = vcombine.low %v5010_v42, %v5020_v22  ;;  %v9811_v51 = vld [vmem:[#allocation14_spill] sm:$0xff]  ;;  %v9812_v8 = vld [vmem:[#allocation15_spill] sm:$0xff] }
 0x279   : > { %7264 = vmatmul.mubr.msk.bf16.gmra.mrb[8].mxu1 %vm1742_vm10, %v6651_v45  ;;  %v5044_v17 = vsel %vm7918_vm9, %v5039_v1, %v5043_v55  ;;  %v5034_v62 = vsel %vm7918_vm9, %v5029_v29, %v5033_v63  ;;  %v5435_v61 = vrot.slane %v5433_v21, 4  ;;  %v5436_v19 = vrot.slane %v8868_v0, 5  ;;  %v9800_v45 = vld [vmem:[#allocation3_spill] sm:$0xff]  ;;  %v9815_v55 = vld [vmem:[#allocation17_spill] sm:$0xff] }
 0x27a   : > { %7267 = vmatprep.mubr.msk.bf16.mxu1 %vm1742_vm10, %v6652_v5  ;;  %v6654_v36 = vcombine.low %v5034_v62, %v5044_v17  ;;  %v5058_v39 = vsel %vm7918_vm9, %v5053_v12, %v5057_v37  ;;  %v5068_v4 = vsel %vm7918_vm9, %v5063_v15, %v5067_v41  ;;  %v5440_v31 = vrot.slane %v8864_v58, 5  ;;  %v9794_v37 = vld [vmem:[#allocation7_spill] sm:$0xff] }
 0x27b   : > { %v6655_v33 = vcombine.low %v5058_v39, %v5068_v4  ;;  %v6673_v50 = vrot.slane %v5367_v18, 9  ;;  %v5437_v63 = vsel %vm8617_vm1, %v5435_v61, %v5436_v19  ;;  %v6674_v0 = vrot.slane %v5368_v25, 9 }
 0x27c   : > { %v5442_v10 = vrot.slane %v5440_v31, 4  ;;  %v9789_v40 = vcombine.low %v9057_v23, %v9061_v20  ;;  %v9790_v44 = vcombine.low %v9072_v3, %v9084_v49  ;;  %v9795_v23 = vcombine.low %v9793_v11, %v9794_v37  ;;  %v9796_v20 = vld [vmem:[#allocation8_spill] sm:$0xff]  ;;  %v9799_v49 = vld [vmem:[#allocation9_spill] sm:$0xff] }
 0x27d   : > { %v5434_v48 = vsel %vm8617_vm1, %v6673_v50, %v5433_v21  ;;  %v5441_v28 = vsel %vm8617_vm1, %v6674_v0, %v5440_v31  ;;  %v9798_v3 = vcombine.low %v9796_v20, %v9797_v26  ;;  %v9801_v6 = vcombine.low %v9799_v49, %v9800_v45 }
 0x27e   : > { %v6691_v13 = vcombine.low %v5434_v48, %v5437_v63  ;;  %v5444_v58 = vsel %vm8617_vm1, %v5442_v10, %v5443_v46  ;;  %v9804_v16 = vcombine.low %v9802_v43, %v9803_v34  ;;  %v9807_v2 = vcombine.low %v9805_v57, %v9806_v32 }
 0x27f   : > { %v6692_v14 = vcombine.low %v5441_v28, %v5444_v58  ;;  %v9809_v5 = vcombine.low %v9196_v27, %v9808_v60  ;;  %v9810_v9 = vcombine.low %v9205_v47, %v9217_v52  ;;  %v9813_v29 = vcombine.low %v9811_v51, %v9812_v8  ;;  %v9814_v27 = vld [vmem:[#allocation16_spill] sm:$0xff] }
 0x280   : > { %v9816_v22 = vcombine.low %v9814_v27, %v9815_v55  ;;  %v9493_v58 = vld [vmem:[%s9710_s4] ss:$0 sm:$0xff] }
 0x281   : > { %7268 = vmatmul.mubr.msk.bf16.gmra.mrb[12].mxu1 %vm1742_vm10, %v6653_v59 }
 0x282   : > { %7271 = vmatprep.mubr.msk.bf16.mxu1 %vm1742_vm10, %v6654_v36 }
 0x289   : > { %7272 = vmatmul.mubr.msk.bf16.gmra.mrb[16].mxu1 %vm1742_vm10, %v6655_v33 }
 0x28a   : > { %7277 = vmatprep.mubr.msk.bf16.mxu1 %vm1742_vm10, %v6691_v13 }
 0x291   : > { %7278 = vmatmul.mubr.msk.bf16.vlgmr.msra.gmra.mrb[20].mxu1 %vm1742_vm10, %v6692_v14 }
 0x292   : > { %7281 = vmatprep.mubr.msk.bf16.mxu1 %vm1742_vm10, %v9789_v40 }
 0x299   : > { %7282 = vmatmul.mubr.msk.bf16.gmra.mrb[24].mxu1 %vm1742_vm10, %v9790_v44 }
 0x29a   : > { %7285 = vmatprep.mubr.msk.bf16.mxu1 %vm1742_vm10, %v9791_v54 }
 0x2a1   : > { %7286 = vmatmul.mubr.msk.bf16.gmra.mrb[28].mxu1 %vm1742_vm10, %v9792_v38 }
 0x2a2   : > { %7289 = vmatprep.mubr.msk.bf16.mxu1 %vm1742_vm10, %v9795_v23 }
 0x2a9   : > { %7290 = vmatmul.mubr.msk.bf16.gmra.mrb[0].mxu1 %vm1742_vm10, %v9798_v3 }
 0x2aa   : > { %7293 = vmatprep.mubr.msk.bf16.mxu1 %vm1742_vm10, %v9801_v6 }
 0x2b1   : > { %7294 = vmatmul.mubr.msk.bf16.gmra.mrb[4].mxu1 %vm1742_vm10, %v9804_v16 }
 0x2b2   : > { %7297 = vmatprep.mubr.msk.bf16.mxu1 %vm1742_vm10, %v9807_v2 }
 0x2b9   : > { %7298 = vmatmul.mubr.msk.bf16.gmra.mrb[8].mxu1 %vm1742_vm10, %v9809_v5 }
 0x2ba   : > { %7301 = vmatprep.mubr.msk.bf16.mxu1 %vm1742_vm10, %v9810_v9 }
 0x2bb   : > { %v9438_v35 = vpop.f32.mrb[44].mxu0 }
 0x2bc   : > { %v9440_v1 = vpop.f32.mrb[45].mxu0 }
 0x2bd   : > { %v9442_v24 = vpop.f32.mrb[46].mxu0 }
 0x2be   : > { %v9444_v30 = vpop.f32.mrb[47].mxu0 }
 0x2c1   : > { %7302 = vmatmul.mubr.msk.bf16.gmra.mrb[12].mxu1 %vm1742_vm10, %v9813_v29 }
 0x2c2   : > { %7305 = vmatprep.mubr.msk.bf16.mxu1 %vm1742_vm10, %v9816_v22 }
 0x2c3   : > { %v9454_v47 = vpop.f32.mrb[48].mxu0 }
 0x2c4   : > { %v9456_v52 = vpop.f32.mrb[49].mxu0 }
 0x2c5   : > { %v9458_v17 = vpop.f32.mrb[50].mxu0 }
 0x2c6   : > { %v9460_v21 = vpop.f32.mrb[51].mxu0 }
 0x2c9   : > { %7306 = vmatmul.mubr.msk.bf16.gmra.mrb[16].mxu1 %vm1742_vm10, %v6706_v7 }
 0x2cb   : > { %v9466_v42 = vpop.f32.mrb[52].mxu0 }
 0x2cc   : > { %v9468_v12 = vpop.f32.mrb[53].mxu0 }
 0x2cd   : > { %v9470_v15 = vpop.f32.mrb[54].mxu0 }
 0x2ce   : > { %v9472_v41 = vpop.f32.mrb[55].mxu0 }
 0x2d3   : > { %v9474_v59 = vpop.f32.mrb[56].mxu0 }
 0x2d4   : > { %v9476_v62 = vpop.f32.mrb[57].mxu0 }
 0x2d5   : > { %v9478_v36 = vpop.f32.mrb[58].mxu0 }
 0x2d6   : > { %v9480_v61 = vpop.f32.mrb[59].mxu0 }
 0x2db   : > { %v9482_v39 = vpop.f32.mrb[60].mxu0 }
 0x2dc   : > { %v9484_v56 = vpop.f32.mrb[61].mxu0 }
 0x2dd   : > { %v9486_v53 = vpop.f32.mrb[62].mxu0 }
 0x2de   : > { %v9488_v7 = vpop.f32.mrb[63].mxu0 }
 0x2e3   : > { %v7109_v4 = vpop.f32.mrb[32].mxu0 }
 0x2e4   : > { %v2911_v18 = vpop.f32.mrb[33].mxu0 }
 0x2e5   : > { %v7110_v19 = vpop.f32.mrb[34].mxu0 }
 0x2e6   : > { %v2914_v31 = vpop.f32.mrb[35].mxu0 }
 0x2eb   : > { %v7113_v33 = vpop.f32.mrb[36].mxu0 }
 0x2ec   : > { %v2927_v50 = vpop.f32.mrb[37].mxu0 }
 0x2ed   : > { %v7114_v63 = vpop.f32.mrb[38].mxu0 }
 0x2ee   : > { %v2930_v48 = vpop.f32.mrb[39].mxu0 }
 0x2f3   : > { %v7117_v13 = vpop.f32.mrb[40].mxu0 }
 0x2f4   : > { %v2943_v10 = vpop.f32.mrb[41].mxu0 }
 0x2f5   : > { %v7118_v25 = vpop.f32.mrb[42].mxu0 }
 0x2f6   : > { %v2946_v46 = vpop.f32.mrb[43].mxu0 }
 0x364   : > { %v7279_v0 = vpop.f32.mrb[20].mxu1 }
 0x365   : > { %v7345_v28 = vadd.f32 %v7279_v0, %v7109_v4  ;;  %v5682_v14 = vpop.f32.mrb[21].mxu1 }
 0x366   : > { %v7346_v40 = vadd.f32 %v5682_v14, %v2911_v18  ;;  %v7280_v44 = vpop.f32.mrb[22].mxu1 }
 0x367   : > { %v5850_v54 = vadd.f32 %v7345_v28, %v9493_v58  ;;  %v7347_v38 = vadd.f32 %v7280_v44, %v7110_v19  ;;  %v5685_v11 = vpop.f32.mrb[23].mxu1 }
 0x368   : > { %v5848_v37 = vadd.f32 %v7346_v40, %v9493_v58  ;;  %v7348_v23 = vadd.f32 %v5685_v11, %v2914_v31 }
 0x369   : > { %v5851_v20 = vadd.f32 %v7347_v38, %v9493_v58  ;;  %v5882_v3 = vmax.f32 %v5850_v54, 0.0 }
 0x36a   : > { %v5849_v26 = vadd.f32 %v7348_v23, %v9493_v58  ;;  %v5880_v45 = vmax.f32 %v5848_v37, 0.0 }
 0x36b   : > { %v5883_v49 = vmax.f32 %v5851_v20, 0.0 }
 0x36c   : > { %v5881_v6 = vmax.f32 %v5849_v26, 0.0  ;;  %v7283_v43 = vpop.f32.mrb[24].mxu1 }
 0x36d   : > { %v5913_v34 = vpack.c.bf16 %v5883_v49, %v5882_v3  ;;  %v7349_v16 = vadd.f32 %v7283_v43, %v7113_v33  ;;  %v5698_v57 = vpop.f32.mrb[25].mxu1 }
 0x36e   : > { %v5912_v32 = vpack.c.bf16 %v5881_v6, %v5880_v45  ;;  %v7350_v2 = vadd.f32 %v5698_v57, %v2927_v50  ;;  %v7284_v60 = vpop.f32.mrb[26].mxu1 }
 0x36f   : > { %v5854_v5 = vadd.f32 %v7349_v16, %v9493_v58  ;;  %v7351_v9 = vadd.f32 %v7284_v60, %v7114_v63  ;;  %v5701_v51 = vpop.f32.mrb[27].mxu1 }
 0x370   : > { %v5852_v8 = vadd.f32 %v7350_v2, %v9493_v58  ;;  %v7352_v29 = vadd.f32 %v5701_v51, %v2930_v48  ;;  %7311 = vmatprep.mubr.msk.bf16.mxu0 %vm1742_vm10, %v5912_v32 }
 0x371   : > { %v5855_v27 = vadd.f32 %v7351_v9, %v9493_v58  ;;  %7312 = vmatmul.mubr.msk.bf16.vlgmr.msra.gmra.mrb[64].mxu0 %vm1742_vm10, %v5913_v34  ;;  %v5886_v22 = vmax.f32 %v5854_v5, 0.0 }
 0x372   : > { %v5853_v55 = vadd.f32 %v7352_v29, %v9493_v58  ;;  %v5884_v18 = vmax.f32 %v5852_v8, 0.0 }
 0x373   : > { %v5887_v4 = vmax.f32 %v5855_v27, 0.0 }
 0x374   : > { %v5885_v19 = vmax.f32 %v5853_v55, 0.0  ;;  %v7287_v31 = vpop.f32.mrb[28].mxu1 }
 0x375   : > { %v5915_v33 = vpack.c.bf16 %v5887_v4, %v5886_v22  ;;  %v7353_v50 = vadd.f32 %v7287_v31, %v7117_v13  ;;  %v5714_v63 = vpop.f32.mrb[29].mxu1 }
 0x376   : > { %v5914_v0 = vpack.c.bf16 %v5885_v19, %v5884_v18  ;;  %v7354_v28 = vadd.f32 %v5714_v63, %v2943_v10  ;;  %v7288_v14 = vpop.f32.mrb[30].mxu1 }
 0x377   : > { %v5858_v48 = vadd.f32 %v7353_v50, %v9493_v58  ;;  %v7355_v40 = vadd.f32 %v7288_v14, %v7118_v25  ;;  %v5717_v44 = vpop.f32.mrb[31].mxu1 }
 0x378   : > { %v5856_v54 = vadd.f32 %v7354_v28, %v9493_v58  ;;  %v7356_v38 = vadd.f32 %v5717_v44, %v2946_v46  ;;  %7315 = vmatprep.mubr.msk.bf16.mxu0 %vm1742_vm10, %v5914_v0 }
 0x379   : > { %v5859_v11 = vadd.f32 %v7355_v40, %v9493_v58  ;;  %7316 = vmatmul.mubr.msk.bf16.gmra.mrb[68].mxu0 %vm1742_vm10, %v5915_v33  ;;  %v5890_v13 = vmax.f32 %v5858_v48, 0.0 }
 0x37a   : > { %v5857_v37 = vadd.f32 %v7356_v38, %v9493_v58  ;;  %v5888_v20 = vmax.f32 %v5856_v54, 0.0 }
 0x37b   : > { %v5891_v23 = vmax.f32 %v5859_v11, 0.0 }
 0x37c   : > { %v5889_v10 = vmax.f32 %v5857_v37, 0.0  ;;  %v7291_v26 = vpop.f32.mrb[0].mxu1 }
 0x37d   : > { %v5917_v3 = vpack.c.bf16 %v5891_v23, %v5890_v13  ;;  %v7357_v25 = vadd.f32 %v7291_v26, %v9438_v35  ;;  %v5730_v49 = vpop.f32.mrb[1].mxu1 }
 0x37e   : > { %v5916_v45 = vpack.c.bf16 %v5889_v10, %v5888_v20  ;;  %v7358_v46 = vadd.f32 %v5730_v49, %v9440_v1  ;;  %v7292_v6 = vpop.f32.mrb[2].mxu1 }
 0x37f   : > { %v5862_v43 = vadd.f32 %v7357_v25, %v9493_v58  ;;  %v7359_v34 = vadd.f32 %v7292_v6, %v9442_v24  ;;  %v5733_v16 = vpop.f32.mrb[3].mxu1 }
 0x380   : > { %v5860_v57 = vadd.f32 %v7358_v46, %v9493_v58  ;;  %v7360_v32 = vadd.f32 %v5733_v16, %v9444_v30  ;;  %7319 = vmatprep.mubr.msk.bf16.mxu0 %vm1742_vm10, %v5916_v45 }
 0x381   : > { %v5863_v2 = vadd.f32 %v7359_v34, %v9493_v58  ;;  %7320 = vmatmul.mubr.msk.bf16.gmra.mrb[72].mxu0 %vm1742_vm10, %v5917_v3  ;;  %v5894_v60 = vmax.f32 %v5862_v43, 0.0 }
 0x382   : > { %v5861_v35 = vadd.f32 %v7360_v32, %v9493_v58  ;;  %v5892_v5 = vmax.f32 %v5860_v57, 0.0 }
 0x383   : > { %v5895_v1 = vmax.f32 %v5863_v2, 0.0 }
 0x384   : > { %v5893_v9 = vmax.f32 %v5861_v35, 0.0  ;;  %v7295_v51 = vpop.f32.mrb[4].mxu1 }
 0x385   : > { %v5919_v8 = vpack.c.bf16 %v5895_v1, %v5894_v60  ;;  %v7361_v24 = vadd.f32 %v7295_v51, %v9454_v47  ;;  %v5746_v29 = vpop.f32.mrb[5].mxu1 }
 0x386   : > { %v5918_v27 = vpack.c.bf16 %v5893_v9, %v5892_v5  ;;  %v7362_v30 = vadd.f32 %v5746_v29, %v9456_v52  ;;  %v7296_v55 = vpop.f32.mrb[6].mxu1 }
 0x387   : > { %v5866_v22 = vadd.f32 %v7361_v24, %v9493_v58  ;;  %v7363_v4 = vadd.f32 %v7296_v55, %v9458_v17  ;;  %v5749_v18 = vpop.f32.mrb[7].mxu1 }
 0x388   : > { %v5864_v19 = vadd.f32 %v7362_v30, %v9493_v58  ;;  %v7364_v31 = vadd.f32 %v5749_v18, %v9460_v21  ;;  %7323 = vmatprep.mubr.msk.bf16.mxu0 %vm1742_vm10, %v5918_v27 }
 0x389   : > { %v5867_v33 = vadd.f32 %v7363_v4, %v9493_v58  ;;  %7324 = vmatmul.mubr.msk.bf16.gmra.mrb[76].mxu0 %vm1742_vm10, %v5919_v8  ;;  %v5898_v50 = vmax.f32 %v5866_v22, 0.0 }
 0x38a   : > { %v5865_v47 = vadd.f32 %v7364_v31, %v9493_v58  ;;  %v5896_v63 = vmax.f32 %v5864_v19, 0.0 }
 0x38b   : > { %v5899_v52 = vmax.f32 %v5867_v33, 0.0 }
 0x38c   : > { %v5897_v0 = vmax.f32 %v5865_v47, 0.0  ;;  %v7299_v28 = vpop.f32.mrb[8].mxu1 }
 0x38d   : > { %v5921_v14 = vpack.c.bf16 %v5899_v52, %v5898_v50  ;;  %v7365_v17 = vadd.f32 %v7299_v28, %v9466_v42  ;;  %v5762_v48 = vpop.f32.mrb[9].mxu1 }
 0x38e   : > { %v5920_v40 = vpack.c.bf16 %v5897_v0, %v5896_v63  ;;  %v7366_v21 = vadd.f32 %v5762_v48, %v9468_v12  ;;  %v7300_v44 = vpop.f32.mrb[10].mxu1  ;;  %v7704_v63 = vld [vmem:[%s7807_s10 + $0x10] sm:$0xff] }
 0x38f   : > { %v5870_v54 = vadd.f32 %v7365_v17, %v9493_v58  ;;  %v7367_v38 = vadd.f32 %v7300_v44, %v9470_v15  ;;  %v5765_v11 = vpop.f32.mrb[11].mxu1  ;;  %v7705_v17 = vld [vmem:[%s7807_s10] sm:$0xff]  ;;  %v7706_v44 = vld [vmem:[%s7807_s10 + $0x18] sm:$0xff] }
 0x390   : > { %v5868_v37 = vadd.f32 %v7366_v21, %v9493_v58  ;;  %v7368_v13 = vadd.f32 %v5765_v11, %v9472_v41  ;;  %7327 = vmatprep.mubr.msk.bf16.mxu0 %vm1742_vm10, %v5920_v40  ;;  %v7707_v11 = vld [vmem:[%s7807_s10 + $0x8] sm:$0xff] }
 0x391   : > { %v5871_v23 = vadd.f32 %v7367_v38, %v9493_v58  ;;  %7328 = vmatmul.mubr.msk.bf16.gmra.mrb[80].mxu0 %vm1742_vm10, %v5921_v14  ;;  %v5902_v20 = vmax.f32 %v5870_v54, 0.0 }
 0x392   : > { %v5869_v42 = vadd.f32 %v7368_v13, %v9493_v58  ;;  %v5900_v10 = vmax.f32 %v5868_v37, 0.0 }
 0x393   : > { %v5903_v12 = vmax.f32 %v5871_v23, 0.0 }
 0x394   : > { %v5901_v26 = vmax.f32 %v5869_v42, 0.0  ;;  %v7303_v3 = vpop.f32.mrb[12].mxu1 }
 0x395   : > { %v5923_v25 = vpack.c.bf16 %v5903_v12, %v5902_v20  ;;  %v7369_v15 = vadd.f32 %v7303_v3, %v9474_v59  ;;  %v5778_v49 = vpop.f32.mrb[13].mxu1  ;;  %v7708_v3 = vld [vmem:[%s7807_s10 + $0x30] sm:$0xff] }
 0x396   : > { %v5922_v45 = vpack.c.bf16 %v5901_v26, %v5900_v10  ;;  %v7370_v41 = vadd.f32 %v5778_v49, %v9476_v62  ;;  %v7304_v46 = vpop.f32.mrb[14].mxu1 }
 0x397   : > { %v5874_v6 = vadd.f32 %v7369_v15, %v9493_v58  ;;  %v7371_v43 = vadd.f32 %v7304_v46, %v9478_v36  ;;  %v5781_v34 = vpop.f32.mrb[15].mxu1 }
 0x398   : > { %v5872_v16 = vadd.f32 %v7370_v41, %v9493_v58  ;;  %v7372_v57 = vadd.f32 %v5781_v34, %v9480_v61  ;;  %7331 = vmatprep.mubr.msk.bf16.mxu0 %vm1742_vm10, %v5922_v45  ;;  %v7709_v45 = vld [vmem:[%s7807_s10 + $0x20] sm:$0xff] }
 0x399   : > { %v5875_v32 = vadd.f32 %v7371_v43, %v9493_v58  ;;  %7332 = vmatmul.mubr.msk.bf16.gmra.mrb[84].mxu0 %vm1742_vm10, %v5923_v25  ;;  %v5906_v2 = vmax.f32 %v5874_v6, 0.0  ;;  %v7710_v43 = vld [vmem:[%s7807_s10 + $0x38] sm:$0xff] }
 0x39a   : > { %v5873_v59 = vadd.f32 %v7372_v57, %v9493_v58  ;;  %v5904_v35 = vmax.f32 %v5872_v16, 0.0  ;;  %v7711_v57 = vld [vmem:[%s7807_s10 + $0x28] sm:$0xff] }
 0x39b   : > { %v5907_v62 = vmax.f32 %v5875_v32, 0.0 }
 0x39c   : > { %v5905_v60 = vmax.f32 %v5873_v59, 0.0  ;;  %v7307_v1 = vpop.f32.mrb[16].mxu1 }
 0x39d   : > { %v5925_v5 = vpack.c.bf16 %v5907_v62, %v5906_v2  ;;  %v7373_v36 = vadd.f32 %v7307_v1, %v9482_v39  ;;  %v5794_v9 = vpop.f32.mrb[17].mxu1 }
 0x39e   : > { %v5924_v51 = vpack.c.bf16 %v5905_v60, %v5904_v35  ;;  %v7374_v61 = vadd.f32 %v5794_v9, %v9484_v56  ;;  %v7308_v8 = vpop.f32.mrb[18].mxu1 }
 0x39f   : > { %v5878_v24 = vadd.f32 %v7373_v36, %v9493_v58  ;;  %v7375_v29 = vadd.f32 %v7308_v8, %v9486_v53  ;;  %v5797_v27 = vpop.f32.mrb[19].mxu1  ;;  %v7712_v36 = vld [vmem:[%s7807_s10 + $0x50] sm:$0xff]  ;;  %v7713_v8 = vld [vmem:[%s7807_s10 + $0x40] sm:$0xff] }
 0x3a0   : > { %v5876_v30 = vadd.f32 %v7374_v61, %v9493_v58  ;;  %v7376_v55 = vadd.f32 %v5797_v27, %v9488_v7  ;;  %7335 = vmatprep.mubr.msk.bf16.mxu0 %vm1742_vm10, %v5924_v51  ;;  %v9566_v7 = vld [vmem:[%s9712_s6] ss:$0 sm:$0xff] }
 0x3a1   : > { %v5879_v22 = vadd.f32 %v7375_v29, %v9493_v58  ;;  %7336 = vmatmul.mubr.msk.bf16.gmra.mrb[88].mxu0 %vm1742_vm10, %v5925_v5  ;;  %v5910_v56 = vmax.f32 %v5878_v24, 0.0 }
 0x3a2   : > { %v5877_v39 = vadd.f32 %v7376_v55, %v9493_v58  ;;  %v5908_v18 = vmax.f32 %v5876_v30, 0.0  ;;  %v7714_v30 = vld [vmem:[%s7807_s10 + $0x58] sm:$0xff] }
 0x3a3   : > { %v5911_v4 = vmax.f32 %v5879_v22, 0.0 }
 0x3a4   : > { %v5909_v19 = vmax.f32 %v5877_v39, 0.0  ;;  %v7715_v39 = vld [vmem:[%s7807_s10 + $0x48] sm:$0xff] }
 0x3a5   : > { %v5927_v53 = vpack.c.bf16 %v5911_v4, %v5910_v56 }
 0x3a6   : > { %v5926_v31 = vpack.c.bf16 %v5909_v19, %v5908_v18 }
 0x3a8   : > { %7339 = vmatprep.mubr.msk.bf16.mxu0 %vm1742_vm10, %v5926_v31 }
 0x3a9   : > { %7340 = vmatmul.mubr.msk.bf16.gmra.mrb[92].mxu0 %vm1742_vm10, %v5927_v53 }
 0x444   : > { %v7313_v33 = vpop.f32.mrb[64].mxu0 }
 0x445   : > { %v6034_v58 = vadd.f32 %v7313_v33, %v9566_v7  ;;  %v6025_v47 = vpop.f32.mrb[65].mxu0 }
 0x446   : > { %v6026_v50 = vadd.f32 %v9566_v7, %v6025_v47  ;;  %v7314_v52 = vpop.f32.mrb[66].mxu0  ;;  %v7716_v47 = vld [vmem:[%s7807_s10 + $0x70] sm:$0xff] }
 0x447   : > { %v6154_v0 = vadd.f32 %v7704_v63, %v6034_v58  ;;  %v6037_v28 = vadd.f32 %v7314_v52, %v9566_v7  ;;  %v6028_v14 = vpop.f32.mrb[67].mxu0 }
 0x448   : > { %v6152_v48 = vadd.f32 %v7705_v17, %v6026_v50  ;;  %v6029_v40 = vadd.f32 %v9566_v7, %v6028_v14 }
 0x449   : > { %v6186_v21 = vmax.f32 %v6154_v0, 0.0  ;;  %v6155_v54 = vadd.f32 %v7706_v44, %v6037_v28  ;;  %v7717_v0 = vld [vmem:[%s7807_s10 + $0x60] sm:$0xff]  ;;  %v7719_v44 = vld [vmem:[%s7807_s10 + $0x68] sm:$0xff] }
 0x44a   : > { %v6184_v38 = vmax.f32 %v6152_v48, 0.0  ;;  %v6153_v37 = vadd.f32 %v7707_v11, %v6029_v40  ;;  %v7718_v48 = vld [vmem:[%s7807_s10 + $0x78] sm:$0xff] }
 0x44b   : > { %6218 = vst.msk [vmem:[%s9577_s28 + $0x10] sm:$0xff] %vm351_vm0, %v6186_v21  ;;  %v6187_v13 = vmax.f32 %v6155_v54, 0.0 }
 0x44c   : > { %6216 = vst.msk [vmem:[%s9577_s28] sm:$0xff] %vm351_vm0, %v6184_v38  ;;  %v6185_v23 = vmax.f32 %v6153_v37, 0.0  ;;  %v7317_v42 = vpop.f32.mrb[68].mxu0 }
 0x44d   : > { %6219 = vst.msk [vmem:[%s9577_s28 + $0x18] sm:$0xff] %vm351_vm0, %v6187_v13  ;;  %v6050_v20 = vadd.f32 %v7317_v42, %v9566_v7  ;;  %v6041_v12 = vpop.f32.mrb[69].mxu0 }
 0x44e   : > { %6217 = vst.msk [vmem:[%s9577_s28 + $0x8] sm:$0xff] %vm351_vm0, %v6185_v23  ;;  %v6042_v10 = vadd.f32 %v9566_v7, %v6041_v12  ;;  %v7318_v26 = vpop.f32.mrb[70].mxu0  ;;  %v7720_v12 = vld [vmem:[%s7807_s10 + $0x90] sm:$0xff] }
 0x44f   : > { %v6158_v25 = vadd.f32 %v7708_v3, %v6050_v20  ;;  %v6053_v15 = vadd.f32 %v7318_v26, %v9566_v7  ;;  %v6044_v49 = vpop.f32.mrb[71].mxu0 }
 0x450   : > { %v6156_v41 = vadd.f32 %v7709_v45, %v6042_v10  ;;  %v6045_v46 = vadd.f32 %v9566_v7, %v6044_v49 }
 0x451   : > { %v6190_v6 = vmax.f32 %v6158_v25, 0.0  ;;  %v6159_v34 = vadd.f32 %v7710_v43, %v6053_v15  ;;  %v7721_v25 = vld [vmem:[%s7807_s10 + $0x80] sm:$0xff]  ;;  %v7723_v43 = vld [vmem:[%s7807_s10 + $0x88] sm:$0xff] }
 0x452   : > { %v6188_v16 = vmax.f32 %v6156_v41, 0.0  ;;  %v6157_v32 = vadd.f32 %v7711_v57, %v6045_v46  ;;  %v7722_v41 = vld [vmem:[%s7807_s10 + $0x98] sm:$0xff] }
 0x453   : > { %6222 = vst.msk [vmem:[%s9577_s28 + $0x30] sm:$0xff] %vm351_vm0, %v6190_v6  ;;  %v6191_v59 = vmax.f32 %v6159_v34, 0.0 }
 0x454   : > { %6220 = vst.msk [vmem:[%s9577_s28 + $0x20] sm:$0xff] %vm351_vm0, %v6188_v16  ;;  %v6189_v2 = vmax.f32 %v6157_v32, 0.0  ;;  %v7321_v62 = vpop.f32.mrb[72].mxu0 }
 0x455   : > { %6223 = vst.msk [vmem:[%s9577_s28 + $0x38] sm:$0xff] %vm351_vm0, %v6191_v59  ;;  %v6066_v35 = vadd.f32 %v7321_v62, %v9566_v7  ;;  %v6057_v60 = vpop.f32.mrb[73].mxu0 }
 0x456   : > { %6221 = vst.msk [vmem:[%s9577_s28 + $0x28] sm:$0xff] %vm351_vm0, %v6189_v2  ;;  %v6058_v1 = vadd.f32 %v9566_v7, %v6057_v60  ;;  %v7322_v5 = vpop.f32.mrb[74].mxu0  ;;  %v7724_v60 = vld [vmem:[%s7807_s10 + $0xb0] sm:$0xff] }
 0x457   : > { %v6162_v9 = vadd.f32 %v7712_v36, %v6066_v35  ;;  %v6069_v51 = vadd.f32 %v7322_v5, %v9566_v7  ;;  %v6060_v61 = vpop.f32.mrb[75].mxu0 }
 0x458   : > { %v6160_v24 = vadd.f32 %v7713_v8, %v6058_v1  ;;  %v6061_v29 = vadd.f32 %v9566_v7, %v6060_v61 }
 0x459   : > { %v6194_v27 = vmax.f32 %v6162_v9, 0.0  ;;  %v6163_v55 = vadd.f32 %v7714_v30, %v6069_v51  ;;  %v7725_v9 = vld [vmem:[%s7807_s10 + $0xa0] sm:$0xff]  ;;  %v7727_v30 = vld [vmem:[%s7807_s10 + $0xa8] sm:$0xff] }
 0x45a   : > { %v6192_v22 = vmax.f32 %v6160_v24, 0.0  ;;  %v6161_v56 = vadd.f32 %v7715_v39, %v6061_v29  ;;  %v7726_v24 = vld [vmem:[%s7807_s10 + $0xb8] sm:$0xff] }
 0x45b   : > { %6226 = vst.msk [vmem:[%s9577_s28 + $0x50] sm:$0xff] %vm351_vm0, %v6194_v27  ;;  %v6195_v4 = vmax.f32 %v6163_v55, 0.0 }
 0x45c   : > { %6224 = vst.msk [vmem:[%s9577_s28 + $0x40] sm:$0xff] %vm351_vm0, %v6192_v22  ;;  %v6193_v18 = vmax.f32 %v6161_v56, 0.0  ;;  %v7325_v19 = vpop.f32.mrb[76].mxu0 }
 0x45d   : > { %6227 = vst.msk [vmem:[%s9577_s28 + $0x58] sm:$0xff] %vm351_vm0, %v6195_v4  ;;  %v6082_v53 = vadd.f32 %v7325_v19, %v9566_v7  ;;  %v6073_v31 = vpop.f32.mrb[77].mxu0 }
 0x45e   : > { %6225 = vst.msk [vmem:[%s9577_s28 + $0x48] sm:$0xff] %vm351_vm0, %v6193_v18  ;;  %v6074_v33 = vadd.f32 %v9566_v7, %v6073_v31  ;;  %v7326_v58 = vpop.f32.mrb[78].mxu0  ;;  %v7728_v31 = vld [vmem:[%s7807_s10 + $0xd0] sm:$0xff] }
 0x45f   : > { %v6166_v50 = vadd.f32 %v7716_v47, %v6082_v53  ;;  %v6085_v52 = vadd.f32 %v7326_v58, %v9566_v7  ;;  %v6076_v63 = vpop.f32.mrb[79].mxu0 }
 0x460   : > { %v6164_v28 = vadd.f32 %v7717_v0, %v6074_v33  ;;  %v6077_v14 = vadd.f32 %v9566_v7, %v6076_v63 }
 0x461   : > { %v6198_v17 = vmax.f32 %v6166_v50, 0.0  ;;  %v6167_v40 = vadd.f32 %v7718_v48, %v6085_v52  ;;  %v7729_v50 = vld [vmem:[%s7807_s10 + $0xc0] sm:$0xff]  ;;  %v7731_v48 = vld [vmem:[%s7807_s10 + $0xc8] sm:$0xff] }
 0x462   : > { %v6196_v21 = vmax.f32 %v6164_v28, 0.0  ;;  %v6165_v54 = vadd.f32 %v7719_v44, %v6077_v14  ;;  %v7730_v28 = vld [vmem:[%s7807_s10 + $0xd8] sm:$0xff] }
 0x463   : > { %6230 = vst.msk [vmem:[%s9577_s28 + $0x70] sm:$0xff] %vm351_vm0, %v6198_v17  ;;  %v6199_v38 = vmax.f32 %v6167_v40, 0.0 }
 0x464   : > { %6228 = vst.msk [vmem:[%s9577_s28 + $0x60] sm:$0xff] %vm351_vm0, %v6196_v21  ;;  %v6197_v11 = vmax.f32 %v6165_v54, 0.0  ;;  %v7329_v37 = vpop.f32.mrb[80].mxu0 }
 0x465   : > { %6231 = vst.msk [vmem:[%s9577_s28 + $0x78] sm:$0xff] %vm351_vm0, %v6199_v38  ;;  %v6098_v13 = vadd.f32 %v7329_v37, %v9566_v7  ;;  %v6089_v23 = vpop.f32.mrb[81].mxu0 }
 0x466   : > { %6229 = vst.msk [vmem:[%s9577_s28 + $0x68] sm:$0xff] %vm351_vm0, %v6197_v11  ;;  %v6090_v42 = vadd.f32 %v9566_v7, %v6089_v23  ;;  %v7330_v20 = vpop.f32.mrb[82].mxu0  ;;  %v7732_v23 = vld [vmem:[%s7807_s10 + $0xf0] sm:$0xff] }
 0x467   : > { %v6170_v10 = vadd.f32 %v7720_v12, %v6098_v13  ;;  %v6101_v26 = vadd.f32 %v7330_v20, %v9566_v7  ;;  %v6092_v3 = vpop.f32.mrb[83].mxu0 }
 0x468   : > { %v6168_v15 = vadd.f32 %v7721_v25, %v6090_v42  ;;  %v6093_v49 = vadd.f32 %v9566_v7, %v6092_v3 }
 0x469   : > { %v6202_v45 = vmax.f32 %v6170_v10, 0.0  ;;  %v6171_v46 = vadd.f32 %v7722_v41, %v6101_v26  ;;  %v7733_v10 = vld [vmem:[%s7807_s10 + $0xe0] sm:$0xff]  ;;  %v7735_v41 = vld [vmem:[%s7807_s10 + $0xe8] sm:$0xff] }
 0x46a   : > { %v6200_v6 = vmax.f32 %v6168_v15, 0.0  ;;  %v6169_v34 = vadd.f32 %v7723_v43, %v6093_v49  ;;  %v7734_v15 = vld [vmem:[%s7807_s10 + $0xf8] sm:$0xff] }
 0x46b   : > { %6234 = vst.msk [vmem:[%s9577_s28 + $0x90] sm:$0xff] %vm351_vm0, %v6202_v45  ;;  %v6203_v16 = vmax.f32 %v6171_v46, 0.0 }
 0x46c   : > { %6232 = vst.msk [vmem:[%s9577_s28 + $0x80] sm:$0xff] %vm351_vm0, %v6200_v6  ;;  %v6201_v57 = vmax.f32 %v6169_v34, 0.0  ;;  %v7333_v32 = vpop.f32.mrb[84].mxu0 }
 0x46d   : > { %6235 = vst.msk [vmem:[%s9577_s28 + $0x98] sm:$0xff] %vm351_vm0, %v6203_v16  ;;  %v6114_v59 = vadd.f32 %v7333_v32, %v9566_v7  ;;  %v6105_v2 = vpop.f32.mrb[85].mxu0 }
 0x46e   : > { %6233 = vst.msk [vmem:[%s9577_s28 + $0x88] sm:$0xff] %vm351_vm0, %v6201_v57  ;;  %v6106_v62 = vadd.f32 %v9566_v7, %v6105_v2  ;;  %v7334_v35 = vpop.f32.mrb[86].mxu0 }
 0x46f   : > { %v6174_v1 = vadd.f32 %v7724_v60, %v6114_v59  ;;  %v6117_v5 = vadd.f32 %v7334_v35, %v9566_v7  ;;  %v6108_v36 = vpop.f32.mrb[87].mxu0 }
 0x470   : > { %v6172_v51 = vadd.f32 %v7725_v9, %v6106_v62  ;;  %v6109_v61 = vadd.f32 %v9566_v7, %v6108_v36 }
 0x471   : > { %v6206_v8 = vmax.f32 %v6174_v1, 0.0  ;;  %v6175_v29 = vadd.f32 %v7726_v24, %v6117_v5 }
 0x472   : > { %v6204_v27 = vmax.f32 %v6172_v51, 0.0  ;;  %v6173_v55 = vadd.f32 %v7727_v30, %v6109_v61 }
 0x473   : > { %6238 = vst.msk [vmem:[%s9577_s28 + $0xb0] sm:$0xff] %vm351_vm0, %v6206_v8  ;;  %v6207_v22 = vmax.f32 %v6175_v29, 0.0 }
 0x474   : > { %6236 = vst.msk [vmem:[%s9577_s28 + $0xa0] sm:$0xff] %vm351_vm0, %v6204_v27  ;;  %v6205_v39 = vmax.f32 %v6173_v55, 0.0  ;;  %v7337_v56 = vpop.f32.mrb[88].mxu0 }
 0x475   : > { %6239 = vst.msk [vmem:[%s9577_s28 + $0xb8] sm:$0xff] %vm351_vm0, %v6207_v22  ;;  %v6130_v4 = vadd.f32 %v7337_v56, %v9566_v7  ;;  %v6121_v18 = vpop.f32.mrb[89].mxu0 }
 0x476   : > { %6237 = vst.msk [vmem:[%s9577_s28 + $0xa8] sm:$0xff] %vm351_vm0, %v6205_v39  ;;  %v6122_v19 = vadd.f32 %v9566_v7, %v6121_v18  ;;  %v7338_v53 = vpop.f32.mrb[90].mxu0 }
 0x477   : > { %v6178_v33 = vadd.f32 %v7728_v31, %v6130_v4  ;;  %v6133_v58 = vadd.f32 %v7338_v53, %v9566_v7  ;;  %v6124_v47 = vpop.f32.mrb[91].mxu0 }
 0x478   : > { %v6176_v52 = vadd.f32 %v7729_v50, %v6122_v19  ;;  %v6125_v63 = vadd.f32 %v9566_v7, %v6124_v47 }
 0x479   : > { %v6210_v0 = vmax.f32 %v6178_v33, 0.0  ;;  %v6179_v14 = vadd.f32 %v7730_v28, %v6133_v58 }
 0x47a   : > { %v6208_v17 = vmax.f32 %v6176_v52, 0.0  ;;  %v6177_v40 = vadd.f32 %v7731_v48, %v6125_v63 }
 0x47b   : > { %6242 = vst.msk [vmem:[%s9577_s28 + $0xd0] sm:$0xff] %vm351_vm0, %v6210_v0  ;;  %v6211_v21 = vmax.f32 %v6179_v14, 0.0 }
 0x47c   : > { %6240 = vst.msk [vmem:[%s9577_s28 + $0xc0] sm:$0xff] %vm351_vm0, %v6208_v17  ;;  %v6209_v44 = vmax.f32 %v6177_v40, 0.0  ;;  %v7341_v54 = vpop.f32.mrb[92].mxu0 }
 0x47d   : > { %6243 = vst.msk [vmem:[%s9577_s28 + $0xd8] sm:$0xff] %vm351_vm0, %v6211_v21  ;;  %v6146_v38 = vadd.f32 %v7341_v54, %v9566_v7  ;;  %v6137_v11 = vpop.f32.mrb[93].mxu0 }
 0x47e   : > { %6241 = vst.msk [vmem:[%s9577_s28 + $0xc8] sm:$0xff] %vm351_vm0, %v6209_v44  ;;  %v6138_v37 = vadd.f32 %v9566_v7, %v6137_v11  ;;  %v7342_v13 = vpop.f32.mrb[94].mxu0 }
 0x47f   : > { %v6182_v42 = vadd.f32 %v7732_v23, %v6146_v38  ;;  %v6149_v20 = vadd.f32 %v7342_v13, %v9566_v7  ;;  %v6140_v12 = vpop.f32.mrb[95].mxu0 }
 0x480   : > { %v6180_v26 = vadd.f32 %v7733_v10, %v6138_v37  ;;  %v6141_v3 = vadd.f32 %v9566_v7, %v6140_v12 }
 0x481   : > { %v6214_v25 = vmax.f32 %v6182_v42, 0.0  ;;  %v6183_v49 = vadd.f32 %v7734_v15, %v6149_v20 }
 0x482   : > { %v6212_v45 = vmax.f32 %v6180_v26, 0.0  ;;  %v6181_v46 = vadd.f32 %v7735_v41, %v6141_v3 }
 0x483   : > { %6246 = vst.msk [vmem:[%s9577_s28 + $0xf0] sm:$0xff] %vm351_vm0, %v6214_v25  ;;  %v6215_v6 = vmax.f32 %v6183_v49, 0.0 }
 0x484   : > { %6244 = vst.msk [vmem:[%s9577_s28 + $0xe0] sm:$0xff] %vm351_vm0, %v6212_v45  ;;  %v6213_v43 = vmax.f32 %v6181_v46, 0.0 }
 0x485   : > { %6247 = vst.msk [vmem:[%s9577_s28 + $0xf8] sm:$0xff] %vm351_vm0, %v6215_v6 }
 0x486   : > { %6245 = vst.msk [vmem:[%s9577_s28 + $0xe8] sm:$0xff] %vm351_vm0, %v6213_v43 }
 0x487 PF: > { %s17_s24 = sadd.s32 1, %s7742_s24  }
 0x488   : > { %p14_p4 = scmp.ge.s32.totalorder %s17_s24, 4  }
 0x48a   :  { %16 = sbr.rel (!%p14_p4) target bundleno = 1 (0x1), region = 89 }

</bundles_post_ra>
